<compile_context>
chip_gen: v7x
topology: tpu7x:2x2x1
jax: 0.10.0
libtpu: 0.0.40
codegen_flags: <defaults>
</compile_context>

<pallas_src>
import functools

import jax
import jax.numpy as jnp
import numpy as np
from jax.experimental import pallas as pl
from jax.experimental.pallas import tpu as pltpu

FEAT = 4096      # input feature size
COMP = 512       # compressed size (LSTM input size)
HID = 512        # LSTM hidden size
GATES = 4 * HID  # i, f, g, o (PyTorch gate order)

VMEM_LIMIT = 48 * 1024 * 1024  # <= v7x's 64 MiB per-core VMEM


def _round_up(n, m):
    return ((n + m - 1) // m) * m


def _tensorcores_per_chip():
    # Only used to decide whether batch-splitting the LSTM recurrence pays off:
    # v7x has 2 TensorCores/chip, v5e/v6e have 1 (splitting there would just
    # double the per-step W_hh weight streaming).
    try:
        kind = (jax.devices()[0].device_kind or "").lower()
    except Exception:
        return 1
    return 2 if ("v7" in kind or "7x" in kind) else 1


# --------------------------------------------------------------------------
# Kernel 1: fused compress + LSTM input projection.
#   gates_in = ((x @ W_c + b_c) @ W_ih + b_lstm)    per (batch-tile, time-tile)
# x and gates_in travel bf16; both MXU dots accumulate in f32.
# Output is batch-first (B_pad, T_pad, 2048) bf16.
# --------------------------------------------------------------------------
def compress_project_kernel(x_ref, wc_ref, bc_ref, wih_ref, bl_ref, o_ref, *,
                            bb, tb):
    rows = bb * tb
    x2 = x_ref[...].reshape(rows, FEAT)                       # bf16 already
    comp = jnp.dot(x2, wc_ref[...], preferred_element_type=jnp.float32)
    comp = comp + bc_ref[...]
    # TODO(synk): nn.Dropout(0.3) treated as eval-mode identity (no masking).
    gates = jnp.dot(comp.astype(jnp.bfloat16), wih_ref[...],
                    preferred_element_type=jnp.float32)
    gates = gates + bl_ref[...]
    o_ref[...] = gates.astype(jnp.bfloat16).reshape(bb, tb, GATES)


def compress_project(x_pad, w_c_bf, b_c, wih_bf, b_lstm):
    B_pad, T_pad, _ = x_pad.shape
    bb = 8                                            # batch tile (sublane mult.)
    tb = max(t for t in (64, 32, 16, 8) if T_pad % t == 0)
    kernel = functools.partial(compress_project_kernel, bb=bb, tb=tb)
    return pl.pallas_call(
        kernel,
        out_shape=jax.ShapeDtypeStruct((B_pad, T_pad, GATES), jnp.bfloat16),
        grid_spec=pltpu.PrefetchScalarGridSpec(
            num_scalar_prefetch=0,
            grid=(B_pad // bb, T_pad // tb),
            in_specs=[
                pl.BlockSpec((bb, tb, FEAT), lambda bi, ti: (bi, ti, 0)),  # x bf16
                pl.BlockSpec((FEAT, COMP), lambda bi, ti: (0, 0)),     # W_c  bf16
                pl.BlockSpec((1, COMP), lambda bi, ti: (0, 0)),        # b_c  f32
                pl.BlockSpec((COMP, GATES), lambda bi, ti: (0, 0)),    # W_ih bf16
                pl.BlockSpec((1, GATES), lambda bi, ti: (0, 0)),       # b    f32
            ],
            out_specs=pl.BlockSpec((bb, tb, GATES), lambda bi, ti: (bi, ti, 0)),
        ),
        compiler_params=pltpu.CompilerParams(
            dimension_semantics=("parallel", "parallel"),
            vmem_limit_bytes=VMEM_LIMIT,
        ),
    )(x_pad, w_c_bf, b_c, wih_bf, b_lstm)


# --------------------------------------------------------------------------
# Kernel 2: single-layer LSTM. Grid = (batch blocks [parallel], time chunks
# [arbitrary]); each grid step runs an unrolled loop of `chunk` timesteps with
# h/c carried in VMEM scratch. Only the recurrent matmul h @ W_hh runs per step
# (input projection precomputed). Padded timesteps skip the whole step via
# pl.when. Output is written batch-first directly.
# --------------------------------------------------------------------------
def lstm_kernel(gin_ref, whh_ref, out_ref, hN_ref, cN_ref, h_sc, c_sc, *,
                chunk, n_tblk, valid_in_last):
    t_blk = pl.program_id(1)

    @pl.when(t_blk == 0)
    def _():
        h_sc[...] = jnp.zeros_like(h_sc)
        c_sc[...] = jnp.zeros_like(c_sc)

    whh = whh_ref[...]

    def step(j):
        h = h_sc[...]
        c = c_sc[...]
        gates = jnp.dot(h.astype(jnp.bfloat16), whh,
                        preferred_element_type=jnp.float32)
        gates = gates + gin_ref[:, j, :].astype(jnp.float32)
        i_g = jax.nn.sigmoid(gates[:, 0 * HID:1 * HID])
        f_g = jax.nn.sigmoid(gates[:, 1 * HID:2 * HID])
        g_g = jnp.tanh(gates[:, 2 * HID:3 * HID])
        o_g = jax.nn.sigmoid(gates[:, 3 * HID:4 * HID])
        c_new = f_g * c + i_g * g_g
        h_new = o_g * jnp.tanh(c_new)
        c_sc[...] = c_new
        h_sc[...] = h_new
        out_ref[:, j, :] = h_new

    for j in range(chunk):           # static unroll (chunk is 8 or 16)
        if j < valid_in_last:
            # statically valid in every time chunk (incl. the last one)
            step(j)
        else:
            # valid only when this is NOT the last time chunk: padded steps skip
            # the whole body (incl. the h@W_hh MXU pass). Their output rows stay
            # stale in VMEM — the wrapper slices them away.
            pl.when(t_blk < n_tblk - 1)(functools.partial(step, j))

    # hN/cN are VMEM-resident across the time axis (constant block index).
    hN_ref[...] = h_sc[...]
    cN_ref[...] = c_sc[...]


def lstm(gates_in, whh_bf, *, seq_len):
    B_pad, T_pad, _ = gates_in.shape
    chunk = 16 if T_pad % 16 == 0 else 8
    n_tblk = T_pad // chunk
    valid_in_last = seq_len - (n_tblk - 1) * chunk
    assert 1 <= valid_in_last <= chunk

    # Split batch across TensorCores only when there are 2 of them (v7x); on
    # 1-TC chips a single batch block streams W_hh through the MXU once/step.
    n_bblk = 2 if (_tensorcores_per_chip() >= 2 and B_pad % 16 == 0) else 1
    bbl = B_pad // n_bblk

    kernel = functools.partial(lstm_kernel, chunk=chunk, n_tblk=n_tblk,
                               valid_in_last=valid_in_last)
    out_shapes = (
        jax.ShapeDtypeStruct((B_pad, T_pad, HID), jnp.float32),  # all h, batch-first
        jax.ShapeDtypeStruct((B_pad, HID), jnp.float32),         # final hidden
        jax.ShapeDtypeStruct((B_pad, HID), jnp.float32),         # final cell
    )
    return pl.pallas_call(
        kernel,
        out_shape=out_shapes,
        grid_spec=pltpu.PrefetchScalarGridSpec(
            num_scalar_prefetch=0,
            grid=(n_bblk, n_tblk),
            in_specs=[
                pl.BlockSpec((bbl, chunk, GATES), lambda b, t: (b, t, 0)),  # bf16
                pl.BlockSpec((HID, GATES), lambda b, t: (0, 0)),            # W_hh bf16
            ],
            out_specs=(
                pl.BlockSpec((bbl, chunk, HID), lambda b, t: (b, t, 0)),
                pl.BlockSpec((bbl, HID), lambda b, t: (b, 0)),
                pl.BlockSpec((bbl, HID), lambda b, t: (b, 0)),
            ),
            scratch_shapes=[
                pltpu.VMEM((bbl, HID), jnp.float32),
                pltpu.VMEM((bbl, HID), jnp.float32),
            ],
        ),
        compiler_params=pltpu.CompilerParams(
            dimension_semantics=("parallel", "arbitrary"),
            vmem_limit_bytes=VMEM_LIMIT,
        ),
    )(gates_in, whh_bf)


# --------------------------------------------------------------------------
# Wrapper: full encoderRNN.forward
# --------------------------------------------------------------------------
def encoder_rnn_forward(x, params):
    B, T, F = x.shape
    assert F == FEAT
    B_pad = _round_up(max(B, 1), 8)
    T_pad = _round_up(max(T, 1), 8)
    # x streams in bf16 (halves the dominant HBM traffic of the compress pass)
    x_pad = jnp.pad(x.astype(jnp.bfloat16), ((0, B_pad - B), (0, T_pad - T), (0, 0)))

    # matmul operands in bf16 (MXU-native); biases & gate math stay f32
    w_c_bf = params["w_c"].astype(jnp.bfloat16)
    wih_bf = params["wih_t"].astype(jnp.bfloat16)
    whh_bf = params["whh_t"].astype(jnp.bfloat16)

    gates_in = compress_project(x_pad, w_c_bf, params["b_c"], wih_bf,
                                params["b_lstm"])        # (B_pad, T_pad, 2048) bf16
    out_full, h_last, c_last = lstm(gates_in, whh_bf, seq_len=T)

    output = out_full[:B, :T, :]                          # (B, T, 512) batch_first
    hidden_state = h_last[:B][None]                       # (1, B, 512)
    cell_state = c_last[:B][None]                         # (1, B, 512)
    return output, (hidden_state, cell_state)


# --------------------------------------------------------------------------
# Pure-JAX reference (fp32) for a correctness check
# --------------------------------------------------------------------------
def ref_forward(x, params):
    B, T, F = x.shape
    comp = x.reshape(-1, F) @ params["w_c"] + params["b_c"][0]
    comp = comp.reshape(B, T, COMP)

    def step(carry, xt):
        h, c = carry
        gates = xt @ params["wih_t"] + h @ params["whh_t"] + params["b_lstm"][0]
        i = jax.nn.sigmoid(gates[:, 0 * HID:1 * HID])
        f = jax.nn.sigmoid(gates[:, 1 * HID:2 * HID])
        g = jnp.tanh(gates[:, 2 * HID:3 * HID])
        o = jax.nn.sigmoid(gates[:, 3 * HID:4 * HID])
        c = f * c + i * g
        h = o * jnp.tanh(c)
        return (h, c), h

    init = (jnp.zeros((B, HID), jnp.float32), jnp.zeros((B, HID), jnp.float32))
    (h, c), outs = jax.lax.scan(step, init, jnp.transpose(comp, (1, 0, 2)))
    return jnp.transpose(outs, (1, 0, 2)), (h[None], c[None])


def make_params(key):
    ks = jax.random.split(key, 6)
    # Linear(4096, 512): PyTorch-style uniform(-1/sqrt(fan_in), 1/sqrt(fan_in))
    bc = 1.0 / np.sqrt(FEAT)
    w_c = jax.random.uniform(ks[0], (FEAT, COMP), jnp.float32, -bc, bc)
    b_c = jax.random.uniform(ks[1], (1, COMP), jnp.float32, -bc, bc)
    # LSTM(512, 512): uniform(-1/sqrt(hidden), 1/sqrt(hidden)); stored transposed
    bl = 1.0 / np.sqrt(HID)
    wih_t = jax.random.uniform(ks[2], (COMP, GATES), jnp.float32, -bl, bl)
    whh_t = jax.random.uniform(ks[3], (HID, GATES), jnp.float32, -bl, bl)
    b_ih = jax.random.uniform(ks[4], (GATES,), jnp.float32, -bl, bl)
    b_hh = jax.random.uniform(ks[5], (GATES,), jnp.float32, -bl, bl)
    b_lstm = (b_ih + b_hh).reshape(1, GATES)
    return dict(w_c=w_c, b_c=b_c, wih_t=wih_t, whh_t=whh_t, b_lstm=b_lstm)


if __name__ == "__main__":
    key = jax.random.PRNGKey(0)
    pkey, xkey = jax.random.split(key)
    params = make_params(pkey)

    B, T = 2, 8
    x = jax.random.normal(xkey, (B, T, FEAT), jnp.float32)

    output, (hidden, cell) = encoder_rnn_forward(x, params)
    jax.block_until_ready((output, hidden, cell))

    assert output.shape == (B, T, HID)
    assert hidden.shape == (1, B, HID)
    assert cell.shape == (1, B, HID)

    ref_out, (ref_h, ref_c) = ref_forward(x, params)
    np.testing.assert_allclose(np.asarray(output), np.asarray(ref_out),
                               rtol=2e-2, atol=2e-2)
    np.testing.assert_allclose(np.asarray(hidden), np.asarray(ref_h),
                               rtol=2e-2, atol=2e-2)
    np.testing.assert_allclose(np.asarray(cell), np.asarray(ref_c),
                               rtol=2e-2, atol=2e-2)

    print("KERNEL_OK")
</pallas_src>

<mosaic_0001>
module attributes {stable_mosaic.version = 11 : i64} {
  func.func @compress_project_kernel(%arg0: i32, %arg1: i32, %arg2: memref<8x8x4096xbf16, #tpu.memory_space<vmem>>, %arg3: memref<4096x512xbf16, #tpu.memory_space<vmem>>, %arg4: memref<1x512xf32, #tpu.memory_space<vmem>>, %arg5: memref<512x2048xbf16, #tpu.memory_space<vmem>>, %arg6: memref<1x2048xf32, #tpu.memory_space<vmem>>, %arg7: memref<8x8x2048xbf16, #tpu.memory_space<vmem>>) attributes {dimension_semantics = [#tpu.dimension_semantics<parallel>, #tpu.dimension_semantics<parallel>], iteration_bounds = array<i64: 1, 1>, scalar_prefetch = 0 : i64, scratch_operands = 0 : i64, tpu.core_type = #tpu.core_type<tc>, window_params = [{transform_indices = @transform_0, window_bounds = array<i64: 8, 8, 4096>}, {pipeline_mode = #tpu.pipeline_mode<synchronous>, transform_indices = @transform_1, window_bounds = array<i64: 4096, 512>}, {pipeline_mode = #tpu.pipeline_mode<synchronous>, transform_indices = @transform_2, window_bounds = array<i64: 1, 512>}, {pipeline_mode = #tpu.pipeline_mode<synchronous>, transform_indices = @transform_3, window_bounds = array<i64: 512, 2048>}, {pipeline_mode = #tpu.pipeline_mode<synchronous>, transform_indices = @transform_4, window_bounds = array<i64: 1, 2048>}, {transform_indices = @transform_5, window_bounds = array<i64: 8, 8, 2048>}]} {
    %c0 = arith.constant 0 : index
    %c0_0 = arith.constant 0 : index
    %c0_1 = arith.constant 0 : index
    %0 = vector.load %arg2[%c0, %c0_0, %c0_1] : memref<8x8x4096xbf16, #tpu.memory_space<vmem>>, vector<8x8x4096xbf16>
    %1 = vector.shape_cast %0 : vector<8x8x4096xbf16> to vector<64x4096xbf16>
    %c0_2 = arith.constant 0 : index
    %c0_3 = arith.constant 0 : index
    %2 = vector.load %arg3[%c0_2, %c0_3] : memref<4096x512xbf16, #tpu.memory_space<vmem>>, vector<4096x512xbf16>
    %cst = arith.constant dense<0.000000e+00> : vector<64x512xf32>
    %3 = tpu.matmul %1, %2, %cst {dimension_numbers = #tpu.dot_dimension_numbers<[1], [0], [0], [1], [0, 0, 1, 1], [], []>} : vector<64x4096xbf16>, vector<4096x512xbf16>, vector<64x512xf32> -> vector<64x512xf32>
    %c0_4 = arith.constant 0 : index
    %c0_5 = arith.constant 0 : index
    %4 = vector.load %arg4[%c0_4, %c0_5] : memref<1x512xf32, #tpu.memory_space<vmem>>, vector<1x512xf32>
    %5 = vector.broadcast %4 : vector<1x512xf32> to vector<64x512xf32>
    %6 = arith.addf %3, %5 : vector<64x512xf32>
    %7 = arith.truncf %6 : vector<64x512xf32> to vector<64x512xbf16>
    %c0_6 = arith.constant 0 : index
    %c0_7 = arith.constant 0 : index
    %8 = vector.load %arg5[%c0_6, %c0_7] : memref<512x2048xbf16, #tpu.memory_space<vmem>>, vector<512x2048xbf16>
    %cst_8 = arith.constant dense<0.000000e+00> : vector<64x2048xf32>
    %9 = tpu.matmul %7, %8, %cst_8 {dimension_numbers = #tpu.dot_dimension_numbers<[1], [0], [0], [1], [0, 0, 1, 1], [], []>} : vector<64x512xbf16>, vector<512x2048xbf16>, vector<64x2048xf32> -> vector<64x2048xf32>
    %c0_9 = arith.constant 0 : index
    %c0_10 = arith.constant 0 : index
    %10 = vector.load %arg6[%c0_9, %c0_10] : memref<1x2048xf32, #tpu.memory_space<vmem>>, vector<1x2048xf32>
    %11 = vector.broadcast %10 : vector<1x2048xf32> to vector<64x2048xf32>
    %12 = arith.addf %9, %11 : vector<64x2048xf32>
    %13 = arith.truncf %12 : vector<64x2048xf32> to vector<64x2048xbf16>
    %14 = vector.shape_cast %13 : vector<64x2048xbf16> to vector<8x8x2048xbf16>
    %c0_11 = arith.constant 0 : index
    %c0_12 = arith.constant 0 : index
    %c0_13 = arith.constant 0 : index
    %15 = vector.load %arg7[%c0_11, %c0_12, %c0_13] : memref<8x8x2048xbf16, #tpu.memory_space<vmem>>, vector<8x8x2048xbf16>
    tpu.vector_store %arg7[%c0_11, %c0_12, %c0_13], %14 {strides = array<i32>} : memref<8x8x2048xbf16, #tpu.memory_space<vmem>>, vector<8x8x2048xbf16>,
    return
  }
  func.func @transform_0(%arg0: i32, %arg1: i32) -> (i32, i32, i32) {
    %c0_i32 = arith.constant 0 : i32
    %c0_i32_0 = arith.constant 0 : i32
    return %arg0, %arg1, %c0_i32 : i32, i32, i32
  }
  func.func @transform_1(%arg0: i32, %arg1: i32) -> (i32, i32) {
    %c0_i32 = arith.constant 0 : i32
    %c0_i32_0 = arith.constant 0 : i32
    %c0_i32_1 = arith.constant 0 : i32
    return %c0_i32, %c0_i32_0 : i32, i32
  }
  func.func @transform_2(%arg0: i32, %arg1: i32) -> (i32, i32) {
    %c0_i32 = arith.constant 0 : i32
    %c0_i32_0 = arith.constant 0 : i32
    %c0_i32_1 = arith.constant 0 : i32
    return %c0_i32, %c0_i32_0 : i32, i32
  }
  func.func @transform_3(%arg0: i32, %arg1: i32) -> (i32, i32) {
    %c0_i32 = arith.constant 0 : i32
    %c0_i32_0 = arith.constant 0 : i32
    %c0_i32_1 = arith.constant 0 : i32
    return %c0_i32, %c0_i32_0 : i32, i32
  }
  func.func @transform_4(%arg0: i32, %arg1: i32) -> (i32, i32) {
    %c0_i32 = arith.constant 0 : i32
    %c0_i32_0 = arith.constant 0 : i32
    %c0_i32_1 = arith.constant 0 : i32
    return %c0_i32, %c0_i32_0 : i32, i32
  }
  func.func @transform_5(%arg0: i32, %arg1: i32) -> (i32, i32, i32) {
    %c0_i32 = arith.constant 0 : i32
    %c0_i32_0 = arith.constant 0 : i32
    return %arg0, %arg1, %c0_i32 : i32, i32, i32
  }
}

</mosaic_0001>

<bundles_post_ra>
// kernel: tpu_custom_call.1
= control target key start
LH: loop header
LB: loop body
LE: loop exit
PB: predicated region body
PF: predicated region fallthrough
CT: control target
= control target key end

     0   :  { %10 = vsyncpa [#allocation3], 0  ;;  %s19079_s0 = inlined_call_operand.hbm [shape: bf16[8,8,4096], index: 0, kind: input, shape index: {}]   ;;  %s19080_s1 = inlined_call_operand.hbm [shape: bf16[4096,512], index: 1, kind: input, shape index: {}]   ;;  %s19081_s2 = inlined_call_operand.hbm [shape: f32[1,512], index: 2, kind: input, shape index: {}]   ;;  %s19082_s3 = inlined_call_operand.hbm [shape: bf16[512,2048], index: 3, kind: input, shape index: {}]   ;;  %s19083_s4 = inlined_call_operand.hbm [shape: f32[1,2048], index: 4, kind: input, shape index: {}]   ;;  %s19084_s5 = inlined_call_operand.hbm [shape: bf16[8,8,2048], index: 5, kind: output, shape index: {}]  }
   0x1   :  { %11 = vsyncpa [#allocation6], 0 }
   0x2   :  { %12 = vsyncpa [#allocation9], 0 }
   0x3   :  { %13 = vsyncpa [#allocation4], 0  ;;  %s18411_s18 = smov [#allocation5]   ;;  %s18271_s22 = scalar_lea.hbm %s19080_s1, 131072 }
   0x4   :  { %s31_s19 = sshll.u32 %s18411_s18, 4  ;;  %p18272_p0 = scmp.ne.s32.totalorder %s19080_s1, %s18271_s22  ;;  %s32_s19 = int_to_ptr.vmem [resolvable:$true] %s31_s19 }
   0x5   :  { %p18275_p1 = scmp.lt.u32.totalorder %s18271_s22, %s19080_s1 }
   0x7   :  { %p18277_p2 = pnand %p18275_p1, %p18272_p0 }
   0x9   :  { %18280 = shalt.err (!%p18277_p2)
}
   0xa   :  { %s18281_s27 = scalar_lea.vmem %s32_s19, 131072  ;;  %p18286_p4 = scmp.lt.s32.totalorder %s32_s19, %s32_s19 }
   0xb   :  { %p18282_p3 = scmp.ne.s32.totalorder %s32_s19, %s18281_s27  ;;  %p18287_p5 = scmp.lt.s32.totalorder %s18281_s27, %s18281_s27 }
   0xd   :  { %p18288_p6 = por %p18287_p5, %p18286_p4 }
   0xf   :  { %p18289_p7 = pnand %p18288_p6, %p18282_p3 }
  0x11   :  { %18292 = shalt.err (!%p18289_p7)
}
  0x12   :  { %s18412_s28 = smov 256   ;;  %s18413_s29 = smov 16  }
  0x13   :  { %37 = dma.hbm_to_vmem [thread:$0]  %s19080_s1, 131072, %s32_s19, [#allocation6], %s18412_s28, %s18412_s28, %s18413_s29  }
  0x14   :  { %s18414_s7 = smov [#allocation8]   ;;  %s18293_s11 = scalar_lea.hbm %s19082_s3, 65536 }
  0x15   :  { %s53_s8 = sshll.u32 %s18414_s7, 4  ;;  %p18294_p8 = scmp.ne.s32.totalorder %s19082_s3, %s18293_s11  ;;  %s54_s8 = int_to_ptr.vmem [resolvable:$true] %s53_s8 }
  0x16   :  { %p18297_p9 = scmp.lt.u32.totalorder %s18293_s11, %s19082_s3 }
  0x18   :  { %p18299_p10 = pnand %p18297_p9, %p18294_p8 }
  0x1a   :  { %18302 = shalt.err (!%p18299_p10)
}
  0x1b   :  { %s18303_s16 = scalar_lea.vmem %s54_s8, 65536  ;;  %p18308_p12 = scmp.lt.s32.totalorder %s54_s8, %s54_s8 }
  0x1c   :  { %p18304_p11 = scmp.ne.s32.totalorder %s54_s8, %s18303_s16  ;;  %p18309_p13 = scmp.lt.s32.totalorder %s18303_s16, %s18303_s16 }
  0x1e   :  { %p18310_p0 = por %p18309_p13, %p18308_p12 }
  0x20   :  { %p18311_p1 = pnand %p18310_p0, %p18304_p11 }
  0x22   :  { %18314 = shalt.err (!%p18311_p1)
}
  0x23   :  { %s18415_s1 = smov 1024   ;;  %s18416_s17 = smov 64  }
  0x24   :  { %59 = dma.hbm_to_vmem [thread:$0]  %s19082_s3, 65536, %s54_s8, [#allocation9], %s18415_s1, %s18415_s1, %s18416_s17  }
  0x25   :  { %s18417_s20 = smov [#allocation2]   ;;  %s18315_s24 = scalar_lea.hbm %s19079_s0, 16384 }
  0x26   :  { %s19_s21 = sshll.u32 %s18417_s20, 4  ;;  %p18316_p2 = scmp.ne.s32.totalorder %s19079_s0, %s18315_s24  ;;  %s20_s21 = int_to_ptr.vmem [resolvable:$true] %s19_s21 }
  0x27   :  { %p18319_p3 = scmp.lt.u32.totalorder %s18315_s24, %s19079_s0 }
  0x29   :  { %p18321_p4 = pnand %p18319_p3, %p18316_p2 }
  0x2b   :  { %18324 = shalt.err (!%p18321_p4)
}
  0x2c   :  { %s18325_s29 = scalar_lea.vmem %s20_s21, 16384  ;;  %p18330_p6 = scmp.lt.s32.totalorder %s20_s21, %s20_s21 }
  0x2d   :  { %p18326_p5 = scmp.ne.s32.totalorder %s20_s21, %s18325_s29  ;;  %p18331_p7 = scmp.lt.s32.totalorder %s18325_s29, %s18325_s29 }
  0x2f   :  { %p18332_p8 = por %p18331_p7, %p18330_p6 }
  0x31   :  { %p18333_p9 = pnand %p18332_p8, %p18326_p5 }
  0x33   :  { %18336 = shalt.err (!%p18333_p9)
}
  0x34   :  { %s18418_s3 = smov 2048   ;;  %s18419_s30 = smov 128  }
  0x35   :  { %25 = dma.hbm_to_vmem [thread:$0]  %s19079_s0, 16384, %s20_s21, [#allocation3], %s18418_s3, %s18418_s3, %s18419_s30  }
  0x36   :  { %s18420_s8 = smov [#allocation7]   ;;  %s18421_s10 = smov [#allocation10]  }
  0x37   :  { %s44_s9 = sshll.u32 %s18420_s8, 4  ;;  %s66_s11 = sshll.u32 %s18421_s10, 4  ;;  %s45_s9 = int_to_ptr.vmem [resolvable:$true] %s44_s9  ;;  %s67_s11 = int_to_ptr.vmem [resolvable:$true] %s66_s11 }
  0x38   :  { %s18337_s14 = scalar_lea.hbm %s19081_s2, 64 }
  0x39   :  { %p18338_p10 = scmp.ne.s32.totalorder %s19081_s2, %s18337_s14  ;;  %p18341_p11 = scmp.lt.u32.totalorder %s18337_s14, %s19081_s2 }
  0x3b   :  { %p18343_p12 = pnand %p18341_p11, %p18338_p10 }
  0x3d   :  { %18346 = shalt.err (!%p18343_p12)
}
  0x3e   :  { %s18347_s0 = scalar_lea.vmem %s45_s9, 64  ;;  %p18352_p0 = scmp.lt.s32.totalorder %s45_s9, %s45_s9 }
  0x3f   :  { %p18348_p13 = scmp.ne.s32.totalorder %s45_s9, %s18347_s0  ;;  %p18353_p1 = scmp.lt.s32.totalorder %s18347_s0, %s18347_s0 }
  0x41   :  { %p18354_p2 = por %p18353_p1, %p18352_p0 }
  0x43   :  { %p18355_p3 = pnand %p18354_p2, %p18348_p13 }
  0x45   :  { %18358 = shalt.err (!%p18355_p3)
}
  0x46   :  { %47 = dma.hbm_to_vmem [thread:$0]  %s19081_s2, 64, %s45_s9, [#allocation6]  }
  0x47   :  { %s18359_s24 = scalar_lea.hbm %s19083_s4, 256 }
  0x48   :  { %p18360_p4 = scmp.ne.s32.totalorder %s19083_s4, %s18359_s24  ;;  %p18363_p5 = scmp.lt.u32.totalorder %s18359_s24, %s19083_s4 }
  0x4a   :  { %p18365_p6 = pnand %p18363_p5, %p18360_p4 }
  0x4c   :  { %18368 = shalt.err (!%p18365_p6)
}
  0x4d   :  { %s18369_s29 = scalar_lea.vmem %s67_s11, 256  ;;  %p18374_p8 = scmp.lt.s32.totalorder %s67_s11, %s67_s11 }
  0x4e   :  { %p18370_p7 = scmp.ne.s32.totalorder %s67_s11, %s18369_s29  ;;  %p18375_p9 = scmp.lt.s32.totalorder %s18369_s29, %s18369_s29 }
  0x50   :  { %p18376_p10 = por %p18375_p9, %p18374_p8 }
  0x52   :  { %p18377_p11 = pnand %p18376_p10, %p18370_p7 }
  0x54   :  { %18380 = shalt.err (!%p18377_p11)
}
  0x55   :  { %69 = dma.hbm_to_vmem [thread:$0]  %s19083_s4, 256, %s67_s11, [#allocation9]  }
  0x56   :  { %18403 = dma.done.wait [#allocation3], 16384  }
  0x57   :  { %18404 = vsyncadd [#allocation3], 4294950912 }
  0x58   :  { %18405 = dma.done.wait [#allocation6], 131136  }
  0x59   :  { %18406 = vsyncadd [#allocation6], 4294836160 }
  0x5a   :  { %18407 = dma.done.wait [#allocation9], 65792  }
  0x5b   :  { %18408 = vsyncadd [#allocation9], 4294901504  ;;  %v16734_v0 = vld [vmem:[#allocation5 + $0x4] ss:$16 sps:$4 sm:$0xff]   ;;  %v16736_v1 = vld [vmem:[#allocation5 + $0xc] ss:$16 sps:$4 sm:$0xff]  }
  0x5c   :  { %7019 = vmatprep.subr.bf16.mxu0 %v16734_v0  ;;  %v16738_v2 = vld [vmem:[#allocation5] ss:$16 sps:$4 sm:$0xff]   ;;  %v16739_v3 = vld [vmem:[#allocation5 + $0x8] ss:$16 sps:$4 sm:$0xff]   ;;  %8187 = vmatprep.subr.bf16.mxu1 %v16736_v1  ;;  %v16740_v4 = vld [vmem:[#allocation5 + $0x24] ss:$16 sps:$4 sm:$0xff]  }
  0x5d   :  { %7020 = vmatpush1.bf16.msra.mxu0 %v16738_v2  ;;  %8188 = vmatpush1.bf16.msra.mxu1 %v16739_v3  ;;  %v16742_v5 = vld [vmem:[#allocation5 + $0x2c] ss:$16 sps:$4 sm:$0xff]   ;;  %v16744_v6 = vld [vmem:[#allocation5 + $0x20] ss:$16 sps:$4 sm:$0xff]   ;;  %v16745_v7 = vld [vmem:[#allocation5 + $0x28] ss:$16 sps:$4 sm:$0xff]  }
  0x5e   :  { %7021 = vmatprep.subr.bf16.mxu0 %v16740_v4  ;;  %8189 = vmatprep.subr.bf16.mxu1 %v16742_v5  ;;  %v16746_v8 = vld [vmem:[#allocation5 + $0x44] ss:$16 sps:$4 sm:$0xff]   ;;  %v16748_v9 = vld [vmem:[#allocation5 + $0x4c] ss:$16 sps:$4 sm:$0xff]   ;;  %v16750_v10 = vld [vmem:[#allocation5 + $0x40] ss:$16 sps:$4 sm:$0xff]  }
  0x5f   :  { %v16751_v11 = vld [vmem:[#allocation5 + $0x48] ss:$16 sps:$4 sm:$0xff]   ;;  %v16752_v12 = vld [vmem:[#allocation5 + $0x64] ss:$16 sps:$4 sm:$0xff]   ;;  %v16754_v13 = vld [vmem:[#allocation5 + $0x6c] ss:$16 sps:$4 sm:$0xff]  }
  0x60   :  { %v16756_v14 = vld [vmem:[#allocation5 + $0x60] ss:$16 sps:$4 sm:$0xff]   ;;  %v16757_v15 = vld [vmem:[#allocation5 + $0x68] ss:$16 sps:$4 sm:$0xff]   ;;  %v16758_v16 = vld [vmem:[#allocation5 + $0x84] ss:$16 sps:$4 sm:$0xff]  }
  0x61   :  { %7022 = vmatpush1.bf16.msra.mxu0 %v16744_v6  ;;  %8190 = vmatpush1.bf16.msra.mxu1 %v16745_v7  ;;  %v16760_v17 = vld [vmem:[#allocation5 + $0x8c] ss:$16 sps:$4 sm:$0xff]   ;;  %v16762_v18 = vld [vmem:[#allocation5 + $0x80] ss:$16 sps:$4 sm:$0xff]   ;;  %v16763_v19 = vld [vmem:[#allocation5 + $0x88] ss:$16 sps:$4 sm:$0xff]  }
  0x62   :  { %7023 = vmatprep.subr.bf16.mxu0 %v16746_v8  ;;  %8191 = vmatprep.subr.bf16.mxu1 %v16748_v9  ;;  %v16764_v20 = vld [vmem:[#allocation5 + $0xa4] ss:$16 sps:$4 sm:$0xff]   ;;  %v16766_v21 = vld [vmem:[#allocation5 + $0xac] ss:$16 sps:$4 sm:$0xff]   ;;  %v16768_v22 = vld [vmem:[#allocation5 + $0xa0] ss:$16 sps:$4 sm:$0xff]  }
  0x63   :  { %v16769_v23 = vld [vmem:[#allocation5 + $0xa8] ss:$16 sps:$4 sm:$0xff]   ;;  %v16770_v24 = vld [vmem:[#allocation5 + $0xc4] ss:$16 sps:$4 sm:$0xff]   ;;  %v16772_v25 = vld [vmem:[#allocation5 + $0xcc] ss:$16 sps:$4 sm:$0xff]  }
  0x64   :  { %v16774_v26 = vld [vmem:[#allocation5 + $0xc0] ss:$16 sps:$4 sm:$0xff]   ;;  %v16775_v27 = vld [vmem:[#allocation5 + $0xc8] ss:$16 sps:$4 sm:$0xff]   ;;  %v16776_v28 = vld [vmem:[#allocation5 + $0xe4] ss:$16 sps:$4 sm:$0xff]  }
  0x65   :  { %7024 = vmatpush1.bf16.msra.mxu0 %v16750_v10  ;;  %8192 = vmatpush1.bf16.msra.mxu1 %v16751_v11  ;;  %v16778_v29 = vld [vmem:[#allocation5 + $0xec] ss:$16 sps:$4 sm:$0xff]   ;;  %v16780_v30 = vld [vmem:[#allocation5 + $0xe0] ss:$16 sps:$4 sm:$0xff]   ;;  %v16781_v31 = vld [vmem:[#allocation5 + $0xe8] ss:$16 sps:$4 sm:$0xff]  }
  0x66   :  { %7025 = vmatprep.subr.bf16.mxu0 %v16752_v12  ;;  %8193 = vmatprep.subr.bf16.mxu1 %v16754_v13  ;;  %v16782_v32 = vld [vmem:[#allocation5 + $0x104] ss:$16 sps:$4 sm:$0xff]   ;;  %v16784_v33 = vld [vmem:[#allocation5 + $0x10c] ss:$16 sps:$4 sm:$0xff]   ;;  %v16786_v34 = vld [vmem:[#allocation5 + $0x100] ss:$16 sps:$4 sm:$0xff]  }
  0x67   :  { %v16787_v35 = vld [vmem:[#allocation5 + $0x108] ss:$16 sps:$4 sm:$0xff]   ;;  %v16788_v36 = vld [vmem:[#allocation5 + $0x124] ss:$16 sps:$4 sm:$0xff]   ;;  %v16790_v37 = vld [vmem:[#allocation5 + $0x12c] ss:$16 sps:$4 sm:$0xff]  }
  0x68   :  { %v16792_v38 = vld [vmem:[#allocation5 + $0x120] ss:$16 sps:$4 sm:$0xff]   ;;  %v16793_v39 = vld [vmem:[#allocation5 + $0x128] ss:$16 sps:$4 sm:$0xff]   ;;  %v16794_v40 = vld [vmem:[#allocation5 + $0x144] ss:$16 sps:$4 sm:$0xff]  }
  0x69   :  { %7026 = vmatpush1.bf16.msra.mxu0 %v16756_v14  ;;  %8194 = vmatpush1.bf16.msra.mxu1 %v16757_v15  ;;  %v16796_v41 = vld [vmem:[#allocation5 + $0x14c] ss:$16 sps:$4 sm:$0xff]   ;;  %v16798_v42 = vld [vmem:[#allocation5 + $0x140] ss:$16 sps:$4 sm:$0xff]   ;;  %v16799_v43 = vld [vmem:[#allocation5 + $0x148] ss:$16 sps:$4 sm:$0xff]  }
  0x6a   :  { %7027 = vmatprep.subr.bf16.mxu0 %v16758_v16  ;;  %8195 = vmatprep.subr.bf16.mxu1 %v16760_v17  ;;  %v16800_v44 = vld [vmem:[#allocation5 + $0x164] ss:$16 sps:$4 sm:$0xff]   ;;  %v16802_v45 = vld [vmem:[#allocation5 + $0x16c] ss:$16 sps:$4 sm:$0xff]   ;;  %v16804_v48 = vld [vmem:[#allocation5 + $0x160] ss:$16 sps:$4 sm:$0xff]  }
  0x6b   :  { %v85_v46 = vld [vmem:[#allocation2] sm:$0xff]  ;;  %v16805_v49 = vld [vmem:[#allocation5 + $0x168] ss:$16 sps:$4 sm:$0xff]   ;;  %v16808_v52 = vld [vmem:[#allocation5 + $0x18c] ss:$16 sps:$4 sm:$0xff]   ;;  %s18422_s4 = smov [#allocation11]  }
  0x6c   :  { %v101_v47 = vld [vmem:[#allocation2 + $0x80] sm:$0xff]  ;;  %v16811_v54 = vld [vmem:[#allocation5 + $0x188] ss:$16 sps:$4 sm:$0xff]   ;;  %v16814_v56 = vld [vmem:[#allocation5 + $0x1ac] ss:$16 sps:$4 sm:$0xff]   ;;  %s14148_s30 = sshll.u32 %s18422_s4, 4  ;;  %s14149_s30 = int_to_ptr.vmem [resolvable:$true] %s14148_s30 }
  0x6d   :  { %7028 = vmatpush1.bf16.msra.mxu0 %v16762_v18  ;;  %8196 = vmatpush1.bf16.msra.mxu1 %v16763_v19  ;;  %v14163_v50 = vcombine.high %v85_v46, %v101_v47  ;;  %v16806_v51 = vld [vmem:[#allocation5 + $0x184] ss:$16 sps:$4 sm:$0xff]   ;;  %v16810_v53 = vld [vmem:[#allocation5 + $0x180] ss:$16 sps:$4 sm:$0xff]   ;;  %v16817_v58 = vld [vmem:[#allocation5 + $0x1a8] ss:$16 sps:$4 sm:$0xff]   ;;  %v14162_v5 = vcombine.low %v85_v46, %v101_v47  ;;  %p18386_p13 = scmp.lt.s32.totalorder %s14149_s30, %s14149_s30 }
  0x6e   :  { %7029 = vmatprep.subr.bf16.mxu0 %v16764_v20  ;;  %8197 = vmatprep.subr.bf16.mxu1 %v16766_v21  ;;  %v16812_v55 = vld [vmem:[#allocation5 + $0x1a4] ss:$16 sps:$4 sm:$0xff]   ;;  %v16816_v57 = vld [vmem:[#allocation5 + $0x1a0] ss:$16 sps:$4 sm:$0xff]   ;;  %v16820_v60 = vld [vmem:[#allocation5 + $0x1cc] ss:$16 sps:$4 sm:$0xff]  }
  0x6f   :  { %7051 = vmatprep.mubr.bf16.mxu0 %v14163_v50  ;;  %8219 = vmatprep.mubr.bf16.mxu1 %v14163_v50  ;;  %v16818_v59 = vld [vmem:[#allocation5 + $0x1c4] ss:$16 sps:$4 sm:$0xff]   ;;  %v16822_v61 = vld [vmem:[#allocation5 + $0x1c0] ss:$16 sps:$4 sm:$0xff]   ;;  %v16823_v62 = vld [vmem:[#allocation5 + $0x1c8] ss:$16 sps:$4 sm:$0xff]  }
  0x70   :  { %v16824_v63 = vld [vmem:[#allocation5 + $0x1e4] ss:$16 sps:$4 sm:$0xff]   ;;  %v16826_v0 = vld [vmem:[#allocation5 + $0x1ec] ss:$16 sps:$4 sm:$0xff]   ;;  %v16828_v1 = vld [vmem:[#allocation5 + $0x1e0] ss:$16 sps:$4 sm:$0xff]  }
  0x71   :  { %7030 = vmatpush1.bf16.msra.mxu0 %v16768_v22  ;;  %8198 = vmatpush1.bf16.msra.mxu1 %v16769_v23  ;;  %v16829_v2 = vld [vmem:[#allocation5 + $0x1e8] ss:$16 sps:$4 sm:$0xff]   ;;  %v16832_v3 = vld [vmem:[#allocation5 + $0x204] ss:$16 sps:$4 sm:$0xff]   ;;  %v16835_v4 = vld [vmem:[#allocation5 + $0x20c] ss:$16 sps:$4 sm:$0xff]  }
  0x72   :  { %7031 = vmatprep.subr.bf16.mxu0 %v16770_v24  ;;  %8199 = vmatprep.subr.bf16.mxu1 %v16772_v25  ;;  %v16830_v6 = vld [vmem:[#allocation5 + $0x200] ss:$16 sps:$4 sm:$0xff]   ;;  %v16833_v7 = vld [vmem:[#allocation5 + $0x208] ss:$16 sps:$4 sm:$0xff]   ;;  %v16838_v8 = vld [vmem:[#allocation5 + $0x224] ss:$16 sps:$4 sm:$0xff]  }
  0x73   :  { %v16841_v9 = vld [vmem:[#allocation5 + $0x22c] ss:$16 sps:$4 sm:$0xff]   ;;  %v16836_v10 = vld [vmem:[#allocation5 + $0x220] ss:$16 sps:$4 sm:$0xff]   ;;  %v16839_v11 = vld [vmem:[#allocation5 + $0x228] ss:$16 sps:$4 sm:$0xff]  }
  0x74   :  { %v16844_v12 = vld [vmem:[#allocation5 + $0x244] ss:$16 sps:$4 sm:$0xff]   ;;  %v16847_v13 = vld [vmem:[#allocation5 + $0x24c] ss:$16 sps:$4 sm:$0xff]   ;;  %v16842_v16 = vld [vmem:[#allocation5 + $0x240] ss:$16 sps:$4 sm:$0xff]  }
  0x75   :  { %7032 = vmatpush1.bf16.msra.mxu0 %v16774_v26  ;;  %8200 = vmatpush1.bf16.msra.mxu1 %v16775_v27  ;;  %v117_v14 = vld [vmem:[#allocation2 + $0x100] sm:$0xff]  ;;  %v16845_v17 = vld [vmem:[#allocation5 + $0x248] ss:$16 sps:$4 sm:$0xff]   ;;  %v16853_v21 = vld [vmem:[#allocation5 + $0x26c] ss:$16 sps:$4 sm:$0xff]   ;;  %s18381_s6 = scalar_lea.vmem %s14149_s30, 8192 }
  0x76   :  { %7033 = vmatprep.subr.bf16.mxu0 %v16776_v28  ;;  %8201 = vmatprep.subr.bf16.mxu1 %v16778_v29  ;;  %v133_v15 = vld [vmem:[#allocation2 + $0x180] sm:$0xff]  ;;  %v16851_v23 = vld [vmem:[#allocation5 + $0x268] ss:$16 sps:$4 sm:$0xff]   ;;  %v16859_v27 = vld [vmem:[#allocation5 + $0x28c] ss:$16 sps:$4 sm:$0xff]   ;;  %p18382_p12 = scmp.ne.s32.totalorder %s14149_s30, %s18381_s6  ;;  %p18387_p0 = scmp.lt.s32.totalorder %s18381_s6, %s18381_s6 }
  0x77   :  { %v14195_v18 = vcombine.high %v117_v14, %v133_v15  ;;  %v14194_v19 = vcombine.low %v117_v14, %v133_v15  ;;  %v16850_v20 = vld [vmem:[#allocation5 + $0x264] ss:$16 sps:$4 sm:$0xff]   ;;  %v16848_v22 = vld [vmem:[#allocation5 + $0x260] ss:$16 sps:$4 sm:$0xff]   ;;  %v16877_v47 = vld [vmem:[#allocation5 + $0x2ec] ss:$16 sps:$4 sm:$0xff]  }
  0x78   :  { %v149_v24 = vld [vmem:[#allocation2 + $0x200] sm:$0xff]  ;;  %v16875_v50 = vld [vmem:[#allocation5 + $0x2e8] ss:$16 sps:$4 sm:$0xff]   ;;  %p18388_p1 = por %p18387_p0, %p18386_p13 }
  0x79   :  { %7034 = vmatpush1.bf16.msra.mxu0 %v16780_v30  ;;  %8202 = vmatpush1.bf16.msra.mxu1 %v16781_v31  ;;  %v165_v25 = vld [vmem:[#allocation2 + $0x280] sm:$0xff]  ;;  %v16857_v31 = vld [vmem:[#allocation5 + $0x288] ss:$16 sps:$4 sm:$0xff]  }
  0x7a   :  { %7035 = vmatprep.subr.bf16.mxu0 %v16782_v32  ;;  %8203 = vmatprep.subr.bf16.mxu1 %v16784_v33  ;;  %v16856_v26 = vld [vmem:[#allocation5 + $0x284] ss:$16 sps:$4 sm:$0xff]   ;;  %v14227_v28 = vcombine.high %v149_v24, %v165_v25  ;;  %v14226_v29 = vcombine.low %v149_v24, %v165_v25  ;;  %v16854_v30 = vld [vmem:[#allocation5 + $0x280] ss:$16 sps:$4 sm:$0xff]   ;;  %v16865_v33 = vld [vmem:[#allocation5 + $0x2ac] ss:$16 sps:$4 sm:$0xff]   ;;  %p18389_p2 = pnand %p18388_p1, %p18382_p12 }
  0x7b   :  { %v16862_v32 = vld [vmem:[#allocation5 + $0x2a4] ss:$16 sps:$4 sm:$0xff]   ;;  %v16917_v14 = vld [vmem:[#allocation5 + $0x3c8] ss:$16 sps:$4 sm:$0xff]  }
  0x7c   :  { %v16874_v46 = vld [vmem:[#allocation5 + $0x2e4] ss:$16 sps:$4 sm:$0xff]   ;;  %v118_v24 = vld [vmem:[#allocation2 + $0x108] sm:$0xff] }
  0x7d   :  { %7036 = vmatpush1.bf16.msra.mxu0 %v16786_v34  ;;  %8204 = vmatpush1.bf16.msra.mxu1 %v16787_v35  ;;  %v181_v34 = vld [vmem:[#allocation2 + $0x300] sm:$0xff]  ;;  %v134_v25 = vld [vmem:[#allocation2 + $0x188] sm:$0xff] }
  0x7e   :  { %7037 = vmatprep.subr.bf16.mxu0 %v16788_v36  ;;  %8205 = vmatprep.subr.bf16.mxu1 %v16790_v37  ;;  %v197_v35 = vld [vmem:[#allocation2 + $0x380] sm:$0xff]  ;;  %v16863_v37 = vld [vmem:[#allocation5 + $0x2a8] ss:$16 sps:$4 sm:$0xff]  }
  0x7f   :  { %v16860_v36 = vld [vmem:[#allocation5 + $0x2a0] ss:$16 sps:$4 sm:$0xff]   ;;  %v16922_v15 = vld [vmem:[#allocation5 + $0x3e4] ss:$16 sps:$4 sm:$0xff]  }
  0x81   :  { %7038 = vmatpush1.bf16.msra.mxu0 %v16792_v38  ;;  %8206 = vmatpush1.bf16.msra.mxu1 %v16793_v39  ;;  %v14259_v38 = vcombine.high %v181_v34, %v197_v35  ;;  %v16868_v39 = vld [vmem:[#allocation5 + $0x2c4] ss:$16 sps:$4 sm:$0xff]  }
  0x82   :  { %7039 = vmatprep.subr.bf16.mxu0 %v16794_v40  ;;  %8207 = vmatprep.subr.bf16.mxu1 %v16796_v41  ;;  %v16871_v40 = vld [vmem:[#allocation5 + $0x2cc] ss:$16 sps:$4 sm:$0xff]   ;;  %v16866_v41 = vld [vmem:[#allocation5 + $0x2c0] ss:$16 sps:$4 sm:$0xff]  }
  0x85   :  { %7040 = vmatpush1.bf16.msra.mxu0 %v16798_v42  ;;  %8208 = vmatpush1.bf16.msra.mxu1 %v16799_v43  ;;  %v16869_v42 = vld [vmem:[#allocation5 + $0x2c8] ss:$16 sps:$4 sm:$0xff]   ;;  %v14258_v43 = vcombine.low %v181_v34, %v197_v35  ;;  %v14196_v34 = vcombine.low %v118_v24, %v134_v25 }
  0x86   :  { %7041 = vmatprep.subr.bf16.mxu0 %v16800_v44  ;;  %8209 = vmatprep.subr.bf16.mxu1 %v16802_v45  ;;  %v18516_v44 = vld [vmem:[#allocation2 + $0x8] sm:$0xff] }
  0x87   :  { %v18518_v45 = vld [vmem:[#allocation2 + $0x88] sm:$0xff] }
  0x88   :  { %v166_v35 = vld [vmem:[#allocation2 + $0x288] sm:$0xff] }
  0x89   :  { %7042 = vmatpush1.bf16.msra.mxu0 %v16804_v48  ;;  %8210 = vmatpush1.bf16.msra.mxu1 %v16805_v49  ;;  %v14165_v48 = vcombine.high %v18516_v44, %v18518_v45  ;;  %v16872_v49 = vld [vmem:[#allocation5 + $0x2e0] ss:$16 sps:$4 sm:$0xff]  }
  0x8a   :  { %7043 = vmatprep.subr.bf16.mxu0 %v16806_v51  ;;  %8211 = vmatprep.subr.bf16.mxu1 %v16808_v52  ;;  %v16880_v51 = vld [vmem:[#allocation5 + $0x304] ss:$16 sps:$4 sm:$0xff]   ;;  %v16883_v52 = vld [vmem:[#allocation5 + $0x30c] ss:$16 sps:$4 sm:$0xff]  }
  0x8d   :  { %7044 = vmatpush1.bf16.msra.mxu0 %v16810_v53  ;;  %8212 = vmatpush1.bf16.msra.mxu1 %v16811_v54  ;;  %v16878_v53 = vld [vmem:[#allocation5 + $0x300] ss:$16 sps:$4 sm:$0xff]   ;;  %v16881_v54 = vld [vmem:[#allocation5 + $0x308] ss:$16 sps:$4 sm:$0xff]  }
  0x8e   :  { %7045 = vmatprep.subr.bf16.mxu0 %v16812_v55  ;;  %8213 = vmatprep.subr.bf16.mxu1 %v16814_v56  ;;  %v16886_v55 = vld [vmem:[#allocation5 + $0x324] ss:$16 sps:$4 sm:$0xff]   ;;  %v16889_v56 = vld [vmem:[#allocation5 + $0x32c] ss:$16 sps:$4 sm:$0xff]  }
  0x91   :  { %7046 = vmatpush1.bf16.msra.mxu0 %v16816_v57  ;;  %8214 = vmatpush1.bf16.msra.mxu1 %v16817_v58  ;;  %v16884_v57 = vld [vmem:[#allocation5 + $0x320] ss:$16 sps:$4 sm:$0xff]   ;;  %v16887_v58 = vld [vmem:[#allocation5 + $0x328] ss:$16 sps:$4 sm:$0xff]  }
  0x92   :  { %7047 = vmatprep.subr.bf16.mxu0 %v16818_v59  ;;  %8215 = vmatprep.subr.bf16.mxu1 %v16820_v60  ;;  %v16892_v59 = vld [vmem:[#allocation5 + $0x344] ss:$16 sps:$4 sm:$0xff]   ;;  %v16895_v60 = vld [vmem:[#allocation5 + $0x34c] ss:$16 sps:$4 sm:$0xff]  }
  0x95   :  { %7048 = vmatpush1.bf16.msra.mxu0 %v16822_v61  ;;  %8216 = vmatpush1.bf16.msra.mxu1 %v16823_v62  ;;  %v16890_v61 = vld [vmem:[#allocation5 + $0x340] ss:$16 sps:$4 sm:$0xff]   ;;  %v16893_v62 = vld [vmem:[#allocation5 + $0x348] ss:$16 sps:$4 sm:$0xff]  }
  0x96   :  { %7049 = vmatprep.subr.bf16.mxu0 %v16824_v63  ;;  %8217 = vmatprep.subr.bf16.mxu1 %v16826_v0  ;;  %v16898_v63 = vld [vmem:[#allocation5 + $0x364] ss:$16 sps:$4 sm:$0xff]   ;;  %v16901_v0 = vld [vmem:[#allocation5 + $0x36c] ss:$16 sps:$4 sm:$0xff]  }
  0x99   :  { %7050 = vmatpush1.bf16.msra.mxu0 %v16828_v1  ;;  %8218 = vmatpush1.bf16.msra.mxu1 %v16829_v2  ;;  %v16896_v1 = vld [vmem:[#allocation5 + $0x360] ss:$16 sps:$4 sm:$0xff]   ;;  %v16899_v2 = vld [vmem:[#allocation5 + $0x368] ss:$16 sps:$4 sm:$0xff]  }
  0x9a   :  { %7092 = vmatprep.subr.bf16.mxu0 %v16832_v3  ;;  %8260 = vmatprep.subr.bf16.mxu1 %v16835_v4  ;;  %v16904_v3 = vld [vmem:[#allocation5 + $0x384] ss:$16 sps:$4 sm:$0xff]   ;;  %v16907_v4 = vld [vmem:[#allocation5 + $0x38c] ss:$16 sps:$4 sm:$0xff]  }
  0x9c   :  { %7052 = vmatmul.mubr.bf16.vlgmr.msra.gmra.mrb[0].mxu0 %v14162_v5  ;;  %8220 = vmatmul.mubr.bf16.vlgmr.msra.gmra.mrb[0].mxu1 %v14162_v5  ;;  %v16902_v5 = vld [vmem:[#allocation5 + $0x380] ss:$16 sps:$4 sm:$0xff]  }
  0x9d   :  { %7093 = vmatpush1.bf16.msra.mxu0 %v16830_v6  ;;  %8261 = vmatpush1.bf16.msra.mxu1 %v16833_v7  ;;  %v16905_v6 = vld [vmem:[#allocation5 + $0x388] ss:$16 sps:$4 sm:$0xff]   ;;  %v16910_v7 = vld [vmem:[#allocation5 + $0x3a4] ss:$16 sps:$4 sm:$0xff]  }
  0x9e   :  { %7094 = vmatprep.subr.bf16.mxu0 %v16838_v8  ;;  %8262 = vmatprep.subr.bf16.mxu1 %v16841_v9  ;;  %v16913_v8 = vld [vmem:[#allocation5 + $0x3ac] ss:$16 sps:$4 sm:$0xff]   ;;  %v16908_v9 = vld [vmem:[#allocation5 + $0x3a0] ss:$16 sps:$4 sm:$0xff]  }
  0x9f   :  { %7061 = vmatprep.mubr.bf16.mxu0 %v14195_v18  ;;  %8229 = vmatprep.mubr.bf16.mxu1 %v14195_v18  ;;  %v16923_v18 = vld [vmem:[#allocation5 + $0x3e8] ss:$16 sps:$4 sm:$0xff]  }
  0xa1   :  { %7095 = vmatpush1.bf16.msra.mxu0 %v16836_v10  ;;  %8263 = vmatpush1.bf16.msra.mxu1 %v16839_v11  ;;  %v16911_v10 = vld [vmem:[#allocation5 + $0x3a8] ss:$16 sps:$4 sm:$0xff]   ;;  %v16916_v11 = vld [vmem:[#allocation5 + $0x3c4] ss:$16 sps:$4 sm:$0xff]  }
  0xa2   :  { %7096 = vmatprep.subr.bf16.mxu0 %v16844_v12  ;;  %8264 = vmatprep.subr.bf16.mxu1 %v16847_v13  ;;  %v16919_v12 = vld [vmem:[#allocation5 + $0x3cc] ss:$16 sps:$4 sm:$0xff]   ;;  %v16914_v13 = vld [vmem:[#allocation5 + $0x3c0] ss:$16 sps:$4 sm:$0xff]  }
  0xa4   :  { %7062 = vmatmul.mubr.bf16.gmra.mrb[4].mxu0 %v14194_v19  ;;  %8230 = vmatmul.mubr.bf16.gmra.mrb[4].mxu1 %v14194_v19  ;;  %v16928_v19 = vld [vmem:[#allocation5 + $0x404] ss:$16 sps:$4 sm:$0xff]  }
  0xa5   :  { %7097 = vmatpush1.bf16.msra.mxu0 %v16842_v16  ;;  %8265 = vmatpush1.bf16.msra.mxu1 %v16845_v17  ;;  %v16925_v16 = vld [vmem:[#allocation5 + $0x3ec] ss:$16 sps:$4 sm:$0xff]   ;;  %v16920_v17 = vld [vmem:[#allocation5 + $0x3e0] ss:$16 sps:$4 sm:$0xff]  }
  0xa6   :  { %7098 = vmatprep.subr.bf16.mxu0 %v16850_v20  ;;  %8266 = vmatprep.subr.bf16.mxu1 %v16853_v21  ;;  %v16931_v20 = vld [vmem:[#allocation5 + $0x40c] ss:$16 sps:$4 sm:$0xff]   ;;  %v16926_v21 = vld [vmem:[#allocation5 + $0x400] ss:$16 sps:$4 sm:$0xff]  }
  0xa7   :  { %7071 = vmatprep.mubr.bf16.mxu0 %v14227_v28  ;;  %8239 = vmatprep.mubr.bf16.mxu1 %v14227_v28  ;;  %v14197_v28 = vcombine.high %v118_v24, %v134_v25  ;;  %v17009_v24 = vld [vmem:[#allocation5 + $0x5ac] ss:$16 sps:$4 sm:$0xff]   ;;  %v17004_v25 = vld [vmem:[#allocation5 + $0x5a0] ss:$16 sps:$4 sm:$0xff]  }
  0xa9   :  { %7099 = vmatpush1.bf16.msra.mxu0 %v16848_v22  ;;  %8267 = vmatpush1.bf16.msra.mxu1 %v16851_v23  ;;  %v14164_v22 = vcombine.low %v18516_v44, %v18518_v45  ;;  %v16929_v23 = vld [vmem:[#allocation5 + $0x408] ss:$16 sps:$4 sm:$0xff]   ;;  %v16955_v44 = vld [vmem:[#allocation5 + $0x48c] ss:$16 sps:$4 sm:$0xff]  }
  0xaa   :  { %7100 = vmatprep.subr.bf16.mxu0 %v16856_v26  ;;  %8268 = vmatprep.subr.bf16.mxu1 %v16859_v27  ;;  %v16934_v26 = vld [vmem:[#allocation5 + $0x424] ss:$16 sps:$4 sm:$0xff]   ;;  %v16937_v27 = vld [vmem:[#allocation5 + $0x42c] ss:$16 sps:$4 sm:$0xff]  }
  0xab   :  { %v182_v45 = vld [vmem:[#allocation2 + $0x308] sm:$0xff] }
  0xac   :  { %7072 = vmatmul.mubr.bf16.gmra.mrb[8].mxu0 %v14226_v29  ;;  %8240 = vmatmul.mubr.bf16.gmra.mrb[8].mxu1 %v14226_v29  ;;  %v16932_v29 = vld [vmem:[#allocation5 + $0x420] ss:$16 sps:$4 sm:$0xff]  }
  0xad   :  { %7101 = vmatpush1.bf16.msra.mxu0 %v16854_v30  ;;  %8269 = vmatpush1.bf16.msra.mxu1 %v16857_v31  ;;  %v16935_v30 = vld [vmem:[#allocation5 + $0x428] ss:$16 sps:$4 sm:$0xff]   ;;  %v16940_v31 = vld [vmem:[#allocation5 + $0x444] ss:$16 sps:$4 sm:$0xff]  }
  0xae   :  { %7102 = vmatprep.subr.bf16.mxu0 %v16862_v32  ;;  %8270 = vmatprep.subr.bf16.mxu1 %v16865_v33  ;;  %v16943_v32 = vld [vmem:[#allocation5 + $0x44c] ss:$16 sps:$4 sm:$0xff]  }
  0xaf   :  { %7081 = vmatprep.mubr.bf16.mxu0 %v14259_v38  ;;  %8249 = vmatprep.mubr.bf16.mxu1 %v14259_v38  ;;  %v150_v33 = vld [vmem:[#allocation2 + $0x208] sm:$0xff]  ;;  %v16946_v38 = vld [vmem:[#allocation5 + $0x464] ss:$16 sps:$4 sm:$0xff]  }
  0xb1   :  { %7103 = vmatpush1.bf16.msra.mxu0 %v16860_v36  ;;  %8271 = vmatpush1.bf16.msra.mxu1 %v16863_v37  ;;  %v16938_v36 = vld [vmem:[#allocation5 + $0x440] ss:$16 sps:$4 sm:$0xff]   ;;  %v16941_v37 = vld [vmem:[#allocation5 + $0x448] ss:$16 sps:$4 sm:$0xff]  }
  0xb2   :  { %7104 = vmatprep.subr.bf16.mxu0 %v16868_v39  ;;  %8272 = vmatprep.subr.bf16.mxu1 %v16871_v40  ;;  %v16949_v39 = vld [vmem:[#allocation5 + $0x46c] ss:$16 sps:$4 sm:$0xff]   ;;  %v14229_v40 = vcombine.high %v150_v33, %v166_v35 }
  0xb4   :  { %7082 = vmatmul.mubr.bf16.gmra.mrb[12].mxu0 %v14258_v43  ;;  %8250 = vmatmul.mubr.bf16.gmra.mrb[12].mxu1 %v14258_v43  ;;  %v16952_v43 = vld [vmem:[#allocation5 + $0x484] ss:$16 sps:$4 sm:$0xff]  }
  0xb5   :  { %7105 = vmatpush1.bf16.msra.mxu0 %v16866_v41  ;;  %8273 = vmatpush1.bf16.msra.mxu1 %v16869_v42  ;;  %v16944_v41 = vld [vmem:[#allocation5 + $0x460] ss:$16 sps:$4 sm:$0xff]   ;;  %v16947_v42 = vld [vmem:[#allocation5 + $0x468] ss:$16 sps:$4 sm:$0xff]  }
  0xb6   :  { %7106 = vmatprep.subr.bf16.mxu0 %v16874_v46  ;;  %8274 = vmatprep.subr.bf16.mxu1 %v16877_v47  ;;  %v14228_v46 = vcombine.low %v150_v33, %v166_v35  ;;  %v198_v47 = vld [vmem:[#allocation2 + $0x388] sm:$0xff]  ;;  %v17016_v33 = vld [vmem:[#allocation5 + $0x5e0] ss:$16 sps:$4 sm:$0xff]   ;;  %v17024_v35 = vld [vmem:[#allocation5 + $0x604] ss:$16 sps:$4 sm:$0xff]  }
  0xb7   :  { %7124 = vmatprep.mubr.bf16.mxu0 %v14165_v48  ;;  %8292 = vmatprep.mubr.bf16.mxu1 %v14165_v48  ;;  %v16950_v48 = vld [vmem:[#allocation5 + $0x480] ss:$16 sps:$4 sm:$0xff]  }
  0xb9   :  { %7107 = vmatpush1.bf16.msra.mxu0 %v16872_v49  ;;  %8275 = vmatpush1.bf16.msra.mxu1 %v16875_v50  ;;  %v16953_v49 = vld [vmem:[#allocation5 + $0x488] ss:$16 sps:$4 sm:$0xff]   ;;  %v16958_v50 = vld [vmem:[#allocation5 + $0x4a4] ss:$16 sps:$4 sm:$0xff]  }
  0xba   :  { %7108 = vmatprep.subr.bf16.mxu0 %v16880_v51  ;;  %8276 = vmatprep.subr.bf16.mxu1 %v16883_v52  ;;  %v16961_v51 = vld [vmem:[#allocation5 + $0x4ac] ss:$16 sps:$4 sm:$0xff]   ;;  %v14261_v52 = vcombine.high %v182_v45, %v198_v47 }
  0xbd   :  { %7109 = vmatpush1.bf16.msra.mxu0 %v16878_v53  ;;  %8277 = vmatpush1.bf16.msra.mxu1 %v16881_v54  ;;  %v16956_v53 = vld [vmem:[#allocation5 + $0x4a0] ss:$16 sps:$4 sm:$0xff]   ;;  %v16959_v54 = vld [vmem:[#allocation5 + $0x4a8] ss:$16 sps:$4 sm:$0xff]  }
  0xbe   :  { %7110 = vmatprep.subr.bf16.mxu0 %v16886_v55  ;;  %8278 = vmatprep.subr.bf16.mxu1 %v16889_v56  ;;  %v16964_v55 = vld [vmem:[#allocation5 + $0x4c4] ss:$16 sps:$4 sm:$0xff]   ;;  %v16967_v56 = vld [vmem:[#allocation5 + $0x4cc] ss:$16 sps:$4 sm:$0xff]  }
  0xc1   :  { %7111 = vmatpush1.bf16.msra.mxu0 %v16884_v57  ;;  %8279 = vmatpush1.bf16.msra.mxu1 %v16887_v58  ;;  %v18524_v57 = vld [vmem:[#allocation2 + $0x10] sm:$0xff]  ;;  %v14260_v58 = vcombine.low %v182_v45, %v198_v47 }
  0xc2   :  { %7112 = vmatprep.subr.bf16.mxu0 %v16892_v59  ;;  %8280 = vmatprep.subr.bf16.mxu1 %v16895_v60  ;;  %v18526_v59 = vld [vmem:[#allocation2 + $0x90] sm:$0xff] }
  0xc3   :  { %v16962_v60 = vld [vmem:[#allocation5 + $0x4c0] ss:$16 sps:$4 sm:$0xff]   ;;  %v17036_v47 = vld [vmem:[#allocation5 + $0x644] ss:$16 sps:$4 sm:$0xff]  }
  0xc4   :  { %v17028_v45 = vld [vmem:[#allocation5 + $0x620] ss:$16 sps:$4 sm:$0xff]  }
  0xc5   :  { %7113 = vmatpush1.bf16.msra.mxu0 %v16890_v61  ;;  %8281 = vmatpush1.bf16.msra.mxu1 %v16893_v62  ;;  %v16965_v61 = vld [vmem:[#allocation5 + $0x4c8] ss:$16 sps:$4 sm:$0xff]   ;;  %v16970_v62 = vld [vmem:[#allocation5 + $0x4e4] ss:$16 sps:$4 sm:$0xff]  }
  0xc6   :  { %7114 = vmatprep.subr.bf16.mxu0 %v16898_v63  ;;  %8282 = vmatprep.subr.bf16.mxu1 %v16901_v0  ;;  %v16973_v63 = vld [vmem:[#allocation5 + $0x4ec] ss:$16 sps:$4 sm:$0xff]   ;;  %v14167_v0 = vcombine.high %v18524_v57, %v18526_v59 }
  0xc9   :  { %7115 = vmatpush1.bf16.msra.mxu0 %v16896_v1  ;;  %8283 = vmatpush1.bf16.msra.mxu1 %v16899_v2  ;;  %v16968_v1 = vld [vmem:[#allocation5 + $0x4e0] ss:$16 sps:$4 sm:$0xff]   ;;  %v16971_v2 = vld [vmem:[#allocation5 + $0x4e8] ss:$16 sps:$4 sm:$0xff]  }
  0xca   :  { %7116 = vmatprep.subr.bf16.mxu0 %v16904_v3  ;;  %8284 = vmatprep.subr.bf16.mxu1 %v16907_v4  ;;  %v16976_v3 = vld [vmem:[#allocation5 + $0x504] ss:$16 sps:$4 sm:$0xff]   ;;  %v16979_v4 = vld [vmem:[#allocation5 + $0x50c] ss:$16 sps:$4 sm:$0xff]  }
  0xcd   :  { %7117 = vmatpush1.bf16.msra.mxu0 %v16902_v5  ;;  %8285 = vmatpush1.bf16.msra.mxu1 %v16905_v6  ;;  %v16974_v5 = vld [vmem:[#allocation5 + $0x500] ss:$16 sps:$4 sm:$0xff]   ;;  %v16977_v6 = vld [vmem:[#allocation5 + $0x508] ss:$16 sps:$4 sm:$0xff]  }
  0xce   :  { %7118 = vmatprep.subr.bf16.mxu0 %v16910_v7  ;;  %8286 = vmatprep.subr.bf16.mxu1 %v16913_v8  ;;  %v16982_v7 = vld [vmem:[#allocation5 + $0x524] ss:$16 sps:$4 sm:$0xff]   ;;  %v16985_v8 = vld [vmem:[#allocation5 + $0x52c] ss:$16 sps:$4 sm:$0xff]  }
  0xd1   :  { %7119 = vmatpush1.bf16.msra.mxu0 %v16908_v9  ;;  %8287 = vmatpush1.bf16.msra.mxu1 %v16911_v10  ;;  %v16980_v9 = vld [vmem:[#allocation5 + $0x520] ss:$16 sps:$4 sm:$0xff]   ;;  %v16983_v10 = vld [vmem:[#allocation5 + $0x528] ss:$16 sps:$4 sm:$0xff]  }
  0xd2   :  { %7120 = vmatprep.subr.bf16.mxu0 %v16916_v11  ;;  %8288 = vmatprep.subr.bf16.mxu1 %v16919_v12  ;;  %v16988_v11 = vld [vmem:[#allocation5 + $0x544] ss:$16 sps:$4 sm:$0xff]   ;;  %v16991_v12 = vld [vmem:[#allocation5 + $0x54c] ss:$16 sps:$4 sm:$0xff]  }
  0xd5   :  { %7121 = vmatpush1.bf16.msra.mxu0 %v16914_v13  ;;  %8289 = vmatpush1.bf16.msra.mxu1 %v16917_v14  ;;  %v16986_v13 = vld [vmem:[#allocation5 + $0x540] ss:$16 sps:$4 sm:$0xff]   ;;  %v16989_v14 = vld [vmem:[#allocation5 + $0x548] ss:$16 sps:$4 sm:$0xff]  }
  0xd6   :  { %7122 = vmatprep.subr.bf16.mxu0 %v16922_v15  ;;  %8290 = vmatprep.subr.bf16.mxu1 %v16925_v16  ;;  %v16994_v15 = vld [vmem:[#allocation5 + $0x564] ss:$16 sps:$4 sm:$0xff]   ;;  %v16997_v16 = vld [vmem:[#allocation5 + $0x56c] ss:$16 sps:$4 sm:$0xff]  }
  0xd9   :  { %7123 = vmatpush1.bf16.msra.mxu0 %v16920_v17  ;;  %8291 = vmatpush1.bf16.msra.mxu1 %v16923_v18  ;;  %v16992_v17 = vld [vmem:[#allocation5 + $0x560] ss:$16 sps:$4 sm:$0xff]   ;;  %v16995_v18 = vld [vmem:[#allocation5 + $0x568] ss:$16 sps:$4 sm:$0xff]  }
  0xda   :  { %7165 = vmatprep.subr.bf16.mxu0 %v16928_v19  ;;  %8333 = vmatprep.subr.bf16.mxu1 %v16931_v20  ;;  %v17000_v19 = vld [vmem:[#allocation5 + $0x584] ss:$16 sps:$4 sm:$0xff]   ;;  %v17003_v20 = vld [vmem:[#allocation5 + $0x58c] ss:$16 sps:$4 sm:$0xff]  }
  0xdc   :  { %7125 = vmatmul.mubr.bf16.vlgmr.msra.gmra.mrb[0].mxu0 %v14164_v22  ;;  %8293 = vmatmul.mubr.bf16.vlgmr.msra.gmra.mrb[0].mxu1 %v14164_v22  ;;  %v17001_v22 = vld [vmem:[#allocation5 + $0x588] ss:$16 sps:$4 sm:$0xff]  }
  0xdd   :  { %7166 = vmatpush1.bf16.msra.mxu0 %v16926_v21  ;;  %8334 = vmatpush1.bf16.msra.mxu1 %v16929_v23  ;;  %v16998_v21 = vld [vmem:[#allocation5 + $0x580] ss:$16 sps:$4 sm:$0xff]   ;;  %v17006_v23 = vld [vmem:[#allocation5 + $0x5a4] ss:$16 sps:$4 sm:$0xff]  }
  0xde   :  { %7167 = vmatprep.subr.bf16.mxu0 %v16934_v26  ;;  %8335 = vmatprep.subr.bf16.mxu1 %v16937_v27  ;;  %v17007_v26 = vld [vmem:[#allocation5 + $0x5a8] ss:$16 sps:$4 sm:$0xff]   ;;  %v17012_v27 = vld [vmem:[#allocation5 + $0x5c4] ss:$16 sps:$4 sm:$0xff]  }
  0xdf   :  { %7134 = vmatprep.mubr.bf16.mxu0 %v14197_v28  ;;  %8302 = vmatprep.mubr.bf16.mxu1 %v14197_v28  ;;  %v17015_v28 = vld [vmem:[#allocation5 + $0x5cc] ss:$16 sps:$4 sm:$0xff]  }
  0xe1   :  { %7168 = vmatpush1.bf16.msra.mxu0 %v16932_v29  ;;  %8336 = vmatpush1.bf16.msra.mxu1 %v16935_v30  ;;  %v17010_v29 = vld [vmem:[#allocation5 + $0x5c0] ss:$16 sps:$4 sm:$0xff]   ;;  %v17013_v30 = vld [vmem:[#allocation5 + $0x5c8] ss:$16 sps:$4 sm:$0xff]  }
  0xe2   :  { %7169 = vmatprep.subr.bf16.mxu0 %v16940_v31  ;;  %8337 = vmatprep.subr.bf16.mxu1 %v16943_v32  ;;  %v17018_v31 = vld [vmem:[#allocation5 + $0x5e4] ss:$16 sps:$4 sm:$0xff]   ;;  %v17021_v32 = vld [vmem:[#allocation5 + $0x5ec] ss:$16 sps:$4 sm:$0xff]  }
  0xe4   :  { %7135 = vmatmul.mubr.bf16.gmra.mrb[4].mxu0 %v14196_v34  ;;  %8303 = vmatmul.mubr.bf16.gmra.mrb[4].mxu1 %v14196_v34  ;;  %v17019_v34 = vld [vmem:[#allocation5 + $0x5e8] ss:$16 sps:$4 sm:$0xff]  }
  0xe5   :  { %7170 = vmatpush1.bf16.msra.mxu0 %v16938_v36  ;;  %8338 = vmatpush1.bf16.msra.mxu1 %v16941_v37  ;;  %v17027_v36 = vld [vmem:[#allocation5 + $0x60c] ss:$16 sps:$4 sm:$0xff]   ;;  %v119_v37 = vld [vmem:[#allocation2 + $0x110] sm:$0xff] }
  0xe6   :  { %7171 = vmatprep.subr.bf16.mxu0 %v16946_v38  ;;  %8339 = vmatprep.subr.bf16.mxu1 %v16949_v39  ;;  %v14166_v38 = vcombine.low %v18524_v57, %v18526_v59  ;;  %v135_v39 = vld [vmem:[#allocation2 + $0x190] sm:$0xff] }
  0xe7   :  { %7144 = vmatprep.mubr.bf16.mxu0 %v14229_v40  ;;  %8312 = vmatprep.mubr.bf16.mxu1 %v14229_v40  ;;  %v17022_v40 = vld [vmem:[#allocation5 + $0x600] ss:$16 sps:$4 sm:$0xff]   ;;  %v17048_v59 = vld [vmem:[#allocation5 + $0x684] ss:$16 sps:$4 sm:$0xff]  }
  0xe8   :  { %v17040_v57 = vld [vmem:[#allocation5 + $0x660] ss:$16 sps:$4 sm:$0xff]  }
  0xe9   :  { %7172 = vmatpush1.bf16.msra.mxu0 %v16944_v41  ;;  %8340 = vmatpush1.bf16.msra.mxu1 %v16947_v42  ;;  %v17025_v41 = vld [vmem:[#allocation5 + $0x608] ss:$16 sps:$4 sm:$0xff]   ;;  %v17030_v42 = vld [vmem:[#allocation5 + $0x624] ss:$16 sps:$4 sm:$0xff]  }
  0xea   :  { %7173 = vmatprep.subr.bf16.mxu0 %v16952_v43  ;;  %8341 = vmatprep.subr.bf16.mxu1 %v16955_v44  ;;  %v17033_v43 = vld [vmem:[#allocation5 + $0x62c] ss:$16 sps:$4 sm:$0xff]   ;;  %v14199_v44 = vcombine.high %v119_v37, %v135_v39 }
  0xec   :  { %7145 = vmatmul.mubr.bf16.gmra.mrb[8].mxu0 %v14228_v46  ;;  %8313 = vmatmul.mubr.bf16.gmra.mrb[8].mxu1 %v14228_v46  ;;  %v17031_v46 = vld [vmem:[#allocation5 + $0x628] ss:$16 sps:$4 sm:$0xff]  }
  0xed   :  { %7174 = vmatpush1.bf16.msra.mxu0 %v16950_v48  ;;  %8342 = vmatpush1.bf16.msra.mxu1 %v16953_v49  ;;  %v17039_v48 = vld [vmem:[#allocation5 + $0x64c] ss:$16 sps:$4 sm:$0xff]   ;;  %v151_v49 = vld [vmem:[#allocation2 + $0x210] sm:$0xff] }
  0xee   :  { %7175 = vmatprep.subr.bf16.mxu0 %v16958_v50  ;;  %8343 = vmatprep.subr.bf16.mxu1 %v16961_v51  ;;  %v14198_v50 = vcombine.low %v119_v37, %v135_v39  ;;  %v167_v51 = vld [vmem:[#allocation2 + $0x290] sm:$0xff] }
  0xef   :  { %7154 = vmatprep.mubr.bf16.mxu0 %v14261_v52  ;;  %8322 = vmatprep.mubr.bf16.mxu1 %v14261_v52  ;;  %v17034_v52 = vld [vmem:[#allocation5 + $0x640] ss:$16 sps:$4 sm:$0xff]   ;;  %v17102_v39 = vld [vmem:[#allocation5 + $0x7a4] ss:$16 sps:$4 sm:$0xff]  }
  0xf0   :  { %v17094_v37 = vld [vmem:[#allocation5 + $0x780] ss:$16 sps:$4 sm:$0xff]  }
  0xf1   :  { %7176 = vmatpush1.bf16.msra.mxu0 %v16956_v53  ;;  %8344 = vmatpush1.bf16.msra.mxu1 %v16959_v54  ;;  %v17037_v53 = vld [vmem:[#allocation5 + $0x648] ss:$16 sps:$4 sm:$0xff]   ;;  %v17042_v54 = vld [vmem:[#allocation5 + $0x664] ss:$16 sps:$4 sm:$0xff]  }
  0xf2   :  { %7177 = vmatprep.subr.bf16.mxu0 %v16964_v55  ;;  %8345 = vmatprep.subr.bf16.mxu1 %v16967_v56  ;;  %v17045_v55 = vld [vmem:[#allocation5 + $0x66c] ss:$16 sps:$4 sm:$0xff]   ;;  %v14231_v56 = vcombine.high %v151_v49, %v167_v51 }
  0xf4   :  { %7155 = vmatmul.mubr.bf16.gmra.mrb[12].mxu0 %v14260_v58  ;;  %8323 = vmatmul.mubr.bf16.gmra.mrb[12].mxu1 %v14260_v58  ;;  %v17043_v58 = vld [vmem:[#allocation5 + $0x668] ss:$16 sps:$4 sm:$0xff]  }
  0xf5   :  { %7178 = vmatpush1.bf16.msra.mxu0 %v16962_v60  ;;  %8346 = vmatpush1.bf16.msra.mxu1 %v16965_v61  ;;  %v17051_v60 = vld [vmem:[#allocation5 + $0x68c] ss:$16 sps:$4 sm:$0xff]   ;;  %v17046_v61 = vld [vmem:[#allocation5 + $0x680] ss:$16 sps:$4 sm:$0xff]  }
  0xf6   :  { %7179 = vmatprep.subr.bf16.mxu0 %v16970_v62  ;;  %8347 = vmatprep.subr.bf16.mxu1 %v16973_v63  ;;  %v17049_v62 = vld [vmem:[#allocation5 + $0x688] ss:$16 sps:$4 sm:$0xff]   ;;  %v14230_v63 = vcombine.low %v151_v49, %v167_v51  ;;  %v17112_v49 = vld [vmem:[#allocation5 + $0x7e0] ss:$16 sps:$4 sm:$0xff]   ;;  %v17120_v51 = vld [vmem:[#allocation5 + $0x804] ss:$16 sps:$4 sm:$0xff]  }
  0xf7   :  { %7197 = vmatprep.mubr.bf16.mxu0 %v14167_v0  ;;  %8365 = vmatprep.mubr.bf16.mxu1 %v14167_v0  ;;  %v183_v0 = vld [vmem:[#allocation2 + $0x310] sm:$0xff] }
  0xf9   :  { %7180 = vmatpush1.bf16.msra.mxu0 %v16968_v1  ;;  %8348 = vmatpush1.bf16.msra.mxu1 %v16971_v2  ;;  %v199_v1 = vld [vmem:[#allocation2 + $0x390] sm:$0xff] }
  0xfa   :  { %7181 = vmatprep.subr.bf16.mxu0 %v16976_v3  ;;  %8349 = vmatprep.subr.bf16.mxu1 %v16979_v4  ;;  %v17054_v2 = vld [vmem:[#allocation5 + $0x6a4] ss:$16 sps:$4 sm:$0xff]   ;;  %v17057_v3 = vld [vmem:[#allocation5 + $0x6ac] ss:$16 sps:$4 sm:$0xff]   ;;  %v14263_v4 = vcombine.high %v183_v0, %v199_v1 }
  0xfd   :  { %7182 = vmatpush1.bf16.msra.mxu0 %v16974_v5  ;;  %8350 = vmatpush1.bf16.msra.mxu1 %v16977_v6  ;;  %v17052_v5 = vld [vmem:[#allocation5 + $0x6a0] ss:$16 sps:$4 sm:$0xff]   ;;  %v17055_v6 = vld [vmem:[#allocation5 + $0x6a8] ss:$16 sps:$4 sm:$0xff]  }
  0xfe   :  { %7183 = vmatprep.subr.bf16.mxu0 %v16982_v7  ;;  %8351 = vmatprep.subr.bf16.mxu1 %v16985_v8  ;;  %v17060_v7 = vld [vmem:[#allocation5 + $0x6c4] ss:$16 sps:$4 sm:$0xff]   ;;  %v17063_v8 = vld [vmem:[#allocation5 + $0x6cc] ss:$16 sps:$4 sm:$0xff]  }
 0x101   :  { %7184 = vmatpush1.bf16.msra.mxu0 %v16980_v9  ;;  %8352 = vmatpush1.bf16.msra.mxu1 %v16983_v10  ;;  %v18532_v9 = vld [vmem:[#allocation2 + $0x18] sm:$0xff]  ;;  %v14262_v10 = vcombine.low %v183_v0, %v199_v1  ;;  %v17130_v1 = vld [vmem:[#allocation5 + $0x840] ss:$16 sps:$4 sm:$0xff]  }
 0x102   :  { %7185 = vmatprep.subr.bf16.mxu0 %v16988_v11  ;;  %8353 = vmatprep.subr.bf16.mxu1 %v16991_v12  ;;  %v18534_v11 = vld [vmem:[#allocation2 + $0x98] sm:$0xff]  ;;  %v17058_v12 = vld [vmem:[#allocation5 + $0x6c0] ss:$16 sps:$4 sm:$0xff]  }
 0x103   :  { %v17135_v0 = vld [vmem:[#allocation5 + $0x84c] ss:$16 sps:$4 sm:$0xff]  }
 0x105   :  { %7186 = vmatpush1.bf16.msra.mxu0 %v16986_v13  ;;  %8354 = vmatpush1.bf16.msra.mxu1 %v16989_v14  ;;  %v17061_v13 = vld [vmem:[#allocation5 + $0x6c8] ss:$16 sps:$4 sm:$0xff]   ;;  %v17066_v14 = vld [vmem:[#allocation5 + $0x6e4] ss:$16 sps:$4 sm:$0xff]  }
 0x106   :  { %7187 = vmatprep.subr.bf16.mxu0 %v16994_v15  ;;  %8355 = vmatprep.subr.bf16.mxu1 %v16997_v16  ;;  %v17069_v15 = vld [vmem:[#allocation5 + $0x6ec] ss:$16 sps:$4 sm:$0xff]   ;;  %v14169_v16 = vcombine.high %v18532_v9, %v18534_v11 }
 0x109   :  { %7188 = vmatpush1.bf16.msra.mxu0 %v16992_v17  ;;  %8356 = vmatpush1.bf16.msra.mxu1 %v16995_v18  ;;  %v17064_v17 = vld [vmem:[#allocation5 + $0x6e0] ss:$16 sps:$4 sm:$0xff]   ;;  %v17067_v18 = vld [vmem:[#allocation5 + $0x6e8] ss:$16 sps:$4 sm:$0xff]  }
 0x10a   :  { %7189 = vmatprep.subr.bf16.mxu0 %v17000_v19  ;;  %8357 = vmatprep.subr.bf16.mxu1 %v17003_v20  ;;  %v17072_v19 = vld [vmem:[#allocation5 + $0x704] ss:$16 sps:$4 sm:$0xff]   ;;  %v17075_v20 = vld [vmem:[#allocation5 + $0x70c] ss:$16 sps:$4 sm:$0xff]  }
 0x10d   :  { %7190 = vmatpush1.bf16.msra.mxu0 %v16998_v21  ;;  %8358 = vmatpush1.bf16.msra.mxu1 %v17001_v22  ;;  %v17070_v21 = vld [vmem:[#allocation5 + $0x700] ss:$16 sps:$4 sm:$0xff]   ;;  %v17073_v22 = vld [vmem:[#allocation5 + $0x708] ss:$16 sps:$4 sm:$0xff]  }
 0x10e   :  { %7191 = vmatprep.subr.bf16.mxu0 %v17006_v23  ;;  %8359 = vmatprep.subr.bf16.mxu1 %v17009_v24  ;;  %v17078_v23 = vld [vmem:[#allocation5 + $0x724] ss:$16 sps:$4 sm:$0xff]   ;;  %v17081_v24 = vld [vmem:[#allocation5 + $0x72c] ss:$16 sps:$4 sm:$0xff]  }
 0x111   :  { %7192 = vmatpush1.bf16.msra.mxu0 %v17004_v25  ;;  %8360 = vmatpush1.bf16.msra.mxu1 %v17007_v26  ;;  %v17076_v25 = vld [vmem:[#allocation5 + $0x720] ss:$16 sps:$4 sm:$0xff]   ;;  %v17079_v26 = vld [vmem:[#allocation5 + $0x728] ss:$16 sps:$4 sm:$0xff]  }
 0x112   :  { %7193 = vmatprep.subr.bf16.mxu0 %v17012_v27  ;;  %8361 = vmatprep.subr.bf16.mxu1 %v17015_v28  ;;  %v17084_v27 = vld [vmem:[#allocation5 + $0x744] ss:$16 sps:$4 sm:$0xff]   ;;  %v17087_v28 = vld [vmem:[#allocation5 + $0x74c] ss:$16 sps:$4 sm:$0xff]  }
 0x115   :  { %7194 = vmatpush1.bf16.msra.mxu0 %v17010_v29  ;;  %8362 = vmatpush1.bf16.msra.mxu1 %v17013_v30  ;;  %v17082_v29 = vld [vmem:[#allocation5 + $0x740] ss:$16 sps:$4 sm:$0xff]   ;;  %v17085_v30 = vld [vmem:[#allocation5 + $0x748] ss:$16 sps:$4 sm:$0xff]  }
 0x116   :  { %7195 = vmatprep.subr.bf16.mxu0 %v17018_v31  ;;  %8363 = vmatprep.subr.bf16.mxu1 %v17021_v32  ;;  %v17090_v31 = vld [vmem:[#allocation5 + $0x764] ss:$16 sps:$4 sm:$0xff]   ;;  %v17093_v32 = vld [vmem:[#allocation5 + $0x76c] ss:$16 sps:$4 sm:$0xff]  }
 0x119   :  { %7196 = vmatpush1.bf16.msra.mxu0 %v17016_v33  ;;  %8364 = vmatpush1.bf16.msra.mxu1 %v17019_v34  ;;  %v17088_v33 = vld [vmem:[#allocation5 + $0x760] ss:$16 sps:$4 sm:$0xff]   ;;  %v17091_v34 = vld [vmem:[#allocation5 + $0x768] ss:$16 sps:$4 sm:$0xff]  }
 0x11a   :  { %7238 = vmatprep.subr.bf16.mxu0 %v17024_v35  ;;  %8406 = vmatprep.subr.bf16.mxu1 %v17027_v36  ;;  %v17096_v35 = vld [vmem:[#allocation5 + $0x784] ss:$16 sps:$4 sm:$0xff]   ;;  %v17099_v36 = vld [vmem:[#allocation5 + $0x78c] ss:$16 sps:$4 sm:$0xff]  }
 0x11c   :  { %7198 = vmatmul.mubr.bf16.vlgmr.msra.gmra.mrb[0].mxu0 %v14166_v38  ;;  %8366 = vmatmul.mubr.bf16.vlgmr.msra.gmra.mrb[0].mxu1 %v14166_v38  ;;  %v17097_v38 = vld [vmem:[#allocation5 + $0x788] ss:$16 sps:$4 sm:$0xff]  }
 0x11d   :  { %7239 = vmatpush1.bf16.msra.mxu0 %v17022_v40  ;;  %8407 = vmatpush1.bf16.msra.mxu1 %v17025_v41  ;;  %v17105_v40 = vld [vmem:[#allocation5 + $0x7ac] ss:$16 sps:$4 sm:$0xff]   ;;  %v17100_v41 = vld [vmem:[#allocation5 + $0x7a0] ss:$16 sps:$4 sm:$0xff]  }
 0x11e   :  { %7240 = vmatprep.subr.bf16.mxu0 %v17030_v42  ;;  %8408 = vmatprep.subr.bf16.mxu1 %v17033_v43  ;;  %v17103_v42 = vld [vmem:[#allocation5 + $0x7a8] ss:$16 sps:$4 sm:$0xff]   ;;  %v17108_v43 = vld [vmem:[#allocation5 + $0x7c4] ss:$16 sps:$4 sm:$0xff]  }
 0x11f   :  { %7207 = vmatprep.mubr.bf16.mxu0 %v14199_v44  ;;  %8375 = vmatprep.mubr.bf16.mxu1 %v14199_v44  ;;  %v17111_v44 = vld [vmem:[#allocation5 + $0x7cc] ss:$16 sps:$4 sm:$0xff]  }
 0x121   :  { %7241 = vmatpush1.bf16.msra.mxu0 %v17028_v45  ;;  %8409 = vmatpush1.bf16.msra.mxu1 %v17031_v46  ;;  %v17106_v45 = vld [vmem:[#allocation5 + $0x7c0] ss:$16 sps:$4 sm:$0xff]   ;;  %v17109_v46 = vld [vmem:[#allocation5 + $0x7c8] ss:$16 sps:$4 sm:$0xff]  }
 0x122   :  { %7242 = vmatprep.subr.bf16.mxu0 %v17036_v47  ;;  %8410 = vmatprep.subr.bf16.mxu1 %v17039_v48  ;;  %v17114_v47 = vld [vmem:[#allocation5 + $0x7e4] ss:$16 sps:$4 sm:$0xff]   ;;  %v17117_v48 = vld [vmem:[#allocation5 + $0x7ec] ss:$16 sps:$4 sm:$0xff]  }
 0x124   :  { %7208 = vmatmul.mubr.bf16.gmra.mrb[4].mxu0 %v14198_v50  ;;  %8376 = vmatmul.mubr.bf16.gmra.mrb[4].mxu1 %v14198_v50  ;;  %v17115_v50 = vld [vmem:[#allocation5 + $0x7e8] ss:$16 sps:$4 sm:$0xff]  }
 0x125   :  { %7243 = vmatpush1.bf16.msra.mxu0 %v17034_v52  ;;  %8411 = vmatpush1.bf16.msra.mxu1 %v17037_v53  ;;  %v17123_v52 = vld [vmem:[#allocation5 + $0x80c] ss:$16 sps:$4 sm:$0xff]   ;;  %v17118_v53 = vld [vmem:[#allocation5 + $0x800] ss:$16 sps:$4 sm:$0xff]  }
 0x126   :  { %7244 = vmatprep.subr.bf16.mxu0 %v17042_v54  ;;  %8412 = vmatprep.subr.bf16.mxu1 %v17045_v55  ;;  %v14168_v54 = vcombine.low %v18532_v9, %v18534_v11  ;;  %v120_v55 = vld [vmem:[#allocation2 + $0x118] sm:$0xff]  ;;  %v17136_v9 = vld [vmem:[#allocation5 + $0x860] ss:$16 sps:$4 sm:$0xff]   ;;  %v17144_v11 = vld [vmem:[#allocation5 + $0x884] ss:$16 sps:$4 sm:$0xff]  }
 0x127   :  { %7217 = vmatprep.mubr.bf16.mxu0 %v14231_v56  ;;  %8385 = vmatprep.mubr.bf16.mxu1 %v14231_v56  ;;  %v136_v56 = vld [vmem:[#allocation2 + $0x198] sm:$0xff] }
 0x129   :  { %7245 = vmatpush1.bf16.msra.mxu0 %v17040_v57  ;;  %8413 = vmatpush1.bf16.msra.mxu1 %v17043_v58  ;;  %v17121_v57 = vld [vmem:[#allocation5 + $0x808] ss:$16 sps:$4 sm:$0xff]   ;;  %v17126_v58 = vld [vmem:[#allocation5 + $0x824] ss:$16 sps:$4 sm:$0xff]  }
 0x12a   :  { %7246 = vmatprep.subr.bf16.mxu0 %v17048_v59  ;;  %8414 = vmatprep.subr.bf16.mxu1 %v17051_v60  ;;  %v17129_v59 = vld [vmem:[#allocation5 + $0x82c] ss:$16 sps:$4 sm:$0xff]   ;;  %v14201_v60 = vcombine.high %v120_v55, %v136_v56 }
 0x12c   :  { %7218 = vmatmul.mubr.bf16.gmra.mrb[8].mxu0 %v14230_v63  ;;  %8386 = vmatmul.mubr.bf16.gmra.mrb[8].mxu1 %v14230_v63  ;;  %v17132_v63 = vld [vmem:[#allocation5 + $0x844] ss:$16 sps:$4 sm:$0xff]  }
 0x12d   :  { %7247 = vmatpush1.bf16.msra.mxu0 %v17046_v61  ;;  %8415 = vmatpush1.bf16.msra.mxu1 %v17049_v62  ;;  %v17124_v61 = vld [vmem:[#allocation5 + $0x820] ss:$16 sps:$4 sm:$0xff]   ;;  %v17127_v62 = vld [vmem:[#allocation5 + $0x828] ss:$16 sps:$4 sm:$0xff]  }
 0x12e   :  { %7248 = vmatprep.subr.bf16.mxu0 %v17054_v2  ;;  %8416 = vmatprep.subr.bf16.mxu1 %v17057_v3  ;;  %v17133_v2 = vld [vmem:[#allocation5 + $0x848] ss:$16 sps:$4 sm:$0xff]   ;;  %v14200_v3 = vcombine.low %v120_v55, %v136_v56  ;;  %v17198_v55 = vld [vmem:[#allocation5 + $0x9a4] ss:$16 sps:$4 sm:$0xff]   ;;  %v17201_v56 = vld [vmem:[#allocation5 + $0x9ac] ss:$16 sps:$4 sm:$0xff]  }
 0x12f   :  { %7227 = vmatprep.mubr.bf16.mxu0 %v14263_v4  ;;  %8395 = vmatprep.mubr.bf16.mxu1 %v14263_v4  ;;  %v152_v4 = vld [vmem:[#allocation2 + $0x218] sm:$0xff] }
 0x131   :  { %7249 = vmatpush1.bf16.msra.mxu0 %v17052_v5  ;;  %8417 = vmatpush1.bf16.msra.mxu1 %v17055_v6  ;;  %v168_v5 = vld [vmem:[#allocation2 + $0x298] sm:$0xff]  ;;  %v17138_v6 = vld [vmem:[#allocation5 + $0x864] ss:$16 sps:$4 sm:$0xff]  }
 0x132   :  { %7250 = vmatprep.subr.bf16.mxu0 %v17060_v7  ;;  %8418 = vmatprep.subr.bf16.mxu1 %v17063_v8  ;;  %v17141_v7 = vld [vmem:[#allocation5 + $0x86c] ss:$16 sps:$4 sm:$0xff]   ;;  %v14233_v8 = vcombine.high %v152_v4, %v168_v5 }
 0x134   :  { %7228 = vmatmul.mubr.bf16.gmra.mrb[12].mxu0 %v14262_v10  ;;  %8396 = vmatmul.mubr.bf16.gmra.mrb[12].mxu1 %v14262_v10  ;;  %v17139_v10 = vld [vmem:[#allocation5 + $0x868] ss:$16 sps:$4 sm:$0xff]  }
 0x135   :  { %7251 = vmatpush1.bf16.msra.mxu0 %v17058_v12  ;;  %8419 = vmatpush1.bf16.msra.mxu1 %v17061_v13  ;;  %v17147_v12 = vld [vmem:[#allocation5 + $0x88c] ss:$16 sps:$4 sm:$0xff]  }
 0x136   :  { %7252 = vmatprep.subr.bf16.mxu0 %v17066_v14  ;;  %8420 = vmatprep.subr.bf16.mxu1 %v17069_v15  ;;  %v184_v13 = vld [vmem:[#allocation2 + $0x318] sm:$0xff]  ;;  %v14232_v14 = vcombine.low %v152_v4, %v168_v5  ;;  %v121_v5 = vld [vmem:[#allocation2 + $0x120] sm:$0xff] }
 0x137   :  { %7270 = vmatprep.mubr.bf16.mxu0 %v14169_v16  ;;  %8438 = vmatprep.mubr.bf16.mxu1 %v14169_v16  ;;  %v200_v15 = vld [vmem:[#allocation2 + $0x398] sm:$0xff]  ;;  %v17142_v16 = vld [vmem:[#allocation5 + $0x880] ss:$16 sps:$4 sm:$0xff]  }
 0x138   :  { %v17219_v4 = vld [vmem:[#allocation5 + $0xa0c] ss:$16 sps:$4 sm:$0xff]  }
 0x139   :  { %7253 = vmatpush1.bf16.msra.mxu0 %v17064_v17  ;;  %8421 = vmatpush1.bf16.msra.mxu1 %v17067_v18  ;;  %v17145_v17 = vld [vmem:[#allocation5 + $0x888] ss:$16 sps:$4 sm:$0xff]   ;;  %v17150_v18 = vld [vmem:[#allocation5 + $0x8a4] ss:$16 sps:$4 sm:$0xff]  }
 0x13a   :  { %7254 = vmatprep.subr.bf16.mxu0 %v17072_v19  ;;  %8422 = vmatprep.subr.bf16.mxu1 %v17075_v20  ;;  %v17153_v19 = vld [vmem:[#allocation5 + $0x8ac] ss:$16 sps:$4 sm:$0xff]   ;;  %v14265_v20 = vcombine.high %v184_v13, %v200_v15 }
 0x13d   :  { %7255 = vmatpush1.bf16.msra.mxu0 %v17070_v21  ;;  %8423 = vmatpush1.bf16.msra.mxu1 %v17073_v22  ;;  %v17148_v21 = vld [vmem:[#allocation5 + $0x8a0] ss:$16 sps:$4 sm:$0xff]   ;;  %v17151_v22 = vld [vmem:[#allocation5 + $0x8a8] ss:$16 sps:$4 sm:$0xff]  }
 0x13e   :  { %7256 = vmatprep.subr.bf16.mxu0 %v17078_v23  ;;  %8424 = vmatprep.subr.bf16.mxu1 %v17081_v24  ;;  %v17156_v23 = vld [vmem:[#allocation5 + $0x8c4] ss:$16 sps:$4 sm:$0xff]   ;;  %v17159_v24 = vld [vmem:[#allocation5 + $0x8cc] ss:$16 sps:$4 sm:$0xff]  }
 0x141   :  { %7257 = vmatpush1.bf16.msra.mxu0 %v17076_v25  ;;  %8425 = vmatpush1.bf16.msra.mxu1 %v17079_v26  ;;  %v18540_v25 = vld [vmem:[#allocation2 + $0x20] sm:$0xff]  ;;  %v14264_v26 = vcombine.low %v184_v13, %v200_v15  ;;  %v17223_v13 = vld [vmem:[#allocation5 + $0xa28] ss:$16 sps:$4 sm:$0xff]  }
 0x142   :  { %7258 = vmatprep.subr.bf16.mxu0 %v17084_v27  ;;  %8426 = vmatprep.subr.bf16.mxu1 %v17087_v28  ;;  %v18542_v27 = vld [vmem:[#allocation2 + $0xa0] sm:$0xff] }
 0x143   :  { %v17154_v28 = vld [vmem:[#allocation5 + $0x8c0] ss:$16 sps:$4 sm:$0xff]   ;;  %v17228_v15 = vld [vmem:[#allocation5 + $0xa44] ss:$16 sps:$4 sm:$0xff]  }
 0x145   :  { %7259 = vmatpush1.bf16.msra.mxu0 %v17082_v29  ;;  %8427 = vmatpush1.bf16.msra.mxu1 %v17085_v30  ;;  %v17157_v29 = vld [vmem:[#allocation5 + $0x8c8] ss:$16 sps:$4 sm:$0xff]   ;;  %v17162_v30 = vld [vmem:[#allocation5 + $0x8e4] ss:$16 sps:$4 sm:$0xff]  }
 0x146   :  { %7260 = vmatprep.subr.bf16.mxu0 %v17090_v31  ;;  %8428 = vmatprep.subr.bf16.mxu1 %v17093_v32  ;;  %v17165_v31 = vld [vmem:[#allocation5 + $0x8ec] ss:$16 sps:$4 sm:$0xff]   ;;  %v14171_v32 = vcombine.high %v18540_v25, %v18542_v27 }
 0x149   :  { %7261 = vmatpush1.bf16.msra.mxu0 %v17088_v33  ;;  %8429 = vmatpush1.bf16.msra.mxu1 %v17091_v34  ;;  %v17160_v33 = vld [vmem:[#allocation5 + $0x8e0] ss:$16 sps:$4 sm:$0xff]   ;;  %v17163_v34 = vld [vmem:[#allocation5 + $0x8e8] ss:$16 sps:$4 sm:$0xff]  }
 0x14a   :  { %7262 = vmatprep.subr.bf16.mxu0 %v17096_v35  ;;  %8430 = vmatprep.subr.bf16.mxu1 %v17099_v36  ;;  %v17168_v35 = vld [vmem:[#allocation5 + $0x904] ss:$16 sps:$4 sm:$0xff]   ;;  %v17171_v36 = vld [vmem:[#allocation5 + $0x90c] ss:$16 sps:$4 sm:$0xff]  }
 0x14d   :  { %7263 = vmatpush1.bf16.msra.mxu0 %v17094_v37  ;;  %8431 = vmatpush1.bf16.msra.mxu1 %v17097_v38  ;;  %v17166_v37 = vld [vmem:[#allocation5 + $0x900] ss:$16 sps:$4 sm:$0xff]   ;;  %v17169_v38 = vld [vmem:[#allocation5 + $0x908] ss:$16 sps:$4 sm:$0xff]  }
 0x14e   :  { %7264 = vmatprep.subr.bf16.mxu0 %v17102_v39  ;;  %8432 = vmatprep.subr.bf16.mxu1 %v17105_v40  ;;  %v17174_v39 = vld [vmem:[#allocation5 + $0x924] ss:$16 sps:$4 sm:$0xff]   ;;  %v17177_v40 = vld [vmem:[#allocation5 + $0x92c] ss:$16 sps:$4 sm:$0xff]  }
 0x151   :  { %7265 = vmatpush1.bf16.msra.mxu0 %v17100_v41  ;;  %8433 = vmatpush1.bf16.msra.mxu1 %v17103_v42  ;;  %v17172_v41 = vld [vmem:[#allocation5 + $0x920] ss:$16 sps:$4 sm:$0xff]   ;;  %v17175_v42 = vld [vmem:[#allocation5 + $0x928] ss:$16 sps:$4 sm:$0xff]  }
 0x152   :  { %7266 = vmatprep.subr.bf16.mxu0 %v17108_v43  ;;  %8434 = vmatprep.subr.bf16.mxu1 %v17111_v44  ;;  %v17180_v43 = vld [vmem:[#allocation5 + $0x944] ss:$16 sps:$4 sm:$0xff]   ;;  %v17183_v44 = vld [vmem:[#allocation5 + $0x94c] ss:$16 sps:$4 sm:$0xff]  }
 0x155   :  { %7267 = vmatpush1.bf16.msra.mxu0 %v17106_v45  ;;  %8435 = vmatpush1.bf16.msra.mxu1 %v17109_v46  ;;  %v17178_v45 = vld [vmem:[#allocation5 + $0x940] ss:$16 sps:$4 sm:$0xff]   ;;  %v17181_v46 = vld [vmem:[#allocation5 + $0x948] ss:$16 sps:$4 sm:$0xff]  }
 0x156   :  { %7268 = vmatprep.subr.bf16.mxu0 %v17114_v47  ;;  %8436 = vmatprep.subr.bf16.mxu1 %v17117_v48  ;;  %v17186_v47 = vld [vmem:[#allocation5 + $0x964] ss:$16 sps:$4 sm:$0xff]   ;;  %v17189_v48 = vld [vmem:[#allocation5 + $0x96c] ss:$16 sps:$4 sm:$0xff]  }
 0x159   :  { %7269 = vmatpush1.bf16.msra.mxu0 %v17112_v49  ;;  %8437 = vmatpush1.bf16.msra.mxu1 %v17115_v50  ;;  %v17184_v49 = vld [vmem:[#allocation5 + $0x960] ss:$16 sps:$4 sm:$0xff]   ;;  %v17187_v50 = vld [vmem:[#allocation5 + $0x968] ss:$16 sps:$4 sm:$0xff]  }
 0x15a   :  { %7311 = vmatprep.subr.bf16.mxu0 %v17120_v51  ;;  %8479 = vmatprep.subr.bf16.mxu1 %v17123_v52  ;;  %v17192_v51 = vld [vmem:[#allocation5 + $0x984] ss:$16 sps:$4 sm:$0xff]   ;;  %v17195_v52 = vld [vmem:[#allocation5 + $0x98c] ss:$16 sps:$4 sm:$0xff]  }
 0x15c   :  { %7271 = vmatmul.mubr.bf16.vlgmr.msra.gmra.mrb[0].mxu0 %v14168_v54  ;;  %8439 = vmatmul.mubr.bf16.vlgmr.msra.gmra.mrb[0].mxu1 %v14168_v54  ;;  %v17193_v54 = vld [vmem:[#allocation5 + $0x988] ss:$16 sps:$4 sm:$0xff]  }
 0x15d   :  { %7312 = vmatpush1.bf16.msra.mxu0 %v17118_v53  ;;  %8480 = vmatpush1.bf16.msra.mxu1 %v17121_v57  ;;  %v17190_v53 = vld [vmem:[#allocation5 + $0x980] ss:$16 sps:$4 sm:$0xff]  }
 0x15e   :  { %7313 = vmatprep.subr.bf16.mxu0 %v17126_v58  ;;  %8481 = vmatprep.subr.bf16.mxu1 %v17129_v59  ;;  %v17196_v57 = vld [vmem:[#allocation5 + $0x9a0] ss:$16 sps:$4 sm:$0xff]   ;;  %v17199_v58 = vld [vmem:[#allocation5 + $0x9a8] ss:$16 sps:$4 sm:$0xff]   ;;  %v17204_v59 = vld [vmem:[#allocation5 + $0x9c4] ss:$16 sps:$4 sm:$0xff]  }
 0x15f   :  { %7280 = vmatprep.mubr.bf16.mxu0 %v14201_v60  ;;  %8448 = vmatprep.mubr.bf16.mxu1 %v14201_v60  ;;  %v17207_v60 = vld [vmem:[#allocation5 + $0x9cc] ss:$16 sps:$4 sm:$0xff]  }
 0x161   :  { %7314 = vmatpush1.bf16.msra.mxu0 %v17124_v61  ;;  %8482 = vmatpush1.bf16.msra.mxu1 %v17127_v62  ;;  %v17202_v61 = vld [vmem:[#allocation5 + $0x9c0] ss:$16 sps:$4 sm:$0xff]   ;;  %v17205_v62 = vld [vmem:[#allocation5 + $0x9c8] ss:$16 sps:$4 sm:$0xff]  }
 0x162   :  { %7315 = vmatprep.subr.bf16.mxu0 %v17132_v63  ;;  %8483 = vmatprep.subr.bf16.mxu1 %v17135_v0  ;;  %v17210_v63 = vld [vmem:[#allocation5 + $0x9e4] ss:$16 sps:$4 sm:$0xff]   ;;  %v17213_v0 = vld [vmem:[#allocation5 + $0x9ec] ss:$16 sps:$4 sm:$0xff]  }
 0x164   :  { %7281 = vmatmul.mubr.bf16.gmra.mrb[4].mxu0 %v14200_v3  ;;  %8449 = vmatmul.mubr.bf16.gmra.mrb[4].mxu1 %v14200_v3  ;;  %v17216_v3 = vld [vmem:[#allocation5 + $0xa04] ss:$16 sps:$4 sm:$0xff]  }
 0x165   :  { %7316 = vmatpush1.bf16.msra.mxu0 %v17130_v1  ;;  %8484 = vmatpush1.bf16.msra.mxu1 %v17133_v2  ;;  %v17208_v1 = vld [vmem:[#allocation5 + $0x9e0] ss:$16 sps:$4 sm:$0xff]   ;;  %v17211_v2 = vld [vmem:[#allocation5 + $0x9e8] ss:$16 sps:$4 sm:$0xff]  }
 0x166   :  { %7317 = vmatprep.subr.bf16.mxu0 %v17138_v6  ;;  %8485 = vmatprep.subr.bf16.mxu1 %v17141_v7  ;;  %v137_v6 = vld [vmem:[#allocation2 + $0x1a0] sm:$0xff]  ;;  %v14170_v7 = vcombine.low %v18540_v25, %v18542_v27  ;;  %v17235_v25 = vld [vmem:[#allocation5 + $0xa68] ss:$16 sps:$4 sm:$0xff]  }
 0x167   :  { %7290 = vmatprep.mubr.bf16.mxu0 %v14233_v8  ;;  %8458 = vmatprep.mubr.bf16.mxu1 %v14233_v8  ;;  %v17214_v8 = vld [vmem:[#allocation5 + $0xa00] ss:$16 sps:$4 sm:$0xff]   ;;  %v17240_v27 = vld [vmem:[#allocation5 + $0xa84] ss:$16 sps:$4 sm:$0xff]  }
 0x169   :  { %7318 = vmatpush1.bf16.msra.mxu0 %v17136_v9  ;;  %8486 = vmatpush1.bf16.msra.mxu1 %v17139_v10  ;;  %v17217_v9 = vld [vmem:[#allocation5 + $0xa08] ss:$16 sps:$4 sm:$0xff]   ;;  %v17222_v10 = vld [vmem:[#allocation5 + $0xa24] ss:$16 sps:$4 sm:$0xff]  }
 0x16a   :  { %7319 = vmatprep.subr.bf16.mxu0 %v17144_v11  ;;  %8487 = vmatprep.subr.bf16.mxu1 %v17147_v12  ;;  %v17225_v11 = vld [vmem:[#allocation5 + $0xa2c] ss:$16 sps:$4 sm:$0xff]   ;;  %v17220_v12 = vld [vmem:[#allocation5 + $0xa20] ss:$16 sps:$4 sm:$0xff]  }
 0x16c   :  { %7291 = vmatmul.mubr.bf16.gmra.mrb[8].mxu0 %v14232_v14  ;;  %8459 = vmatmul.mubr.bf16.gmra.mrb[8].mxu1 %v14232_v14  ;;  %v14203_v14 = vcombine.high %v121_v5, %v137_v6 }
 0x16d   :  { %7320 = vmatpush1.bf16.msra.mxu0 %v17142_v16  ;;  %8488 = vmatpush1.bf16.msra.mxu1 %v17145_v17  ;;  %v17231_v16 = vld [vmem:[#allocation5 + $0xa4c] ss:$16 sps:$4 sm:$0xff]   ;;  %v153_v17 = vld [vmem:[#allocation2 + $0x220] sm:$0xff] }
 0x16e   :  { %7321 = vmatprep.subr.bf16.mxu0 %v17150_v18  ;;  %8489 = vmatprep.subr.bf16.mxu1 %v17153_v19  ;;  %v169_v18 = vld [vmem:[#allocation2 + $0x2a0] sm:$0xff]  ;;  %v14202_v19 = vcombine.low %v121_v5, %v137_v6  ;;  %v17289_v6 = vld [vmem:[#allocation5 + $0xb88] ss:$16 sps:$4 sm:$0xff]  }
 0x16f   :  { %7300 = vmatprep.mubr.bf16.mxu0 %v14265_v20  ;;  %8468 = vmatprep.mubr.bf16.mxu1 %v14265_v20  ;;  %v17226_v20 = vld [vmem:[#allocation5 + $0xa40] ss:$16 sps:$4 sm:$0xff]  }
 0x170   :  { %v17286_v5 = vld [vmem:[#allocation5 + $0xb80] ss:$16 sps:$4 sm:$0xff]  }
 0x171   :  { %7322 = vmatpush1.bf16.msra.mxu0 %v17148_v21  ;;  %8490 = vmatpush1.bf16.msra.mxu1 %v17151_v22  ;;  %v17229_v21 = vld [vmem:[#allocation5 + $0xa48] ss:$16 sps:$4 sm:$0xff]   ;;  %v17234_v22 = vld [vmem:[#allocation5 + $0xa64] ss:$16 sps:$4 sm:$0xff]  }
 0x172   :  { %7323 = vmatprep.subr.bf16.mxu0 %v17156_v23  ;;  %8491 = vmatprep.subr.bf16.mxu1 %v17159_v24  ;;  %v17237_v23 = vld [vmem:[#allocation5 + $0xa6c] ss:$16 sps:$4 sm:$0xff]   ;;  %v17232_v24 = vld [vmem:[#allocation5 + $0xa60] ss:$16 sps:$4 sm:$0xff]  }
 0x174   :  { %7301 = vmatmul.mubr.bf16.gmra.mrb[12].mxu0 %v14264_v26  ;;  %8469 = vmatmul.mubr.bf16.gmra.mrb[12].mxu1 %v14264_v26  ;;  %v14235_v26 = vcombine.high %v153_v17, %v169_v18 }
 0x175   :  { %7324 = vmatpush1.bf16.msra.mxu0 %v17154_v28  ;;  %8492 = vmatpush1.bf16.msra.mxu1 %v17157_v29  ;;  %v17243_v28 = vld [vmem:[#allocation5 + $0xa8c] ss:$16 sps:$4 sm:$0xff]   ;;  %v185_v29 = vld [vmem:[#allocation2 + $0x320] sm:$0xff] }
 0x176   :  { %7325 = vmatprep.subr.bf16.mxu0 %v17162_v30  ;;  %8493 = vmatprep.subr.bf16.mxu1 %v17165_v31  ;;  %v201_v30 = vld [vmem:[#allocation2 + $0x3a0] sm:$0xff]  ;;  %v14234_v31 = vcombine.low %v153_v17, %v169_v18  ;;  %v17307_v18 = vld [vmem:[#allocation5 + $0xbe8] ss:$16 sps:$4 sm:$0xff]  }
 0x177   :  { %7343 = vmatprep.mubr.bf16.mxu0 %v14171_v32  ;;  %8511 = vmatprep.mubr.bf16.mxu1 %v14171_v32  ;;  %v17238_v32 = vld [vmem:[#allocation5 + $0xa80] ss:$16 sps:$4 sm:$0xff]  }
 0x178   :  { %v17304_v17 = vld [vmem:[#allocation5 + $0xbe0] ss:$16 sps:$4 sm:$0xff]  }
 0x179   :  { %7326 = vmatpush1.bf16.msra.mxu0 %v17160_v33  ;;  %8494 = vmatpush1.bf16.msra.mxu1 %v17163_v34  ;;  %v17241_v33 = vld [vmem:[#allocation5 + $0xa88] ss:$16 sps:$4 sm:$0xff]   ;;  %v17246_v34 = vld [vmem:[#allocation5 + $0xaa4] ss:$16 sps:$4 sm:$0xff]  }
 0x17a   :  { %7327 = vmatprep.subr.bf16.mxu0 %v17168_v35  ;;  %8495 = vmatprep.subr.bf16.mxu1 %v17171_v36  ;;  %v17249_v35 = vld [vmem:[#allocation5 + $0xaac] ss:$16 sps:$4 sm:$0xff]   ;;  %v17244_v36 = vld [vmem:[#allocation5 + $0xaa0] ss:$16 sps:$4 sm:$0xff]  }
 0x17d   :  { %7328 = vmatpush1.bf16.msra.mxu0 %v17166_v37  ;;  %8496 = vmatpush1.bf16.msra.mxu1 %v17169_v38  ;;  %v17247_v37 = vld [vmem:[#allocation5 + $0xaa8] ss:$16 sps:$4 sm:$0xff]   ;;  %v14267_v38 = vcombine.high %v185_v29, %v201_v30 }
 0x17e   :  { %7329 = vmatprep.subr.bf16.mxu0 %v17174_v39  ;;  %8497 = vmatprep.subr.bf16.mxu1 %v17177_v40  ;;  %v17252_v39 = vld [vmem:[#allocation5 + $0xac4] ss:$16 sps:$4 sm:$0xff]   ;;  %v17255_v40 = vld [vmem:[#allocation5 + $0xacc] ss:$16 sps:$4 sm:$0xff]  }
 0x181   :  { %7330 = vmatpush1.bf16.msra.mxu0 %v17172_v41  ;;  %8498 = vmatpush1.bf16.msra.mxu1 %v17175_v42  ;;  %v18548_v41 = vld [vmem:[#allocation2 + $0x28] sm:$0xff] }
 0x182   :  { %7331 = vmatprep.subr.bf16.mxu0 %v17180_v43  ;;  %8499 = vmatprep.subr.bf16.mxu1 %v17183_v44  ;;  %v18550_v42 = vld [vmem:[#allocation2 + $0xa8] sm:$0xff]  ;;  %v14266_v43 = vcombine.low %v185_v29, %v201_v30  ;;  %v17250_v44 = vld [vmem:[#allocation5 + $0xac0] ss:$16 sps:$4 sm:$0xff]  }
 0x183   :  { %v17319_v29 = vld [vmem:[#allocation5 + $0xc28] ss:$16 sps:$4 sm:$0xff]  }
 0x185   :  { %7332 = vmatpush1.bf16.msra.mxu0 %v17178_v45  ;;  %8500 = vmatpush1.bf16.msra.mxu1 %v17181_v46  ;;  %v17253_v45 = vld [vmem:[#allocation5 + $0xac8] ss:$16 sps:$4 sm:$0xff]   ;;  %v17258_v46 = vld [vmem:[#allocation5 + $0xae4] ss:$16 sps:$4 sm:$0xff]  }
 0x186   :  { %7333 = vmatprep.subr.bf16.mxu0 %v17186_v47  ;;  %8501 = vmatprep.subr.bf16.mxu1 %v17189_v48  ;;  %v17261_v47 = vld [vmem:[#allocation5 + $0xaec] ss:$16 sps:$4 sm:$0xff]   ;;  %v14173_v48 = vcombine.high %v18548_v41, %v18550_v42 }
 0x189   :  { %7334 = vmatpush1.bf16.msra.mxu0 %v17184_v49  ;;  %8502 = vmatpush1.bf16.msra.mxu1 %v17187_v50  ;;  %v17256_v49 = vld [vmem:[#allocation5 + $0xae0] ss:$16 sps:$4 sm:$0xff]   ;;  %v17259_v50 = vld [vmem:[#allocation5 + $0xae8] ss:$16 sps:$4 sm:$0xff]  }
 0x18a   :  { %7335 = vmatprep.subr.bf16.mxu0 %v17192_v51  ;;  %8503 = vmatprep.subr.bf16.mxu1 %v17195_v52  ;;  %v17264_v51 = vld [vmem:[#allocation5 + $0xb04] ss:$16 sps:$4 sm:$0xff]   ;;  %v17267_v52 = vld [vmem:[#allocation5 + $0xb0c] ss:$16 sps:$4 sm:$0xff]  }
 0x18d   :  { %7336 = vmatpush1.bf16.msra.mxu0 %v17190_v53  ;;  %8504 = vmatpush1.bf16.msra.mxu1 %v17193_v54  ;;  %v17262_v53 = vld [vmem:[#allocation5 + $0xb00] ss:$16 sps:$4 sm:$0xff]   ;;  %v17265_v54 = vld [vmem:[#allocation5 + $0xb08] ss:$16 sps:$4 sm:$0xff]  }
 0x18e   :  { %7337 = vmatprep.subr.bf16.mxu0 %v17198_v55  ;;  %8505 = vmatprep.subr.bf16.mxu1 %v17201_v56  ;;  %v17270_v55 = vld [vmem:[#allocation5 + $0xb24] ss:$16 sps:$4 sm:$0xff]   ;;  %v17273_v56 = vld [vmem:[#allocation5 + $0xb2c] ss:$16 sps:$4 sm:$0xff]  }
 0x191   :  { %7338 = vmatpush1.bf16.msra.mxu0 %v17196_v57  ;;  %8506 = vmatpush1.bf16.msra.mxu1 %v17199_v58  ;;  %v17268_v57 = vld [vmem:[#allocation5 + $0xb20] ss:$16 sps:$4 sm:$0xff]   ;;  %v17271_v58 = vld [vmem:[#allocation5 + $0xb28] ss:$16 sps:$4 sm:$0xff]  }
 0x192   :  { %7339 = vmatprep.subr.bf16.mxu0 %v17204_v59  ;;  %8507 = vmatprep.subr.bf16.mxu1 %v17207_v60  ;;  %v17276_v59 = vld [vmem:[#allocation5 + $0xb44] ss:$16 sps:$4 sm:$0xff]   ;;  %v17279_v60 = vld [vmem:[#allocation5 + $0xb4c] ss:$16 sps:$4 sm:$0xff]  }
 0x195   :  { %7340 = vmatpush1.bf16.msra.mxu0 %v17202_v61  ;;  %8508 = vmatpush1.bf16.msra.mxu1 %v17205_v62  ;;  %v17274_v61 = vld [vmem:[#allocation5 + $0xb40] ss:$16 sps:$4 sm:$0xff]   ;;  %v17277_v62 = vld [vmem:[#allocation5 + $0xb48] ss:$16 sps:$4 sm:$0xff]  }
 0x196   :  { %7341 = vmatprep.subr.bf16.mxu0 %v17210_v63  ;;  %8509 = vmatprep.subr.bf16.mxu1 %v17213_v0  ;;  %v17282_v63 = vld [vmem:[#allocation5 + $0xb64] ss:$16 sps:$4 sm:$0xff]   ;;  %v17285_v0 = vld [vmem:[#allocation5 + $0xb6c] ss:$16 sps:$4 sm:$0xff]  }
 0x199   :  { %7342 = vmatpush1.bf16.msra.mxu0 %v17208_v1  ;;  %8510 = vmatpush1.bf16.msra.mxu1 %v17211_v2  ;;  %v17280_v1 = vld [vmem:[#allocation5 + $0xb60] ss:$16 sps:$4 sm:$0xff]   ;;  %v17283_v2 = vld [vmem:[#allocation5 + $0xb68] ss:$16 sps:$4 sm:$0xff]  }
 0x19a   :  { %7384 = vmatprep.subr.bf16.mxu0 %v17216_v3  ;;  %8552 = vmatprep.subr.bf16.mxu1 %v17219_v4  ;;  %v17288_v3 = vld [vmem:[#allocation5 + $0xb84] ss:$16 sps:$4 sm:$0xff]   ;;  %v17291_v4 = vld [vmem:[#allocation5 + $0xb8c] ss:$16 sps:$4 sm:$0xff]  }
 0x19c   :  { %7344 = vmatmul.mubr.bf16.vlgmr.msra.gmra.mrb[0].mxu0 %v14170_v7  ;;  %8512 = vmatmul.mubr.bf16.vlgmr.msra.gmra.mrb[0].mxu1 %v14170_v7  ;;  %v17294_v7 = vld [vmem:[#allocation5 + $0xba4] ss:$16 sps:$4 sm:$0xff]  }
 0x19d   :  { %7385 = vmatpush1.bf16.msra.mxu0 %v17214_v8  ;;  %8553 = vmatpush1.bf16.msra.mxu1 %v17217_v9  ;;  %v17297_v8 = vld [vmem:[#allocation5 + $0xbac] ss:$16 sps:$4 sm:$0xff]   ;;  %v17292_v9 = vld [vmem:[#allocation5 + $0xba0] ss:$16 sps:$4 sm:$0xff]  }
 0x19e   :  { %7386 = vmatprep.subr.bf16.mxu0 %v17222_v10  ;;  %8554 = vmatprep.subr.bf16.mxu1 %v17225_v11  ;;  %v17295_v10 = vld [vmem:[#allocation5 + $0xba8] ss:$16 sps:$4 sm:$0xff]   ;;  %v17300_v11 = vld [vmem:[#allocation5 + $0xbc4] ss:$16 sps:$4 sm:$0xff]  }
 0x19f   :  { %7353 = vmatprep.mubr.bf16.mxu0 %v14203_v14  ;;  %8521 = vmatprep.mubr.bf16.mxu1 %v14203_v14  ;;  %v17301_v14 = vld [vmem:[#allocation5 + $0xbc8] ss:$16 sps:$4 sm:$0xff]  }
 0x1a1   :  { %7387 = vmatpush1.bf16.msra.mxu0 %v17220_v12  ;;  %8555 = vmatpush1.bf16.msra.mxu1 %v17223_v13  ;;  %v17303_v12 = vld [vmem:[#allocation5 + $0xbcc] ss:$16 sps:$4 sm:$0xff]   ;;  %v17298_v13 = vld [vmem:[#allocation5 + $0xbc0] ss:$16 sps:$4 sm:$0xff]  }
 0x1a2   :  { %7388 = vmatprep.subr.bf16.mxu0 %v17228_v15  ;;  %8556 = vmatprep.subr.bf16.mxu1 %v17231_v16  ;;  %v17306_v15 = vld [vmem:[#allocation5 + $0xbe4] ss:$16 sps:$4 sm:$0xff]   ;;  %v17309_v16 = vld [vmem:[#allocation5 + $0xbec] ss:$16 sps:$4 sm:$0xff]  }
 0x1a4   :  { %7354 = vmatmul.mubr.bf16.gmra.mrb[4].mxu0 %v14202_v19  ;;  %8522 = vmatmul.mubr.bf16.gmra.mrb[4].mxu1 %v14202_v19  ;;  %v17312_v19 = vld [vmem:[#allocation5 + $0xc04] ss:$16 sps:$4 sm:$0xff]  }
 0x1a5   :  { %7389 = vmatpush1.bf16.msra.mxu0 %v17226_v20  ;;  %8557 = vmatpush1.bf16.msra.mxu1 %v17229_v21  ;;  %v17315_v20 = vld [vmem:[#allocation5 + $0xc0c] ss:$16 sps:$4 sm:$0xff]  }
 0x1a6   :  { %7390 = vmatprep.subr.bf16.mxu0 %v17234_v22  ;;  %8558 = vmatprep.subr.bf16.mxu1 %v17237_v23  ;;  %v122_v21 = vld [vmem:[#allocation2 + $0x128] sm:$0xff]  ;;  %v14172_v23 = vcombine.low %v18548_v41, %v18550_v42 }
 0x1a7   :  { %7363 = vmatprep.mubr.bf16.mxu0 %v14235_v26  ;;  %8531 = vmatprep.mubr.bf16.mxu1 %v14235_v26  ;;  %v138_v22 = vld [vmem:[#allocation2 + $0x1a8] sm:$0xff]  ;;  %v17318_v26 = vld [vmem:[#allocation5 + $0xc24] ss:$16 sps:$4 sm:$0xff]  }
 0x1a8   :  { %v14205_v30 = vcombine.high %v122_v21, %v138_v22  ;;  %v17331_v41 = vld [vmem:[#allocation5 + $0xc68] ss:$16 sps:$4 sm:$0xff]  }
 0x1a9   :  { %7391 = vmatpush1.bf16.msra.mxu0 %v17232_v24  ;;  %8559 = vmatpush1.bf16.msra.mxu1 %v17235_v25  ;;  %v17310_v24 = vld [vmem:[#allocation5 + $0xc00] ss:$16 sps:$4 sm:$0xff]   ;;  %v17313_v25 = vld [vmem:[#allocation5 + $0xc08] ss:$16 sps:$4 sm:$0xff]  }
 0x1aa   :  { %7392 = vmatprep.subr.bf16.mxu0 %v17240_v27  ;;  %8560 = vmatprep.subr.bf16.mxu1 %v17243_v28  ;;  %v17321_v27 = vld [vmem:[#allocation5 + $0xc2c] ss:$16 sps:$4 sm:$0xff]   ;;  %v17316_v28 = vld [vmem:[#allocation5 + $0xc20] ss:$16 sps:$4 sm:$0xff]  }
 0x1ac   :  { %7364 = vmatmul.mubr.bf16.gmra.mrb[8].mxu0 %v14234_v31  ;;  %8532 = vmatmul.mubr.bf16.gmra.mrb[8].mxu1 %v14234_v31  ;;  %v17324_v31 = vld [vmem:[#allocation5 + $0xc44] ss:$16 sps:$4 sm:$0xff]  }
 0x1ad   :  { %7393 = vmatpush1.bf16.msra.mxu0 %v17238_v32  ;;  %8561 = vmatpush1.bf16.msra.mxu1 %v17241_v33  ;;  %v17327_v32 = vld [vmem:[#allocation5 + $0xc4c] ss:$16 sps:$4 sm:$0xff]  }
 0x1ae   :  { %7394 = vmatprep.subr.bf16.mxu0 %v17246_v34  ;;  %8562 = vmatprep.subr.bf16.mxu1 %v17249_v35  ;;  %v154_v33 = vld [vmem:[#allocation2 + $0x228] sm:$0xff]  ;;  %v14204_v35 = vcombine.low %v122_v21, %v138_v22  ;;  %v17382_v21 = vld [vmem:[#allocation5 + $0xd80] ss:$16 sps:$4 sm:$0xff]  }
 0x1af   :  { %7373 = vmatprep.mubr.bf16.mxu0 %v14267_v38  ;;  %8541 = vmatprep.mubr.bf16.mxu1 %v14267_v38  ;;  %v170_v34 = vld [vmem:[#allocation2 + $0x2a8] sm:$0xff]  ;;  %v17330_v38 = vld [vmem:[#allocation5 + $0xc64] ss:$16 sps:$4 sm:$0xff]  }
 0x1b0   :  { %v14237_v42 = vcombine.high %v154_v33, %v170_v34  ;;  %v17385_v22 = vld [vmem:[#allocation5 + $0xd88] ss:$16 sps:$4 sm:$0xff]  }
 0x1b1   :  { %7395 = vmatpush1.bf16.msra.mxu0 %v17244_v36  ;;  %8563 = vmatpush1.bf16.msra.mxu1 %v17247_v37  ;;  %v17322_v36 = vld [vmem:[#allocation5 + $0xc40] ss:$16 sps:$4 sm:$0xff]   ;;  %v17325_v37 = vld [vmem:[#allocation5 + $0xc48] ss:$16 sps:$4 sm:$0xff]  }
 0x1b2   :  { %7396 = vmatprep.subr.bf16.mxu0 %v17252_v39  ;;  %8564 = vmatprep.subr.bf16.mxu1 %v17255_v40  ;;  %v17333_v39 = vld [vmem:[#allocation5 + $0xc6c] ss:$16 sps:$4 sm:$0xff]   ;;  %v17328_v40 = vld [vmem:[#allocation5 + $0xc60] ss:$16 sps:$4 sm:$0xff]  }
 0x1b4   :  { %7374 = vmatmul.mubr.bf16.gmra.mrb[12].mxu0 %v14266_v43  ;;  %8542 = vmatmul.mubr.bf16.gmra.mrb[12].mxu1 %v14266_v43  ;;  %v17336_v43 = vld [vmem:[#allocation5 + $0xc84] ss:$16 sps:$4 sm:$0xff]  }
 0x1b5   :  { %7397 = vmatpush1.bf16.msra.mxu0 %v17250_v44  ;;  %8565 = vmatpush1.bf16.msra.mxu1 %v17253_v45  ;;  %v17339_v44 = vld [vmem:[#allocation5 + $0xc8c] ss:$16 sps:$4 sm:$0xff]  }
 0x1b6   :  { %7398 = vmatprep.subr.bf16.mxu0 %v17258_v46  ;;  %8566 = vmatprep.subr.bf16.mxu1 %v17261_v47  ;;  %v186_v45 = vld [vmem:[#allocation2 + $0x328] sm:$0xff]  ;;  %v14236_v47 = vcombine.low %v154_v33, %v170_v34  ;;  %v17400_v33 = vld [vmem:[#allocation5 + $0xde0] ss:$16 sps:$4 sm:$0xff]  }
 0x1b7   :  { %7416 = vmatprep.mubr.bf16.mxu0 %v14173_v48  ;;  %8584 = vmatprep.mubr.bf16.mxu1 %v14173_v48  ;;  %v202_v46 = vld [vmem:[#allocation2 + $0x3a8] sm:$0xff]  ;;  %v17334_v48 = vld [vmem:[#allocation5 + $0xc80] ss:$16 sps:$4 sm:$0xff]  }
 0x1b8   :  { %v17403_v34 = vld [vmem:[#allocation5 + $0xde8] ss:$16 sps:$4 sm:$0xff]  }
 0x1b9   :  { %7399 = vmatpush1.bf16.msra.mxu0 %v17256_v49  ;;  %8567 = vmatpush1.bf16.msra.mxu1 %v17259_v50  ;;  %v17337_v49 = vld [vmem:[#allocation5 + $0xc88] ss:$16 sps:$4 sm:$0xff]   ;;  %v17342_v50 = vld [vmem:[#allocation5 + $0xca4] ss:$16 sps:$4 sm:$0xff]  }
 0x1ba   :  { %7400 = vmatprep.subr.bf16.mxu0 %v17264_v51  ;;  %8568 = vmatprep.subr.bf16.mxu1 %v17267_v52  ;;  %v17345_v51 = vld [vmem:[#allocation5 + $0xcac] ss:$16 sps:$4 sm:$0xff]   ;;  %v17340_v52 = vld [vmem:[#allocation5 + $0xca0] ss:$16 sps:$4 sm:$0xff]  }
 0x1bd   :  { %7401 = vmatpush1.bf16.msra.mxu0 %v17262_v53  ;;  %8569 = vmatpush1.bf16.msra.mxu1 %v17265_v54  ;;  %v17343_v53 = vld [vmem:[#allocation5 + $0xca8] ss:$16 sps:$4 sm:$0xff]   ;;  %v14269_v54 = vcombine.high %v186_v45, %v202_v46 }
 0x1be   :  { %7402 = vmatprep.subr.bf16.mxu0 %v17270_v55  ;;  %8570 = vmatprep.subr.bf16.mxu1 %v17273_v56  ;;  %v17348_v55 = vld [vmem:[#allocation5 + $0xcc4] ss:$16 sps:$4 sm:$0xff]   ;;  %v17351_v56 = vld [vmem:[#allocation5 + $0xccc] ss:$16 sps:$4 sm:$0xff]  }
 0x1c1   :  { %7403 = vmatpush1.bf16.msra.mxu0 %v17268_v57  ;;  %8571 = vmatpush1.bf16.msra.mxu1 %v17271_v58  ;;  %v18556_v57 = vld [vmem:[#allocation2 + $0x30] sm:$0xff] }
 0x1c2   :  { %7404 = vmatprep.subr.bf16.mxu0 %v17276_v59  ;;  %8572 = vmatprep.subr.bf16.mxu1 %v17279_v60  ;;  %v18558_v58 = vld [vmem:[#allocation2 + $0xb0] sm:$0xff]  ;;  %v14268_v59 = vcombine.low %v186_v45, %v202_v46  ;;  %v17415_v45 = vld [vmem:[#allocation5 + $0xe28] ss:$16 sps:$4 sm:$0xff]  }
 0x1c3   :  { %v17346_v60 = vld [vmem:[#allocation5 + $0xcc0] ss:$16 sps:$4 sm:$0xff]  }
 0x1c5   :  { %7405 = vmatpush1.bf16.msra.mxu0 %v17274_v61  ;;  %8573 = vmatpush1.bf16.msra.mxu1 %v17277_v62  ;;  %v17349_v61 = vld [vmem:[#allocation5 + $0xcc8] ss:$16 sps:$4 sm:$0xff]   ;;  %v17354_v62 = vld [vmem:[#allocation5 + $0xce4] ss:$16 sps:$4 sm:$0xff]  }
 0x1c6   :  { %7406 = vmatprep.subr.bf16.mxu0 %v17282_v63  ;;  %8574 = vmatprep.subr.bf16.mxu1 %v17285_v0  ;;  %v17357_v63 = vld [vmem:[#allocation5 + $0xcec] ss:$16 sps:$4 sm:$0xff]   ;;  %v14175_v0 = vcombine.high %v18556_v57, %v18558_v58 }
 0x1c9   :  { %7407 = vmatpush1.bf16.msra.mxu0 %v17280_v1  ;;  %8575 = vmatpush1.bf16.msra.mxu1 %v17283_v2  ;;  %v17352_v1 = vld [vmem:[#allocation5 + $0xce0] ss:$16 sps:$4 sm:$0xff]   ;;  %v17355_v2 = vld [vmem:[#allocation5 + $0xce8] ss:$16 sps:$4 sm:$0xff]  }
 0x1ca   :  { %7408 = vmatprep.subr.bf16.mxu0 %v17288_v3  ;;  %8576 = vmatprep.subr.bf16.mxu1 %v17291_v4  ;;  %v17360_v3 = vld [vmem:[#allocation5 + $0xd04] ss:$16 sps:$4 sm:$0xff]   ;;  %v17363_v4 = vld [vmem:[#allocation5 + $0xd0c] ss:$16 sps:$4 sm:$0xff]  }
 0x1cd   :  { %7409 = vmatpush1.bf16.msra.mxu0 %v17286_v5  ;;  %8577 = vmatpush1.bf16.msra.mxu1 %v17289_v6  ;;  %v17358_v5 = vld [vmem:[#allocation5 + $0xd00] ss:$16 sps:$4 sm:$0xff]   ;;  %v17361_v6 = vld [vmem:[#allocation5 + $0xd08] ss:$16 sps:$4 sm:$0xff]  }
 0x1ce   :  { %7410 = vmatprep.subr.bf16.mxu0 %v17294_v7  ;;  %8578 = vmatprep.subr.bf16.mxu1 %v17297_v8  ;;  %v17366_v7 = vld [vmem:[#allocation5 + $0xd24] ss:$16 sps:$4 sm:$0xff]   ;;  %v17369_v8 = vld [vmem:[#allocation5 + $0xd2c] ss:$16 sps:$4 sm:$0xff]  }
 0x1d1   :  { %7411 = vmatpush1.bf16.msra.mxu0 %v17292_v9  ;;  %8579 = vmatpush1.bf16.msra.mxu1 %v17295_v10  ;;  %v17364_v9 = vld [vmem:[#allocation5 + $0xd20] ss:$16 sps:$4 sm:$0xff]   ;;  %v17367_v10 = vld [vmem:[#allocation5 + $0xd28] ss:$16 sps:$4 sm:$0xff]  }
 0x1d2   :  { %7412 = vmatprep.subr.bf16.mxu0 %v17300_v11  ;;  %8580 = vmatprep.subr.bf16.mxu1 %v17303_v12  ;;  %v17372_v11 = vld [vmem:[#allocation5 + $0xd44] ss:$16 sps:$4 sm:$0xff]   ;;  %v17375_v12 = vld [vmem:[#allocation5 + $0xd4c] ss:$16 sps:$4 sm:$0xff]  }
 0x1d5   :  { %7413 = vmatpush1.bf16.msra.mxu0 %v17298_v13  ;;  %8581 = vmatpush1.bf16.msra.mxu1 %v17301_v14  ;;  %v17370_v13 = vld [vmem:[#allocation5 + $0xd40] ss:$16 sps:$4 sm:$0xff]   ;;  %v17373_v14 = vld [vmem:[#allocation5 + $0xd48] ss:$16 sps:$4 sm:$0xff]  }
 0x1d6   :  { %7414 = vmatprep.subr.bf16.mxu0 %v17306_v15  ;;  %8582 = vmatprep.subr.bf16.mxu1 %v17309_v16  ;;  %v17378_v15 = vld [vmem:[#allocation5 + $0xd64] ss:$16 sps:$4 sm:$0xff]   ;;  %v17381_v16 = vld [vmem:[#allocation5 + $0xd6c] ss:$16 sps:$4 sm:$0xff]  }
 0x1d9   :  { %7415 = vmatpush1.bf16.msra.mxu0 %v17304_v17  ;;  %8583 = vmatpush1.bf16.msra.mxu1 %v17307_v18  ;;  %v17376_v17 = vld [vmem:[#allocation5 + $0xd60] ss:$16 sps:$4 sm:$0xff]   ;;  %v17379_v18 = vld [vmem:[#allocation5 + $0xd68] ss:$16 sps:$4 sm:$0xff]  }
 0x1da   :  { %7457 = vmatprep.subr.bf16.mxu0 %v17312_v19  ;;  %8625 = vmatprep.subr.bf16.mxu1 %v17315_v20  ;;  %v17384_v19 = vld [vmem:[#allocation5 + $0xd84] ss:$16 sps:$4 sm:$0xff]   ;;  %v17387_v20 = vld [vmem:[#allocation5 + $0xd8c] ss:$16 sps:$4 sm:$0xff]  }
 0x1dc   :  { %7417 = vmatmul.mubr.bf16.vlgmr.msra.gmra.mrb[0].mxu0 %v14172_v23  ;;  %8585 = vmatmul.mubr.bf16.vlgmr.msra.gmra.mrb[0].mxu1 %v14172_v23  ;;  %v17390_v23 = vld [vmem:[#allocation5 + $0xda4] ss:$16 sps:$4 sm:$0xff]  }
 0x1dd   :  { %7458 = vmatpush1.bf16.msra.mxu0 %v17310_v24  ;;  %8626 = vmatpush1.bf16.msra.mxu1 %v17313_v25  ;;  %v17393_v24 = vld [vmem:[#allocation5 + $0xdac] ss:$16 sps:$4 sm:$0xff]   ;;  %v17388_v25 = vld [vmem:[#allocation5 + $0xda0] ss:$16 sps:$4 sm:$0xff]  }
 0x1de   :  { %7459 = vmatprep.subr.bf16.mxu0 %v17318_v26  ;;  %8627 = vmatprep.subr.bf16.mxu1 %v17321_v27  ;;  %v17391_v26 = vld [vmem:[#allocation5 + $0xda8] ss:$16 sps:$4 sm:$0xff]   ;;  %v17396_v27 = vld [vmem:[#allocation5 + $0xdc4] ss:$16 sps:$4 sm:$0xff]  }
 0x1df   :  { %7426 = vmatprep.mubr.bf16.mxu0 %v14205_v30  ;;  %8594 = vmatprep.mubr.bf16.mxu1 %v14205_v30  ;;  %v17397_v30 = vld [vmem:[#allocation5 + $0xdc8] ss:$16 sps:$4 sm:$0xff]  }
 0x1e1   :  { %7460 = vmatpush1.bf16.msra.mxu0 %v17316_v28  ;;  %8628 = vmatpush1.bf16.msra.mxu1 %v17319_v29  ;;  %v17399_v28 = vld [vmem:[#allocation5 + $0xdcc] ss:$16 sps:$4 sm:$0xff]   ;;  %v17394_v29 = vld [vmem:[#allocation5 + $0xdc0] ss:$16 sps:$4 sm:$0xff]  }
 0x1e2   :  { %7461 = vmatprep.subr.bf16.mxu0 %v17324_v31  ;;  %8629 = vmatprep.subr.bf16.mxu1 %v17327_v32  ;;  %v17402_v31 = vld [vmem:[#allocation5 + $0xde4] ss:$16 sps:$4 sm:$0xff]   ;;  %v17405_v32 = vld [vmem:[#allocation5 + $0xdec] ss:$16 sps:$4 sm:$0xff]  }
 0x1e4   :  { %7427 = vmatmul.mubr.bf16.gmra.mrb[4].mxu0 %v14204_v35  ;;  %8595 = vmatmul.mubr.bf16.gmra.mrb[4].mxu1 %v14204_v35  ;;  %v17408_v35 = vld [vmem:[#allocation5 + $0xe04] ss:$16 sps:$4 sm:$0xff]  }
 0x1e5   :  { %7462 = vmatpush1.bf16.msra.mxu0 %v17322_v36  ;;  %8630 = vmatpush1.bf16.msra.mxu1 %v17325_v37  ;;  %v17411_v36 = vld [vmem:[#allocation5 + $0xe0c] ss:$16 sps:$4 sm:$0xff]   ;;  %v123_v37 = vld [vmem:[#allocation2 + $0x130] sm:$0xff] }
 0x1e6   :  { %7463 = vmatprep.subr.bf16.mxu0 %v17330_v38  ;;  %8631 = vmatprep.subr.bf16.mxu1 %v17333_v39  ;;  %v139_v38 = vld [vmem:[#allocation2 + $0x1b0] sm:$0xff]  ;;  %v14174_v39 = vcombine.low %v18556_v57, %v18558_v58  ;;  %v17427_v57 = vld [vmem:[#allocation5 + $0xe68] ss:$16 sps:$4 sm:$0xff]  }
 0x1e7   :  { %7436 = vmatprep.mubr.bf16.mxu0 %v14237_v42  ;;  %8604 = vmatprep.mubr.bf16.mxu1 %v14237_v42  ;;  %v17414_v42 = vld [vmem:[#allocation5 + $0xe24] ss:$16 sps:$4 sm:$0xff]   ;;  %v14207_v46 = vcombine.high %v123_v37, %v139_v38 }
 0x1e9   :  { %7464 = vmatpush1.bf16.msra.mxu0 %v17328_v40  ;;  %8632 = vmatpush1.bf16.msra.mxu1 %v17331_v41  ;;  %v17406_v40 = vld [vmem:[#allocation5 + $0xe00] ss:$16 sps:$4 sm:$0xff]   ;;  %v17409_v41 = vld [vmem:[#allocation5 + $0xe08] ss:$16 sps:$4 sm:$0xff]  }
 0x1ea   :  { %7465 = vmatprep.subr.bf16.mxu0 %v17336_v43  ;;  %8633 = vmatprep.subr.bf16.mxu1 %v17339_v44  ;;  %v17417_v43 = vld [vmem:[#allocation5 + $0xe2c] ss:$16 sps:$4 sm:$0xff]   ;;  %v17412_v44 = vld [vmem:[#allocation5 + $0xe20] ss:$16 sps:$4 sm:$0xff]  }
 0x1ec   :  { %7437 = vmatmul.mubr.bf16.gmra.mrb[8].mxu0 %v14236_v47  ;;  %8605 = vmatmul.mubr.bf16.gmra.mrb[8].mxu1 %v14236_v47  ;;  %v17420_v47 = vld [vmem:[#allocation5 + $0xe44] ss:$16 sps:$4 sm:$0xff]  }
 0x1ed   :  { %7466 = vmatpush1.bf16.msra.mxu0 %v17334_v48  ;;  %8634 = vmatpush1.bf16.msra.mxu1 %v17337_v49  ;;  %v17423_v48 = vld [vmem:[#allocation5 + $0xe4c] ss:$16 sps:$4 sm:$0xff]   ;;  %v155_v49 = vld [vmem:[#allocation2 + $0x230] sm:$0xff] }
 0x1ee   :  { %7467 = vmatprep.subr.bf16.mxu0 %v17342_v50  ;;  %8635 = vmatprep.subr.bf16.mxu1 %v17345_v51  ;;  %v171_v50 = vld [vmem:[#allocation2 + $0x2b0] sm:$0xff]  ;;  %v14206_v51 = vcombine.low %v123_v37, %v139_v38  ;;  %v17481_v38 = vld [vmem:[#allocation5 + $0xf88] ss:$16 sps:$4 sm:$0xff]  }
 0x1ef   :  { %7446 = vmatprep.mubr.bf16.mxu0 %v14269_v54  ;;  %8614 = vmatprep.mubr.bf16.mxu1 %v14269_v54  ;;  %v17426_v54 = vld [vmem:[#allocation5 + $0xe64] ss:$16 sps:$4 sm:$0xff]   ;;  %v14239_v58 = vcombine.high %v155_v49, %v171_v50  ;;  %v17478_v37 = vld [vmem:[#allocation5 + $0xf80] ss:$16 sps:$4 sm:$0xff]  }
 0x1f1   :  { %7468 = vmatpush1.bf16.msra.mxu0 %v17340_v52  ;;  %8636 = vmatpush1.bf16.msra.mxu1 %v17343_v53  ;;  %v17418_v52 = vld [vmem:[#allocation5 + $0xe40] ss:$16 sps:$4 sm:$0xff]   ;;  %v17421_v53 = vld [vmem:[#allocation5 + $0xe48] ss:$16 sps:$4 sm:$0xff]  }
 0x1f2   :  { %7469 = vmatprep.subr.bf16.mxu0 %v17348_v55  ;;  %8637 = vmatprep.subr.bf16.mxu1 %v17351_v56  ;;  %v17429_v55 = vld [vmem:[#allocation5 + $0xe6c] ss:$16 sps:$4 sm:$0xff]   ;;  %v17424_v56 = vld [vmem:[#allocation5 + $0xe60] ss:$16 sps:$4 sm:$0xff]  }
 0x1f4   :  { %7447 = vmatmul.mubr.bf16.gmra.mrb[12].mxu0 %v14268_v59  ;;  %8615 = vmatmul.mubr.bf16.gmra.mrb[12].mxu1 %v14268_v59  ;;  %v17432_v59 = vld [vmem:[#allocation5 + $0xe84] ss:$16 sps:$4 sm:$0xff]  }
 0x1f5   :  { %7470 = vmatpush1.bf16.msra.mxu0 %v17346_v60  ;;  %8638 = vmatpush1.bf16.msra.mxu1 %v17349_v61  ;;  %v17435_v60 = vld [vmem:[#allocation5 + $0xe8c] ss:$16 sps:$4 sm:$0xff]   ;;  %v187_v61 = vld [vmem:[#allocation2 + $0x330] sm:$0xff] }
 0x1f6   :  { %7471 = vmatprep.subr.bf16.mxu0 %v17354_v62  ;;  %8639 = vmatprep.subr.bf16.mxu1 %v17357_v63  ;;  %v203_v62 = vld [vmem:[#allocation2 + $0x3b0] sm:$0xff]  ;;  %v14238_v63 = vcombine.low %v155_v49, %v171_v50  ;;  %v17499_v50 = vld [vmem:[#allocation5 + $0xfe8] ss:$16 sps:$4 sm:$0xff]  }
 0x1f7   :  { %7489 = vmatprep.mubr.bf16.mxu0 %v14175_v0  ;;  %8657 = vmatprep.mubr.bf16.mxu1 %v14175_v0  ;;  %v17430_v0 = vld [vmem:[#allocation5 + $0xe80] ss:$16 sps:$4 sm:$0xff]  }
 0x1f8   :  { %v17496_v49 = vld [vmem:[#allocation5 + $0xfe0] ss:$16 sps:$4 sm:$0xff]  }
 0x1f9   :  { %7472 = vmatpush1.bf16.msra.mxu0 %v17352_v1  ;;  %8640 = vmatpush1.bf16.msra.mxu1 %v17355_v2  ;;  %v17433_v1 = vld [vmem:[#allocation5 + $0xe88] ss:$16 sps:$4 sm:$0xff]   ;;  %v17438_v2 = vld [vmem:[#allocation5 + $0xea4] ss:$16 sps:$4 sm:$0xff]  }
 0x1fa   :  { %7473 = vmatprep.subr.bf16.mxu0 %v17360_v3  ;;  %8641 = vmatprep.subr.bf16.mxu1 %v17363_v4  ;;  %v17441_v3 = vld [vmem:[#allocation5 + $0xeac] ss:$16 sps:$4 sm:$0xff]   ;;  %v17436_v4 = vld [vmem:[#allocation5 + $0xea0] ss:$16 sps:$4 sm:$0xff]  }
 0x1fd   :  { %7474 = vmatpush1.bf16.msra.mxu0 %v17358_v5  ;;  %8642 = vmatpush1.bf16.msra.mxu1 %v17361_v6  ;;  %v17439_v5 = vld [vmem:[#allocation5 + $0xea8] ss:$16 sps:$4 sm:$0xff]   ;;  %v14271_v6 = vcombine.high %v187_v61, %v203_v62 }
 0x1fe   :  { %7475 = vmatprep.subr.bf16.mxu0 %v17366_v7  ;;  %8643 = vmatprep.subr.bf16.mxu1 %v17369_v8  ;;  %v17444_v7 = vld [vmem:[#allocation5 + $0xec4] ss:$16 sps:$4 sm:$0xff]   ;;  %v17447_v8 = vld [vmem:[#allocation5 + $0xecc] ss:$16 sps:$4 sm:$0xff]  }
 0x201   :  { %7476 = vmatpush1.bf16.msra.mxu0 %v17364_v9  ;;  %8644 = vmatpush1.bf16.msra.mxu1 %v17367_v10  ;;  %v18564_v9 = vld [vmem:[#allocation2 + $0x38] sm:$0xff] }
 0x202   :  { %7477 = vmatprep.subr.bf16.mxu0 %v17372_v11  ;;  %8645 = vmatprep.subr.bf16.mxu1 %v17375_v12  ;;  %v18566_v10 = vld [vmem:[#allocation2 + $0xb8] sm:$0xff]  ;;  %v14270_v11 = vcombine.low %v187_v61, %v203_v62  ;;  %v17442_v12 = vld [vmem:[#allocation5 + $0xec0] ss:$16 sps:$4 sm:$0xff]  }
 0x203   :  { %v17511_v61 = vld [vmem:[#allocation5 + $0x1028] ss:$16 sps:$4 sm:$0xff]  }
 0x205   :  { %7478 = vmatpush1.bf16.msra.mxu0 %v17370_v13  ;;  %8646 = vmatpush1.bf16.msra.mxu1 %v17373_v14  ;;  %v17445_v13 = vld [vmem:[#allocation5 + $0xec8] ss:$16 sps:$4 sm:$0xff]   ;;  %v17450_v14 = vld [vmem:[#allocation5 + $0xee4] ss:$16 sps:$4 sm:$0xff]  }
 0x206   :  { %7479 = vmatprep.subr.bf16.mxu0 %v17378_v15  ;;  %8647 = vmatprep.subr.bf16.mxu1 %v17381_v16  ;;  %v17453_v15 = vld [vmem:[#allocation5 + $0xeec] ss:$16 sps:$4 sm:$0xff]   ;;  %v14177_v16 = vcombine.high %v18564_v9, %v18566_v10 }
 0x209   :  { %7480 = vmatpush1.bf16.msra.mxu0 %v17376_v17  ;;  %8648 = vmatpush1.bf16.msra.mxu1 %v17379_v18  ;;  %v17448_v17 = vld [vmem:[#allocation5 + $0xee0] ss:$16 sps:$4 sm:$0xff]   ;;  %v17451_v18 = vld [vmem:[#allocation5 + $0xee8] ss:$16 sps:$4 sm:$0xff]  }
 0x20a   :  { %7481 = vmatprep.subr.bf16.mxu0 %v17384_v19  ;;  %8649 = vmatprep.subr.bf16.mxu1 %v17387_v20  ;;  %v17456_v19 = vld [vmem:[#allocation5 + $0xf04] ss:$16 sps:$4 sm:$0xff]   ;;  %v17459_v20 = vld [vmem:[#allocation5 + $0xf0c] ss:$16 sps:$4 sm:$0xff]  }
 0x20d   :  { %7482 = vmatpush1.bf16.msra.mxu0 %v17382_v21  ;;  %8650 = vmatpush1.bf16.msra.mxu1 %v17385_v22  ;;  %v17454_v21 = vld [vmem:[#allocation5 + $0xf00] ss:$16 sps:$4 sm:$0xff]   ;;  %v17457_v22 = vld [vmem:[#allocation5 + $0xf08] ss:$16 sps:$4 sm:$0xff]  }
 0x20e   :  { %7483 = vmatprep.subr.bf16.mxu0 %v17390_v23  ;;  %8651 = vmatprep.subr.bf16.mxu1 %v17393_v24  ;;  %v17462_v23 = vld [vmem:[#allocation5 + $0xf24] ss:$16 sps:$4 sm:$0xff]   ;;  %v17465_v24 = vld [vmem:[#allocation5 + $0xf2c] ss:$16 sps:$4 sm:$0xff]  }
 0x211   :  { %7484 = vmatpush1.bf16.msra.mxu0 %v17388_v25  ;;  %8652 = vmatpush1.bf16.msra.mxu1 %v17391_v26  ;;  %v17460_v25 = vld [vmem:[#allocation5 + $0xf20] ss:$16 sps:$4 sm:$0xff]   ;;  %v17463_v26 = vld [vmem:[#allocation5 + $0xf28] ss:$16 sps:$4 sm:$0xff]  }
 0x212   :  { %7485 = vmatprep.subr.bf16.mxu0 %v17396_v27  ;;  %8653 = vmatprep.subr.bf16.mxu1 %v17399_v28  ;;  %v17468_v27 = vld [vmem:[#allocation5 + $0xf44] ss:$16 sps:$4 sm:$0xff]   ;;  %v17471_v28 = vld [vmem:[#allocation5 + $0xf4c] ss:$16 sps:$4 sm:$0xff]  }
 0x215   :  { %7486 = vmatpush1.bf16.msra.mxu0 %v17394_v29  ;;  %8654 = vmatpush1.bf16.msra.mxu1 %v17397_v30  ;;  %v17466_v29 = vld [vmem:[#allocation5 + $0xf40] ss:$16 sps:$4 sm:$0xff]   ;;  %v17469_v30 = vld [vmem:[#allocation5 + $0xf48] ss:$16 sps:$4 sm:$0xff]  }
 0x216   :  { %7487 = vmatprep.subr.bf16.mxu0 %v17402_v31  ;;  %8655 = vmatprep.subr.bf16.mxu1 %v17405_v32  ;;  %v17474_v31 = vld [vmem:[#allocation5 + $0xf64] ss:$16 sps:$4 sm:$0xff]   ;;  %v17477_v32 = vld [vmem:[#allocation5 + $0xf6c] ss:$16 sps:$4 sm:$0xff]  }
 0x219   :  { %7488 = vmatpush1.bf16.msra.mxu0 %v17400_v33  ;;  %8656 = vmatpush1.bf16.msra.mxu1 %v17403_v34  ;;  %v17472_v33 = vld [vmem:[#allocation5 + $0xf60] ss:$16 sps:$4 sm:$0xff]   ;;  %v17475_v34 = vld [vmem:[#allocation5 + $0xf68] ss:$16 sps:$4 sm:$0xff]  }
 0x21a   :  { %7530 = vmatprep.subr.bf16.mxu0 %v17408_v35  ;;  %8698 = vmatprep.subr.bf16.mxu1 %v17411_v36  ;;  %v17480_v35 = vld [vmem:[#allocation5 + $0xf84] ss:$16 sps:$4 sm:$0xff]   ;;  %v17483_v36 = vld [vmem:[#allocation5 + $0xf8c] ss:$16 sps:$4 sm:$0xff]  }
 0x21c   :  { %7490 = vmatmul.mubr.bf16.vlgmr.msra.gmra.mrb[0].mxu0 %v14174_v39  ;;  %8658 = vmatmul.mubr.bf16.vlgmr.msra.gmra.mrb[0].mxu1 %v14174_v39  ;;  %v17486_v39 = vld [vmem:[#allocation5 + $0xfa4] ss:$16 sps:$4 sm:$0xff]  }
 0x21d   :  { %7531 = vmatpush1.bf16.msra.mxu0 %v17406_v40  ;;  %8699 = vmatpush1.bf16.msra.mxu1 %v17409_v41  ;;  %v17489_v40 = vld [vmem:[#allocation5 + $0xfac] ss:$16 sps:$4 sm:$0xff]   ;;  %v17484_v41 = vld [vmem:[#allocation5 + $0xfa0] ss:$16 sps:$4 sm:$0xff]  }
 0x21e   :  { %7532 = vmatprep.subr.bf16.mxu0 %v17414_v42  ;;  %8700 = vmatprep.subr.bf16.mxu1 %v17417_v43  ;;  %v17487_v42 = vld [vmem:[#allocation5 + $0xfa8] ss:$16 sps:$4 sm:$0xff]   ;;  %v17492_v43 = vld [vmem:[#allocation5 + $0xfc4] ss:$16 sps:$4 sm:$0xff]  }
 0x21f   :  { %7499 = vmatprep.mubr.bf16.mxu0 %v14207_v46  ;;  %8667 = vmatprep.mubr.bf16.mxu1 %v14207_v46  ;;  %v17493_v46 = vld [vmem:[#allocation5 + $0xfc8] ss:$16 sps:$4 sm:$0xff]  }
 0x221   :  { %7533 = vmatpush1.bf16.msra.mxu0 %v17412_v44  ;;  %8701 = vmatpush1.bf16.msra.mxu1 %v17415_v45  ;;  %v17495_v44 = vld [vmem:[#allocation5 + $0xfcc] ss:$16 sps:$4 sm:$0xff]   ;;  %v17490_v45 = vld [vmem:[#allocation5 + $0xfc0] ss:$16 sps:$4 sm:$0xff]  }
 0x222   :  { %7534 = vmatprep.subr.bf16.mxu0 %v17420_v47  ;;  %8702 = vmatprep.subr.bf16.mxu1 %v17423_v48  ;;  %v17498_v47 = vld [vmem:[#allocation5 + $0xfe4] ss:$16 sps:$4 sm:$0xff]   ;;  %v17501_v48 = vld [vmem:[#allocation5 + $0xfec] ss:$16 sps:$4 sm:$0xff]  }
 0x224   :  { %7500 = vmatmul.mubr.bf16.gmra.mrb[4].mxu0 %v14206_v51  ;;  %8668 = vmatmul.mubr.bf16.gmra.mrb[4].mxu1 %v14206_v51  ;;  %v17504_v51 = vld [vmem:[#allocation5 + $0x1004] ss:$16 sps:$4 sm:$0xff]  }
 0x225   :  { %7535 = vmatpush1.bf16.msra.mxu0 %v17418_v52  ;;  %8703 = vmatpush1.bf16.msra.mxu1 %v17421_v53  ;;  %v17507_v52 = vld [vmem:[#allocation5 + $0x100c] ss:$16 sps:$4 sm:$0xff]  }
 0x226   :  { %7536 = vmatprep.subr.bf16.mxu0 %v17426_v54  ;;  %8704 = vmatprep.subr.bf16.mxu1 %v17429_v55  ;;  %v124_v53 = vld [vmem:[#allocation2 + $0x138] sm:$0xff]  ;;  %v14176_v55 = vcombine.low %v18564_v9, %v18566_v10 }
 0x227   :  { %7509 = vmatprep.mubr.bf16.mxu0 %v14239_v58  ;;  %8677 = vmatprep.mubr.bf16.mxu1 %v14239_v58  ;;  %v140_v54 = vld [vmem:[#allocation2 + $0x1b8] sm:$0xff]  ;;  %v17510_v58 = vld [vmem:[#allocation5 + $0x1024] ss:$16 sps:$4 sm:$0xff]  }
 0x228   :  { %v14209_v62 = vcombine.high %v124_v53, %v140_v54  ;;  %v17523_v9 = vld [vmem:[#allocation5 + $0x1068] ss:$16 sps:$4 sm:$0xff]  }
 0x229   :  { %7537 = vmatpush1.bf16.msra.mxu0 %v17424_v56  ;;  %8705 = vmatpush1.bf16.msra.mxu1 %v17427_v57  ;;  %v17502_v56 = vld [vmem:[#allocation5 + $0x1000] ss:$16 sps:$4 sm:$0xff]   ;;  %v17505_v57 = vld [vmem:[#allocation5 + $0x1008] ss:$16 sps:$4 sm:$0xff]  }
 0x22a   :  { %7538 = vmatprep.subr.bf16.mxu0 %v17432_v59  ;;  %8706 = vmatprep.subr.bf16.mxu1 %v17435_v60  ;;  %v17513_v59 = vld [vmem:[#allocation5 + $0x102c] ss:$16 sps:$4 sm:$0xff]   ;;  %v17508_v60 = vld [vmem:[#allocation5 + $0x1020] ss:$16 sps:$4 sm:$0xff]  }
 0x22c   :  { %7510 = vmatmul.mubr.bf16.gmra.mrb[8].mxu0 %v14238_v63  ;;  %8678 = vmatmul.mubr.bf16.gmra.mrb[8].mxu1 %v14238_v63  ;;  %v17516_v63 = vld [vmem:[#allocation5 + $0x1044] ss:$16 sps:$4 sm:$0xff]  }
 0x22d   :  { %7539 = vmatpush1.bf16.msra.mxu0 %v17430_v0  ;;  %8707 = vmatpush1.bf16.msra.mxu1 %v17433_v1  ;;  %v17519_v0 = vld [vmem:[#allocation5 + $0x104c] ss:$16 sps:$4 sm:$0xff]  }
 0x22e   :  { %7540 = vmatprep.subr.bf16.mxu0 %v17438_v2  ;;  %8708 = vmatprep.subr.bf16.mxu1 %v17441_v3  ;;  %v156_v1 = vld [vmem:[#allocation2 + $0x238] sm:$0xff]  ;;  %v14208_v3 = vcombine.low %v124_v53, %v140_v54  ;;  %v17574_v53 = vld [vmem:[#allocation5 + $0x1180] ss:$16 sps:$4 sm:$0xff]  }
 0x22f   :  { %7519 = vmatprep.mubr.bf16.mxu0 %v14271_v6  ;;  %8687 = vmatprep.mubr.bf16.mxu1 %v14271_v6  ;;  %v172_v2 = vld [vmem:[#allocation2 + $0x2b8] sm:$0xff]  ;;  %v17522_v6 = vld [vmem:[#allocation5 + $0x1064] ss:$16 sps:$4 sm:$0xff]  }
 0x230   :  { %v14241_v10 = vcombine.high %v156_v1, %v172_v2  ;;  %v17577_v54 = vld [vmem:[#allocation5 + $0x1188] ss:$16 sps:$4 sm:$0xff]  }
 0x231   :  { %7541 = vmatpush1.bf16.msra.mxu0 %v17436_v4  ;;  %8709 = vmatpush1.bf16.msra.mxu1 %v17439_v5  ;;  %v17514_v4 = vld [vmem:[#allocation5 + $0x1040] ss:$16 sps:$4 sm:$0xff]   ;;  %v17517_v5 = vld [vmem:[#allocation5 + $0x1048] ss:$16 sps:$4 sm:$0xff]  }
 0x232   :  { %7542 = vmatprep.subr.bf16.mxu0 %v17444_v7  ;;  %8710 = vmatprep.subr.bf16.mxu1 %v17447_v8  ;;  %v17525_v7 = vld [vmem:[#allocation5 + $0x106c] ss:$16 sps:$4 sm:$0xff]   ;;  %v17520_v8 = vld [vmem:[#allocation5 + $0x1060] ss:$16 sps:$4 sm:$0xff]  }
 0x234   :  { %7520 = vmatmul.mubr.bf16.gmra.mrb[12].mxu0 %v14270_v11  ;;  %8688 = vmatmul.mubr.bf16.gmra.mrb[12].mxu1 %v14270_v11  ;;  %v17528_v11 = vld [vmem:[#allocation5 + $0x1084] ss:$16 sps:$4 sm:$0xff]  }
 0x235   :  { %7543 = vmatpush1.bf16.msra.mxu0 %v17442_v12  ;;  %8711 = vmatpush1.bf16.msra.mxu1 %v17445_v13  ;;  %v17531_v12 = vld [vmem:[#allocation5 + $0x108c] ss:$16 sps:$4 sm:$0xff]  }
 0x236   :  { %7544 = vmatprep.subr.bf16.mxu0 %v17450_v14  ;;  %8712 = vmatprep.subr.bf16.mxu1 %v17453_v15  ;;  %v188_v13 = vld [vmem:[#allocation2 + $0x338] sm:$0xff]  ;;  %v14240_v15 = vcombine.low %v156_v1, %v172_v2  ;;  %v17592_v1 = vld [vmem:[#allocation5 + $0x11e0] ss:$16 sps:$4 sm:$0xff]  }
 0x237   :  { %7562 = vmatprep.mubr.bf16.mxu0 %v14177_v16  ;;  %8730 = vmatprep.mubr.bf16.mxu1 %v14177_v16  ;;  %v204_v14 = vld [vmem:[#allocation2 + $0x3b8] sm:$0xff]  ;;  %v17526_v16 = vld [vmem:[#allocation5 + $0x1080] ss:$16 sps:$4 sm:$0xff]  }
 0x238   :  { %v17595_v2 = vld [vmem:[#allocation5 + $0x11e8] ss:$16 sps:$4 sm:$0xff]  }
 0x239   :  { %7545 = vmatpush1.bf16.msra.mxu0 %v17448_v17  ;;  %8713 = vmatpush1.bf16.msra.mxu1 %v17451_v18  ;;  %v17529_v17 = vld [vmem:[#allocation5 + $0x1088] ss:$16 sps:$4 sm:$0xff]   ;;  %v17534_v18 = vld [vmem:[#allocation5 + $0x10a4] ss:$16 sps:$4 sm:$0xff]  }
 0x23a   :  { %7546 = vmatprep.subr.bf16.mxu0 %v17456_v19  ;;  %8714 = vmatprep.subr.bf16.mxu1 %v17459_v20  ;;  %v17537_v19 = vld [vmem:[#allocation5 + $0x10ac] ss:$16 sps:$4 sm:$0xff]   ;;  %v17532_v20 = vld [vmem:[#allocation5 + $0x10a0] ss:$16 sps:$4 sm:$0xff]  }
 0x23d   :  { %7547 = vmatpush1.bf16.msra.mxu0 %v17454_v21  ;;  %8715 = vmatpush1.bf16.msra.mxu1 %v17457_v22  ;;  %v17535_v21 = vld [vmem:[#allocation5 + $0x10a8] ss:$16 sps:$4 sm:$0xff]   ;;  %v14273_v22 = vcombine.high %v188_v13, %v204_v14 }
 0x23e   :  { %7548 = vmatprep.subr.bf16.mxu0 %v17462_v23  ;;  %8716 = vmatprep.subr.bf16.mxu1 %v17465_v24  ;;  %v17540_v23 = vld [vmem:[#allocation5 + $0x10c4] ss:$16 sps:$4 sm:$0xff]   ;;  %v17543_v24 = vld [vmem:[#allocation5 + $0x10cc] ss:$16 sps:$4 sm:$0xff]  }
 0x241   :  { %7549 = vmatpush1.bf16.msra.mxu0 %v17460_v25  ;;  %8717 = vmatpush1.bf16.msra.mxu1 %v17463_v26  ;;  %v18572_v25 = vld [vmem:[#allocation2 + $0x40] sm:$0xff] }
 0x242   :  { %7550 = vmatprep.subr.bf16.mxu0 %v17468_v27  ;;  %8718 = vmatprep.subr.bf16.mxu1 %v17471_v28  ;;  %v18574_v26 = vld [vmem:[#allocation2 + $0xc0] sm:$0xff]  ;;  %v14272_v27 = vcombine.low %v188_v13, %v204_v14  ;;  %v17607_v13 = vld [vmem:[#allocation5 + $0x1228] ss:$16 sps:$4 sm:$0xff]  }
 0x243   :  { %v17538_v28 = vld [vmem:[#allocation5 + $0x10c0] ss:$16 sps:$4 sm:$0xff]  }
 0x245   :  { %7551 = vmatpush1.bf16.msra.mxu0 %v17466_v29  ;;  %8719 = vmatpush1.bf16.msra.mxu1 %v17469_v30  ;;  %v17541_v29 = vld [vmem:[#allocation5 + $0x10c8] ss:$16 sps:$4 sm:$0xff]   ;;  %v17546_v30 = vld [vmem:[#allocation5 + $0x10e4] ss:$16 sps:$4 sm:$0xff]  }
 0x246   :  { %7552 = vmatprep.subr.bf16.mxu0 %v17474_v31  ;;  %8720 = vmatprep.subr.bf16.mxu1 %v17477_v32  ;;  %v17549_v31 = vld [vmem:[#allocation5 + $0x10ec] ss:$16 sps:$4 sm:$0xff]   ;;  %v14179_v32 = vcombine.high %v18572_v25, %v18574_v26 }
 0x249   :  { %7553 = vmatpush1.bf16.msra.mxu0 %v17472_v33  ;;  %8721 = vmatpush1.bf16.msra.mxu1 %v17475_v34  ;;  %v17544_v33 = vld [vmem:[#allocation5 + $0x10e0] ss:$16 sps:$4 sm:$0xff]   ;;  %v17547_v34 = vld [vmem:[#allocation5 + $0x10e8] ss:$16 sps:$4 sm:$0xff]  }
 0x24a   :  { %7554 = vmatprep.subr.bf16.mxu0 %v17480_v35  ;;  %8722 = vmatprep.subr.bf16.mxu1 %v17483_v36  ;;  %v17552_v35 = vld [vmem:[#allocation5 + $0x1104] ss:$16 sps:$4 sm:$0xff]   ;;  %v17555_v36 = vld [vmem:[#allocation5 + $0x110c] ss:$16 sps:$4 sm:$0xff]  }
 0x24d   :  { %7555 = vmatpush1.bf16.msra.mxu0 %v17478_v37  ;;  %8723 = vmatpush1.bf16.msra.mxu1 %v17481_v38  ;;  %v17550_v37 = vld [vmem:[#allocation5 + $0x1100] ss:$16 sps:$4 sm:$0xff]   ;;  %v17553_v38 = vld [vmem:[#allocation5 + $0x1108] ss:$16 sps:$4 sm:$0xff]  }
 0x24e   :  { %7556 = vmatprep.subr.bf16.mxu0 %v17486_v39  ;;  %8724 = vmatprep.subr.bf16.mxu1 %v17489_v40  ;;  %v17558_v39 = vld [vmem:[#allocation5 + $0x1124] ss:$16 sps:$4 sm:$0xff]   ;;  %v17561_v40 = vld [vmem:[#allocation5 + $0x112c] ss:$16 sps:$4 sm:$0xff]  }
 0x251   :  { %7557 = vmatpush1.bf16.msra.mxu0 %v17484_v41  ;;  %8725 = vmatpush1.bf16.msra.mxu1 %v17487_v42  ;;  %v17556_v41 = vld [vmem:[#allocation5 + $0x1120] ss:$16 sps:$4 sm:$0xff]   ;;  %v17559_v42 = vld [vmem:[#allocation5 + $0x1128] ss:$16 sps:$4 sm:$0xff]  }
 0x252   :  { %7558 = vmatprep.subr.bf16.mxu0 %v17492_v43  ;;  %8726 = vmatprep.subr.bf16.mxu1 %v17495_v44  ;;  %v17564_v43 = vld [vmem:[#allocation5 + $0x1144] ss:$16 sps:$4 sm:$0xff]   ;;  %v17567_v44 = vld [vmem:[#allocation5 + $0x114c] ss:$16 sps:$4 sm:$0xff]  }
 0x255   :  { %7559 = vmatpush1.bf16.msra.mxu0 %v17490_v45  ;;  %8727 = vmatpush1.bf16.msra.mxu1 %v17493_v46  ;;  %v17562_v45 = vld [vmem:[#allocation5 + $0x1140] ss:$16 sps:$4 sm:$0xff]   ;;  %v17565_v46 = vld [vmem:[#allocation5 + $0x1148] ss:$16 sps:$4 sm:$0xff]  }
 0x256   :  { %7560 = vmatprep.subr.bf16.mxu0 %v17498_v47  ;;  %8728 = vmatprep.subr.bf16.mxu1 %v17501_v48  ;;  %v17570_v47 = vld [vmem:[#allocation5 + $0x1164] ss:$16 sps:$4 sm:$0xff]   ;;  %v17573_v48 = vld [vmem:[#allocation5 + $0x116c] ss:$16 sps:$4 sm:$0xff]  }
 0x259   :  { %7561 = vmatpush1.bf16.msra.mxu0 %v17496_v49  ;;  %8729 = vmatpush1.bf16.msra.mxu1 %v17499_v50  ;;  %v17568_v49 = vld [vmem:[#allocation5 + $0x1160] ss:$16 sps:$4 sm:$0xff]   ;;  %v17571_v50 = vld [vmem:[#allocation5 + $0x1168] ss:$16 sps:$4 sm:$0xff]  }
 0x25a   :  { %7603 = vmatprep.subr.bf16.mxu0 %v17504_v51  ;;  %8771 = vmatprep.subr.bf16.mxu1 %v17507_v52  ;;  %v17576_v51 = vld [vmem:[#allocation5 + $0x1184] ss:$16 sps:$4 sm:$0xff]   ;;  %v17579_v52 = vld [vmem:[#allocation5 + $0x118c] ss:$16 sps:$4 sm:$0xff]  }
 0x25c   :  { %7563 = vmatmul.mubr.bf16.vlgmr.msra.gmra.mrb[0].mxu0 %v14176_v55  ;;  %8731 = vmatmul.mubr.bf16.vlgmr.msra.gmra.mrb[0].mxu1 %v14176_v55  ;;  %v17582_v55 = vld [vmem:[#allocation5 + $0x11a4] ss:$16 sps:$4 sm:$0xff]  }
 0x25d   :  { %7604 = vmatpush1.bf16.msra.mxu0 %v17502_v56  ;;  %8772 = vmatpush1.bf16.msra.mxu1 %v17505_v57  ;;  %v17585_v56 = vld [vmem:[#allocation5 + $0x11ac] ss:$16 sps:$4 sm:$0xff]   ;;  %v17580_v57 = vld [vmem:[#allocation5 + $0x11a0] ss:$16 sps:$4 sm:$0xff]  }
 0x25e   :  { %7605 = vmatprep.subr.bf16.mxu0 %v17510_v58  ;;  %8773 = vmatprep.subr.bf16.mxu1 %v17513_v59  ;;  %v17583_v58 = vld [vmem:[#allocation5 + $0x11a8] ss:$16 sps:$4 sm:$0xff]   ;;  %v17588_v59 = vld [vmem:[#allocation5 + $0x11c4] ss:$16 sps:$4 sm:$0xff]  }
 0x25f   :  { %7572 = vmatprep.mubr.bf16.mxu0 %v14209_v62  ;;  %8740 = vmatprep.mubr.bf16.mxu1 %v14209_v62  ;;  %v17589_v62 = vld [vmem:[#allocation5 + $0x11c8] ss:$16 sps:$4 sm:$0xff]  }
 0x261   :  { %7606 = vmatpush1.bf16.msra.mxu0 %v17508_v60  ;;  %8774 = vmatpush1.bf16.msra.mxu1 %v17511_v61  ;;  %v17591_v60 = vld [vmem:[#allocation5 + $0x11cc] ss:$16 sps:$4 sm:$0xff]   ;;  %v17586_v61 = vld [vmem:[#allocation5 + $0x11c0] ss:$16 sps:$4 sm:$0xff]  }
 0x262   :  { %7607 = vmatprep.subr.bf16.mxu0 %v17516_v63  ;;  %8775 = vmatprep.subr.bf16.mxu1 %v17519_v0  ;;  %v17594_v63 = vld [vmem:[#allocation5 + $0x11e4] ss:$16 sps:$4 sm:$0xff]   ;;  %v17597_v0 = vld [vmem:[#allocation5 + $0x11ec] ss:$16 sps:$4 sm:$0xff]  }
 0x264   :  { %7573 = vmatmul.mubr.bf16.gmra.mrb[4].mxu0 %v14208_v3  ;;  %8741 = vmatmul.mubr.bf16.gmra.mrb[4].mxu1 %v14208_v3  ;;  %v17600_v3 = vld [vmem:[#allocation5 + $0x1204] ss:$16 sps:$4 sm:$0xff]  }
 0x265   :  { %7608 = vmatpush1.bf16.msra.mxu0 %v17514_v4  ;;  %8776 = vmatpush1.bf16.msra.mxu1 %v17517_v5  ;;  %v17603_v4 = vld [vmem:[#allocation5 + $0x120c] ss:$16 sps:$4 sm:$0xff]   ;;  %v125_v5 = vld [vmem:[#allocation2 + $0x140] sm:$0xff] }
 0x266   :  { %7609 = vmatprep.subr.bf16.mxu0 %v17522_v6  ;;  %8777 = vmatprep.subr.bf16.mxu1 %v17525_v7  ;;  %v141_v6 = vld [vmem:[#allocation2 + $0x1c0] sm:$0xff]  ;;  %v14178_v7 = vcombine.low %v18572_v25, %v18574_v26  ;;  %v17619_v25 = vld [vmem:[#allocation5 + $0x1268] ss:$16 sps:$4 sm:$0xff]  }
 0x267   :  { %7582 = vmatprep.mubr.bf16.mxu0 %v14241_v10  ;;  %8750 = vmatprep.mubr.bf16.mxu1 %v14241_v10  ;;  %v17606_v10 = vld [vmem:[#allocation5 + $0x1224] ss:$16 sps:$4 sm:$0xff]   ;;  %v14211_v14 = vcombine.high %v125_v5, %v141_v6 }
 0x269   :  { %7610 = vmatpush1.bf16.msra.mxu0 %v17520_v8  ;;  %8778 = vmatpush1.bf16.msra.mxu1 %v17523_v9  ;;  %v17598_v8 = vld [vmem:[#allocation5 + $0x1200] ss:$16 sps:$4 sm:$0xff]   ;;  %v17601_v9 = vld [vmem:[#allocation5 + $0x1208] ss:$16 sps:$4 sm:$0xff]  }
 0x26a   :  { %7611 = vmatprep.subr.bf16.mxu0 %v17528_v11  ;;  %8779 = vmatprep.subr.bf16.mxu1 %v17531_v12  ;;  %v17609_v11 = vld [vmem:[#allocation5 + $0x122c] ss:$16 sps:$4 sm:$0xff]   ;;  %v17604_v12 = vld [vmem:[#allocation5 + $0x1220] ss:$16 sps:$4 sm:$0xff]  }
 0x26c   :  { %7583 = vmatmul.mubr.bf16.gmra.mrb[8].mxu0 %v14240_v15  ;;  %8751 = vmatmul.mubr.bf16.gmra.mrb[8].mxu1 %v14240_v15  ;;  %v17612_v15 = vld [vmem:[#allocation5 + $0x1244] ss:$16 sps:$4 sm:$0xff]  }
 0x26d   :  { %7612 = vmatpush1.bf16.msra.mxu0 %v17526_v16  ;;  %8780 = vmatpush1.bf16.msra.mxu1 %v17529_v17  ;;  %v17615_v16 = vld [vmem:[#allocation5 + $0x124c] ss:$16 sps:$4 sm:$0xff]   ;;  %v157_v17 = vld [vmem:[#allocation2 + $0x240] sm:$0xff] }
 0x26e   :  { %7613 = vmatprep.subr.bf16.mxu0 %v17534_v18  ;;  %8781 = vmatprep.subr.bf16.mxu1 %v17537_v19  ;;  %v173_v18 = vld [vmem:[#allocation2 + $0x2c0] sm:$0xff]  ;;  %v14210_v19 = vcombine.low %v125_v5, %v141_v6  ;;  %v17673_v6 = vld [vmem:[#allocation5 + $0x1388] ss:$16 sps:$4 sm:$0xff]  }
 0x26f   :  { %7592 = vmatprep.mubr.bf16.mxu0 %v14273_v22  ;;  %8760 = vmatprep.mubr.bf16.mxu1 %v14273_v22  ;;  %v17618_v22 = vld [vmem:[#allocation5 + $0x1264] ss:$16 sps:$4 sm:$0xff]   ;;  %v14243_v26 = vcombine.high %v157_v17, %v173_v18  ;;  %v17670_v5 = vld [vmem:[#allocation5 + $0x1380] ss:$16 sps:$4 sm:$0xff]  }
 0x271   :  { %7614 = vmatpush1.bf16.msra.mxu0 %v17532_v20  ;;  %8782 = vmatpush1.bf16.msra.mxu1 %v17535_v21  ;;  %v17610_v20 = vld [vmem:[#allocation5 + $0x1240] ss:$16 sps:$4 sm:$0xff]   ;;  %v17613_v21 = vld [vmem:[#allocation5 + $0x1248] ss:$16 sps:$4 sm:$0xff]  }
 0x272   :  { %7615 = vmatprep.subr.bf16.mxu0 %v17540_v23  ;;  %8783 = vmatprep.subr.bf16.mxu1 %v17543_v24  ;;  %v17621_v23 = vld [vmem:[#allocation5 + $0x126c] ss:$16 sps:$4 sm:$0xff]   ;;  %v17616_v24 = vld [vmem:[#allocation5 + $0x1260] ss:$16 sps:$4 sm:$0xff]  }
 0x274   :  { %7593 = vmatmul.mubr.bf16.gmra.mrb[12].mxu0 %v14272_v27  ;;  %8761 = vmatmul.mubr.bf16.gmra.mrb[12].mxu1 %v14272_v27  ;;  %v17624_v27 = vld [vmem:[#allocation5 + $0x1284] ss:$16 sps:$4 sm:$0xff]  }
 0x275   :  { %7616 = vmatpush1.bf16.msra.mxu0 %v17538_v28  ;;  %8784 = vmatpush1.bf16.msra.mxu1 %v17541_v29  ;;  %v17627_v28 = vld [vmem:[#allocation5 + $0x128c] ss:$16 sps:$4 sm:$0xff]   ;;  %v189_v29 = vld [vmem:[#allocation2 + $0x340] sm:$0xff] }
 0x276   :  { %7617 = vmatprep.subr.bf16.mxu0 %v17546_v30  ;;  %8785 = vmatprep.subr.bf16.mxu1 %v17549_v31  ;;  %v205_v30 = vld [vmem:[#allocation2 + $0x3c0] sm:$0xff]  ;;  %v14242_v31 = vcombine.low %v157_v17, %v173_v18  ;;  %v17691_v18 = vld [vmem:[#allocation5 + $0x13e8] ss:$16 sps:$4 sm:$0xff]  }
 0x277   :  { %7635 = vmatprep.mubr.bf16.mxu0 %v14179_v32  ;;  %8803 = vmatprep.mubr.bf16.mxu1 %v14179_v32  ;;  %v17622_v32 = vld [vmem:[#allocation5 + $0x1280] ss:$16 sps:$4 sm:$0xff]  }
 0x278   :  { %v17688_v17 = vld [vmem:[#allocation5 + $0x13e0] ss:$16 sps:$4 sm:$0xff]  }
 0x279   :  { %7618 = vmatpush1.bf16.msra.mxu0 %v17544_v33  ;;  %8786 = vmatpush1.bf16.msra.mxu1 %v17547_v34  ;;  %v17625_v33 = vld [vmem:[#allocation5 + $0x1288] ss:$16 sps:$4 sm:$0xff]   ;;  %v17630_v34 = vld [vmem:[#allocation5 + $0x12a4] ss:$16 sps:$4 sm:$0xff]  }
 0x27a   :  { %7619 = vmatprep.subr.bf16.mxu0 %v17552_v35  ;;  %8787 = vmatprep.subr.bf16.mxu1 %v17555_v36  ;;  %v17633_v35 = vld [vmem:[#allocation5 + $0x12ac] ss:$16 sps:$4 sm:$0xff]   ;;  %v17628_v36 = vld [vmem:[#allocation5 + $0x12a0] ss:$16 sps:$4 sm:$0xff]  }
 0x27d   :  { %7620 = vmatpush1.bf16.msra.mxu0 %v17550_v37  ;;  %8788 = vmatpush1.bf16.msra.mxu1 %v17553_v38  ;;  %v17631_v37 = vld [vmem:[#allocation5 + $0x12a8] ss:$16 sps:$4 sm:$0xff]   ;;  %v14275_v38 = vcombine.high %v189_v29, %v205_v30 }
 0x27e   :  { %7621 = vmatprep.subr.bf16.mxu0 %v17558_v39  ;;  %8789 = vmatprep.subr.bf16.mxu1 %v17561_v40  ;;  %v17636_v39 = vld [vmem:[#allocation5 + $0x12c4] ss:$16 sps:$4 sm:$0xff]   ;;  %v17639_v40 = vld [vmem:[#allocation5 + $0x12cc] ss:$16 sps:$4 sm:$0xff]  }
 0x281   :  { %7622 = vmatpush1.bf16.msra.mxu0 %v17556_v41  ;;  %8790 = vmatpush1.bf16.msra.mxu1 %v17559_v42  ;;  %v18580_v41 = vld [vmem:[#allocation2 + $0x48] sm:$0xff] }
 0x282   :  { %7623 = vmatprep.subr.bf16.mxu0 %v17564_v43  ;;  %8791 = vmatprep.subr.bf16.mxu1 %v17567_v44  ;;  %v18582_v42 = vld [vmem:[#allocation2 + $0xc8] sm:$0xff]  ;;  %v14274_v43 = vcombine.low %v189_v29, %v205_v30  ;;  %v17634_v44 = vld [vmem:[#allocation5 + $0x12c0] ss:$16 sps:$4 sm:$0xff]  }
 0x283   :  { %v17700_v29 = vld [vmem:[#allocation5 + $0x1420] ss:$16 sps:$4 sm:$0xff]   ;;  %v17703_v30 = vld [vmem:[#allocation5 + $0x1428] ss:$16 sps:$4 sm:$0xff]  }
 0x285   :  { %7624 = vmatpush1.bf16.msra.mxu0 %v17562_v45  ;;  %8792 = vmatpush1.bf16.msra.mxu1 %v17565_v46  ;;  %v17637_v45 = vld [vmem:[#allocation5 + $0x12c8] ss:$16 sps:$4 sm:$0xff]   ;;  %v17642_v46 = vld [vmem:[#allocation5 + $0x12e4] ss:$16 sps:$4 sm:$0xff]  }
 0x286   :  { %7625 = vmatprep.subr.bf16.mxu0 %v17570_v47  ;;  %8793 = vmatprep.subr.bf16.mxu1 %v17573_v48  ;;  %v17645_v47 = vld [vmem:[#allocation5 + $0x12ec] ss:$16 sps:$4 sm:$0xff]   ;;  %v14181_v48 = vcombine.high %v18580_v41, %v18582_v42 }
 0x289   :  { %7626 = vmatpush1.bf16.msra.mxu0 %v17568_v49  ;;  %8794 = vmatpush1.bf16.msra.mxu1 %v17571_v50  ;;  %v17640_v49 = vld [vmem:[#allocation5 + $0x12e0] ss:$16 sps:$4 sm:$0xff]   ;;  %v17643_v50 = vld [vmem:[#allocation5 + $0x12e8] ss:$16 sps:$4 sm:$0xff]  }
 0x28a   :  { %7627 = vmatprep.subr.bf16.mxu0 %v17576_v51  ;;  %8795 = vmatprep.subr.bf16.mxu1 %v17579_v52  ;;  %v17648_v51 = vld [vmem:[#allocation5 + $0x1304] ss:$16 sps:$4 sm:$0xff]   ;;  %v17651_v52 = vld [vmem:[#allocation5 + $0x130c] ss:$16 sps:$4 sm:$0xff]  }
 0x28d   :  { %7628 = vmatpush1.bf16.msra.mxu0 %v17574_v53  ;;  %8796 = vmatpush1.bf16.msra.mxu1 %v17577_v54  ;;  %v17646_v53 = vld [vmem:[#allocation5 + $0x1300] ss:$16 sps:$4 sm:$0xff]   ;;  %v17649_v54 = vld [vmem:[#allocation5 + $0x1308] ss:$16 sps:$4 sm:$0xff]  }
 0x28e   :  { %7629 = vmatprep.subr.bf16.mxu0 %v17582_v55  ;;  %8797 = vmatprep.subr.bf16.mxu1 %v17585_v56  ;;  %v17654_v55 = vld [vmem:[#allocation5 + $0x1324] ss:$16 sps:$4 sm:$0xff]   ;;  %v17657_v56 = vld [vmem:[#allocation5 + $0x132c] ss:$16 sps:$4 sm:$0xff]  }
 0x291   :  { %7630 = vmatpush1.bf16.msra.mxu0 %v17580_v57  ;;  %8798 = vmatpush1.bf16.msra.mxu1 %v17583_v58  ;;  %v17652_v57 = vld [vmem:[#allocation5 + $0x1320] ss:$16 sps:$4 sm:$0xff]   ;;  %v17655_v58 = vld [vmem:[#allocation5 + $0x1328] ss:$16 sps:$4 sm:$0xff]  }
 0x292   :  { %7631 = vmatprep.subr.bf16.mxu0 %v17588_v59  ;;  %8799 = vmatprep.subr.bf16.mxu1 %v17591_v60  ;;  %v17660_v59 = vld [vmem:[#allocation5 + $0x1344] ss:$16 sps:$4 sm:$0xff]   ;;  %v17663_v60 = vld [vmem:[#allocation5 + $0x134c] ss:$16 sps:$4 sm:$0xff]  }
 0x295   :  { %7632 = vmatpush1.bf16.msra.mxu0 %v17586_v61  ;;  %8800 = vmatpush1.bf16.msra.mxu1 %v17589_v62  ;;  %v17658_v61 = vld [vmem:[#allocation5 + $0x1340] ss:$16 sps:$4 sm:$0xff]   ;;  %v17661_v62 = vld [vmem:[#allocation5 + $0x1348] ss:$16 sps:$4 sm:$0xff]  }
 0x296   :  { %7633 = vmatprep.subr.bf16.mxu0 %v17594_v63  ;;  %8801 = vmatprep.subr.bf16.mxu1 %v17597_v0  ;;  %v17666_v63 = vld [vmem:[#allocation5 + $0x1364] ss:$16 sps:$4 sm:$0xff]   ;;  %v17669_v0 = vld [vmem:[#allocation5 + $0x136c] ss:$16 sps:$4 sm:$0xff]  }
 0x299   :  { %7634 = vmatpush1.bf16.msra.mxu0 %v17592_v1  ;;  %8802 = vmatpush1.bf16.msra.mxu1 %v17595_v2  ;;  %v17664_v1 = vld [vmem:[#allocation5 + $0x1360] ss:$16 sps:$4 sm:$0xff]   ;;  %v17667_v2 = vld [vmem:[#allocation5 + $0x1368] ss:$16 sps:$4 sm:$0xff]  }
 0x29a   :  { %7676 = vmatprep.subr.bf16.mxu0 %v17600_v3  ;;  %8844 = vmatprep.subr.bf16.mxu1 %v17603_v4  ;;  %v17672_v3 = vld [vmem:[#allocation5 + $0x1384] ss:$16 sps:$4 sm:$0xff]   ;;  %v17675_v4 = vld [vmem:[#allocation5 + $0x138c] ss:$16 sps:$4 sm:$0xff]  }
 0x29c   :  { %7636 = vmatmul.mubr.bf16.vlgmr.msra.gmra.mrb[0].mxu0 %v14178_v7  ;;  %8804 = vmatmul.mubr.bf16.vlgmr.msra.gmra.mrb[0].mxu1 %v14178_v7  ;;  %v17678_v7 = vld [vmem:[#allocation5 + $0x13a4] ss:$16 sps:$4 sm:$0xff]  }
 0x29d   :  { %7677 = vmatpush1.bf16.msra.mxu0 %v17598_v8  ;;  %8845 = vmatpush1.bf16.msra.mxu1 %v17601_v9  ;;  %v17681_v8 = vld [vmem:[#allocation5 + $0x13ac] ss:$16 sps:$4 sm:$0xff]   ;;  %v17676_v9 = vld [vmem:[#allocation5 + $0x13a0] ss:$16 sps:$4 sm:$0xff]  }
 0x29e   :  { %7678 = vmatprep.subr.bf16.mxu0 %v17606_v10  ;;  %8846 = vmatprep.subr.bf16.mxu1 %v17609_v11  ;;  %v17679_v10 = vld [vmem:[#allocation5 + $0x13a8] ss:$16 sps:$4 sm:$0xff]   ;;  %v17684_v11 = vld [vmem:[#allocation5 + $0x13c4] ss:$16 sps:$4 sm:$0xff]  }
 0x29f   :  { %7645 = vmatprep.mubr.bf16.mxu0 %v14211_v14  ;;  %8813 = vmatprep.mubr.bf16.mxu1 %v14211_v14  ;;  %v17685_v14 = vld [vmem:[#allocation5 + $0x13c8] ss:$16 sps:$4 sm:$0xff]  }
 0x2a1   :  { %7679 = vmatpush1.bf16.msra.mxu0 %v17604_v12  ;;  %8847 = vmatpush1.bf16.msra.mxu1 %v17607_v13  ;;  %v17687_v12 = vld [vmem:[#allocation5 + $0x13cc] ss:$16 sps:$4 sm:$0xff]   ;;  %v17682_v13 = vld [vmem:[#allocation5 + $0x13c0] ss:$16 sps:$4 sm:$0xff]  }
 0x2a2   :  { %7680 = vmatprep.subr.bf16.mxu0 %v17612_v15  ;;  %8848 = vmatprep.subr.bf16.mxu1 %v17615_v16  ;;  %v17690_v15 = vld [vmem:[#allocation5 + $0x13e4] ss:$16 sps:$4 sm:$0xff]   ;;  %v17693_v16 = vld [vmem:[#allocation5 + $0x13ec] ss:$16 sps:$4 sm:$0xff]  }
 0x2a4   :  { %7646 = vmatmul.mubr.bf16.gmra.mrb[4].mxu0 %v14210_v19  ;;  %8814 = vmatmul.mubr.bf16.gmra.mrb[4].mxu1 %v14210_v19  ;;  %v17696_v19 = vld [vmem:[#allocation5 + $0x1404] ss:$16 sps:$4 sm:$0xff]  }
 0x2a5   :  { %7681 = vmatpush1.bf16.msra.mxu0 %v17610_v20  ;;  %8849 = vmatpush1.bf16.msra.mxu1 %v17613_v21  ;;  %v17699_v20 = vld [vmem:[#allocation5 + $0x140c] ss:$16 sps:$4 sm:$0xff]   ;;  %v14180_v21 = vcombine.low %v18580_v41, %v18582_v42  ;;  %v17712_v41 = vld [vmem:[#allocation5 + $0x1460] ss:$16 sps:$4 sm:$0xff]   ;;  %v17715_v42 = vld [vmem:[#allocation5 + $0x1468] ss:$16 sps:$4 sm:$0xff]  }
 0x2a6   :  { %7682 = vmatprep.subr.bf16.mxu0 %v17618_v22  ;;  %8850 = vmatprep.subr.bf16.mxu1 %v17621_v23  ;;  %v126_v22 = vld [vmem:[#allocation2 + $0x148] sm:$0xff] }
 0x2a7   :  { %7655 = vmatprep.mubr.bf16.mxu0 %v14243_v26  ;;  %8823 = vmatprep.mubr.bf16.mxu1 %v14243_v26  ;;  %v142_v23 = vld [vmem:[#allocation2 + $0x1c8] sm:$0xff]  ;;  %v17702_v26 = vld [vmem:[#allocation5 + $0x1424] ss:$16 sps:$4 sm:$0xff]  }
 0x2a9   :  { %7683 = vmatpush1.bf16.msra.mxu0 %v17616_v24  ;;  %8851 = vmatpush1.bf16.msra.mxu1 %v17619_v25  ;;  %v17694_v24 = vld [vmem:[#allocation5 + $0x1400] ss:$16 sps:$4 sm:$0xff]   ;;  %v17697_v25 = vld [vmem:[#allocation5 + $0x1408] ss:$16 sps:$4 sm:$0xff]  }
 0x2aa   :  { %7684 = vmatprep.subr.bf16.mxu0 %v17624_v27  ;;  %8852 = vmatprep.subr.bf16.mxu1 %v17627_v28  ;;  %v17705_v27 = vld [vmem:[#allocation5 + $0x142c] ss:$16 sps:$4 sm:$0xff]   ;;  %v14213_v28 = vcombine.high %v126_v22, %v142_v23 }
 0x2ac   :  { %7656 = vmatmul.mubr.bf16.gmra.mrb[8].mxu0 %v14242_v31  ;;  %8824 = vmatmul.mubr.bf16.gmra.mrb[8].mxu1 %v14242_v31  ;;  %v17708_v31 = vld [vmem:[#allocation5 + $0x1444] ss:$16 sps:$4 sm:$0xff]  }
 0x2ad   :  { %7685 = vmatpush1.bf16.msra.mxu0 %v17622_v32  ;;  %8853 = vmatpush1.bf16.msra.mxu1 %v17625_v33  ;;  %v17711_v32 = vld [vmem:[#allocation5 + $0x144c] ss:$16 sps:$4 sm:$0xff]   ;;  %v14212_v33 = vcombine.low %v126_v22, %v142_v23  ;;  %v17769_v22 = vld [vmem:[#allocation5 + $0x1588] ss:$16 sps:$4 sm:$0xff]   ;;  %v17774_v23 = vld [vmem:[#allocation5 + $0x15a4] ss:$16 sps:$4 sm:$0xff]  }
 0x2ae   :  { %7686 = vmatprep.subr.bf16.mxu0 %v17630_v34  ;;  %8854 = vmatprep.subr.bf16.mxu1 %v17633_v35  ;;  %v158_v34 = vld [vmem:[#allocation2 + $0x248] sm:$0xff] }
 0x2af   :  { %7665 = vmatprep.mubr.bf16.mxu0 %v14275_v38  ;;  %8833 = vmatprep.mubr.bf16.mxu1 %v14275_v38  ;;  %v174_v35 = vld [vmem:[#allocation2 + $0x2c8] sm:$0xff]  ;;  %v17714_v38 = vld [vmem:[#allocation5 + $0x1464] ss:$16 sps:$4 sm:$0xff]  }
 0x2b1   :  { %7687 = vmatpush1.bf16.msra.mxu0 %v17628_v36  ;;  %8855 = vmatpush1.bf16.msra.mxu1 %v17631_v37  ;;  %v17706_v36 = vld [vmem:[#allocation5 + $0x1440] ss:$16 sps:$4 sm:$0xff]   ;;  %v17709_v37 = vld [vmem:[#allocation5 + $0x1448] ss:$16 sps:$4 sm:$0xff]  }
 0x2b2   :  { %7688 = vmatprep.subr.bf16.mxu0 %v17636_v39  ;;  %8856 = vmatprep.subr.bf16.mxu1 %v17639_v40  ;;  %v17717_v39 = vld [vmem:[#allocation5 + $0x146c] ss:$16 sps:$4 sm:$0xff]   ;;  %v14245_v40 = vcombine.high %v158_v34, %v174_v35 }
 0x2b4   :  { %7666 = vmatmul.mubr.bf16.gmra.mrb[12].mxu0 %v14274_v43  ;;  %8834 = vmatmul.mubr.bf16.gmra.mrb[12].mxu1 %v14274_v43  ;;  %v17720_v43 = vld [vmem:[#allocation5 + $0x1484] ss:$16 sps:$4 sm:$0xff]  }
 0x2b5   :  { %7689 = vmatpush1.bf16.msra.mxu0 %v17634_v44  ;;  %8857 = vmatpush1.bf16.msra.mxu1 %v17637_v45  ;;  %v17723_v44 = vld [vmem:[#allocation5 + $0x148c] ss:$16 sps:$4 sm:$0xff]   ;;  %v14244_v45 = vcombine.low %v158_v34, %v174_v35  ;;  %v17787_v34 = vld [vmem:[#allocation5 + $0x15e8] ss:$16 sps:$4 sm:$0xff]   ;;  %v17792_v35 = vld [vmem:[#allocation5 + $0x1604] ss:$16 sps:$4 sm:$0xff]  }
 0x2b6   :  { %7690 = vmatprep.subr.bf16.mxu0 %v17642_v46  ;;  %8858 = vmatprep.subr.bf16.mxu1 %v17645_v47  ;;  %v190_v46 = vld [vmem:[#allocation2 + $0x348] sm:$0xff] }
 0x2b7   :  { %7708 = vmatprep.mubr.bf16.mxu0 %v14181_v48  ;;  %8876 = vmatprep.mubr.bf16.mxu1 %v14181_v48  ;;  %v206_v47 = vld [vmem:[#allocation2 + $0x3c8] sm:$0xff]  ;;  %v17718_v48 = vld [vmem:[#allocation5 + $0x1480] ss:$16 sps:$4 sm:$0xff]  }
 0x2b9   :  { %7691 = vmatpush1.bf16.msra.mxu0 %v17640_v49  ;;  %8859 = vmatpush1.bf16.msra.mxu1 %v17643_v50  ;;  %v17721_v49 = vld [vmem:[#allocation5 + $0x1488] ss:$16 sps:$4 sm:$0xff]   ;;  %v17726_v50 = vld [vmem:[#allocation5 + $0x14a4] ss:$16 sps:$4 sm:$0xff]  }
 0x2ba   :  { %7692 = vmatprep.subr.bf16.mxu0 %v17648_v51  ;;  %8860 = vmatprep.subr.bf16.mxu1 %v17651_v52  ;;  %v17729_v51 = vld [vmem:[#allocation5 + $0x14ac] ss:$16 sps:$4 sm:$0xff]   ;;  %v14277_v52 = vcombine.high %v190_v46, %v206_v47 }
 0x2bd   :  { %7693 = vmatpush1.bf16.msra.mxu0 %v17646_v53  ;;  %8861 = vmatpush1.bf16.msra.mxu1 %v17649_v54  ;;  %v17724_v53 = vld [vmem:[#allocation5 + $0x14a0] ss:$16 sps:$4 sm:$0xff]   ;;  %v17727_v54 = vld [vmem:[#allocation5 + $0x14a8] ss:$16 sps:$4 sm:$0xff]  }
 0x2be   :  { %7694 = vmatprep.subr.bf16.mxu0 %v17654_v55  ;;  %8862 = vmatprep.subr.bf16.mxu1 %v17657_v56  ;;  %v17732_v55 = vld [vmem:[#allocation5 + $0x14c4] ss:$16 sps:$4 sm:$0xff]   ;;  %v17735_v56 = vld [vmem:[#allocation5 + $0x14cc] ss:$16 sps:$4 sm:$0xff]  }
 0x2c1   :  { %7695 = vmatpush1.bf16.msra.mxu0 %v17652_v57  ;;  %8863 = vmatpush1.bf16.msra.mxu1 %v17655_v58  ;;  %v14276_v57 = vcombine.low %v190_v46, %v206_v47  ;;  %v18588_v58 = vld [vmem:[#allocation2 + $0x50] sm:$0xff]  ;;  %v17799_v46 = vld [vmem:[#allocation5 + $0x1628] ss:$16 sps:$4 sm:$0xff]  }
 0x2c2   :  { %7696 = vmatprep.subr.bf16.mxu0 %v17660_v59  ;;  %8864 = vmatprep.subr.bf16.mxu1 %v17663_v60  ;;  %v18590_v59 = vld [vmem:[#allocation2 + $0xd0] sm:$0xff] }
 0x2c3   :  { %v17730_v60 = vld [vmem:[#allocation5 + $0x14c0] ss:$16 sps:$4 sm:$0xff]   ;;  %v17804_v47 = vld [vmem:[#allocation5 + $0x1644] ss:$16 sps:$4 sm:$0xff]  }
 0x2c5   :  { %7697 = vmatpush1.bf16.msra.mxu0 %v17658_v61  ;;  %8865 = vmatpush1.bf16.msra.mxu1 %v17661_v62  ;;  %v17733_v61 = vld [vmem:[#allocation5 + $0x14c8] ss:$16 sps:$4 sm:$0xff]   ;;  %v17738_v62 = vld [vmem:[#allocation5 + $0x14e4] ss:$16 sps:$4 sm:$0xff]  }
 0x2c6   :  { %7698 = vmatprep.subr.bf16.mxu0 %v17666_v63  ;;  %8866 = vmatprep.subr.bf16.mxu1 %v17669_v0  ;;  %v17741_v63 = vld [vmem:[#allocation5 + $0x14ec] ss:$16 sps:$4 sm:$0xff]   ;;  %v14183_v0 = vcombine.high %v18588_v58, %v18590_v59 }
 0x2c9   :  { %7699 = vmatpush1.bf16.msra.mxu0 %v17664_v1  ;;  %8867 = vmatpush1.bf16.msra.mxu1 %v17667_v2  ;;  %v17736_v1 = vld [vmem:[#allocation5 + $0x14e0] ss:$16 sps:$4 sm:$0xff]   ;;  %v17739_v2 = vld [vmem:[#allocation5 + $0x14e8] ss:$16 sps:$4 sm:$0xff]  }
 0x2ca   :  { %7700 = vmatprep.subr.bf16.mxu0 %v17672_v3  ;;  %8868 = vmatprep.subr.bf16.mxu1 %v17675_v4  ;;  %v17744_v3 = vld [vmem:[#allocation5 + $0x1504] ss:$16 sps:$4 sm:$0xff]   ;;  %v17747_v4 = vld [vmem:[#allocation5 + $0x150c] ss:$16 sps:$4 sm:$0xff]  }
 0x2cd   :  { %7701 = vmatpush1.bf16.msra.mxu0 %v17670_v5  ;;  %8869 = vmatpush1.bf16.msra.mxu1 %v17673_v6  ;;  %v17742_v5 = vld [vmem:[#allocation5 + $0x1500] ss:$16 sps:$4 sm:$0xff]   ;;  %v17745_v6 = vld [vmem:[#allocation5 + $0x1508] ss:$16 sps:$4 sm:$0xff]  }
 0x2ce   :  { %7702 = vmatprep.subr.bf16.mxu0 %v17678_v7  ;;  %8870 = vmatprep.subr.bf16.mxu1 %v17681_v8  ;;  %v17750_v7 = vld [vmem:[#allocation5 + $0x1524] ss:$16 sps:$4 sm:$0xff]   ;;  %v17753_v8 = vld [vmem:[#allocation5 + $0x152c] ss:$16 sps:$4 sm:$0xff]  }
 0x2d1   :  { %7703 = vmatpush1.bf16.msra.mxu0 %v17676_v9  ;;  %8871 = vmatpush1.bf16.msra.mxu1 %v17679_v10  ;;  %v17748_v9 = vld [vmem:[#allocation5 + $0x1520] ss:$16 sps:$4 sm:$0xff]   ;;  %v17751_v10 = vld [vmem:[#allocation5 + $0x1528] ss:$16 sps:$4 sm:$0xff]  }
 0x2d2   :  { %7704 = vmatprep.subr.bf16.mxu0 %v17684_v11  ;;  %8872 = vmatprep.subr.bf16.mxu1 %v17687_v12  ;;  %v17756_v11 = vld [vmem:[#allocation5 + $0x1544] ss:$16 sps:$4 sm:$0xff]   ;;  %v17759_v12 = vld [vmem:[#allocation5 + $0x154c] ss:$16 sps:$4 sm:$0xff]  }
 0x2d5   :  { %7705 = vmatpush1.bf16.msra.mxu0 %v17682_v13  ;;  %8873 = vmatpush1.bf16.msra.mxu1 %v17685_v14  ;;  %v17754_v13 = vld [vmem:[#allocation5 + $0x1540] ss:$16 sps:$4 sm:$0xff]   ;;  %v17757_v14 = vld [vmem:[#allocation5 + $0x1548] ss:$16 sps:$4 sm:$0xff]  }
 0x2d6   :  { %7706 = vmatprep.subr.bf16.mxu0 %v17690_v15  ;;  %8874 = vmatprep.subr.bf16.mxu1 %v17693_v16  ;;  %v17762_v15 = vld [vmem:[#allocation5 + $0x1564] ss:$16 sps:$4 sm:$0xff]   ;;  %v17765_v16 = vld [vmem:[#allocation5 + $0x156c] ss:$16 sps:$4 sm:$0xff]  }
 0x2d9   :  { %7707 = vmatpush1.bf16.msra.mxu0 %v17688_v17  ;;  %8875 = vmatpush1.bf16.msra.mxu1 %v17691_v18  ;;  %v17760_v17 = vld [vmem:[#allocation5 + $0x1560] ss:$16 sps:$4 sm:$0xff]   ;;  %v17763_v18 = vld [vmem:[#allocation5 + $0x1568] ss:$16 sps:$4 sm:$0xff]  }
 0x2da   :  { %7749 = vmatprep.subr.bf16.mxu0 %v17696_v19  ;;  %8917 = vmatprep.subr.bf16.mxu1 %v17699_v20  ;;  %v17768_v19 = vld [vmem:[#allocation5 + $0x1584] ss:$16 sps:$4 sm:$0xff]   ;;  %v17771_v20 = vld [vmem:[#allocation5 + $0x158c] ss:$16 sps:$4 sm:$0xff]  }
 0x2dc   :  { %7709 = vmatmul.mubr.bf16.vlgmr.msra.gmra.mrb[0].mxu0 %v14180_v21  ;;  %8877 = vmatmul.mubr.bf16.vlgmr.msra.gmra.mrb[0].mxu1 %v14180_v21  ;;  %v17766_v21 = vld [vmem:[#allocation5 + $0x1580] ss:$16 sps:$4 sm:$0xff]  }
 0x2dd   :  { %7750 = vmatpush1.bf16.msra.mxu0 %v17694_v24  ;;  %8918 = vmatpush1.bf16.msra.mxu1 %v17697_v25  ;;  %v17777_v24 = vld [vmem:[#allocation5 + $0x15ac] ss:$16 sps:$4 sm:$0xff]   ;;  %v17772_v25 = vld [vmem:[#allocation5 + $0x15a0] ss:$16 sps:$4 sm:$0xff]  }
 0x2de   :  { %7751 = vmatprep.subr.bf16.mxu0 %v17702_v26  ;;  %8919 = vmatprep.subr.bf16.mxu1 %v17705_v27  ;;  %v17775_v26 = vld [vmem:[#allocation5 + $0x15a8] ss:$16 sps:$4 sm:$0xff]   ;;  %v17780_v27 = vld [vmem:[#allocation5 + $0x15c4] ss:$16 sps:$4 sm:$0xff]  }
 0x2df   :  { %7718 = vmatprep.mubr.bf16.mxu0 %v14213_v28  ;;  %8886 = vmatprep.mubr.bf16.mxu1 %v14213_v28  ;;  %v17783_v28 = vld [vmem:[#allocation5 + $0x15cc] ss:$16 sps:$4 sm:$0xff]  }
 0x2e1   :  { %7752 = vmatpush1.bf16.msra.mxu0 %v17700_v29  ;;  %8920 = vmatpush1.bf16.msra.mxu1 %v17703_v30  ;;  %v17778_v29 = vld [vmem:[#allocation5 + $0x15c0] ss:$16 sps:$4 sm:$0xff]   ;;  %v17781_v30 = vld [vmem:[#allocation5 + $0x15c8] ss:$16 sps:$4 sm:$0xff]  }
 0x2e2   :  { %7753 = vmatprep.subr.bf16.mxu0 %v17708_v31  ;;  %8921 = vmatprep.subr.bf16.mxu1 %v17711_v32  ;;  %v17786_v31 = vld [vmem:[#allocation5 + $0x15e4] ss:$16 sps:$4 sm:$0xff]   ;;  %v17789_v32 = vld [vmem:[#allocation5 + $0x15ec] ss:$16 sps:$4 sm:$0xff]  }
 0x2e4   :  { %7719 = vmatmul.mubr.bf16.gmra.mrb[4].mxu0 %v14212_v33  ;;  %8887 = vmatmul.mubr.bf16.gmra.mrb[4].mxu1 %v14212_v33  ;;  %v17784_v33 = vld [vmem:[#allocation5 + $0x15e0] ss:$16 sps:$4 sm:$0xff]  }
 0x2e5   :  { %7754 = vmatpush1.bf16.msra.mxu0 %v17706_v36  ;;  %8922 = vmatpush1.bf16.msra.mxu1 %v17709_v37  ;;  %v17795_v36 = vld [vmem:[#allocation5 + $0x160c] ss:$16 sps:$4 sm:$0xff]   ;;  %v14182_v37 = vcombine.low %v18588_v58, %v18590_v59  ;;  %v17811_v58 = vld [vmem:[#allocation5 + $0x1668] ss:$16 sps:$4 sm:$0xff]   ;;  %v17816_v59 = vld [vmem:[#allocation5 + $0x1684] ss:$16 sps:$4 sm:$0xff]  }
 0x2e6   :  { %7755 = vmatprep.subr.bf16.mxu0 %v17714_v38  ;;  %8923 = vmatprep.subr.bf16.mxu1 %v17717_v39  ;;  %v127_v38 = vld [vmem:[#allocation2 + $0x150] sm:$0xff] }
 0x2e7   :  { %7728 = vmatprep.mubr.bf16.mxu0 %v14245_v40  ;;  %8896 = vmatprep.mubr.bf16.mxu1 %v14245_v40  ;;  %v143_v39 = vld [vmem:[#allocation2 + $0x1d0] sm:$0xff] }
 0x2e8   :  { %v17790_v40 = vld [vmem:[#allocation5 + $0x1600] ss:$16 sps:$4 sm:$0xff]  }
 0x2e9   :  { %7756 = vmatpush1.bf16.msra.mxu0 %v17712_v41  ;;  %8924 = vmatpush1.bf16.msra.mxu1 %v17715_v42  ;;  %v17793_v41 = vld [vmem:[#allocation5 + $0x1608] ss:$16 sps:$4 sm:$0xff]   ;;  %v17798_v42 = vld [vmem:[#allocation5 + $0x1624] ss:$16 sps:$4 sm:$0xff]  }
 0x2ea   :  { %7757 = vmatprep.subr.bf16.mxu0 %v17720_v43  ;;  %8925 = vmatprep.subr.bf16.mxu1 %v17723_v44  ;;  %v17801_v43 = vld [vmem:[#allocation5 + $0x162c] ss:$16 sps:$4 sm:$0xff]   ;;  %v14215_v44 = vcombine.high %v127_v38, %v143_v39 }
 0x2ec   :  { %7729 = vmatmul.mubr.bf16.gmra.mrb[8].mxu0 %v14244_v45  ;;  %8897 = vmatmul.mubr.bf16.gmra.mrb[8].mxu1 %v14244_v45  ;;  %v17796_v45 = vld [vmem:[#allocation5 + $0x1620] ss:$16 sps:$4 sm:$0xff]  }
 0x2ed   :  { %7758 = vmatpush1.bf16.msra.mxu0 %v17718_v48  ;;  %8926 = vmatpush1.bf16.msra.mxu1 %v17721_v49  ;;  %v17807_v48 = vld [vmem:[#allocation5 + $0x164c] ss:$16 sps:$4 sm:$0xff]   ;;  %v14214_v49 = vcombine.low %v127_v38, %v143_v39  ;;  %v17865_v38 = vld [vmem:[#allocation5 + $0x1788] ss:$16 sps:$4 sm:$0xff]   ;;  %v17870_v39 = vld [vmem:[#allocation5 + $0x17a4] ss:$16 sps:$4 sm:$0xff]  }
 0x2ee   :  { %7759 = vmatprep.subr.bf16.mxu0 %v17726_v50  ;;  %8927 = vmatprep.subr.bf16.mxu1 %v17729_v51  ;;  %v159_v50 = vld [vmem:[#allocation2 + $0x250] sm:$0xff] }
 0x2ef   :  { %7738 = vmatprep.mubr.bf16.mxu0 %v14277_v52  ;;  %8906 = vmatprep.mubr.bf16.mxu1 %v14277_v52  ;;  %v175_v51 = vld [vmem:[#allocation2 + $0x2d0] sm:$0xff] }
 0x2f0   :  { %v17802_v52 = vld [vmem:[#allocation5 + $0x1640] ss:$16 sps:$4 sm:$0xff]  }
 0x2f1   :  { %7760 = vmatpush1.bf16.msra.mxu0 %v17724_v53  ;;  %8928 = vmatpush1.bf16.msra.mxu1 %v17727_v54  ;;  %v17805_v53 = vld [vmem:[#allocation5 + $0x1648] ss:$16 sps:$4 sm:$0xff]   ;;  %v17810_v54 = vld [vmem:[#allocation5 + $0x1664] ss:$16 sps:$4 sm:$0xff]  }
 0x2f2   :  { %7761 = vmatprep.subr.bf16.mxu0 %v17732_v55  ;;  %8929 = vmatprep.subr.bf16.mxu1 %v17735_v56  ;;  %v17813_v55 = vld [vmem:[#allocation5 + $0x166c] ss:$16 sps:$4 sm:$0xff]   ;;  %v14247_v56 = vcombine.high %v159_v50, %v175_v51 }
 0x2f4   :  { %7739 = vmatmul.mubr.bf16.gmra.mrb[12].mxu0 %v14276_v57  ;;  %8907 = vmatmul.mubr.bf16.gmra.mrb[12].mxu1 %v14276_v57  ;;  %v17808_v57 = vld [vmem:[#allocation5 + $0x1660] ss:$16 sps:$4 sm:$0xff]  }
 0x2f5   :  { %7762 = vmatpush1.bf16.msra.mxu0 %v17730_v60  ;;  %8930 = vmatpush1.bf16.msra.mxu1 %v17733_v61  ;;  %v17819_v60 = vld [vmem:[#allocation5 + $0x168c] ss:$16 sps:$4 sm:$0xff]   ;;  %v14246_v61 = vcombine.low %v159_v50, %v175_v51  ;;  %v17883_v50 = vld [vmem:[#allocation5 + $0x17e8] ss:$16 sps:$4 sm:$0xff]   ;;  %v17888_v51 = vld [vmem:[#allocation5 + $0x1804] ss:$16 sps:$4 sm:$0xff]  }
 0x2f6   :  { %7763 = vmatprep.subr.bf16.mxu0 %v17738_v62  ;;  %8931 = vmatprep.subr.bf16.mxu1 %v17741_v63  ;;  %v191_v62 = vld [vmem:[#allocation2 + $0x350] sm:$0xff] }
 0x2f7   :  { %7781 = vmatprep.mubr.bf16.mxu0 %v14183_v0  ;;  %8949 = vmatprep.mubr.bf16.mxu1 %v14183_v0  ;;  %v207_v63 = vld [vmem:[#allocation2 + $0x3d0] sm:$0xff] }
 0x2f8   :  { %v17814_v0 = vld [vmem:[#allocation5 + $0x1680] ss:$16 sps:$4 sm:$0xff]  }
 0x2f9   :  { %7764 = vmatpush1.bf16.msra.mxu0 %v17736_v1  ;;  %8932 = vmatpush1.bf16.msra.mxu1 %v17739_v2  ;;  %v17817_v1 = vld [vmem:[#allocation5 + $0x1688] ss:$16 sps:$4 sm:$0xff]   ;;  %v17822_v2 = vld [vmem:[#allocation5 + $0x16a4] ss:$16 sps:$4 sm:$0xff]  }
 0x2fa   :  { %7765 = vmatprep.subr.bf16.mxu0 %v17744_v3  ;;  %8933 = vmatprep.subr.bf16.mxu1 %v17747_v4  ;;  %v17825_v3 = vld [vmem:[#allocation5 + $0x16ac] ss:$16 sps:$4 sm:$0xff]   ;;  %v14279_v4 = vcombine.high %v191_v62, %v207_v63 }
 0x2fd   :  { %7766 = vmatpush1.bf16.msra.mxu0 %v17742_v5  ;;  %8934 = vmatpush1.bf16.msra.mxu1 %v17745_v6  ;;  %v17820_v5 = vld [vmem:[#allocation5 + $0x16a0] ss:$16 sps:$4 sm:$0xff]   ;;  %v17823_v6 = vld [vmem:[#allocation5 + $0x16a8] ss:$16 sps:$4 sm:$0xff]  }
 0x2fe   :  { %7767 = vmatprep.subr.bf16.mxu0 %v17750_v7  ;;  %8935 = vmatprep.subr.bf16.mxu1 %v17753_v8  ;;  %v17828_v7 = vld [vmem:[#allocation5 + $0x16c4] ss:$16 sps:$4 sm:$0xff]   ;;  %v17831_v8 = vld [vmem:[#allocation5 + $0x16cc] ss:$16 sps:$4 sm:$0xff]  }
 0x301   :  { %7768 = vmatpush1.bf16.msra.mxu0 %v17748_v9  ;;  %8936 = vmatpush1.bf16.msra.mxu1 %v17751_v10  ;;  %v14278_v9 = vcombine.low %v191_v62, %v207_v63  ;;  %v18596_v10 = vld [vmem:[#allocation2 + $0x58] sm:$0xff]  ;;  %v17900_v63 = vld [vmem:[#allocation5 + $0x1844] ss:$16 sps:$4 sm:$0xff]  }
 0x302   :  { %7769 = vmatprep.subr.bf16.mxu0 %v17756_v11  ;;  %8937 = vmatprep.subr.bf16.mxu1 %v17759_v12  ;;  %v18598_v11 = vld [vmem:[#allocation2 + $0xd8] sm:$0xff]  ;;  %v17826_v12 = vld [vmem:[#allocation5 + $0x16c0] ss:$16 sps:$4 sm:$0xff]  }
 0x303   :  { %v17895_v62 = vld [vmem:[#allocation5 + $0x1828] ss:$16 sps:$4 sm:$0xff]  }
 0x305   :  { %7770 = vmatpush1.bf16.msra.mxu0 %v17754_v13  ;;  %8938 = vmatpush1.bf16.msra.mxu1 %v17757_v14  ;;  %v17829_v13 = vld [vmem:[#allocation5 + $0x16c8] ss:$16 sps:$4 sm:$0xff]   ;;  %v17834_v14 = vld [vmem:[#allocation5 + $0x16e4] ss:$16 sps:$4 sm:$0xff]  }
 0x306   :  { %7771 = vmatprep.subr.bf16.mxu0 %v17762_v15  ;;  %8939 = vmatprep.subr.bf16.mxu1 %v17765_v16  ;;  %v17837_v15 = vld [vmem:[#allocation5 + $0x16ec] ss:$16 sps:$4 sm:$0xff]   ;;  %v14185_v16 = vcombine.high %v18596_v10, %v18598_v11 }
 0x309   :  { %7772 = vmatpush1.bf16.msra.mxu0 %v17760_v17  ;;  %8940 = vmatpush1.bf16.msra.mxu1 %v17763_v18  ;;  %v17832_v17 = vld [vmem:[#allocation5 + $0x16e0] ss:$16 sps:$4 sm:$0xff]   ;;  %v17835_v18 = vld [vmem:[#allocation5 + $0x16e8] ss:$16 sps:$4 sm:$0xff]  }
 0x30a   :  { %7773 = vmatprep.subr.bf16.mxu0 %v17768_v19  ;;  %8941 = vmatprep.subr.bf16.mxu1 %v17771_v20  ;;  %v17840_v19 = vld [vmem:[#allocation5 + $0x1704] ss:$16 sps:$4 sm:$0xff]   ;;  %v17843_v20 = vld [vmem:[#allocation5 + $0x170c] ss:$16 sps:$4 sm:$0xff]  }
 0x30d   :  { %7774 = vmatpush1.bf16.msra.mxu0 %v17766_v21  ;;  %8942 = vmatpush1.bf16.msra.mxu1 %v17769_v22  ;;  %v17838_v21 = vld [vmem:[#allocation5 + $0x1700] ss:$16 sps:$4 sm:$0xff]   ;;  %v17841_v22 = vld [vmem:[#allocation5 + $0x1708] ss:$16 sps:$4 sm:$0xff]  }
 0x30e   :  { %7775 = vmatprep.subr.bf16.mxu0 %v17774_v23  ;;  %8943 = vmatprep.subr.bf16.mxu1 %v17777_v24  ;;  %v17846_v23 = vld [vmem:[#allocation5 + $0x1724] ss:$16 sps:$4 sm:$0xff]   ;;  %v17849_v24 = vld [vmem:[#allocation5 + $0x172c] ss:$16 sps:$4 sm:$0xff]  }
 0x311   :  { %7776 = vmatpush1.bf16.msra.mxu0 %v17772_v25  ;;  %8944 = vmatpush1.bf16.msra.mxu1 %v17775_v26  ;;  %v17844_v25 = vld [vmem:[#allocation5 + $0x1720] ss:$16 sps:$4 sm:$0xff]   ;;  %v17847_v26 = vld [vmem:[#allocation5 + $0x1728] ss:$16 sps:$4 sm:$0xff]  }
 0x312   :  { %7777 = vmatprep.subr.bf16.mxu0 %v17780_v27  ;;  %8945 = vmatprep.subr.bf16.mxu1 %v17783_v28  ;;  %v17852_v27 = vld [vmem:[#allocation5 + $0x1744] ss:$16 sps:$4 sm:$0xff]   ;;  %v17855_v28 = vld [vmem:[#allocation5 + $0x174c] ss:$16 sps:$4 sm:$0xff]  }
 0x315   :  { %7778 = vmatpush1.bf16.msra.mxu0 %v17778_v29  ;;  %8946 = vmatpush1.bf16.msra.mxu1 %v17781_v30  ;;  %v17850_v29 = vld [vmem:[#allocation5 + $0x1740] ss:$16 sps:$4 sm:$0xff]   ;;  %v17853_v30 = vld [vmem:[#allocation5 + $0x1748] ss:$16 sps:$4 sm:$0xff]  }
 0x316   :  { %7779 = vmatprep.subr.bf16.mxu0 %v17786_v31  ;;  %8947 = vmatprep.subr.bf16.mxu1 %v17789_v32  ;;  %v17858_v31 = vld [vmem:[#allocation5 + $0x1764] ss:$16 sps:$4 sm:$0xff]   ;;  %v17861_v32 = vld [vmem:[#allocation5 + $0x176c] ss:$16 sps:$4 sm:$0xff]  }
 0x319   :  { %7780 = vmatpush1.bf16.msra.mxu0 %v17784_v33  ;;  %8948 = vmatpush1.bf16.msra.mxu1 %v17787_v34  ;;  %v17856_v33 = vld [vmem:[#allocation5 + $0x1760] ss:$16 sps:$4 sm:$0xff]   ;;  %v17859_v34 = vld [vmem:[#allocation5 + $0x1768] ss:$16 sps:$4 sm:$0xff]  }
 0x31a   :  { %7822 = vmatprep.subr.bf16.mxu0 %v17792_v35  ;;  %8990 = vmatprep.subr.bf16.mxu1 %v17795_v36  ;;  %v17864_v35 = vld [vmem:[#allocation5 + $0x1784] ss:$16 sps:$4 sm:$0xff]   ;;  %v17867_v36 = vld [vmem:[#allocation5 + $0x178c] ss:$16 sps:$4 sm:$0xff]  }
 0x31c   :  { %7782 = vmatmul.mubr.bf16.vlgmr.msra.gmra.mrb[0].mxu0 %v14182_v37  ;;  %8950 = vmatmul.mubr.bf16.vlgmr.msra.gmra.mrb[0].mxu1 %v14182_v37  ;;  %v17862_v37 = vld [vmem:[#allocation5 + $0x1780] ss:$16 sps:$4 sm:$0xff]  }
 0x31d   :  { %7823 = vmatpush1.bf16.msra.mxu0 %v17790_v40  ;;  %8991 = vmatpush1.bf16.msra.mxu1 %v17793_v41  ;;  %v17873_v40 = vld [vmem:[#allocation5 + $0x17ac] ss:$16 sps:$4 sm:$0xff]   ;;  %v17868_v41 = vld [vmem:[#allocation5 + $0x17a0] ss:$16 sps:$4 sm:$0xff]  }
 0x31e   :  { %7824 = vmatprep.subr.bf16.mxu0 %v17798_v42  ;;  %8992 = vmatprep.subr.bf16.mxu1 %v17801_v43  ;;  %v17871_v42 = vld [vmem:[#allocation5 + $0x17a8] ss:$16 sps:$4 sm:$0xff]   ;;  %v17876_v43 = vld [vmem:[#allocation5 + $0x17c4] ss:$16 sps:$4 sm:$0xff]  }
 0x31f   :  { %7791 = vmatprep.mubr.bf16.mxu0 %v14215_v44  ;;  %8959 = vmatprep.mubr.bf16.mxu1 %v14215_v44  ;;  %v17879_v44 = vld [vmem:[#allocation5 + $0x17cc] ss:$16 sps:$4 sm:$0xff]  }
 0x321   :  { %7825 = vmatpush1.bf16.msra.mxu0 %v17796_v45  ;;  %8993 = vmatpush1.bf16.msra.mxu1 %v17799_v46  ;;  %v17874_v45 = vld [vmem:[#allocation5 + $0x17c0] ss:$16 sps:$4 sm:$0xff]   ;;  %v17877_v46 = vld [vmem:[#allocation5 + $0x17c8] ss:$16 sps:$4 sm:$0xff]  }
 0x322   :  { %7826 = vmatprep.subr.bf16.mxu0 %v17804_v47  ;;  %8994 = vmatprep.subr.bf16.mxu1 %v17807_v48  ;;  %v17882_v47 = vld [vmem:[#allocation5 + $0x17e4] ss:$16 sps:$4 sm:$0xff]   ;;  %v17885_v48 = vld [vmem:[#allocation5 + $0x17ec] ss:$16 sps:$4 sm:$0xff]  }
 0x324   :  { %7792 = vmatmul.mubr.bf16.gmra.mrb[4].mxu0 %v14214_v49  ;;  %8960 = vmatmul.mubr.bf16.gmra.mrb[4].mxu1 %v14214_v49  ;;  %v17880_v49 = vld [vmem:[#allocation5 + $0x17e0] ss:$16 sps:$4 sm:$0xff]  }
 0x325   :  { %7827 = vmatpush1.bf16.msra.mxu0 %v17802_v52  ;;  %8995 = vmatpush1.bf16.msra.mxu1 %v17805_v53  ;;  %v17891_v52 = vld [vmem:[#allocation5 + $0x180c] ss:$16 sps:$4 sm:$0xff]   ;;  %v14184_v53 = vcombine.low %v18596_v10, %v18598_v11  ;;  %v17907_v10 = vld [vmem:[#allocation5 + $0x1868] ss:$16 sps:$4 sm:$0xff]   ;;  %v17912_v11 = vld [vmem:[#allocation5 + $0x1884] ss:$16 sps:$4 sm:$0xff]  }
 0x326   :  { %7828 = vmatprep.subr.bf16.mxu0 %v17810_v54  ;;  %8996 = vmatprep.subr.bf16.mxu1 %v17813_v55  ;;  %v128_v54 = vld [vmem:[#allocation2 + $0x158] sm:$0xff] }
 0x327   :  { %7801 = vmatprep.mubr.bf16.mxu0 %v14247_v56  ;;  %8969 = vmatprep.mubr.bf16.mxu1 %v14247_v56  ;;  %v144_v55 = vld [vmem:[#allocation2 + $0x1d8] sm:$0xff]  ;;  %v17886_v56 = vld [vmem:[#allocation5 + $0x1800] ss:$16 sps:$4 sm:$0xff]  }
 0x329   :  { %7829 = vmatpush1.bf16.msra.mxu0 %v17808_v57  ;;  %8997 = vmatpush1.bf16.msra.mxu1 %v17811_v58  ;;  %v17889_v57 = vld [vmem:[#allocation5 + $0x1808] ss:$16 sps:$4 sm:$0xff]   ;;  %v17894_v58 = vld [vmem:[#allocation5 + $0x1824] ss:$16 sps:$4 sm:$0xff]  }
 0x32a   :  { %7830 = vmatprep.subr.bf16.mxu0 %v17816_v59  ;;  %8998 = vmatprep.subr.bf16.mxu1 %v17819_v60  ;;  %v17897_v59 = vld [vmem:[#allocation5 + $0x182c] ss:$16 sps:$4 sm:$0xff]   ;;  %v14217_v60 = vcombine.high %v128_v54, %v144_v55 }
 0x32c   :  { %7802 = vmatmul.mubr.bf16.gmra.mrb[8].mxu0 %v14246_v61  ;;  %8970 = vmatmul.mubr.bf16.gmra.mrb[8].mxu1 %v14246_v61  ;;  %v17892_v61 = vld [vmem:[#allocation5 + $0x1820] ss:$16 sps:$4 sm:$0xff]  }
 0x32d   :  { %7831 = vmatpush1.bf16.msra.mxu0 %v17814_v0  ;;  %8999 = vmatpush1.bf16.msra.mxu1 %v17817_v1  ;;  %v17903_v0 = vld [vmem:[#allocation5 + $0x184c] ss:$16 sps:$4 sm:$0xff]   ;;  %v14216_v1 = vcombine.low %v128_v54, %v144_v55  ;;  %v17961_v54 = vld [vmem:[#allocation5 + $0x1988] ss:$16 sps:$4 sm:$0xff]   ;;  %v17966_v55 = vld [vmem:[#allocation5 + $0x19a4] ss:$16 sps:$4 sm:$0xff]  }
 0x32e   :  { %7832 = vmatprep.subr.bf16.mxu0 %v17822_v2  ;;  %9000 = vmatprep.subr.bf16.mxu1 %v17825_v3  ;;  %v160_v2 = vld [vmem:[#allocation2 + $0x258] sm:$0xff] }
 0x32f   :  { %7811 = vmatprep.mubr.bf16.mxu0 %v14279_v4  ;;  %8979 = vmatprep.mubr.bf16.mxu1 %v14279_v4  ;;  %v176_v3 = vld [vmem:[#allocation2 + $0x2d8] sm:$0xff]  ;;  %v17898_v4 = vld [vmem:[#allocation5 + $0x1840] ss:$16 sps:$4 sm:$0xff]  }
 0x331   :  { %7833 = vmatpush1.bf16.msra.mxu0 %v17820_v5  ;;  %9001 = vmatpush1.bf16.msra.mxu1 %v17823_v6  ;;  %v17901_v5 = vld [vmem:[#allocation5 + $0x1848] ss:$16 sps:$4 sm:$0xff]   ;;  %v17906_v6 = vld [vmem:[#allocation5 + $0x1864] ss:$16 sps:$4 sm:$0xff]  }
 0x332   :  { %7834 = vmatprep.subr.bf16.mxu0 %v17828_v7  ;;  %9002 = vmatprep.subr.bf16.mxu1 %v17831_v8  ;;  %v17909_v7 = vld [vmem:[#allocation5 + $0x186c] ss:$16 sps:$4 sm:$0xff]   ;;  %v14249_v8 = vcombine.high %v160_v2, %v176_v3 }
 0x334   :  { %7812 = vmatmul.mubr.bf16.gmra.mrb[12].mxu0 %v14278_v9  ;;  %8980 = vmatmul.mubr.bf16.gmra.mrb[12].mxu1 %v14278_v9  ;;  %v17904_v9 = vld [vmem:[#allocation5 + $0x1860] ss:$16 sps:$4 sm:$0xff]  }
 0x335   :  { %7835 = vmatpush1.bf16.msra.mxu0 %v17826_v12  ;;  %9003 = vmatpush1.bf16.msra.mxu1 %v17829_v13  ;;  %v17915_v12 = vld [vmem:[#allocation5 + $0x188c] ss:$16 sps:$4 sm:$0xff]   ;;  %v14248_v13 = vcombine.low %v160_v2, %v176_v3  ;;  %v17979_v2 = vld [vmem:[#allocation5 + $0x19e8] ss:$16 sps:$4 sm:$0xff]   ;;  %v17984_v3 = vld [vmem:[#allocation5 + $0x1a04] ss:$16 sps:$4 sm:$0xff]  }
 0x336   :  { %7836 = vmatprep.subr.bf16.mxu0 %v17834_v14  ;;  %9004 = vmatprep.subr.bf16.mxu1 %v17837_v15  ;;  %v192_v14 = vld [vmem:[#allocation2 + $0x358] sm:$0xff] }
 0x337   :  { %7854 = vmatprep.mubr.bf16.mxu0 %v14185_v16  ;;  %9022 = vmatprep.mubr.bf16.mxu1 %v14185_v16  ;;  %v208_v15 = vld [vmem:[#allocation2 + $0x3d8] sm:$0xff]  ;;  %v17910_v16 = vld [vmem:[#allocation5 + $0x1880] ss:$16 sps:$4 sm:$0xff]  }
 0x339   :  { %7837 = vmatpush1.bf16.msra.mxu0 %v17832_v17  ;;  %9005 = vmatpush1.bf16.msra.mxu1 %v17835_v18  ;;  %v17913_v17 = vld [vmem:[#allocation5 + $0x1888] ss:$16 sps:$4 sm:$0xff]   ;;  %v17918_v18 = vld [vmem:[#allocation5 + $0x18a4] ss:$16 sps:$4 sm:$0xff]  }
 0x33a   :  { %7838 = vmatprep.subr.bf16.mxu0 %v17840_v19  ;;  %9006 = vmatprep.subr.bf16.mxu1 %v17843_v20  ;;  %v17921_v19 = vld [vmem:[#allocation5 + $0x18ac] ss:$16 sps:$4 sm:$0xff]   ;;  %v14281_v20 = vcombine.high %v192_v14, %v208_v15 }
 0x33d   :  { %7839 = vmatpush1.bf16.msra.mxu0 %v17838_v21  ;;  %9007 = vmatpush1.bf16.msra.mxu1 %v17841_v22  ;;  %v17916_v21 = vld [vmem:[#allocation5 + $0x18a0] ss:$16 sps:$4 sm:$0xff]   ;;  %v17919_v22 = vld [vmem:[#allocation5 + $0x18a8] ss:$16 sps:$4 sm:$0xff]  }
 0x33e   :  { %7840 = vmatprep.subr.bf16.mxu0 %v17846_v23  ;;  %9008 = vmatprep.subr.bf16.mxu1 %v17849_v24  ;;  %v17924_v23 = vld [vmem:[#allocation5 + $0x18c4] ss:$16 sps:$4 sm:$0xff]   ;;  %v17927_v24 = vld [vmem:[#allocation5 + $0x18cc] ss:$16 sps:$4 sm:$0xff]  }
 0x341   :  { %7841 = vmatpush1.bf16.msra.mxu0 %v17844_v25  ;;  %9009 = vmatpush1.bf16.msra.mxu1 %v17847_v26  ;;  %v14280_v25 = vcombine.low %v192_v14, %v208_v15  ;;  %v18604_v26 = vld [vmem:[#allocation2 + $0x60] sm:$0xff]  ;;  %v17991_v14 = vld [vmem:[#allocation5 + $0x1a28] ss:$16 sps:$4 sm:$0xff]  }
 0x342   :  { %7842 = vmatprep.subr.bf16.mxu0 %v17852_v27  ;;  %9010 = vmatprep.subr.bf16.mxu1 %v17855_v28  ;;  %v18606_v27 = vld [vmem:[#allocation2 + $0xe0] sm:$0xff] }
 0x343   :  { %v17922_v28 = vld [vmem:[#allocation5 + $0x18c0] ss:$16 sps:$4 sm:$0xff]   ;;  %v17996_v15 = vld [vmem:[#allocation5 + $0x1a44] ss:$16 sps:$4 sm:$0xff]  }
 0x345   :  { %7843 = vmatpush1.bf16.msra.mxu0 %v17850_v29  ;;  %9011 = vmatpush1.bf16.msra.mxu1 %v17853_v30  ;;  %v17925_v29 = vld [vmem:[#allocation5 + $0x18c8] ss:$16 sps:$4 sm:$0xff]   ;;  %v17930_v30 = vld [vmem:[#allocation5 + $0x18e4] ss:$16 sps:$4 sm:$0xff]  }
 0x346   :  { %7844 = vmatprep.subr.bf16.mxu0 %v17858_v31  ;;  %9012 = vmatprep.subr.bf16.mxu1 %v17861_v32  ;;  %v17933_v31 = vld [vmem:[#allocation5 + $0x18ec] ss:$16 sps:$4 sm:$0xff]   ;;  %v14187_v32 = vcombine.high %v18604_v26, %v18606_v27 }
 0x349   :  { %7845 = vmatpush1.bf16.msra.mxu0 %v17856_v33  ;;  %9013 = vmatpush1.bf16.msra.mxu1 %v17859_v34  ;;  %v17928_v33 = vld [vmem:[#allocation5 + $0x18e0] ss:$16 sps:$4 sm:$0xff]   ;;  %v17931_v34 = vld [vmem:[#allocation5 + $0x18e8] ss:$16 sps:$4 sm:$0xff]  }
 0x34a   :  { %7846 = vmatprep.subr.bf16.mxu0 %v17864_v35  ;;  %9014 = vmatprep.subr.bf16.mxu1 %v17867_v36  ;;  %v17936_v35 = vld [vmem:[#allocation5 + $0x1904] ss:$16 sps:$4 sm:$0xff]   ;;  %v17939_v36 = vld [vmem:[#allocation5 + $0x190c] ss:$16 sps:$4 sm:$0xff]  }
 0x34d   :  { %7847 = vmatpush1.bf16.msra.mxu0 %v17862_v37  ;;  %9015 = vmatpush1.bf16.msra.mxu1 %v17865_v38  ;;  %v17934_v37 = vld [vmem:[#allocation5 + $0x1900] ss:$16 sps:$4 sm:$0xff]   ;;  %v17937_v38 = vld [vmem:[#allocation5 + $0x1908] ss:$16 sps:$4 sm:$0xff]  }
 0x34e   :  { %7848 = vmatprep.subr.bf16.mxu0 %v17870_v39  ;;  %9016 = vmatprep.subr.bf16.mxu1 %v17873_v40  ;;  %v17942_v39 = vld [vmem:[#allocation5 + $0x1924] ss:$16 sps:$4 sm:$0xff]   ;;  %v17945_v40 = vld [vmem:[#allocation5 + $0x192c] ss:$16 sps:$4 sm:$0xff]  }
 0x351   :  { %7849 = vmatpush1.bf16.msra.mxu0 %v17868_v41  ;;  %9017 = vmatpush1.bf16.msra.mxu1 %v17871_v42  ;;  %v17940_v41 = vld [vmem:[#allocation5 + $0x1920] ss:$16 sps:$4 sm:$0xff]   ;;  %v17943_v42 = vld [vmem:[#allocation5 + $0x1928] ss:$16 sps:$4 sm:$0xff]  }
 0x352   :  { %7850 = vmatprep.subr.bf16.mxu0 %v17876_v43  ;;  %9018 = vmatprep.subr.bf16.mxu1 %v17879_v44  ;;  %v17948_v43 = vld [vmem:[#allocation5 + $0x1944] ss:$16 sps:$4 sm:$0xff]   ;;  %v17951_v44 = vld [vmem:[#allocation5 + $0x194c] ss:$16 sps:$4 sm:$0xff]  }
 0x355   :  { %7851 = vmatpush1.bf16.msra.mxu0 %v17874_v45  ;;  %9019 = vmatpush1.bf16.msra.mxu1 %v17877_v46  ;;  %v17946_v45 = vld [vmem:[#allocation5 + $0x1940] ss:$16 sps:$4 sm:$0xff]   ;;  %v17949_v46 = vld [vmem:[#allocation5 + $0x1948] ss:$16 sps:$4 sm:$0xff]  }
 0x356   :  { %7852 = vmatprep.subr.bf16.mxu0 %v17882_v47  ;;  %9020 = vmatprep.subr.bf16.mxu1 %v17885_v48  ;;  %v17954_v47 = vld [vmem:[#allocation5 + $0x1964] ss:$16 sps:$4 sm:$0xff]   ;;  %v17957_v48 = vld [vmem:[#allocation5 + $0x196c] ss:$16 sps:$4 sm:$0xff]  }
 0x359   :  { %7853 = vmatpush1.bf16.msra.mxu0 %v17880_v49  ;;  %9021 = vmatpush1.bf16.msra.mxu1 %v17883_v50  ;;  %v17952_v49 = vld [vmem:[#allocation5 + $0x1960] ss:$16 sps:$4 sm:$0xff]   ;;  %v17955_v50 = vld [vmem:[#allocation5 + $0x1968] ss:$16 sps:$4 sm:$0xff]  }
 0x35a   :  { %7895 = vmatprep.subr.bf16.mxu0 %v17888_v51  ;;  %9063 = vmatprep.subr.bf16.mxu1 %v17891_v52  ;;  %v17960_v51 = vld [vmem:[#allocation5 + $0x1984] ss:$16 sps:$4 sm:$0xff]   ;;  %v17963_v52 = vld [vmem:[#allocation5 + $0x198c] ss:$16 sps:$4 sm:$0xff]  }
 0x35c   :  { %7855 = vmatmul.mubr.bf16.vlgmr.msra.gmra.mrb[0].mxu0 %v14184_v53  ;;  %9023 = vmatmul.mubr.bf16.vlgmr.msra.gmra.mrb[0].mxu1 %v14184_v53  ;;  %v17958_v53 = vld [vmem:[#allocation5 + $0x1980] ss:$16 sps:$4 sm:$0xff]  }
 0x35d   :  { %7896 = vmatpush1.bf16.msra.mxu0 %v17886_v56  ;;  %9064 = vmatpush1.bf16.msra.mxu1 %v17889_v57  ;;  %v17969_v56 = vld [vmem:[#allocation5 + $0x19ac] ss:$16 sps:$4 sm:$0xff]   ;;  %v17964_v57 = vld [vmem:[#allocation5 + $0x19a0] ss:$16 sps:$4 sm:$0xff]  }
 0x35e   :  { %7897 = vmatprep.subr.bf16.mxu0 %v17894_v58  ;;  %9065 = vmatprep.subr.bf16.mxu1 %v17897_v59  ;;  %v17967_v58 = vld [vmem:[#allocation5 + $0x19a8] ss:$16 sps:$4 sm:$0xff]   ;;  %v17972_v59 = vld [vmem:[#allocation5 + $0x19c4] ss:$16 sps:$4 sm:$0xff]  }
 0x35f   :  { %7864 = vmatprep.mubr.bf16.mxu0 %v14217_v60  ;;  %9032 = vmatprep.mubr.bf16.mxu1 %v14217_v60  ;;  %v17975_v60 = vld [vmem:[#allocation5 + $0x19cc] ss:$16 sps:$4 sm:$0xff]  }
 0x361   :  { %7898 = vmatpush1.bf16.msra.mxu0 %v17892_v61  ;;  %9066 = vmatpush1.bf16.msra.mxu1 %v17895_v62  ;;  %v17970_v61 = vld [vmem:[#allocation5 + $0x19c0] ss:$16 sps:$4 sm:$0xff]   ;;  %v17973_v62 = vld [vmem:[#allocation5 + $0x19c8] ss:$16 sps:$4 sm:$0xff]  }
 0x362   :  { %7899 = vmatprep.subr.bf16.mxu0 %v17900_v63  ;;  %9067 = vmatprep.subr.bf16.mxu1 %v17903_v0  ;;  %v17978_v63 = vld [vmem:[#allocation5 + $0x19e4] ss:$16 sps:$4 sm:$0xff]   ;;  %v17981_v0 = vld [vmem:[#allocation5 + $0x19ec] ss:$16 sps:$4 sm:$0xff]  }
 0x364   :  { %7865 = vmatmul.mubr.bf16.gmra.mrb[4].mxu0 %v14216_v1  ;;  %9033 = vmatmul.mubr.bf16.gmra.mrb[4].mxu1 %v14216_v1  ;;  %v17976_v1 = vld [vmem:[#allocation5 + $0x19e0] ss:$16 sps:$4 sm:$0xff]  }
 0x365   :  { %7900 = vmatpush1.bf16.msra.mxu0 %v17898_v4  ;;  %9068 = vmatpush1.bf16.msra.mxu1 %v17901_v5  ;;  %v17987_v4 = vld [vmem:[#allocation5 + $0x1a0c] ss:$16 sps:$4 sm:$0xff]   ;;  %v14186_v5 = vcombine.low %v18604_v26, %v18606_v27  ;;  %v18003_v26 = vld [vmem:[#allocation5 + $0x1a68] ss:$16 sps:$4 sm:$0xff]   ;;  %v18008_v27 = vld [vmem:[#allocation5 + $0x1a84] ss:$16 sps:$4 sm:$0xff]  }
 0x366   :  { %7901 = vmatprep.subr.bf16.mxu0 %v17906_v6  ;;  %9069 = vmatprep.subr.bf16.mxu1 %v17909_v7  ;;  %v129_v6 = vld [vmem:[#allocation2 + $0x160] sm:$0xff] }
 0x367   :  { %7874 = vmatprep.mubr.bf16.mxu0 %v14249_v8  ;;  %9042 = vmatprep.mubr.bf16.mxu1 %v14249_v8  ;;  %v145_v7 = vld [vmem:[#allocation2 + $0x1e0] sm:$0xff] }
 0x368   :  { %v17982_v8 = vld [vmem:[#allocation5 + $0x1a00] ss:$16 sps:$4 sm:$0xff]  }
 0x369   :  { %7902 = vmatpush1.bf16.msra.mxu0 %v17904_v9  ;;  %9070 = vmatpush1.bf16.msra.mxu1 %v17907_v10  ;;  %v17985_v9 = vld [vmem:[#allocation5 + $0x1a08] ss:$16 sps:$4 sm:$0xff]   ;;  %v17990_v10 = vld [vmem:[#allocation5 + $0x1a24] ss:$16 sps:$4 sm:$0xff]  }
 0x36a   :  { %7903 = vmatprep.subr.bf16.mxu0 %v17912_v11  ;;  %9071 = vmatprep.subr.bf16.mxu1 %v17915_v12  ;;  %v17993_v11 = vld [vmem:[#allocation5 + $0x1a2c] ss:$16 sps:$4 sm:$0xff]   ;;  %v14219_v12 = vcombine.high %v129_v6, %v145_v7 }
 0x36c   :  { %7875 = vmatmul.mubr.bf16.gmra.mrb[8].mxu0 %v14248_v13  ;;  %9043 = vmatmul.mubr.bf16.gmra.mrb[8].mxu1 %v14248_v13  ;;  %v17988_v13 = vld [vmem:[#allocation5 + $0x1a20] ss:$16 sps:$4 sm:$0xff]  }
 0x36d   :  { %7904 = vmatpush1.bf16.msra.mxu0 %v17910_v16  ;;  %9072 = vmatpush1.bf16.msra.mxu1 %v17913_v17  ;;  %v17999_v16 = vld [vmem:[#allocation5 + $0x1a4c] ss:$16 sps:$4 sm:$0xff]   ;;  %v14218_v17 = vcombine.low %v129_v6, %v145_v7  ;;  %v18057_v6 = vld [vmem:[#allocation5 + $0x1b88] ss:$16 sps:$4 sm:$0xff]   ;;  %v18062_v7 = vld [vmem:[#allocation5 + $0x1ba4] ss:$16 sps:$4 sm:$0xff]  }
 0x36e   :  { %7905 = vmatprep.subr.bf16.mxu0 %v17918_v18  ;;  %9073 = vmatprep.subr.bf16.mxu1 %v17921_v19  ;;  %v161_v18 = vld [vmem:[#allocation2 + $0x260] sm:$0xff] }
 0x36f   :  { %7884 = vmatprep.mubr.bf16.mxu0 %v14281_v20  ;;  %9052 = vmatprep.mubr.bf16.mxu1 %v14281_v20  ;;  %v177_v19 = vld [vmem:[#allocation2 + $0x2e0] sm:$0xff] }
 0x370   :  { %v17994_v20 = vld [vmem:[#allocation5 + $0x1a40] ss:$16 sps:$4 sm:$0xff]  }
 0x371   :  { %7906 = vmatpush1.bf16.msra.mxu0 %v17916_v21  ;;  %9074 = vmatpush1.bf16.msra.mxu1 %v17919_v22  ;;  %v17997_v21 = vld [vmem:[#allocation5 + $0x1a48] ss:$16 sps:$4 sm:$0xff]   ;;  %v18002_v22 = vld [vmem:[#allocation5 + $0x1a64] ss:$16 sps:$4 sm:$0xff]  }
 0x372   :  { %7907 = vmatprep.subr.bf16.mxu0 %v17924_v23  ;;  %9075 = vmatprep.subr.bf16.mxu1 %v17927_v24  ;;  %v18005_v23 = vld [vmem:[#allocation5 + $0x1a6c] ss:$16 sps:$4 sm:$0xff]   ;;  %v14251_v24 = vcombine.high %v161_v18, %v177_v19 }
 0x374   :  { %7885 = vmatmul.mubr.bf16.gmra.mrb[12].mxu0 %v14280_v25  ;;  %9053 = vmatmul.mubr.bf16.gmra.mrb[12].mxu1 %v14280_v25  ;;  %v18000_v25 = vld [vmem:[#allocation5 + $0x1a60] ss:$16 sps:$4 sm:$0xff]  }
 0x375   :  { %7908 = vmatpush1.bf16.msra.mxu0 %v17922_v28  ;;  %9076 = vmatpush1.bf16.msra.mxu1 %v17925_v29  ;;  %v18011_v28 = vld [vmem:[#allocation5 + $0x1a8c] ss:$16 sps:$4 sm:$0xff]   ;;  %v14250_v29 = vcombine.low %v161_v18, %v177_v19  ;;  %v18075_v18 = vld [vmem:[#allocation5 + $0x1be8] ss:$16 sps:$4 sm:$0xff]   ;;  %v18080_v19 = vld [vmem:[#allocation5 + $0x1c04] ss:$16 sps:$4 sm:$0xff]  }
 0x376   :  { %7909 = vmatprep.subr.bf16.mxu0 %v17930_v30  ;;  %9077 = vmatprep.subr.bf16.mxu1 %v17933_v31  ;;  %v193_v30 = vld [vmem:[#allocation2 + $0x360] sm:$0xff] }
 0x377   :  { %7927 = vmatprep.mubr.bf16.mxu0 %v14187_v32  ;;  %9095 = vmatprep.mubr.bf16.mxu1 %v14187_v32  ;;  %v209_v31 = vld [vmem:[#allocation2 + $0x3e0] sm:$0xff] }
 0x378   :  { %v18006_v32 = vld [vmem:[#allocation5 + $0x1a80] ss:$16 sps:$4 sm:$0xff]  }
 0x379   :  { %7910 = vmatpush1.bf16.msra.mxu0 %v17928_v33  ;;  %9078 = vmatpush1.bf16.msra.mxu1 %v17931_v34  ;;  %v18009_v33 = vld [vmem:[#allocation5 + $0x1a88] ss:$16 sps:$4 sm:$0xff]   ;;  %v18014_v34 = vld [vmem:[#allocation5 + $0x1aa4] ss:$16 sps:$4 sm:$0xff]  }
 0x37a   :  { %7911 = vmatprep.subr.bf16.mxu0 %v17936_v35  ;;  %9079 = vmatprep.subr.bf16.mxu1 %v17939_v36  ;;  %v18017_v35 = vld [vmem:[#allocation5 + $0x1aac] ss:$16 sps:$4 sm:$0xff]   ;;  %v14283_v36 = vcombine.high %v193_v30, %v209_v31 }
 0x37d   :  { %7912 = vmatpush1.bf16.msra.mxu0 %v17934_v37  ;;  %9080 = vmatpush1.bf16.msra.mxu1 %v17937_v38  ;;  %v18012_v37 = vld [vmem:[#allocation5 + $0x1aa0] ss:$16 sps:$4 sm:$0xff]   ;;  %v18015_v38 = vld [vmem:[#allocation5 + $0x1aa8] ss:$16 sps:$4 sm:$0xff]  }
 0x37e   :  { %7913 = vmatprep.subr.bf16.mxu0 %v17942_v39  ;;  %9081 = vmatprep.subr.bf16.mxu1 %v17945_v40  ;;  %v18020_v39 = vld [vmem:[#allocation5 + $0x1ac4] ss:$16 sps:$4 sm:$0xff]   ;;  %v18023_v40 = vld [vmem:[#allocation5 + $0x1acc] ss:$16 sps:$4 sm:$0xff]  }
 0x381   :  { %7914 = vmatpush1.bf16.msra.mxu0 %v17940_v41  ;;  %9082 = vmatpush1.bf16.msra.mxu1 %v17943_v42  ;;  %v14282_v41 = vcombine.low %v193_v30, %v209_v31  ;;  %v18612_v42 = vld [vmem:[#allocation2 + $0x68] sm:$0xff]  ;;  %v18092_v31 = vld [vmem:[#allocation5 + $0x1c44] ss:$16 sps:$4 sm:$0xff]  }
 0x382   :  { %7915 = vmatprep.subr.bf16.mxu0 %v17948_v43  ;;  %9083 = vmatprep.subr.bf16.mxu1 %v17951_v44  ;;  %v18614_v43 = vld [vmem:[#allocation2 + $0xe8] sm:$0xff]  ;;  %v18018_v44 = vld [vmem:[#allocation5 + $0x1ac0] ss:$16 sps:$4 sm:$0xff]  }
 0x383   :  { %v18087_v30 = vld [vmem:[#allocation5 + $0x1c28] ss:$16 sps:$4 sm:$0xff]  }
 0x385   :  { %7916 = vmatpush1.bf16.msra.mxu0 %v17946_v45  ;;  %9084 = vmatpush1.bf16.msra.mxu1 %v17949_v46  ;;  %v18021_v45 = vld [vmem:[#allocation5 + $0x1ac8] ss:$16 sps:$4 sm:$0xff]   ;;  %v18026_v46 = vld [vmem:[#allocation5 + $0x1ae4] ss:$16 sps:$4 sm:$0xff]  }
 0x386   :  { %7917 = vmatprep.subr.bf16.mxu0 %v17954_v47  ;;  %9085 = vmatprep.subr.bf16.mxu1 %v17957_v48  ;;  %v18029_v47 = vld [vmem:[#allocation5 + $0x1aec] ss:$16 sps:$4 sm:$0xff]   ;;  %v14189_v48 = vcombine.high %v18612_v42, %v18614_v43 }
 0x389   :  { %7918 = vmatpush1.bf16.msra.mxu0 %v17952_v49  ;;  %9086 = vmatpush1.bf16.msra.mxu1 %v17955_v50  ;;  %v18024_v49 = vld [vmem:[#allocation5 + $0x1ae0] ss:$16 sps:$4 sm:$0xff]   ;;  %v18027_v50 = vld [vmem:[#allocation5 + $0x1ae8] ss:$16 sps:$4 sm:$0xff]  }
 0x38a   :  { %7919 = vmatprep.subr.bf16.mxu0 %v17960_v51  ;;  %9087 = vmatprep.subr.bf16.mxu1 %v17963_v52  ;;  %v18032_v51 = vld [vmem:[#allocation5 + $0x1b04] ss:$16 sps:$4 sm:$0xff]   ;;  %v18035_v52 = vld [vmem:[#allocation5 + $0x1b0c] ss:$16 sps:$4 sm:$0xff]  }
 0x38d   :  { %7920 = vmatpush1.bf16.msra.mxu0 %v17958_v53  ;;  %9088 = vmatpush1.bf16.msra.mxu1 %v17961_v54  ;;  %v18030_v53 = vld [vmem:[#allocation5 + $0x1b00] ss:$16 sps:$4 sm:$0xff]   ;;  %v18033_v54 = vld [vmem:[#allocation5 + $0x1b08] ss:$16 sps:$4 sm:$0xff]  }
 0x38e   :  { %7921 = vmatprep.subr.bf16.mxu0 %v17966_v55  ;;  %9089 = vmatprep.subr.bf16.mxu1 %v17969_v56  ;;  %v18038_v55 = vld [vmem:[#allocation5 + $0x1b24] ss:$16 sps:$4 sm:$0xff]   ;;  %v18041_v56 = vld [vmem:[#allocation5 + $0x1b2c] ss:$16 sps:$4 sm:$0xff]  }
 0x391   :  { %7922 = vmatpush1.bf16.msra.mxu0 %v17964_v57  ;;  %9090 = vmatpush1.bf16.msra.mxu1 %v17967_v58  ;;  %v18036_v57 = vld [vmem:[#allocation5 + $0x1b20] ss:$16 sps:$4 sm:$0xff]   ;;  %v18039_v58 = vld [vmem:[#allocation5 + $0x1b28] ss:$16 sps:$4 sm:$0xff]  }
 0x392   :  { %7923 = vmatprep.subr.bf16.mxu0 %v17972_v59  ;;  %9091 = vmatprep.subr.bf16.mxu1 %v17975_v60  ;;  %v18044_v59 = vld [vmem:[#allocation5 + $0x1b44] ss:$16 sps:$4 sm:$0xff]   ;;  %v18047_v60 = vld [vmem:[#allocation5 + $0x1b4c] ss:$16 sps:$4 sm:$0xff]  }
 0x395   :  { %7924 = vmatpush1.bf16.msra.mxu0 %v17970_v61  ;;  %9092 = vmatpush1.bf16.msra.mxu1 %v17973_v62  ;;  %v18042_v61 = vld [vmem:[#allocation5 + $0x1b40] ss:$16 sps:$4 sm:$0xff]   ;;  %v18045_v62 = vld [vmem:[#allocation5 + $0x1b48] ss:$16 sps:$4 sm:$0xff]  }
 0x396   :  { %7925 = vmatprep.subr.bf16.mxu0 %v17978_v63  ;;  %9093 = vmatprep.subr.bf16.mxu1 %v17981_v0  ;;  %v18050_v63 = vld [vmem:[#allocation5 + $0x1b64] ss:$16 sps:$4 sm:$0xff]   ;;  %v18053_v0 = vld [vmem:[#allocation5 + $0x1b6c] ss:$16 sps:$4 sm:$0xff]  }
 0x399   :  { %7926 = vmatpush1.bf16.msra.mxu0 %v17976_v1  ;;  %9094 = vmatpush1.bf16.msra.mxu1 %v17979_v2  ;;  %v18048_v1 = vld [vmem:[#allocation5 + $0x1b60] ss:$16 sps:$4 sm:$0xff]   ;;  %v18051_v2 = vld [vmem:[#allocation5 + $0x1b68] ss:$16 sps:$4 sm:$0xff]  }
 0x39a   :  { %7968 = vmatprep.subr.bf16.mxu0 %v17984_v3  ;;  %9136 = vmatprep.subr.bf16.mxu1 %v17987_v4  ;;  %v18056_v3 = vld [vmem:[#allocation5 + $0x1b84] ss:$16 sps:$4 sm:$0xff]   ;;  %v18059_v4 = vld [vmem:[#allocation5 + $0x1b8c] ss:$16 sps:$4 sm:$0xff]  }
 0x39c   :  { %7928 = vmatmul.mubr.bf16.vlgmr.msra.gmra.mrb[0].mxu0 %v14186_v5  ;;  %9096 = vmatmul.mubr.bf16.vlgmr.msra.gmra.mrb[0].mxu1 %v14186_v5  ;;  %v18054_v5 = vld [vmem:[#allocation5 + $0x1b80] ss:$16 sps:$4 sm:$0xff]  }
 0x39d   :  { %7969 = vmatpush1.bf16.msra.mxu0 %v17982_v8  ;;  %9137 = vmatpush1.bf16.msra.mxu1 %v17985_v9  ;;  %v18065_v8 = vld [vmem:[#allocation5 + $0x1bac] ss:$16 sps:$4 sm:$0xff]   ;;  %v18060_v9 = vld [vmem:[#allocation5 + $0x1ba0] ss:$16 sps:$4 sm:$0xff]  }
 0x39e   :  { %7970 = vmatprep.subr.bf16.mxu0 %v17990_v10  ;;  %9138 = vmatprep.subr.bf16.mxu1 %v17993_v11  ;;  %v18063_v10 = vld [vmem:[#allocation5 + $0x1ba8] ss:$16 sps:$4 sm:$0xff]   ;;  %v18068_v11 = vld [vmem:[#allocation5 + $0x1bc4] ss:$16 sps:$4 sm:$0xff]  }
 0x39f   :  { %7937 = vmatprep.mubr.bf16.mxu0 %v14219_v12  ;;  %9105 = vmatprep.mubr.bf16.mxu1 %v14219_v12  ;;  %v18071_v12 = vld [vmem:[#allocation5 + $0x1bcc] ss:$16 sps:$4 sm:$0xff]  }
 0x3a1   :  { %7971 = vmatpush1.bf16.msra.mxu0 %v17988_v13  ;;  %9139 = vmatpush1.bf16.msra.mxu1 %v17991_v14  ;;  %v18066_v13 = vld [vmem:[#allocation5 + $0x1bc0] ss:$16 sps:$4 sm:$0xff]   ;;  %v18069_v14 = vld [vmem:[#allocation5 + $0x1bc8] ss:$16 sps:$4 sm:$0xff]  }
 0x3a2   :  { %7972 = vmatprep.subr.bf16.mxu0 %v17996_v15  ;;  %9140 = vmatprep.subr.bf16.mxu1 %v17999_v16  ;;  %v18074_v15 = vld [vmem:[#allocation5 + $0x1be4] ss:$16 sps:$4 sm:$0xff]   ;;  %v18077_v16 = vld [vmem:[#allocation5 + $0x1bec] ss:$16 sps:$4 sm:$0xff]  }
 0x3a4   :  { %7938 = vmatmul.mubr.bf16.gmra.mrb[4].mxu0 %v14218_v17  ;;  %9106 = vmatmul.mubr.bf16.gmra.mrb[4].mxu1 %v14218_v17  ;;  %v18072_v17 = vld [vmem:[#allocation5 + $0x1be0] ss:$16 sps:$4 sm:$0xff]  }
 0x3a5   :  { %7973 = vmatpush1.bf16.msra.mxu0 %v17994_v20  ;;  %9141 = vmatpush1.bf16.msra.mxu1 %v17997_v21  ;;  %v18083_v20 = vld [vmem:[#allocation5 + $0x1c0c] ss:$16 sps:$4 sm:$0xff]   ;;  %v14188_v21 = vcombine.low %v18612_v42, %v18614_v43  ;;  %v18099_v42 = vld [vmem:[#allocation5 + $0x1c68] ss:$16 sps:$4 sm:$0xff]   ;;  %v18104_v43 = vld [vmem:[#allocation5 + $0x1c84] ss:$16 sps:$4 sm:$0xff]  }
 0x3a6   :  { %7974 = vmatprep.subr.bf16.mxu0 %v18002_v22  ;;  %9142 = vmatprep.subr.bf16.mxu1 %v18005_v23  ;;  %v130_v22 = vld [vmem:[#allocation2 + $0x168] sm:$0xff] }
 0x3a7   :  { %7947 = vmatprep.mubr.bf16.mxu0 %v14251_v24  ;;  %9115 = vmatprep.mubr.bf16.mxu1 %v14251_v24  ;;  %v146_v23 = vld [vmem:[#allocation2 + $0x1e8] sm:$0xff]  ;;  %v18078_v24 = vld [vmem:[#allocation5 + $0x1c00] ss:$16 sps:$4 sm:$0xff]  }
 0x3a9   :  { %7975 = vmatpush1.bf16.msra.mxu0 %v18000_v25  ;;  %9143 = vmatpush1.bf16.msra.mxu1 %v18003_v26  ;;  %v18081_v25 = vld [vmem:[#allocation5 + $0x1c08] ss:$16 sps:$4 sm:$0xff]   ;;  %v18086_v26 = vld [vmem:[#allocation5 + $0x1c24] ss:$16 sps:$4 sm:$0xff]  }
 0x3aa   :  { %7976 = vmatprep.subr.bf16.mxu0 %v18008_v27  ;;  %9144 = vmatprep.subr.bf16.mxu1 %v18011_v28  ;;  %v18089_v27 = vld [vmem:[#allocation5 + $0x1c2c] ss:$16 sps:$4 sm:$0xff]   ;;  %v14221_v28 = vcombine.high %v130_v22, %v146_v23 }
 0x3ac   :  { %7948 = vmatmul.mubr.bf16.gmra.mrb[8].mxu0 %v14250_v29  ;;  %9116 = vmatmul.mubr.bf16.gmra.mrb[8].mxu1 %v14250_v29  ;;  %v18084_v29 = vld [vmem:[#allocation5 + $0x1c20] ss:$16 sps:$4 sm:$0xff]  }
 0x3ad   :  { %7977 = vmatpush1.bf16.msra.mxu0 %v18006_v32  ;;  %9145 = vmatpush1.bf16.msra.mxu1 %v18009_v33  ;;  %v18095_v32 = vld [vmem:[#allocation5 + $0x1c4c] ss:$16 sps:$4 sm:$0xff]   ;;  %v14220_v33 = vcombine.low %v130_v22, %v146_v23  ;;  %v18153_v22 = vld [vmem:[#allocation5 + $0x1d88] ss:$16 sps:$4 sm:$0xff]   ;;  %v18158_v23 = vld [vmem:[#allocation5 + $0x1da4] ss:$16 sps:$4 sm:$0xff]  }
 0x3ae   :  { %7978 = vmatprep.subr.bf16.mxu0 %v18014_v34  ;;  %9146 = vmatprep.subr.bf16.mxu1 %v18017_v35  ;;  %v162_v34 = vld [vmem:[#allocation2 + $0x268] sm:$0xff] }
 0x3af   :  { %7957 = vmatprep.mubr.bf16.mxu0 %v14283_v36  ;;  %9125 = vmatprep.mubr.bf16.mxu1 %v14283_v36  ;;  %v178_v35 = vld [vmem:[#allocation2 + $0x2e8] sm:$0xff]  ;;  %v18090_v36 = vld [vmem:[#allocation5 + $0x1c40] ss:$16 sps:$4 sm:$0xff]  }
 0x3b1   :  { %7979 = vmatpush1.bf16.msra.mxu0 %v18012_v37  ;;  %9147 = vmatpush1.bf16.msra.mxu1 %v18015_v38  ;;  %v18093_v37 = vld [vmem:[#allocation5 + $0x1c48] ss:$16 sps:$4 sm:$0xff]   ;;  %v18098_v38 = vld [vmem:[#allocation5 + $0x1c64] ss:$16 sps:$4 sm:$0xff]  }
 0x3b2   :  { %7980 = vmatprep.subr.bf16.mxu0 %v18020_v39  ;;  %9148 = vmatprep.subr.bf16.mxu1 %v18023_v40  ;;  %v18101_v39 = vld [vmem:[#allocation5 + $0x1c6c] ss:$16 sps:$4 sm:$0xff]   ;;  %v14253_v40 = vcombine.high %v162_v34, %v178_v35 }
 0x3b4   :  { %7958 = vmatmul.mubr.bf16.gmra.mrb[12].mxu0 %v14282_v41  ;;  %9126 = vmatmul.mubr.bf16.gmra.mrb[12].mxu1 %v14282_v41  ;;  %v18096_v41 = vld [vmem:[#allocation5 + $0x1c60] ss:$16 sps:$4 sm:$0xff]  }
 0x3b5   :  { %7981 = vmatpush1.bf16.msra.mxu0 %v18018_v44  ;;  %9149 = vmatpush1.bf16.msra.mxu1 %v18021_v45  ;;  %v18107_v44 = vld [vmem:[#allocation5 + $0x1c8c] ss:$16 sps:$4 sm:$0xff]   ;;  %v14252_v45 = vcombine.low %v162_v34, %v178_v35  ;;  %v18171_v34 = vld [vmem:[#allocation5 + $0x1de8] ss:$16 sps:$4 sm:$0xff]   ;;  %v18176_v35 = vld [vmem:[#allocation5 + $0x1e04] ss:$16 sps:$4 sm:$0xff]  }
 0x3b6   :  { %7982 = vmatprep.subr.bf16.mxu0 %v18026_v46  ;;  %9150 = vmatprep.subr.bf16.mxu1 %v18029_v47  ;;  %v194_v46 = vld [vmem:[#allocation2 + $0x368] sm:$0xff] }
 0x3b7   :  { %8000 = vmatprep.mubr.bf16.mxu0 %v14189_v48  ;;  %9168 = vmatprep.mubr.bf16.mxu1 %v14189_v48  ;;  %v210_v47 = vld [vmem:[#allocation2 + $0x3e8] sm:$0xff]  ;;  %v18102_v48 = vld [vmem:[#allocation5 + $0x1c80] ss:$16 sps:$4 sm:$0xff]  }
 0x3b9   :  { %7983 = vmatpush1.bf16.msra.mxu0 %v18024_v49  ;;  %9151 = vmatpush1.bf16.msra.mxu1 %v18027_v50  ;;  %v18105_v49 = vld [vmem:[#allocation5 + $0x1c88] ss:$16 sps:$4 sm:$0xff]   ;;  %v18110_v50 = vld [vmem:[#allocation5 + $0x1ca4] ss:$16 sps:$4 sm:$0xff]  }
 0x3ba   :  { %7984 = vmatprep.subr.bf16.mxu0 %v18032_v51  ;;  %9152 = vmatprep.subr.bf16.mxu1 %v18035_v52  ;;  %v18113_v51 = vld [vmem:[#allocation5 + $0x1cac] ss:$16 sps:$4 sm:$0xff]   ;;  %v14285_v52 = vcombine.high %v194_v46, %v210_v47 }
 0x3bd   :  { %7985 = vmatpush1.bf16.msra.mxu0 %v18030_v53  ;;  %9153 = vmatpush1.bf16.msra.mxu1 %v18033_v54  ;;  %v18108_v53 = vld [vmem:[#allocation5 + $0x1ca0] ss:$16 sps:$4 sm:$0xff]   ;;  %v18111_v54 = vld [vmem:[#allocation5 + $0x1ca8] ss:$16 sps:$4 sm:$0xff]  }
 0x3be   :  { %7986 = vmatprep.subr.bf16.mxu0 %v18038_v55  ;;  %9154 = vmatprep.subr.bf16.mxu1 %v18041_v56  ;;  %v18116_v55 = vld [vmem:[#allocation5 + $0x1cc4] ss:$16 sps:$4 sm:$0xff]   ;;  %v18119_v56 = vld [vmem:[#allocation5 + $0x1ccc] ss:$16 sps:$4 sm:$0xff]  }
 0x3c1   :  { %7987 = vmatpush1.bf16.msra.mxu0 %v18036_v57  ;;  %9155 = vmatpush1.bf16.msra.mxu1 %v18039_v58  ;;  %v14284_v57 = vcombine.low %v194_v46, %v210_v47  ;;  %v18620_v58 = vld [vmem:[#allocation2 + $0x70] sm:$0xff]  ;;  %v18183_v46 = vld [vmem:[#allocation5 + $0x1e28] ss:$16 sps:$4 sm:$0xff]  }
 0x3c2   :  { %7988 = vmatprep.subr.bf16.mxu0 %v18044_v59  ;;  %9156 = vmatprep.subr.bf16.mxu1 %v18047_v60  ;;  %v18622_v59 = vld [vmem:[#allocation2 + $0xf0] sm:$0xff] }
 0x3c3   :  { %v18114_v60 = vld [vmem:[#allocation5 + $0x1cc0] ss:$16 sps:$4 sm:$0xff]   ;;  %v18188_v47 = vld [vmem:[#allocation5 + $0x1e44] ss:$16 sps:$4 sm:$0xff]  }
 0x3c5   :  { %7989 = vmatpush1.bf16.msra.mxu0 %v18042_v61  ;;  %9157 = vmatpush1.bf16.msra.mxu1 %v18045_v62  ;;  %v18117_v61 = vld [vmem:[#allocation5 + $0x1cc8] ss:$16 sps:$4 sm:$0xff]   ;;  %v18122_v62 = vld [vmem:[#allocation5 + $0x1ce4] ss:$16 sps:$4 sm:$0xff]  }
 0x3c6   :  { %7990 = vmatprep.subr.bf16.mxu0 %v18050_v63  ;;  %9158 = vmatprep.subr.bf16.mxu1 %v18053_v0  ;;  %v18125_v63 = vld [vmem:[#allocation5 + $0x1cec] ss:$16 sps:$4 sm:$0xff]   ;;  %v14191_v0 = vcombine.high %v18620_v58, %v18622_v59 }
 0x3c9   :  { %7991 = vmatpush1.bf16.msra.mxu0 %v18048_v1  ;;  %9159 = vmatpush1.bf16.msra.mxu1 %v18051_v2  ;;  %v18120_v1 = vld [vmem:[#allocation5 + $0x1ce0] ss:$16 sps:$4 sm:$0xff]   ;;  %v18123_v2 = vld [vmem:[#allocation5 + $0x1ce8] ss:$16 sps:$4 sm:$0xff]  }
 0x3ca   :  { %7992 = vmatprep.subr.bf16.mxu0 %v18056_v3  ;;  %9160 = vmatprep.subr.bf16.mxu1 %v18059_v4  ;;  %v18128_v3 = vld [vmem:[#allocation5 + $0x1d04] ss:$16 sps:$4 sm:$0xff]   ;;  %v18131_v4 = vld [vmem:[#allocation5 + $0x1d0c] ss:$16 sps:$4 sm:$0xff]  }
 0x3cd   :  { %7993 = vmatpush1.bf16.msra.mxu0 %v18054_v5  ;;  %9161 = vmatpush1.bf16.msra.mxu1 %v18057_v6  ;;  %v18126_v5 = vld [vmem:[#allocation5 + $0x1d00] ss:$16 sps:$4 sm:$0xff]   ;;  %v18129_v6 = vld [vmem:[#allocation5 + $0x1d08] ss:$16 sps:$4 sm:$0xff]  }
 0x3ce   :  { %7994 = vmatprep.subr.bf16.mxu0 %v18062_v7  ;;  %9162 = vmatprep.subr.bf16.mxu1 %v18065_v8  ;;  %v18134_v7 = vld [vmem:[#allocation5 + $0x1d24] ss:$16 sps:$4 sm:$0xff]   ;;  %v18137_v8 = vld [vmem:[#allocation5 + $0x1d2c] ss:$16 sps:$4 sm:$0xff]  }
 0x3d1   :  { %7995 = vmatpush1.bf16.msra.mxu0 %v18060_v9  ;;  %9163 = vmatpush1.bf16.msra.mxu1 %v18063_v10  ;;  %v18132_v9 = vld [vmem:[#allocation5 + $0x1d20] ss:$16 sps:$4 sm:$0xff]   ;;  %v18135_v10 = vld [vmem:[#allocation5 + $0x1d28] ss:$16 sps:$4 sm:$0xff]  }
 0x3d2   :  { %7996 = vmatprep.subr.bf16.mxu0 %v18068_v11  ;;  %9164 = vmatprep.subr.bf16.mxu1 %v18071_v12  ;;  %v18140_v11 = vld [vmem:[#allocation5 + $0x1d44] ss:$16 sps:$4 sm:$0xff]   ;;  %v18143_v12 = vld [vmem:[#allocation5 + $0x1d4c] ss:$16 sps:$4 sm:$0xff]  }
 0x3d5   :  { %7997 = vmatpush1.bf16.msra.mxu0 %v18066_v13  ;;  %9165 = vmatpush1.bf16.msra.mxu1 %v18069_v14  ;;  %v18138_v13 = vld [vmem:[#allocation5 + $0x1d40] ss:$16 sps:$4 sm:$0xff]   ;;  %v18141_v14 = vld [vmem:[#allocation5 + $0x1d48] ss:$16 sps:$4 sm:$0xff]  }
 0x3d6   :  { %7998 = vmatprep.subr.bf16.mxu0 %v18074_v15  ;;  %9166 = vmatprep.subr.bf16.mxu1 %v18077_v16  ;;  %v18146_v15 = vld [vmem:[#allocation5 + $0x1d64] ss:$16 sps:$4 sm:$0xff]   ;;  %v18149_v16 = vld [vmem:[#allocation5 + $0x1d6c] ss:$16 sps:$4 sm:$0xff]  }
 0x3d9   :  { %7999 = vmatpush1.bf16.msra.mxu0 %v18072_v17  ;;  %9167 = vmatpush1.bf16.msra.mxu1 %v18075_v18  ;;  %v18144_v17 = vld [vmem:[#allocation5 + $0x1d60] ss:$16 sps:$4 sm:$0xff]   ;;  %v18147_v18 = vld [vmem:[#allocation5 + $0x1d68] ss:$16 sps:$4 sm:$0xff]  }
 0x3da   :  { %8041 = vmatprep.subr.bf16.mxu0 %v18080_v19  ;;  %9209 = vmatprep.subr.bf16.mxu1 %v18083_v20  ;;  %v18152_v19 = vld [vmem:[#allocation5 + $0x1d84] ss:$16 sps:$4 sm:$0xff]   ;;  %v18155_v20 = vld [vmem:[#allocation5 + $0x1d8c] ss:$16 sps:$4 sm:$0xff]  }
 0x3dc   :  { %8001 = vmatmul.mubr.bf16.vlgmr.msra.gmra.mrb[0].mxu0 %v14188_v21  ;;  %9169 = vmatmul.mubr.bf16.vlgmr.msra.gmra.mrb[0].mxu1 %v14188_v21  ;;  %v18150_v21 = vld [vmem:[#allocation5 + $0x1d80] ss:$16 sps:$4 sm:$0xff]  }
 0x3dd   :  { %8042 = vmatpush1.bf16.msra.mxu0 %v18078_v24  ;;  %9210 = vmatpush1.bf16.msra.mxu1 %v18081_v25  ;;  %v18161_v24 = vld [vmem:[#allocation5 + $0x1dac] ss:$16 sps:$4 sm:$0xff]   ;;  %v18156_v25 = vld [vmem:[#allocation5 + $0x1da0] ss:$16 sps:$4 sm:$0xff]  }
 0x3de   :  { %8043 = vmatprep.subr.bf16.mxu0 %v18086_v26  ;;  %9211 = vmatprep.subr.bf16.mxu1 %v18089_v27  ;;  %v18159_v26 = vld [vmem:[#allocation5 + $0x1da8] ss:$16 sps:$4 sm:$0xff]   ;;  %v18164_v27 = vld [vmem:[#allocation5 + $0x1dc4] ss:$16 sps:$4 sm:$0xff]  }
 0x3df   :  { %8010 = vmatprep.mubr.bf16.mxu0 %v14221_v28  ;;  %9178 = vmatprep.mubr.bf16.mxu1 %v14221_v28  ;;  %v18167_v28 = vld [vmem:[#allocation5 + $0x1dcc] ss:$16 sps:$4 sm:$0xff]  }
 0x3e1   :  { %8044 = vmatpush1.bf16.msra.mxu0 %v18084_v29  ;;  %9212 = vmatpush1.bf16.msra.mxu1 %v18087_v30  ;;  %v18162_v29 = vld [vmem:[#allocation5 + $0x1dc0] ss:$16 sps:$4 sm:$0xff]   ;;  %v18165_v30 = vld [vmem:[#allocation5 + $0x1dc8] ss:$16 sps:$4 sm:$0xff]  }
 0x3e2   :  { %8045 = vmatprep.subr.bf16.mxu0 %v18092_v31  ;;  %9213 = vmatprep.subr.bf16.mxu1 %v18095_v32  ;;  %v18170_v31 = vld [vmem:[#allocation5 + $0x1de4] ss:$16 sps:$4 sm:$0xff]   ;;  %v18173_v32 = vld [vmem:[#allocation5 + $0x1dec] ss:$16 sps:$4 sm:$0xff]  }
 0x3e4   :  { %8011 = vmatmul.mubr.bf16.gmra.mrb[4].mxu0 %v14220_v33  ;;  %9179 = vmatmul.mubr.bf16.gmra.mrb[4].mxu1 %v14220_v33  ;;  %v18168_v33 = vld [vmem:[#allocation5 + $0x1de0] ss:$16 sps:$4 sm:$0xff]  }
 0x3e5   :  { %8046 = vmatpush1.bf16.msra.mxu0 %v18090_v36  ;;  %9214 = vmatpush1.bf16.msra.mxu1 %v18093_v37  ;;  %v18179_v36 = vld [vmem:[#allocation5 + $0x1e0c] ss:$16 sps:$4 sm:$0xff]   ;;  %v14190_v37 = vcombine.low %v18620_v58, %v18622_v59  ;;  %v18195_v58 = vld [vmem:[#allocation5 + $0x1e68] ss:$16 sps:$4 sm:$0xff]   ;;  %v18200_v59 = vld [vmem:[#allocation5 + $0x1e84] ss:$16 sps:$4 sm:$0xff]  }
 0x3e6   :  { %8047 = vmatprep.subr.bf16.mxu0 %v18098_v38  ;;  %9215 = vmatprep.subr.bf16.mxu1 %v18101_v39  ;;  %v131_v38 = vld [vmem:[#allocation2 + $0x170] sm:$0xff] }
 0x3e7   :  { %8020 = vmatprep.mubr.bf16.mxu0 %v14253_v40  ;;  %9188 = vmatprep.mubr.bf16.mxu1 %v14253_v40  ;;  %v147_v39 = vld [vmem:[#allocation2 + $0x1f0] sm:$0xff] }
 0x3e8   :  { %v18174_v40 = vld [vmem:[#allocation5 + $0x1e00] ss:$16 sps:$4 sm:$0xff]  }
 0x3e9   :  { %8048 = vmatpush1.bf16.msra.mxu0 %v18096_v41  ;;  %9216 = vmatpush1.bf16.msra.mxu1 %v18099_v42  ;;  %v18177_v41 = vld [vmem:[#allocation5 + $0x1e08] ss:$16 sps:$4 sm:$0xff]   ;;  %v18182_v42 = vld [vmem:[#allocation5 + $0x1e24] ss:$16 sps:$4 sm:$0xff]  }
 0x3ea   :  { %8049 = vmatprep.subr.bf16.mxu0 %v18104_v43  ;;  %9217 = vmatprep.subr.bf16.mxu1 %v18107_v44  ;;  %v18185_v43 = vld [vmem:[#allocation5 + $0x1e2c] ss:$16 sps:$4 sm:$0xff]   ;;  %v14223_v44 = vcombine.high %v131_v38, %v147_v39 }
 0x3ec   :  { %8021 = vmatmul.mubr.bf16.gmra.mrb[8].mxu0 %v14252_v45  ;;  %9189 = vmatmul.mubr.bf16.gmra.mrb[8].mxu1 %v14252_v45  ;;  %v18180_v45 = vld [vmem:[#allocation5 + $0x1e20] ss:$16 sps:$4 sm:$0xff]  }
 0x3ed   :  { %8050 = vmatpush1.bf16.msra.mxu0 %v18102_v48  ;;  %9218 = vmatpush1.bf16.msra.mxu1 %v18105_v49  ;;  %v18191_v48 = vld [vmem:[#allocation5 + $0x1e4c] ss:$16 sps:$4 sm:$0xff]   ;;  %v14222_v49 = vcombine.low %v131_v38, %v147_v39  ;;  %v18249_v38 = vld [vmem:[#allocation5 + $0x1f88] ss:$16 sps:$4 sm:$0xff]   ;;  %v18254_v39 = vld [vmem:[#allocation5 + $0x1fa4] ss:$16 sps:$4 sm:$0xff]  }
 0x3ee   :  { %8051 = vmatprep.subr.bf16.mxu0 %v18110_v50  ;;  %9219 = vmatprep.subr.bf16.mxu1 %v18113_v51  ;;  %v163_v50 = vld [vmem:[#allocation2 + $0x270] sm:$0xff] }
 0x3ef   :  { %8030 = vmatprep.mubr.bf16.mxu0 %v14285_v52  ;;  %9198 = vmatprep.mubr.bf16.mxu1 %v14285_v52  ;;  %v179_v51 = vld [vmem:[#allocation2 + $0x2f0] sm:$0xff] }
 0x3f0   :  { %v18186_v52 = vld [vmem:[#allocation5 + $0x1e40] ss:$16 sps:$4 sm:$0xff]  }
 0x3f1   :  { %8052 = vmatpush1.bf16.msra.mxu0 %v18108_v53  ;;  %9220 = vmatpush1.bf16.msra.mxu1 %v18111_v54  ;;  %v18189_v53 = vld [vmem:[#allocation5 + $0x1e48] ss:$16 sps:$4 sm:$0xff]   ;;  %v18194_v54 = vld [vmem:[#allocation5 + $0x1e64] ss:$16 sps:$4 sm:$0xff]  }
 0x3f2   :  { %8053 = vmatprep.subr.bf16.mxu0 %v18116_v55  ;;  %9221 = vmatprep.subr.bf16.mxu1 %v18119_v56  ;;  %v18197_v55 = vld [vmem:[#allocation5 + $0x1e6c] ss:$16 sps:$4 sm:$0xff]   ;;  %v14255_v56 = vcombine.high %v163_v50, %v179_v51 }
 0x3f4   :  { %8031 = vmatmul.mubr.bf16.gmra.mrb[12].mxu0 %v14284_v57  ;;  %9199 = vmatmul.mubr.bf16.gmra.mrb[12].mxu1 %v14284_v57  ;;  %v18192_v57 = vld [vmem:[#allocation5 + $0x1e60] ss:$16 sps:$4 sm:$0xff]  }
 0x3f5   :  { %8054 = vmatpush1.bf16.msra.mxu0 %v18114_v60  ;;  %9222 = vmatpush1.bf16.msra.mxu1 %v18117_v61  ;;  %v18203_v60 = vld [vmem:[#allocation5 + $0x1e8c] ss:$16 sps:$4 sm:$0xff]   ;;  %v14254_v61 = vcombine.low %v163_v50, %v179_v51  ;;  %v9379_v50 = vld [vmem:[#allocation8 + $0x40] sm:$0xff] }
 0x3f6   :  { %8055 = vmatprep.subr.bf16.mxu0 %v18122_v62  ;;  %9223 = vmatprep.subr.bf16.mxu1 %v18125_v63  ;;  %v195_v62 = vld [vmem:[#allocation2 + $0x370] sm:$0xff] }
 0x3f7   :  { %8073 = vmatprep.mubr.bf16.mxu0 %v14191_v0  ;;  %9241 = vmatprep.mubr.bf16.mxu1 %v14191_v0  ;;  %v211_v63 = vld [vmem:[#allocation2 + $0x3f0] sm:$0xff] }
 0x3f8   :  { %v18198_v0 = vld [vmem:[#allocation5 + $0x1e80] ss:$16 sps:$4 sm:$0xff]  }
 0x3f9   :  { %8056 = vmatpush1.bf16.msra.mxu0 %v18120_v1  ;;  %9224 = vmatpush1.bf16.msra.mxu1 %v18123_v2  ;;  %v18201_v1 = vld [vmem:[#allocation5 + $0x1e88] ss:$16 sps:$4 sm:$0xff]   ;;  %v18206_v2 = vld [vmem:[#allocation5 + $0x1ea4] ss:$16 sps:$4 sm:$0xff]   ;;  %v9372_v51 = vld [vmem:[#allocation8 + $0x8] sm:$0xff] }
 0x3fa   :  { %8057 = vmatprep.subr.bf16.mxu0 %v18128_v3  ;;  %9225 = vmatprep.subr.bf16.mxu1 %v18131_v4  ;;  %v18209_v3 = vld [vmem:[#allocation5 + $0x1eac] ss:$16 sps:$4 sm:$0xff]   ;;  %v14287_v4 = vcombine.high %v195_v62, %v211_v63 }
 0x3fd   :  { %8058 = vmatpush1.bf16.msra.mxu0 %v18126_v5  ;;  %9226 = vmatpush1.bf16.msra.mxu1 %v18129_v6  ;;  %v18204_v5 = vld [vmem:[#allocation5 + $0x1ea0] ss:$16 sps:$4 sm:$0xff]   ;;  %v18207_v6 = vld [vmem:[#allocation5 + $0x1ea8] ss:$16 sps:$4 sm:$0xff]  }
 0x3fe   :  { %8059 = vmatprep.subr.bf16.mxu0 %v18134_v7  ;;  %9227 = vmatprep.subr.bf16.mxu1 %v18137_v8  ;;  %v18212_v7 = vld [vmem:[#allocation5 + $0x1ec4] ss:$16 sps:$4 sm:$0xff]   ;;  %v18215_v8 = vld [vmem:[#allocation5 + $0x1ecc] ss:$16 sps:$4 sm:$0xff]  }
 0x401   :  { %8060 = vmatpush1.bf16.msra.mxu0 %v18132_v9  ;;  %9228 = vmatpush1.bf16.msra.mxu1 %v18135_v10  ;;  %v14286_v9 = vcombine.low %v195_v62, %v211_v63  ;;  %v18628_v10 = vld [vmem:[#allocation2 + $0x78] sm:$0xff]  ;;  %v9388_v62 = vld [vmem:[#allocation8 + $0x88] sm:$0xff] }
 0x402   :  { %8061 = vmatprep.subr.bf16.mxu0 %v18140_v11  ;;  %9229 = vmatprep.subr.bf16.mxu1 %v18143_v12  ;;  %v18630_v11 = vld [vmem:[#allocation2 + $0xf8] sm:$0xff]  ;;  %v18210_v12 = vld [vmem:[#allocation5 + $0x1ec0] ss:$16 sps:$4 sm:$0xff]  }
 0x403   :  { %v9396_v63 = vld [vmem:[#allocation8 + $0xc8] sm:$0xff] }
 0x405   :  { %8062 = vmatpush1.bf16.msra.mxu0 %v18138_v13  ;;  %9230 = vmatpush1.bf16.msra.mxu1 %v18141_v14  ;;  %v18213_v13 = vld [vmem:[#allocation5 + $0x1ec8] ss:$16 sps:$4 sm:$0xff]   ;;  %v18218_v14 = vld [vmem:[#allocation5 + $0x1ee4] ss:$16 sps:$4 sm:$0xff]  }
 0x406   :  { %8063 = vmatprep.subr.bf16.mxu0 %v18146_v15  ;;  %9231 = vmatprep.subr.bf16.mxu1 %v18149_v16  ;;  %v18221_v15 = vld [vmem:[#allocation5 + $0x1eec] ss:$16 sps:$4 sm:$0xff]   ;;  %v14193_v16 = vcombine.high %v18628_v10, %v18630_v11 }
 0x409   :  { %8064 = vmatpush1.bf16.msra.mxu0 %v18144_v17  ;;  %9232 = vmatpush1.bf16.msra.mxu1 %v18147_v18  ;;  %v18216_v17 = vld [vmem:[#allocation5 + $0x1ee0] ss:$16 sps:$4 sm:$0xff]   ;;  %v18219_v18 = vld [vmem:[#allocation5 + $0x1ee8] ss:$16 sps:$4 sm:$0xff]  }
 0x40a   :  { %8065 = vmatprep.subr.bf16.mxu0 %v18152_v19  ;;  %9233 = vmatprep.subr.bf16.mxu1 %v18155_v20  ;;  %v18224_v19 = vld [vmem:[#allocation5 + $0x1f04] ss:$16 sps:$4 sm:$0xff]   ;;  %v18227_v20 = vld [vmem:[#allocation5 + $0x1f0c] ss:$16 sps:$4 sm:$0xff]  }
 0x40d   :  { %8066 = vmatpush1.bf16.msra.mxu0 %v18150_v21  ;;  %9234 = vmatpush1.bf16.msra.mxu1 %v18153_v22  ;;  %v18222_v21 = vld [vmem:[#allocation5 + $0x1f00] ss:$16 sps:$4 sm:$0xff]   ;;  %v18225_v22 = vld [vmem:[#allocation5 + $0x1f08] ss:$16 sps:$4 sm:$0xff]  }
 0x40e   :  { %8067 = vmatprep.subr.bf16.mxu0 %v18158_v23  ;;  %9235 = vmatprep.subr.bf16.mxu1 %v18161_v24  ;;  %v18230_v23 = vld [vmem:[#allocation5 + $0x1f24] ss:$16 sps:$4 sm:$0xff]   ;;  %v18233_v24 = vld [vmem:[#allocation5 + $0x1f2c] ss:$16 sps:$4 sm:$0xff]  }
 0x411   :  { %8068 = vmatpush1.bf16.msra.mxu0 %v18156_v25  ;;  %9236 = vmatpush1.bf16.msra.mxu1 %v18159_v26  ;;  %v18228_v25 = vld [vmem:[#allocation5 + $0x1f20] ss:$16 sps:$4 sm:$0xff]   ;;  %v18231_v26 = vld [vmem:[#allocation5 + $0x1f28] ss:$16 sps:$4 sm:$0xff]  }
 0x412   :  { %8069 = vmatprep.subr.bf16.mxu0 %v18164_v27  ;;  %9237 = vmatprep.subr.bf16.mxu1 %v18167_v28  ;;  %v18236_v27 = vld [vmem:[#allocation5 + $0x1f44] ss:$16 sps:$4 sm:$0xff]   ;;  %v18239_v28 = vld [vmem:[#allocation5 + $0x1f4c] ss:$16 sps:$4 sm:$0xff]  }
 0x415   :  { %8070 = vmatpush1.bf16.msra.mxu0 %v18162_v29  ;;  %9238 = vmatpush1.bf16.msra.mxu1 %v18165_v30  ;;  %v18234_v29 = vld [vmem:[#allocation5 + $0x1f40] ss:$16 sps:$4 sm:$0xff]   ;;  %v18237_v30 = vld [vmem:[#allocation5 + $0x1f48] ss:$16 sps:$4 sm:$0xff]  }
 0x416   :  { %8071 = vmatprep.subr.bf16.mxu0 %v18170_v31  ;;  %9239 = vmatprep.subr.bf16.mxu1 %v18173_v32  ;;  %v18242_v31 = vld [vmem:[#allocation5 + $0x1f64] ss:$16 sps:$4 sm:$0xff]   ;;  %v18245_v32 = vld [vmem:[#allocation5 + $0x1f6c] ss:$16 sps:$4 sm:$0xff]  }
 0x419   :  { %8072 = vmatpush1.bf16.msra.mxu0 %v18168_v33  ;;  %9240 = vmatpush1.bf16.msra.mxu1 %v18171_v34  ;;  %v18240_v33 = vld [vmem:[#allocation5 + $0x1f60] ss:$16 sps:$4 sm:$0xff]   ;;  %v18243_v34 = vld [vmem:[#allocation5 + $0x1f68] ss:$16 sps:$4 sm:$0xff]  }
 0x41a   :  { %8114 = vmatprep.subr.bf16.mxu0 %v18176_v35  ;;  %9282 = vmatprep.subr.bf16.mxu1 %v18179_v36  ;;  %v18248_v35 = vld [vmem:[#allocation5 + $0x1f84] ss:$16 sps:$4 sm:$0xff]   ;;  %v18251_v36 = vld [vmem:[#allocation5 + $0x1f8c] ss:$16 sps:$4 sm:$0xff]  }
 0x41c   :  { %8074 = vmatmul.mubr.bf16.vlgmr.msra.gmra.mrb[0].mxu0 %v14190_v37  ;;  %9242 = vmatmul.mubr.bf16.vlgmr.msra.gmra.mrb[0].mxu1 %v14190_v37  ;;  %v18246_v37 = vld [vmem:[#allocation5 + $0x1f80] ss:$16 sps:$4 sm:$0xff]  }
 0x41d   :  { %8115 = vmatpush1.bf16.msra.mxu0 %v18174_v40  ;;  %9283 = vmatpush1.bf16.msra.mxu1 %v18177_v41  ;;  %v18257_v40 = vld [vmem:[#allocation5 + $0x1fac] ss:$16 sps:$4 sm:$0xff]   ;;  %v18252_v41 = vld [vmem:[#allocation5 + $0x1fa0] ss:$16 sps:$4 sm:$0xff]  }
 0x41e   :  { %8116 = vmatprep.subr.bf16.mxu0 %v18182_v42  ;;  %9284 = vmatprep.subr.bf16.mxu1 %v18185_v43  ;;  %v18255_v42 = vld [vmem:[#allocation5 + $0x1fa8] ss:$16 sps:$4 sm:$0xff]   ;;  %v18260_v43 = vld [vmem:[#allocation5 + $0x1fc4] ss:$16 sps:$4 sm:$0xff]  }
 0x41f   :  { %8083 = vmatprep.mubr.bf16.mxu0 %v14223_v44  ;;  %9251 = vmatprep.mubr.bf16.mxu1 %v14223_v44  ;;  %v18263_v44 = vld [vmem:[#allocation5 + $0x1fcc] ss:$16 sps:$4 sm:$0xff]  }
 0x421   :  { %8117 = vmatpush1.bf16.msra.mxu0 %v18180_v45  ;;  %9285 = vmatpush1.bf16.msra.mxu1 %v18183_v46  ;;  %v18258_v45 = vld [vmem:[#allocation5 + $0x1fc0] ss:$16 sps:$4 sm:$0xff]   ;;  %v18261_v46 = vld [vmem:[#allocation5 + $0x1fc8] ss:$16 sps:$4 sm:$0xff]  }
 0x422   :  { %8118 = vmatprep.subr.bf16.mxu0 %v18188_v47  ;;  %9286 = vmatprep.subr.bf16.mxu1 %v18191_v48  ;;  %v18266_v47 = vld [vmem:[#allocation5 + $0x1fe4] ss:$16 sps:$4 sm:$0xff]   ;;  %v18269_v48 = vld [vmem:[#allocation5 + $0x1fec] ss:$16 sps:$4 sm:$0xff]  }
 0x424   :  { %8084 = vmatmul.mubr.bf16.gmra.mrb[4].mxu0 %v14222_v49  ;;  %9252 = vmatmul.mubr.bf16.gmra.mrb[4].mxu1 %v14222_v49  ;;  %v9371_v49 = vld [vmem:[#allocation8] sm:$0xff] }
 0x425   :  { %8119 = vmatpush1.bf16.msra.mxu0 %v18186_v52  ;;  %9287 = vmatpush1.bf16.msra.mxu1 %v18189_v53  ;;  %v9380_v52 = vld [vmem:[#allocation8 + $0x48] sm:$0xff] }
 0x426   :  { %8120 = vmatprep.subr.bf16.mxu0 %v18194_v54  ;;  %9288 = vmatprep.subr.bf16.mxu1 %v18197_v55  ;;  %v18264_v53 = vld [vmem:[#allocation5 + $0x1fe0] ss:$16 sps:$4 sm:$0xff]   ;;  %v18267_v54 = vld [vmem:[#allocation5 + $0x1fe8] ss:$16 sps:$4 sm:$0xff]  }
 0x427   :  { %8093 = vmatprep.mubr.bf16.mxu0 %v14255_v56  ;;  %9261 = vmatprep.mubr.bf16.mxu1 %v14255_v56  ;;  %v132_v55 = vld [vmem:[#allocation2 + $0x178] sm:$0xff] }
 0x428   :  { %v148_v56 = vld [vmem:[#allocation2 + $0x1f8] sm:$0xff] }
 0x429   :  { %8121 = vmatpush1.bf16.msra.mxu0 %v18192_v57  ;;  %9289 = vmatpush1.bf16.msra.mxu1 %v18195_v58  ;;  %v15315_v57 = vcombine.high %v9371_v49, %v9379_v50  ;;  %v15317_v58 = vcombine.high %v9372_v51, %v9380_v52 }
 0x42a   :  { %8122 = vmatprep.subr.bf16.mxu0 %v18200_v59  ;;  %9290 = vmatprep.subr.bf16.mxu1 %v18203_v60  ;;  %v9387_v59 = vld [vmem:[#allocation8 + $0x80] sm:$0xff]  ;;  %v14192_v60 = vcombine.low %v18628_v10, %v18630_v11  ;;  %v180_v10 = vld [vmem:[#allocation2 + $0x2f8] sm:$0xff] }
 0x42c   :  { %8094 = vmatmul.mubr.bf16.gmra.mrb[8].mxu0 %v14254_v61  ;;  %9262 = vmatmul.mubr.bf16.gmra.mrb[8].mxu1 %v14254_v61  ;;  %v9395_v61 = vld [vmem:[#allocation8 + $0xc0] sm:$0xff] }
 0x42d   :  { %8123 = vmatpush1.bf16.msra.mxu0 %v18198_v0  ;;  %9291 = vmatpush1.bf16.msra.mxu1 %v18201_v1  ;;  %v14225_v0 = vcombine.high %v132_v55, %v148_v56  ;;  %v15314_v1 = vcombine.low %v9371_v49, %v9379_v50  ;;  %v15330_v11 = vcombine.low %v9387_v59, %v9395_v61 }
 0x42e   :  { %8124 = vmatprep.subr.bf16.mxu0 %v18206_v2  ;;  %9292 = vmatprep.subr.bf16.mxu1 %v18209_v3  ;;  %v15316_v2 = vcombine.low %v9372_v51, %v9380_v52  ;;  %v15331_v3 = vcombine.high %v9387_v59, %v9395_v61 }
 0x42f   :  { %8103 = vmatprep.mubr.bf16.mxu0 %v14287_v4  ;;  %9271 = vmatprep.mubr.bf16.mxu1 %v14287_v4  ;;  %v15333_v4 = vcombine.high %v9388_v62, %v9396_v63 }
 0x431   :  { %8125 = vmatpush1.bf16.msra.mxu0 %v18204_v5  ;;  %9293 = vmatpush1.bf16.msra.mxu1 %v18207_v6  ;;  %v9403_v5 = vld [vmem:[#allocation8 + $0x100] sm:$0xff] }
 0x432   :  { %8126 = vmatprep.subr.bf16.mxu0 %v18212_v7  ;;  %9294 = vmatprep.subr.bf16.mxu1 %v18215_v8  ;;  %v9411_v6 = vld [vmem:[#allocation8 + $0x140] sm:$0xff]  ;;  %v9404_v7 = vld [vmem:[#allocation8 + $0x108] sm:$0xff] }
 0x433   :  { %v9412_v8 = vld [vmem:[#allocation8 + $0x148] sm:$0xff] }
 0x434   :  { %8104 = vmatmul.mubr.bf16.gmra.mrb[12].mxu0 %v14286_v9  ;;  %9272 = vmatmul.mubr.bf16.gmra.mrb[12].mxu1 %v14286_v9  ;;  %v164_v9 = vld [vmem:[#allocation2 + $0x278] sm:$0xff] }
 0x435   :  { %8127 = vmatpush1.bf16.msra.mxu0 %v18210_v12  ;;  %9295 = vmatpush1.bf16.msra.mxu1 %v18213_v13  ;;  %v15332_v12 = vcombine.low %v9388_v62, %v9396_v63  ;;  %v15347_v13 = vcombine.high %v9403_v5, %v9411_v6  ;;  %v9499_v62 = vld [vmem:[#allocation8 + $0x400] sm:$0xff] }
 0x436   :  { %8128 = vmatprep.subr.bf16.mxu0 %v18218_v14  ;;  %9296 = vmatprep.subr.bf16.mxu1 %v18221_v15  ;;  %v15349_v14 = vcombine.high %v9404_v7, %v9412_v8  ;;  %v9419_v15 = vld [vmem:[#allocation8 + $0x180] sm:$0xff] }
 0x437   :  { %8146 = vmatprep.mubr.bf16.mxu0 %v14193_v16  ;;  %9314 = vmatprep.mubr.bf16.mxu1 %v14193_v16  ;;  %v14224_v16 = vcombine.low %v132_v55, %v148_v56  ;;  %v9491_v55 = vld [vmem:[#allocation8 + $0x3c0] sm:$0xff]  ;;  %v9484_v56 = vld [vmem:[#allocation8 + $0x388] sm:$0xff] }
 0x438   :  { %v9507_v63 = vld [vmem:[#allocation8 + $0x440] sm:$0xff] }
 0x439   :  { %8129 = vmatpush1.bf16.msra.mxu0 %v18216_v17  ;;  %9297 = vmatpush1.bf16.msra.mxu1 %v18219_v18  ;;  %v9427_v17 = vld [vmem:[#allocation8 + $0x1c0] sm:$0xff]  ;;  %v9420_v18 = vld [vmem:[#allocation8 + $0x188] sm:$0xff] }
 0x43a   :  { %8130 = vmatprep.subr.bf16.mxu0 %v18224_v19  ;;  %9298 = vmatprep.subr.bf16.mxu1 %v18227_v20  ;;  %v9428_v19 = vld [vmem:[#allocation8 + $0x1c8] sm:$0xff]  ;;  %v14257_v20 = vcombine.high %v164_v9, %v180_v10 }
 0x43d   :  { %8131 = vmatpush1.bf16.msra.mxu0 %v18222_v21  ;;  %9299 = vmatpush1.bf16.msra.mxu1 %v18225_v22  ;;  %v15346_v21 = vcombine.low %v9403_v5, %v9411_v6  ;;  %v15348_v22 = vcombine.low %v9404_v7, %v9412_v8  ;;  %v9515_v6 = vld [vmem:[#allocation8 + $0x480] sm:$0xff]  ;;  %v9516_v8 = vld [vmem:[#allocation8 + $0x488] sm:$0xff] }
 0x43e   :  { %8132 = vmatprep.subr.bf16.mxu0 %v18230_v23  ;;  %9300 = vmatprep.subr.bf16.mxu1 %v18233_v24  ;;  %v15363_v23 = vcombine.high %v9419_v15, %v9427_v17  ;;  %v15365_v24 = vcombine.high %v9420_v18, %v9428_v19  ;;  %v9523_v7 = vld [vmem:[#allocation8 + $0x4c0] sm:$0xff] }
 0x441   :  { %8133 = vmatpush1.bf16.msra.mxu0 %v18228_v25  ;;  %9301 = vmatpush1.bf16.msra.mxu1 %v18231_v26  ;;  %v9435_v25 = vld [vmem:[#allocation8 + $0x200] sm:$0xff] }
 0x442   :  { %8134 = vmatprep.subr.bf16.mxu0 %v18236_v27  ;;  %9302 = vmatprep.subr.bf16.mxu1 %v18239_v28  ;;  %v9443_v26 = vld [vmem:[#allocation8 + $0x240] sm:$0xff]  ;;  %v9436_v27 = vld [vmem:[#allocation8 + $0x208] sm:$0xff] }
 0x443   :  { %v9444_v28 = vld [vmem:[#allocation8 + $0x248] sm:$0xff] }
 0x445   :  { %8135 = vmatpush1.bf16.msra.mxu0 %v18234_v29  ;;  %9303 = vmatpush1.bf16.msra.mxu1 %v18237_v30  ;;  %v196_v29 = vld [vmem:[#allocation2 + $0x378] sm:$0xff] }
 0x446   :  { %8136 = vmatprep.subr.bf16.mxu0 %v18242_v31  ;;  %9304 = vmatprep.subr.bf16.mxu1 %v18245_v32  ;;  %v212_v30 = vld [vmem:[#allocation2 + $0x3f8] sm:$0xff]  ;;  %v15362_v31 = vcombine.low %v9419_v15, %v9427_v17  ;;  %v15364_v32 = vcombine.low %v9420_v18, %v9428_v19  ;;  %v9539_v15 = vld [vmem:[#allocation8 + $0x540] sm:$0xff]  ;;  %v9540_v17 = vld [vmem:[#allocation8 + $0x548] sm:$0xff]  ;;  %v15458_v18 = vcombine.low %v9515_v6, %v9523_v7 }
 0x449   :  { %8137 = vmatpush1.bf16.msra.mxu0 %v18240_v33  ;;  %9305 = vmatpush1.bf16.msra.mxu1 %v18243_v34  ;;  %v15379_v33 = vcombine.high %v9435_v25, %v9443_v26  ;;  %v15381_v34 = vcombine.high %v9436_v27, %v9444_v28 }
 0x44a   :  { %8138 = vmatprep.subr.bf16.mxu0 %v18248_v35  ;;  %9306 = vmatprep.subr.bf16.mxu1 %v18251_v36  ;;  %v9451_v35 = vld [vmem:[#allocation8 + $0x280] sm:$0xff]  ;;  %v14256_v36 = vcombine.low %v164_v9, %v180_v10  ;;  %v9524_v9 = vld [vmem:[#allocation8 + $0x4c8] sm:$0xff]  ;;  %v15442_v10 = vcombine.low %v9499_v62, %v9507_v63 }
 0x44b   :  { %v15460_v19 = vcombine.low %v9516_v8, %v9524_v9 }
 0x44d   :  { %8139 = vmatpush1.bf16.msra.mxu0 %v18246_v37  ;;  %9307 = vmatpush1.bf16.msra.mxu1 %v18249_v38  ;;  %v9459_v37 = vld [vmem:[#allocation8 + $0x2c0] sm:$0xff]  ;;  %v9452_v38 = vld [vmem:[#allocation8 + $0x288] sm:$0xff] }
 0x44e   :  { %8140 = vmatprep.subr.bf16.mxu0 %v18254_v39  ;;  %9308 = vmatprep.subr.bf16.mxu1 %v18257_v40  ;;  %v9460_v39 = vld [vmem:[#allocation8 + $0x2c8] sm:$0xff]  ;;  %v14289_v40 = vcombine.high %v196_v29, %v212_v30  ;;  %v15394_v49 = vcombine.low %v9451_v35, %v9459_v37 }
 0x44f   :  { %v15396_v50 = vcombine.low %v9452_v38, %v9460_v39 }
 0x451   :  { %8141 = vmatpush1.bf16.msra.mxu0 %v18252_v41  ;;  %9309 = vmatpush1.bf16.msra.mxu1 %v18255_v42  ;;  %v15378_v41 = vcombine.low %v9435_v25, %v9443_v26  ;;  %v15380_v42 = vcombine.low %v9436_v27, %v9444_v28  ;;  %v9556_v25 = vld [vmem:[#allocation8 + $0x5c8] sm:$0xff] }
 0x452   :  { %8142 = vmatprep.subr.bf16.mxu0 %v18260_v43  ;;  %9310 = vmatprep.subr.bf16.mxu1 %v18263_v44  ;;  %v15395_v43 = vcombine.high %v9451_v35, %v9459_v37  ;;  %v15397_v44 = vcombine.high %v9452_v38, %v9460_v39  ;;  %v9579_v38 = vld [vmem:[#allocation8 + $0x680] sm:$0xff] }
 0x453   :  { %v9587_v39 = vld [vmem:[#allocation8 + $0x6c0] sm:$0xff] }
 0x455   :  { %8143 = vmatpush1.bf16.msra.mxu0 %v18258_v45  ;;  %9311 = vmatpush1.bf16.msra.mxu1 %v18261_v46  ;;  %v9467_v45 = vld [vmem:[#allocation8 + $0x300] sm:$0xff] }
 0x456   :  { %8144 = vmatprep.subr.bf16.mxu0 %v18266_v47  ;;  %9312 = vmatprep.subr.bf16.mxu1 %v18269_v48  ;;  %v9475_v46 = vld [vmem:[#allocation8 + $0x340] sm:$0xff]  ;;  %v9468_v47 = vld [vmem:[#allocation8 + $0x308] sm:$0xff] }
 0x457   :  { %v9476_v48 = vld [vmem:[#allocation8 + $0x348] sm:$0xff]  ;;  %v15411_v51 = vcombine.high %v9467_v45, %v9475_v46 }
 0x458   :  { %v15413_v52 = vcombine.high %v9468_v47, %v9476_v48  ;;  %v15412_v59 = vcombine.low %v9468_v47, %v9476_v48  ;;  %v9595_v48 = vld [vmem:[#allocation8 + $0x700] sm:$0xff] }
 0x459   :  { %8145 = vmatpush1.bf16.msra.mxu0 %v18264_v53  ;;  %9313 = vmatpush1.bf16.msra.mxu1 %v18267_v54  ;;  %v9483_v53 = vld [vmem:[#allocation8 + $0x380] sm:$0xff]  ;;  %v14288_v54 = vcombine.low %v196_v29, %v212_v30 }
 0x45a   :  { %12527 = vmatprep.subr.bf16.mxu0 %v15315_v57  ;;  %12673 = vmatprep.subr.bf16.mxu1 %v15317_v58  ;;  %v9492_v57 = vld [vmem:[#allocation8 + $0x3c8] sm:$0xff]  ;;  %v15410_v58 = vcombine.low %v9467_v45, %v9475_v46  ;;  %v9563_v30 = vld [vmem:[#allocation8 + $0x600] sm:$0xff]  ;;  %v15522_v46 = vcombine.low %v9579_v38, %v9587_v39 }
 0x45b   :  { %v15429_v61 = vcombine.high %v9484_v56, %v9492_v57 }
 0x45c   :  { %8147 = vmatmul.mubr.bf16.vlgmr.msra.gmra.mrb[0].mxu0 %v14192_v60  ;;  %9315 = vmatmul.mubr.bf16.vlgmr.msra.gmra.mrb[0].mxu1 %v14192_v60  ;;  %v15427_v60 = vcombine.high %v9483_v53, %v9491_v55 }
 0x45d   :  { %8156 = vmatprep.mubr.bf16.mxu0 %v14225_v0  ;;  %9324 = vmatprep.mubr.bf16.mxu1 %v14225_v0  ;;  %v9500_v0 = vld [vmem:[#allocation8 + $0x408] sm:$0xff] }
 0x45e   :  { %12528 = vmatpush1.bf16.msra.mxu0 %v15314_v1  ;;  %12674 = vmatpush1.bf16.msra.mxu1 %v15316_v2  ;;  %v9508_v1 = vld [vmem:[#allocation8 + $0x448] sm:$0xff]  ;;  %v15426_v2 = vcombine.low %v9483_v53, %v9491_v55 }
 0x45f   :  { %12529 = vmatprep.subr.bf16.mxu0 %v15331_v3  ;;  %12675 = vmatprep.subr.bf16.mxu1 %v15333_v4  ;;  %v15428_v3 = vcombine.low %v9484_v56, %v9492_v57  ;;  %v15443_v4 = vcombine.high %v9499_v62, %v9507_v63  ;;  %v15445_v5 = vcombine.high %v9500_v0, %v9508_v1  ;;  %v9611_v56 = vld [vmem:[#allocation8 + $0x780] sm:$0xff] }
 0x460   :  { %v9619_v57 = vld [vmem:[#allocation8 + $0x7c0] sm:$0xff] }
 0x462   :  { %12530 = vmatpush1.bf16.msra.mxu0 %v15330_v11  ;;  %12676 = vmatpush1.bf16.msra.mxu1 %v15332_v12  ;;  %v15444_v11 = vcombine.low %v9500_v0, %v9508_v1  ;;  %v15459_v12 = vcombine.high %v9515_v6, %v9523_v7  ;;  %v18636_v0 = vld [vmem:[#allocation8 + $0x800] sm:$0xff] }
 0x463   :  { %12531 = vmatprep.subr.bf16.mxu0 %v15347_v13  ;;  %12677 = vmatprep.subr.bf16.mxu1 %v15349_v14  ;;  %v15461_v13 = vcombine.high %v9516_v8, %v9524_v9  ;;  %v9531_v14 = vld [vmem:[#allocation8 + $0x500] sm:$0xff]  ;;  %v1239_v8 = vlaneseq }
 0x464   :  { %8157 = vmatmul.mubr.bf16.gmra.mrb[4].mxu0 %v14224_v16  ;;  %9325 = vmatmul.mubr.bf16.gmra.mrb[4].mxu1 %v14224_v16  ;;  %v9532_v16 = vld [vmem:[#allocation8 + $0x508] sm:$0xff]  ;;  %v15474_v26 = vcombine.low %v9531_v14, %v9539_v15  ;;  %v9635_v1 = vld [vmem:[#allocation8 + $0x840] sm:$0xff] }
 0x465   :  { %8166 = vmatprep.mubr.bf16.mxu0 %v14257_v20  ;;  %9334 = vmatprep.mubr.bf16.mxu1 %v14257_v20  ;;  %v15475_v20 = vcombine.high %v9531_v14, %v9539_v15  ;;  %v15476_v27 = vcombine.low %v9532_v16, %v9540_v17  ;;  %v18640_v9 = vshrl.u32 %v1239_v8, 7  ;;  %v9684_v8 = vld [vmem:[#allocation8 + $0x9c8] sm:$0xff] }
 0x466   :  { %12532 = vmatpush1.bf16.msra.mxu0 %v15346_v21  ;;  %12678 = vmatpush1.bf16.msra.mxu1 %v15348_v22  ;;  %v15477_v21 = vcombine.high %v9532_v16, %v9540_v17  ;;  %v9547_v22 = vld [vmem:[#allocation8 + $0x580] sm:$0xff] }
 0x467   :  { %12533 = vmatprep.subr.bf16.mxu0 %v15363_v23  ;;  %12679 = vmatprep.subr.bf16.mxu1 %v15365_v24  ;;  %v9555_v23 = vld [vmem:[#allocation8 + $0x5c0] sm:$0xff]  ;;  %v9548_v24 = vld [vmem:[#allocation8 + $0x588] sm:$0xff]  ;;  %v18652_v14 = vsub.s32 3, %v18640_v9 }
 0x468   :  { %v15491_v28 = vcombine.high %v9547_v22, %v9555_v23  ;;  %v15493_v29 = vcombine.high %v9548_v24, %v9556_v25  ;;  %v15492_v35 = vcombine.low %v9548_v24, %v9556_v25 }
 0x46a   :  { %12534 = vmatpush1.bf16.msra.mxu0 %v15362_v31  ;;  %12680 = vmatpush1.bf16.msra.mxu1 %v15364_v32  ;;  %v9571_v31 = vld [vmem:[#allocation8 + $0x640] sm:$0xff]  ;;  %v9564_v32 = vld [vmem:[#allocation8 + $0x608] sm:$0xff] }
 0x46b   :  { %12535 = vmatprep.subr.bf16.mxu0 %v15379_v33  ;;  %12681 = vmatprep.subr.bf16.mxu1 %v15381_v34  ;;  %v9572_v33 = vld [vmem:[#allocation8 + $0x648] sm:$0xff]  ;;  %v15490_v34 = vcombine.low %v9547_v22, %v9555_v23 }
 0x46c   :  { %8167 = vmatmul.mubr.bf16.gmra.mrb[8].mxu0 %v14256_v36  ;;  %9335 = vmatmul.mubr.bf16.gmra.mrb[8].mxu1 %v14256_v36  ;;  %v15507_v36 = vcombine.high %v9563_v30, %v9571_v31  ;;  %v15509_v37 = vcombine.high %v9564_v32, %v9572_v33 }
 0x46d   :  { %8176 = vmatprep.mubr.bf16.mxu0 %v14289_v40  ;;  %9344 = vmatprep.mubr.bf16.mxu1 %v14289_v40  ;;  %v9580_v40 = vld [vmem:[#allocation8 + $0x688] sm:$0xff] }
 0x46e   :  { %12536 = vmatpush1.bf16.msra.mxu0 %v15378_v41  ;;  %12682 = vmatpush1.bf16.msra.mxu1 %v15380_v42  ;;  %v9588_v41 = vld [vmem:[#allocation8 + $0x6c8] sm:$0xff]  ;;  %v15506_v42 = vcombine.low %v9563_v30, %v9571_v31  ;;  %v9643_v31 = vld [vmem:[#allocation8 + $0x880] sm:$0xff] }
 0x46f   :  { %12537 = vmatprep.subr.bf16.mxu0 %v15395_v43  ;;  %12683 = vmatprep.subr.bf16.mxu1 %v15397_v44  ;;  %v15508_v43 = vcombine.low %v9564_v32, %v9572_v33  ;;  %v15523_v44 = vcombine.high %v9579_v38, %v9587_v39  ;;  %v15525_v45 = vcombine.high %v9580_v40, %v9588_v41  ;;  %v9652_v38 = vld [vmem:[#allocation8 + $0x8c8] sm:$0xff] }
 0x470   :  { %v15524_v47 = vcombine.low %v9580_v40, %v9588_v41 }
 0x472   :  { %12538 = vmatpush1.bf16.msra.mxu0 %v15394_v49  ;;  %12684 = vmatpush1.bf16.msra.mxu1 %v15396_v50  ;;  %v9603_v49 = vld [vmem:[#allocation8 + $0x740] sm:$0xff]  ;;  %v9596_v50 = vld [vmem:[#allocation8 + $0x708] sm:$0xff] }
 0x473   :  { %12539 = vmatprep.subr.bf16.mxu0 %v15411_v51  ;;  %12685 = vmatprep.subr.bf16.mxu1 %v15413_v52  ;;  %v15539_v51 = vcombine.high %v9595_v48, %v9603_v49  ;;  %v9604_v52 = vld [vmem:[#allocation8 + $0x748] sm:$0xff]  ;;  %v15538_v53 = vcombine.low %v9595_v48, %v9603_v49 }
 0x474   :  { %8177 = vmatmul.mubr.bf16.gmra.mrb[12].mxu0 %v14288_v54  ;;  %9345 = vmatmul.mubr.bf16.gmra.mrb[12].mxu1 %v14288_v54  ;;  %v15540_v54 = vcombine.low %v9596_v50, %v9604_v52  ;;  %v15541_v55 = vcombine.high %v9596_v50, %v9604_v52  ;;  %v9668_v48 = vld [vmem:[#allocation8 + $0x948] sm:$0xff] }
 0x476   :  { %12540 = vmatpush1.bf16.msra.mxu0 %v15410_v58  ;;  %12686 = vmatpush1.bf16.msra.mxu1 %v15412_v59  ;;  %v9612_v58 = vld [vmem:[#allocation8 + $0x788] sm:$0xff]  ;;  %v15555_v59 = vcombine.high %v9611_v56, %v9619_v57 }
 0x477   :  { %12541 = vmatprep.subr.bf16.mxu0 %v15427_v60  ;;  %12687 = vmatprep.subr.bf16.mxu1 %v15429_v61  ;;  %v9620_v60 = vld [vmem:[#allocation8 + $0x7c8] sm:$0xff]  ;;  %v15554_v61 = vcombine.low %v9611_v56, %v9619_v57 }
 0x478   :  { %v15556_v62 = vcombine.low %v9612_v58, %v9620_v60  ;;  %v15557_v63 = vcombine.high %v9612_v58, %v9620_v60 }
 0x47a   :  { %12542 = vmatpush1.bf16.msra.mxu0 %v15426_v2  ;;  %12688 = vmatpush1.bf16.msra.mxu1 %v15428_v3  ;;  %v9628_v2 = vld [vmem:[#allocation8 + $0x808] sm:$0xff]  ;;  %v15571_v3 = vcombine.high %v18636_v0, %v9635_v1 }
 0x47b   :  { %12543 = vmatprep.subr.bf16.mxu0 %v15443_v4  ;;  %12689 = vmatprep.subr.bf16.mxu1 %v15445_v5  ;;  %v9636_v4 = vld [vmem:[#allocation8 + $0x848] sm:$0xff]  ;;  %v15570_v5 = vcombine.low %v18636_v0, %v9635_v1  ;;  %v9675_v1 = vld [vmem:[#allocation8 + $0x980] sm:$0xff] }
 0x47c   :  { %v15572_v6 = vcombine.low %v9628_v2, %v9636_v4  ;;  %v15573_v7 = vcombine.high %v9628_v2, %v9636_v4 }
 0x47e   :  { %12544 = vmatpush1.bf16.msra.mxu0 %v15442_v10  ;;  %12690 = vmatpush1.bf16.msra.mxu1 %v15444_v11  ;;  %v18643_v10 = vsub.s32 0, %v18640_v9  ;;  %v18646_v11 = vsub.s32 2, %v18640_v9 }
 0x47f   :  { %12545 = vmatprep.subr.bf16.mxu0 %v15459_v12  ;;  %12691 = vmatprep.subr.bf16.mxu1 %v15461_v13  ;;  %v1237_v12 = vld [vmem:[#allocation7] sm:$0xf]  ;;  %v18649_v13 = vsub.s32 1, %v18640_v9 }
 0x480   :  { %v18655_v15 = vrot.slane %v1237_v12, %v18643_v10  ;;  %v18658_v16 = vrot.slane %v1237_v12, %v18646_v11 }
 0x482   :  { %12546 = vmatpush1.bf16.msra.mxu0 %v15458_v18  ;;  %12692 = vmatpush1.bf16.msra.mxu1 %v15460_v19  ;;  %v18661_v19 = vrot.slane %v1237_v12, %v18649_v13 }
 0x483   :  { %12547 = vmatprep.subr.bf16.mxu0 %v15475_v20  ;;  %12693 = vmatprep.subr.bf16.mxu1 %v15477_v21  ;;  %v18664_v20 = vrot.slane %v1237_v12, %v18652_v14 }
 0x486   :  { %12548 = vmatpush1.bf16.msra.mxu0 %v15474_v26  ;;  %12694 = vmatpush1.bf16.msra.mxu1 %v15476_v27 }
 0x487   :  { %12549 = vmatprep.subr.bf16.mxu0 %v15491_v28  ;;  %12695 = vmatprep.subr.bf16.mxu1 %v15493_v29 }
 0x48a   :  { %12550 = vmatpush1.bf16.msra.mxu0 %v15490_v34  ;;  %12696 = vmatpush1.bf16.msra.mxu1 %v15492_v35 }
 0x48b   :  { %12551 = vmatprep.subr.bf16.mxu0 %v15507_v36  ;;  %12697 = vmatprep.subr.bf16.mxu1 %v15509_v37  ;;  %v9651_v36 = vld [vmem:[#allocation8 + $0x8c0] sm:$0xff]  ;;  %v9644_v37 = vld [vmem:[#allocation8 + $0x888] sm:$0xff] }
 0x48e   :  { %12552 = vmatpush1.bf16.msra.mxu0 %v15506_v42  ;;  %12698 = vmatpush1.bf16.msra.mxu1 %v15508_v43  ;;  %v18682_v43 = vld [vmem:[#allocation8 + $0x900] sm:$0xff] }
 0x48f   :  { %12553 = vmatprep.subr.bf16.mxu0 %v15523_v44  ;;  %12699 = vmatprep.subr.bf16.mxu1 %v15525_v45  ;;  %v15587_v44 = vcombine.high %v9643_v31, %v9651_v36  ;;  %v15589_v45 = vcombine.high %v9644_v37, %v9652_v38 }
 0x492   :  { %12554 = vmatpush1.bf16.msra.mxu0 %v15522_v46  ;;  %12700 = vmatpush1.bf16.msra.mxu1 %v15524_v47  ;;  %v9667_v46 = vld [vmem:[#allocation8 + $0x940] sm:$0xff]  ;;  %v9660_v47 = vld [vmem:[#allocation8 + $0x908] sm:$0xff] }
 0x493   :  { %12555 = vmatprep.subr.bf16.mxu0 %v15539_v51  ;;  %12701 = vmatprep.subr.bf16.mxu1 %v15541_v55  ;;  %v15603_v58 = vcombine.high %v18682_v43, %v9667_v46 }
 0x496   :  { %12556 = vmatpush1.bf16.msra.mxu0 %v15538_v53  ;;  %12702 = vmatpush1.bf16.msra.mxu1 %v15540_v54  ;;  %v15586_v53 = vcombine.low %v9643_v31, %v9651_v36  ;;  %v15588_v54 = vcombine.low %v9644_v37, %v9652_v38 }
 0x497   :  { %12557 = vmatprep.subr.bf16.mxu0 %v15555_v59  ;;  %12703 = vmatprep.subr.bf16.mxu1 %v15557_v63  ;;  %v15605_v59 = vcombine.high %v9660_v47, %v9668_v48 }
 0x49a   :  { %12558 = vmatpush1.bf16.msra.mxu0 %v15554_v61  ;;  %12704 = vmatpush1.bf16.msra.mxu1 %v15556_v62 }
 0x49b   :  { %12600 = vmatprep.subr.bf16.mxu0 %v15571_v3  ;;  %12746 = vmatprep.subr.bf16.mxu1 %v15573_v7  ;;  %v9676_v7 = vld [vmem:[#allocation8 + $0x988] sm:$0xff] }
 0x52f   :  { %v8148_v17 = vpop.f32.mrb[0].mxu0  ;;  %v9316_v18 = vpop.f32.mrb[0].mxu1 }
 0x530   :  { %v8150_v21 = vpop.f32.mrb[1].mxu0  ;;  %v9318_v22 = vpop.f32.mrb[1].mxu1  ;;  %v15954_v25 = vadd.f32 %v8148_v17, %v18655_v15  ;;  %v15970_v26 = vadd.f32 %v9316_v18, %v18658_v16  ;;  %v15602_v18 = vcombine.low %v18682_v43, %v9667_v46 }
 0x531   :  { %v8152_v23 = vpop.f32.mrb[2].mxu0  ;;  %v9320_v24 = vpop.f32.mrb[2].mxu1  ;;  %v15955_v32 = vadd.f32 %v8150_v21, %v18661_v19  ;;  %v15971_v33 = vadd.f32 %v9318_v22, %v18664_v20 }
 0x532   :  { %v15956_v27 = vadd.f32 %v8152_v23, %v18655_v15  ;;  %v15972_v28 = vadd.f32 %v9320_v24, %v18658_v16  ;;  %v8154_v29 = vpop.f32.mrb[3].mxu0  ;;  %v9322_v30 = vpop.f32.mrb[3].mxu1  ;;  %v15604_v23 = vcombine.low %v9660_v47, %v9668_v48  ;;  %v18706_v24 = vld [vmem:[#allocation8 + $0xa00] sm:$0xff] }
 0x533   :  { %v15957_v34 = vadd.f32 %v8154_v29, %v18661_v19  ;;  %v15973_v35 = vadd.f32 %v9322_v30, %v18664_v20  ;;  %v9700_v29 = vld [vmem:[#allocation8 + $0xa48] sm:$0xff] }
 0x534   :  { %v18674_v39 = vpack.c.bf16 %v15956_v27, %v15954_v25  ;;  %v18676_v40 = vpack.c.bf16 %v15972_v28, %v15970_v26  ;;  %v15621_v26 = vcombine.high %v9676_v7, %v9684_v8  ;;  %v9699_v27 = vld [vmem:[#allocation8 + $0xa40] sm:$0xff]  ;;  %v9692_v28 = vld [vmem:[#allocation8 + $0xa08] sm:$0xff] }
 0x535   :  { %v18678_v41 = vpack.c.bf16 %v15957_v34, %v15955_v32  ;;  %v18680_v42 = vpack.c.bf16 %v15973_v35, %v15971_v33  ;;  %v15620_v35 = vcombine.low %v9676_v7, %v9684_v8  ;;  %v15635_v43 = vcombine.high %v18706_v24, %v9699_v27 }
 0x537   :  { %v8158_v49 = vpop.f32.mrb[4].mxu0  ;;  %v9326_v50 = vpop.f32.mrb[4].mxu1  ;;  %12559 = vmatprep.mubr.bf16.mxu0 %v18678_v41  ;;  %12705 = vmatprep.mubr.bf16.mxu1 %v18678_v41 }
 0x538   :  { %v8160_v51 = vpop.f32.mrb[5].mxu0  ;;  %v9328_v52 = vpop.f32.mrb[5].mxu1  ;;  %12560 = vmatmul.mubr.bf16.vlgmr.msra.gmra.mrb[16].mxu0 %v18674_v39  ;;  %12706 = vmatmul.mubr.bf16.vlgmr.msra.gmra.mrb[16].mxu1 %v18674_v39  ;;  %v15958_v55 = vadd.f32 %v8158_v49, %v18655_v15  ;;  %v15974_v60 = vadd.f32 %v9326_v50, %v18658_v16  ;;  %v9707_v50 = vld [vmem:[#allocation8 + $0xa80] sm:$0xff] }
 0x539   :  { %12601 = vmatpush1.bf16.msra.mxu0 %v15570_v5  ;;  %12747 = vmatpush1.bf16.msra.mxu1 %v15572_v6  ;;  %v8162_v56 = vpop.f32.mrb[6].mxu0  ;;  %v9330_v57 = vpop.f32.mrb[6].mxu1  ;;  %v15959_v2 = vadd.f32 %v8160_v51, %v18661_v19  ;;  %v15975_v3 = vadd.f32 %v9328_v52, %v18664_v20  ;;  %v9683_v6 = vld [vmem:[#allocation8 + $0x9c0] sm:$0xff] }
 0x53a   :  { %v15960_v61 = vadd.f32 %v8162_v56, %v18655_v15  ;;  %v15976_v62 = vadd.f32 %v9330_v57, %v18658_v16  ;;  %v8164_v63 = vpop.f32.mrb[7].mxu0  ;;  %v9332_v0 = vpop.f32.mrb[7].mxu1  ;;  %12602 = vmatprep.subr.bf16.mxu0 %v15587_v44  ;;  %12748 = vmatprep.subr.bf16.mxu1 %v15589_v45  ;;  %v15619_v25 = vcombine.high %v9675_v1, %v9683_v6  ;;  %v9708_v56 = vld [vmem:[#allocation8 + $0xa88] sm:$0xff] }
 0x53b   :  { %v15961_v4 = vadd.f32 %v8164_v63, %v18661_v19  ;;  %v15977_v5 = vadd.f32 %v9332_v0, %v18664_v20  ;;  %v15618_v34 = vcombine.low %v9675_v1, %v9683_v6  ;;  %v15637_v44 = vcombine.high %v9692_v28, %v9700_v29  ;;  %v9716_v57 = vld [vmem:[#allocation8 + $0xac8] sm:$0xff]  ;;  %v9723_v0 = vld [vmem:[#allocation8 + $0xb00] sm:$0xff] }
 0x53c   :  { %v18697_v12 = vpack.c.bf16 %v15960_v61, %v15958_v55  ;;  %v18699_v17 = vpack.c.bf16 %v15976_v62, %v15974_v60  ;;  %v9715_v55 = vld [vmem:[#allocation8 + $0xac0] sm:$0xff]  ;;  %v15634_v60 = vcombine.low %v18706_v24, %v9699_v27  ;;  %v15636_v63 = vcombine.low %v9692_v28, %v9700_v29 }
 0x53d   :  { %v18702_v21 = vpack.c.bf16 %v15961_v4, %v15959_v2  ;;  %v18704_v22 = vpack.c.bf16 %v15977_v5, %v15975_v3  ;;  %12603 = vmatpush1.bf16.msra.mxu0 %v15586_v53  ;;  %12749 = vmatpush1.bf16.msra.mxu1 %v15588_v54  ;;  %v15651_v1 = vcombine.high %v9707_v50, %v9715_v55  ;;  %v9731_v3 = vld [vmem:[#allocation8 + $0xb40] sm:$0xff]  ;;  %v9724_v4 = vld [vmem:[#allocation8 + $0xb08] sm:$0xff] }
 0x53e   :  { %12604 = vmatprep.subr.bf16.mxu0 %v15603_v58  ;;  %12750 = vmatprep.subr.bf16.mxu1 %v15605_v59  ;;  %v15653_v2 = vcombine.high %v9708_v56, %v9716_v57  ;;  %v9732_v5 = vld [vmem:[#allocation8 + $0xb48] sm:$0xff]  ;;  %v15652_v24 = vcombine.low %v9708_v56, %v9716_v57  ;;  %v15667_v28 = vcombine.high %v9723_v0, %v9731_v3 }
 0x53f   :  { %v8168_v30 = vpop.f32.mrb[8].mxu0  ;;  %v9336_v31 = vpop.f32.mrb[8].mxu1  ;;  %12569 = vmatprep.mubr.bf16.mxu0 %v18702_v21  ;;  %12715 = vmatprep.mubr.bf16.mxu1 %v18702_v21  ;;  %v15669_v29 = vcombine.high %v9724_v4, %v9732_v5 }
 0x540   :  { %v8170_v32 = vpop.f32.mrb[9].mxu0  ;;  %v9338_v33 = vpop.f32.mrb[9].mxu1  ;;  %12570 = vmatmul.mubr.bf16.gmra.mrb[20].mxu0 %v18697_v12  ;;  %12716 = vmatmul.mubr.bf16.gmra.mrb[20].mxu1 %v18697_v12  ;;  %v15962_v36 = vadd.f32 %v8168_v30, %v18655_v15  ;;  %v15978_v45 = vadd.f32 %v9336_v31, %v18658_v16 }
 0x541   :  { %12605 = vmatpush1.bf16.msra.mxu0 %v15602_v18  ;;  %12751 = vmatpush1.bf16.msra.mxu1 %v15604_v23  ;;  %v8172_v37 = vpop.f32.mrb[10].mxu0  ;;  %v9340_v38 = vpop.f32.mrb[10].mxu1  ;;  %v15963_v51 = vadd.f32 %v8170_v32, %v18661_v19  ;;  %v15979_v52 = vadd.f32 %v9338_v33, %v18664_v20  ;;  %v15650_v23 = vcombine.low %v9707_v50, %v9715_v55 }
 0x542   :  { %v15964_v46 = vadd.f32 %v8172_v37, %v18655_v15  ;;  %v15980_v47 = vadd.f32 %v9340_v38, %v18658_v16  ;;  %v8174_v48 = vpop.f32.mrb[11].mxu0  ;;  %v9342_v49 = vpop.f32.mrb[11].mxu1  ;;  %12606 = vmatprep.subr.bf16.mxu0 %v15619_v25  ;;  %12752 = vmatprep.subr.bf16.mxu1 %v15621_v26  ;;  %v15668_v50 = vcombine.low %v9724_v4, %v9732_v5 }
 0x543   :  { %v15965_v53 = vadd.f32 %v8174_v48, %v18661_v19  ;;  %v15981_v54 = vadd.f32 %v9342_v49, %v18664_v20 }
 0x544   :  { %v18721_v58 = vpack.c.bf16 %v15964_v46, %v15962_v36  ;;  %v18723_v59 = vpack.c.bf16 %v15980_v47, %v15978_v45  ;;  %v9747_v46 = vld [vmem:[#allocation8 + $0xbc0] sm:$0xff]  ;;  %v9748_v47 = vld [vmem:[#allocation8 + $0xbc8] sm:$0xff] }
 0x545   :  { %v18726_v61 = vpack.c.bf16 %v15965_v53, %v15963_v51  ;;  %v18728_v62 = vpack.c.bf16 %v15981_v54, %v15979_v52  ;;  %12607 = vmatpush1.bf16.msra.mxu0 %v15618_v34  ;;  %12753 = vmatpush1.bf16.msra.mxu1 %v15620_v35  ;;  %v9763_v52 = vld [vmem:[#allocation8 + $0xc40] sm:$0xff]  ;;  %v9756_v53 = vld [vmem:[#allocation8 + $0xc08] sm:$0xff] }
 0x546   :  { %12608 = vmatprep.subr.bf16.mxu0 %v15635_v43  ;;  %12754 = vmatprep.subr.bf16.mxu1 %v15637_v44  ;;  %v9739_v43 = vld [vmem:[#allocation8 + $0xb80] sm:$0xff]  ;;  %v9764_v54 = vld [vmem:[#allocation8 + $0xc48] sm:$0xff] }
 0x547   :  { %v8178_v6 = vpop.f32.mrb[12].mxu0  ;;  %v9346_v7 = vpop.f32.mrb[12].mxu1  ;;  %12579 = vmatprep.mubr.bf16.mxu0 %v18726_v61  ;;  %12725 = vmatprep.mubr.bf16.mxu1 %v18726_v61  ;;  %v15682_v55 = vcombine.low %v9739_v43, %v9747_v46  ;;  %v15700_v4 = vcombine.low %v9756_v53, %v9764_v54 }
 0x548   :  { %v8180_v8 = vpop.f32.mrb[13].mxu0  ;;  %v9348_v18 = vpop.f32.mrb[13].mxu1  ;;  %12580 = vmatmul.mubr.bf16.gmra.mrb[24].mxu0 %v18721_v58  ;;  %12726 = vmatmul.mubr.bf16.gmra.mrb[24].mxu1 %v18721_v58  ;;  %v15966_v25 = vadd.f32 %v8178_v6, %v18655_v15  ;;  %v15982_v30 = vadd.f32 %v9346_v7, %v18658_v16  ;;  %v9787_v7 = vld [vmem:[#allocation8 + $0xd00] sm:$0xff] }
 0x549   :  { %12609 = vmatpush1.bf16.msra.mxu0 %v15634_v60  ;;  %12755 = vmatpush1.bf16.msra.mxu1 %v15636_v63  ;;  %v8182_v26 = vpop.f32.mrb[14].mxu0  ;;  %v9350_v27 = vpop.f32.mrb[14].mxu1  ;;  %v15967_v35 = vadd.f32 %v8180_v8, %v18661_v19  ;;  %v15983_v36 = vadd.f32 %v9348_v18, %v18664_v20  ;;  %v15701_v60 = vcombine.high %v9756_v53, %v9764_v54  ;;  %v9771_v63 = vld [vmem:[#allocation8 + $0xc80] sm:$0xff]  ;;  %v9788_v18 = vld [vmem:[#allocation8 + $0xd08] sm:$0xff] }
 0x54a   :  { %v15968_v31 = vadd.f32 %v8182_v26, %v18655_v15  ;;  %v15984_v32 = vadd.f32 %v9350_v27, %v18658_v16  ;;  %v8184_v33 = vpop.f32.mrb[15].mxu0  ;;  %v9352_v34 = vpop.f32.mrb[15].mxu1  ;;  %12610 = vmatprep.subr.bf16.mxu0 %v15651_v1  ;;  %12756 = vmatprep.subr.bf16.mxu1 %v15653_v2  ;;  %v15666_v15 = vcombine.low %v9723_v0, %v9731_v3  ;;  %v9740_v16 = vld [vmem:[#allocation8 + $0xb88] sm:$0xff]  ;;  %v9779_v0 = vld [vmem:[#allocation8 + $0xcc0] sm:$0xff] }
 0x54b   :  { %v15969_v37 = vadd.f32 %v8184_v33, %v18661_v19  ;;  %v15985_v38 = vadd.f32 %v9352_v34, %v18664_v20  ;;  %v9755_v19 = vld [vmem:[#allocation8 + $0xc00] sm:$0xff]  ;;  %v15683_v20 = vcombine.high %v9739_v43, %v9747_v46  ;;  %v15685_v51 = vcombine.high %v9740_v16, %v9748_v47  ;;  %v9772_v1 = vld [vmem:[#allocation8 + $0xc88] sm:$0xff] }
 0x54c   :  { %v18742_v44 = vpack.c.bf16 %v15968_v31, %v15966_v25  ;;  %v18744_v45 = vpack.c.bf16 %v15984_v32, %v15982_v30  ;;  %v15684_v56 = vcombine.low %v9740_v16, %v9748_v47  ;;  %v15699_v57 = vcombine.high %v9755_v19, %v9763_v52  ;;  %v9780_v2 = vld [vmem:[#allocation8 + $0xcc8] sm:$0xff]  ;;  %v9795_v8 = vld [vmem:[#allocation8 + $0xd40] sm:$0xff] }
 0x54d   :  { %v18746_v48 = vpack.c.bf16 %v15969_v37, %v15967_v35  ;;  %v18748_v49 = vpack.c.bf16 %v15985_v38, %v15983_v36  ;;  %12611 = vmatpush1.bf16.msra.mxu0 %v15650_v23  ;;  %12757 = vmatpush1.bf16.msra.mxu1 %v15652_v24  ;;  %v15698_v3 = vcombine.low %v9755_v19, %v9763_v52  ;;  %v9796_v23 = vld [vmem:[#allocation8 + $0xd48] sm:$0xff]  ;;  %v9819_v36 = vld [vmem:[#allocation8 + $0xe00] sm:$0xff] }
 0x54e   :  { %12612 = vmatprep.subr.bf16.mxu0 %v15667_v28  ;;  %12758 = vmatprep.subr.bf16.mxu1 %v15669_v29  ;;  %v15715_v5 = vcombine.high %v9771_v63, %v9779_v0  ;;  %v15717_v6 = vcombine.high %v9772_v1, %v9780_v2  ;;  %v15714_v24 = vcombine.low %v9771_v63, %v9779_v0  ;;  %v9803_v28 = vld [vmem:[#allocation8 + $0xd80] sm:$0xff]  ;;  %v9804_v30 = vld [vmem:[#allocation8 + $0xd88] sm:$0xff] }
 0x54f   :  { %12589 = vmatprep.mubr.bf16.mxu0 %v18746_v48  ;;  %12735 = vmatprep.mubr.bf16.mxu1 %v18746_v48  ;;  %v15716_v25 = vcombine.low %v9772_v1, %v9780_v2  ;;  %v15731_v26 = vcombine.high %v9787_v7, %v9795_v8  ;;  %v15733_v27 = vcombine.high %v9788_v18, %v9796_v23  ;;  %v9811_v29 = vld [vmem:[#allocation8 + $0xdc0] sm:$0xff]  ;;  %v9812_v31 = vld [vmem:[#allocation8 + $0xdc8] sm:$0xff] }
 0x550   :  { %12590 = vmatmul.mubr.bf16.gmra.mrb[28].mxu0 %v18742_v44  ;;  %12736 = vmatmul.mubr.bf16.gmra.mrb[28].mxu1 %v18742_v44  ;;  %v15730_v32 = vcombine.low %v9787_v7, %v9795_v8  ;;  %v15732_v33 = vcombine.low %v9788_v18, %v9796_v23  ;;  %v15747_v34 = vcombine.high %v9803_v28, %v9811_v29  ;;  %v9827_v37 = vld [vmem:[#allocation8 + $0xe40] sm:$0xff]  ;;  %v9820_v38 = vld [vmem:[#allocation8 + $0xe08] sm:$0xff] }
 0x551   :  { %12613 = vmatpush1.bf16.msra.mxu0 %v15666_v15  ;;  %12759 = vmatpush1.bf16.msra.mxu1 %v15668_v50  ;;  %v15749_v35 = vcombine.high %v9804_v30, %v9812_v31  ;;  %v9828_v43 = vld [vmem:[#allocation8 + $0xe48] sm:$0xff]  ;;  %v15746_v15 = vcombine.low %v9803_v28, %v9811_v29  ;;  %v15748_v46 = vcombine.low %v9804_v30, %v9812_v31  ;;  %v9835_v50 = vld [vmem:[#allocation8 + $0xe80] sm:$0xff]  ;;  %v9382_v28 = vld [vmem:[#allocation8 + $0x58] sm:$0xff] }
 0x552   :  { %12632 = vmatprep.mubr.bf16.mxu0 %v18680_v42  ;;  %12778 = vmatprep.mubr.bf16.mxu1 %v18680_v42  ;;  %v15763_v16 = vcombine.high %v9819_v36, %v9827_v37  ;;  %v15765_v47 = vcombine.high %v9820_v38, %v9828_v43  ;;  %v9843_v19 = vld [vmem:[#allocation8 + $0xec0] sm:$0xff]  ;;  %v15762_v52 = vcombine.low %v9819_v36, %v9827_v37  ;;  %v9860_v63 = vld [vmem:[#allocation8 + $0xf48] sm:$0xff]  ;;  %v9398_v36 = vld [vmem:[#allocation8 + $0xd8] sm:$0xff] }
 0x553   :  { %12614 = vmatprep.subr.bf16.mxu0 %v15683_v20  ;;  %12760 = vmatprep.subr.bf16.mxu1 %v15685_v51  ;;  %v9836_v20 = vld [vmem:[#allocation8 + $0xe88] sm:$0xff]  ;;  %v15764_v53 = vcombine.low %v9820_v38, %v9828_v43  ;;  %v15779_v54 = vcombine.high %v9835_v50, %v9843_v19  ;;  %v15778_v0 = vcombine.low %v9835_v50, %v9843_v19  ;;  %v9414_v50 = vld [vmem:[#allocation8 + $0x158] sm:$0xff] }
 0x554   :  { %v9844_v51 = vld [vmem:[#allocation8 + $0xec8] sm:$0xff] }
 0x555   :  { %12615 = vmatpush1.bf16.msra.mxu0 %v15682_v55  ;;  %12761 = vmatpush1.bf16.msra.mxu1 %v15684_v56  ;;  %v15781_v55 = vcombine.high %v9836_v20, %v9844_v51  ;;  %v9851_v56 = vld [vmem:[#allocation8 + $0xf00] sm:$0xff]  ;;  %v15780_v1 = vcombine.low %v9836_v20, %v9844_v51  ;;  %v9876_v7 = vld [vmem:[#allocation8 + $0xfc8] sm:$0xff] }
 0x556   :  { %12616 = vmatprep.subr.bf16.mxu0 %v15699_v57  ;;  %12762 = vmatprep.subr.bf16.mxu1 %v15701_v60  ;;  %v9859_v57 = vld [vmem:[#allocation8 + $0xf40] sm:$0xff]  ;;  %v9852_v60 = vld [vmem:[#allocation8 + $0xf08] sm:$0xff] }
 0x557   :  { %v15795_v2 = vcombine.high %v9851_v56, %v9859_v57  ;;  %v15794_v8 = vcombine.low %v9851_v56, %v9859_v57  ;;  %v15796_v18 = vcombine.low %v9852_v60, %v9860_v63  ;;  %v9430_v56 = vld [vmem:[#allocation8 + $0x1d8] sm:$0xff] }
 0x559   :  { %12617 = vmatpush1.bf16.msra.mxu0 %v15698_v3  ;;  %12763 = vmatpush1.bf16.msra.mxu1 %v15700_v4  ;;  %v15797_v3 = vcombine.high %v9852_v60, %v9860_v63  ;;  %v9867_v4 = vld [vmem:[#allocation8 + $0xf80] sm:$0xff] }
 0x55a   :  { %12618 = vmatprep.subr.bf16.mxu0 %v15715_v5  ;;  %12764 = vmatprep.subr.bf16.mxu1 %v15717_v6  ;;  %v9875_v5 = vld [vmem:[#allocation8 + $0xfc0] sm:$0xff]  ;;  %v9868_v6 = vld [vmem:[#allocation8 + $0xf88] sm:$0xff] }
 0x55b   :  { %v15811_v23 = vcombine.high %v9867_v4, %v9875_v5  ;;  %v15810_v29 = vcombine.low %v9867_v4, %v9875_v5  ;;  %v15812_v30 = vcombine.low %v9868_v6, %v9876_v7  ;;  %v9446_v4 = vld [vmem:[#allocation8 + $0x258] sm:$0xff] }
 0x55d   :  { %12619 = vmatpush1.bf16.msra.mxu0 %v15714_v24  ;;  %12765 = vmatpush1.bf16.msra.mxu1 %v15716_v25  ;;  %v15813_v24 = vcombine.high %v9868_v6, %v9876_v7  ;;  %v9373_v25 = vld [vmem:[#allocation8 + $0x10] sm:$0xff] }
 0x55e   :  { %12620 = vmatprep.subr.bf16.mxu0 %v15731_v26  ;;  %12766 = vmatprep.subr.bf16.mxu1 %v15733_v27  ;;  %v9381_v26 = vld [vmem:[#allocation8 + $0x50] sm:$0xff]  ;;  %v9374_v27 = vld [vmem:[#allocation8 + $0x18] sm:$0xff] }
 0x55f   :  { %v15319_v31 = vcombine.high %v9373_v25, %v9381_v26  ;;  %v15318_v37 = vcombine.low %v9373_v25, %v9381_v26  ;;  %v15320_v38 = vcombine.low %v9374_v27, %v9382_v28  ;;  %v9462_v25 = vld [vmem:[#allocation8 + $0x2d8] sm:$0xff] }
 0x561   :  { %12621 = vmatpush1.bf16.msra.mxu0 %v15730_v32  ;;  %12767 = vmatpush1.bf16.msra.mxu1 %v15732_v33  ;;  %v15321_v32 = vcombine.high %v9374_v27, %v9382_v28  ;;  %v9389_v33 = vld [vmem:[#allocation8 + $0x90] sm:$0xff] }
 0x562   :  { %12622 = vmatprep.subr.bf16.mxu0 %v15747_v34  ;;  %12768 = vmatprep.subr.bf16.mxu1 %v15749_v35  ;;  %v9397_v34 = vld [vmem:[#allocation8 + $0xd0] sm:$0xff]  ;;  %v9390_v35 = vld [vmem:[#allocation8 + $0x98] sm:$0xff] }
 0x563   :  { %v15335_v43 = vcombine.high %v9389_v33, %v9397_v34  ;;  %v15334_v19 = vcombine.low %v9389_v33, %v9397_v34  ;;  %v15336_v20 = vcombine.low %v9390_v35, %v9398_v36  ;;  %v9478_v33 = vld [vmem:[#allocation8 + $0x358] sm:$0xff] }
 0x565   :  { %12623 = vmatpush1.bf16.msra.mxu0 %v15746_v15  ;;  %12769 = vmatpush1.bf16.msra.mxu1 %v15748_v46  ;;  %v15337_v15 = vcombine.high %v9390_v35, %v9398_v36  ;;  %v9405_v46 = vld [vmem:[#allocation8 + $0x110] sm:$0xff] }
 0x566   :  { %12624 = vmatprep.subr.bf16.mxu0 %v15763_v16  ;;  %12770 = vmatprep.subr.bf16.mxu1 %v15765_v47  ;;  %v9413_v16 = vld [vmem:[#allocation8 + $0x150] sm:$0xff]  ;;  %v9406_v47 = vld [vmem:[#allocation8 + $0x118] sm:$0xff] }
 0x567   :  { %v15351_v51 = vcombine.high %v9405_v46, %v9413_v16  ;;  %v15350_v57 = vcombine.low %v9405_v46, %v9413_v16  ;;  %v15352_v60 = vcombine.low %v9406_v47, %v9414_v50  ;;  %v9494_v46 = vld [vmem:[#allocation8 + $0x3d8] sm:$0xff] }
 0x569   :  { %12625 = vmatpush1.bf16.msra.mxu0 %v15762_v52  ;;  %12771 = vmatpush1.bf16.msra.mxu1 %v15764_v53  ;;  %v15353_v52 = vcombine.high %v9406_v47, %v9414_v50  ;;  %v9421_v53 = vld [vmem:[#allocation8 + $0x190] sm:$0xff] }
 0x56a   :  { %12626 = vmatprep.subr.bf16.mxu0 %v15779_v54  ;;  %12772 = vmatprep.subr.bf16.mxu1 %v15781_v55  ;;  %v9429_v54 = vld [vmem:[#allocation8 + $0x1d0] sm:$0xff]  ;;  %v9422_v55 = vld [vmem:[#allocation8 + $0x198] sm:$0xff] }
 0x56b   :  { %v15367_v63 = vcombine.high %v9421_v53, %v9429_v54  ;;  %v15366_v5 = vcombine.low %v9421_v53, %v9429_v54  ;;  %v15368_v6 = vcombine.low %v9422_v55, %v9430_v56  ;;  %v9510_v53 = vld [vmem:[#allocation8 + $0x458] sm:$0xff] }
 0x56d   :  { %12627 = vmatpush1.bf16.msra.mxu0 %v15778_v0  ;;  %12773 = vmatpush1.bf16.msra.mxu1 %v15780_v1  ;;  %v15369_v0 = vcombine.high %v9422_v55, %v9430_v56  ;;  %v9437_v1 = vld [vmem:[#allocation8 + $0x210] sm:$0xff] }
 0x56e   :  { %12628 = vmatprep.subr.bf16.mxu0 %v15795_v2  ;;  %12774 = vmatprep.subr.bf16.mxu1 %v15797_v3  ;;  %v9445_v2 = vld [vmem:[#allocation8 + $0x250] sm:$0xff]  ;;  %v9438_v3 = vld [vmem:[#allocation8 + $0x218] sm:$0xff] }
 0x56f   :  { %v15383_v7 = vcombine.high %v9437_v1, %v9445_v2  ;;  %v15382_v26 = vcombine.low %v9437_v1, %v9445_v2  ;;  %v15384_v27 = vcombine.low %v9438_v3, %v9446_v4  ;;  %v9526_v1 = vld [vmem:[#allocation8 + $0x4d8] sm:$0xff] }
 0x571   :  { %12629 = vmatpush1.bf16.msra.mxu0 %v15794_v8  ;;  %12775 = vmatpush1.bf16.msra.mxu1 %v15796_v18  ;;  %v15385_v8 = vcombine.high %v9438_v3, %v9446_v4  ;;  %v9453_v18 = vld [vmem:[#allocation8 + $0x290] sm:$0xff] }
 0x572   :  { %12630 = vmatprep.subr.bf16.mxu0 %v15811_v23  ;;  %12776 = vmatprep.subr.bf16.mxu1 %v15813_v24  ;;  %v9461_v23 = vld [vmem:[#allocation8 + $0x2d0] sm:$0xff]  ;;  %v9454_v24 = vld [vmem:[#allocation8 + $0x298] sm:$0xff] }
 0x573   :  { %v15399_v28 = vcombine.high %v9453_v18, %v9461_v23  ;;  %v15398_v34 = vcombine.low %v9453_v18, %v9461_v23  ;;  %v15400_v35 = vcombine.low %v9454_v24, %v9462_v25  ;;  %v9542_v18 = vld [vmem:[#allocation8 + $0x558] sm:$0xff] }
 0x575   :  { %12631 = vmatpush1.bf16.msra.mxu0 %v15810_v29  ;;  %12777 = vmatpush1.bf16.msra.mxu1 %v15812_v30  ;;  %v15401_v29 = vcombine.high %v9454_v24, %v9462_v25  ;;  %v9469_v30 = vld [vmem:[#allocation8 + $0x310] sm:$0xff] }
 0x576   :  { %12819 = vmatprep.subr.bf16.mxu0 %v15319_v31  ;;  %12965 = vmatprep.subr.bf16.mxu1 %v15321_v32  ;;  %v9477_v31 = vld [vmem:[#allocation8 + $0x350] sm:$0xff]  ;;  %v9470_v32 = vld [vmem:[#allocation8 + $0x318] sm:$0xff] }
 0x577   :  { %v15415_v36 = vcombine.high %v9469_v30, %v9477_v31  ;;  %v15414_v16 = vcombine.low %v9469_v30, %v9477_v31  ;;  %v15416_v47 = vcombine.low %v9470_v32, %v9478_v33  ;;  %v9558_v30 = vld [vmem:[#allocation8 + $0x5d8] sm:$0xff] }
 0x578   :  { %12633 = vmatmul.mubr.bf16.vlgmr.msra.gmra.mrb[16].mxu0 %v18676_v40  ;;  %12779 = vmatmul.mubr.bf16.vlgmr.msra.gmra.mrb[16].mxu1 %v18676_v40 }
 0x579   :  { %12642 = vmatprep.mubr.bf16.mxu0 %v18704_v22  ;;  %12788 = vmatprep.mubr.bf16.mxu1 %v18704_v22 }
 0x57a   :  { %12820 = vmatpush1.bf16.msra.mxu0 %v15318_v37  ;;  %12966 = vmatpush1.bf16.msra.mxu1 %v15320_v38  ;;  %v15417_v37 = vcombine.high %v9470_v32, %v9478_v33  ;;  %v9485_v38 = vld [vmem:[#allocation8 + $0x390] sm:$0xff] }
 0x57b   :  { %12821 = vmatprep.subr.bf16.mxu0 %v15335_v43  ;;  %12967 = vmatprep.subr.bf16.mxu1 %v15337_v15  ;;  %v9493_v43 = vld [vmem:[#allocation8 + $0x3d0] sm:$0xff]  ;;  %v9486_v15 = vld [vmem:[#allocation8 + $0x398] sm:$0xff] }
 0x57c   :  { %v15431_v50 = vcombine.high %v9485_v38, %v9493_v43  ;;  %v15430_v54 = vcombine.low %v9485_v38, %v9493_v43  ;;  %v15432_v55 = vcombine.low %v9486_v15, %v9494_v46  ;;  %v9574_v38 = vld [vmem:[#allocation8 + $0x658] sm:$0xff] }
 0x57e   :  { %12822 = vmatpush1.bf16.msra.mxu0 %v15334_v19  ;;  %12968 = vmatpush1.bf16.msra.mxu1 %v15336_v20  ;;  %v15433_v19 = vcombine.high %v9486_v15, %v9494_v46  ;;  %v9501_v20 = vld [vmem:[#allocation8 + $0x410] sm:$0xff] }
 0x57f   :  { %12823 = vmatprep.subr.bf16.mxu0 %v15351_v51  ;;  %12969 = vmatprep.subr.bf16.mxu1 %v15353_v52  ;;  %v9509_v51 = vld [vmem:[#allocation8 + $0x450] sm:$0xff]  ;;  %v9502_v52 = vld [vmem:[#allocation8 + $0x418] sm:$0xff] }
 0x580   :  { %12643 = vmatmul.mubr.bf16.gmra.mrb[20].mxu0 %v18699_v17  ;;  %12789 = vmatmul.mubr.bf16.gmra.mrb[20].mxu1 %v18699_v17  ;;  %v15447_v56 = vcombine.high %v9501_v20, %v9509_v51  ;;  %v15446_v2 = vcombine.low %v9501_v20, %v9509_v51  ;;  %v15448_v3 = vcombine.low %v9502_v52, %v9510_v53  ;;  %v9590_v20 = vld [vmem:[#allocation8 + $0x6d8] sm:$0xff] }
 0x581   :  { %12652 = vmatprep.mubr.bf16.mxu0 %v18728_v62  ;;  %12798 = vmatprep.mubr.bf16.mxu1 %v18728_v62 }
 0x582   :  { %12824 = vmatpush1.bf16.msra.mxu0 %v15350_v57  ;;  %12970 = vmatpush1.bf16.msra.mxu1 %v15352_v60  ;;  %v15449_v57 = vcombine.high %v9502_v52, %v9510_v53  ;;  %v9517_v60 = vld [vmem:[#allocation8 + $0x490] sm:$0xff] }
 0x583   :  { %12825 = vmatprep.subr.bf16.mxu0 %v15367_v63  ;;  %12971 = vmatprep.subr.bf16.mxu1 %v15369_v0  ;;  %v9525_v63 = vld [vmem:[#allocation8 + $0x4d0] sm:$0xff]  ;;  %v9518_v0 = vld [vmem:[#allocation8 + $0x498] sm:$0xff] }
 0x584   :  { %v15463_v4 = vcombine.high %v9517_v60, %v9525_v63  ;;  %v15462_v23 = vcombine.low %v9517_v60, %v9525_v63  ;;  %v15464_v24 = vcombine.low %v9518_v0, %v9526_v1  ;;  %v9606_v60 = vld [vmem:[#allocation8 + $0x758] sm:$0xff] }
 0x586   :  { %12826 = vmatpush1.bf16.msra.mxu0 %v15366_v5  ;;  %12972 = vmatpush1.bf16.msra.mxu1 %v15368_v6  ;;  %v15465_v5 = vcombine.high %v9518_v0, %v9526_v1  ;;  %v9533_v6 = vld [vmem:[#allocation8 + $0x510] sm:$0xff] }
 0x587   :  { %12827 = vmatprep.subr.bf16.mxu0 %v15383_v7  ;;  %12973 = vmatprep.subr.bf16.mxu1 %v15385_v8  ;;  %v9541_v7 = vld [vmem:[#allocation8 + $0x550] sm:$0xff]  ;;  %v9534_v8 = vld [vmem:[#allocation8 + $0x518] sm:$0xff] }
 0x588   :  { %12653 = vmatmul.mubr.bf16.gmra.mrb[24].mxu0 %v18723_v59  ;;  %12799 = vmatmul.mubr.bf16.gmra.mrb[24].mxu1 %v18723_v59  ;;  %v15479_v25 = vcombine.high %v9533_v6, %v9541_v7  ;;  %v15478_v31 = vcombine.low %v9533_v6, %v9541_v7  ;;  %v15480_v32 = vcombine.low %v9534_v8, %v9542_v18  ;;  %v9622_v6 = vld [vmem:[#allocation8 + $0x7d8] sm:$0xff] }
 0x589   :  { %12662 = vmatprep.mubr.bf16.mxu0 %v18748_v49  ;;  %12808 = vmatprep.mubr.bf16.mxu1 %v18748_v49 }
 0x58a   :  { %12828 = vmatpush1.bf16.msra.mxu0 %v15382_v26  ;;  %12974 = vmatpush1.bf16.msra.mxu1 %v15384_v27  ;;  %v15481_v26 = vcombine.high %v9534_v8, %v9542_v18  ;;  %v9549_v27 = vld [vmem:[#allocation8 + $0x590] sm:$0xff] }
 0x58b   :  { %12829 = vmatprep.subr.bf16.mxu0 %v15399_v28  ;;  %12975 = vmatprep.subr.bf16.mxu1 %v15401_v29  ;;  %v9557_v28 = vld [vmem:[#allocation8 + $0x5d0] sm:$0xff]  ;;  %v9550_v29 = vld [vmem:[#allocation8 + $0x598] sm:$0xff] }
 0x58c   :  { %v15495_v33 = vcombine.high %v9549_v27, %v9557_v28  ;;  %v15494_v43 = vcombine.low %v9549_v27, %v9557_v28  ;;  %v15496_v15 = vcombine.low %v9550_v29, %v9558_v30  ;;  %v9638_v27 = vld [vmem:[#allocation8 + $0x858] sm:$0xff] }
 0x58e   :  { %12830 = vmatpush1.bf16.msra.mxu0 %v15398_v34  ;;  %12976 = vmatpush1.bf16.msra.mxu1 %v15400_v35  ;;  %v15497_v34 = vcombine.high %v9550_v29, %v9558_v30  ;;  %v9565_v35 = vld [vmem:[#allocation8 + $0x610] sm:$0xff] }
 0x58f   :  { %12831 = vmatprep.subr.bf16.mxu0 %v15415_v36  ;;  %12977 = vmatprep.subr.bf16.mxu1 %v15417_v37  ;;  %v9573_v36 = vld [vmem:[#allocation8 + $0x650] sm:$0xff]  ;;  %v9566_v37 = vld [vmem:[#allocation8 + $0x618] sm:$0xff] }
 0x590   :  { %12663 = vmatmul.mubr.bf16.gmra.mrb[28].mxu0 %v18744_v45  ;;  %12809 = vmatmul.mubr.bf16.gmra.mrb[28].mxu1 %v18744_v45  ;;  %v15511_v46 = vcombine.high %v9565_v35, %v9573_v36  ;;  %v15510_v51 = vcombine.low %v9565_v35, %v9573_v36  ;;  %v15512_v52 = vcombine.low %v9566_v37, %v9574_v38  ;;  %v9654_v35 = vld [vmem:[#allocation8 + $0x8d8] sm:$0xff] }
 0x591   :  { %12851 = vmatprep.mubr.bf16.mxu0 %v18678_v41  ;;  %12997 = vmatprep.mubr.bf16.mxu1 %v18678_v41 }
 0x592   :  { %12832 = vmatpush1.bf16.msra.mxu0 %v15414_v16  ;;  %12978 = vmatpush1.bf16.msra.mxu1 %v15416_v47  ;;  %v15513_v16 = vcombine.high %v9566_v37, %v9574_v38  ;;  %v9581_v47 = vld [vmem:[#allocation8 + $0x690] sm:$0xff] }
 0x593   :  { %12833 = vmatprep.subr.bf16.mxu0 %v15431_v50  ;;  %12979 = vmatprep.subr.bf16.mxu1 %v15433_v19  ;;  %v9589_v50 = vld [vmem:[#allocation8 + $0x6d0] sm:$0xff]  ;;  %v9582_v19 = vld [vmem:[#allocation8 + $0x698] sm:$0xff] }
 0x594   :  { %v15527_v53 = vcombine.high %v9581_v47, %v9589_v50  ;;  %v15526_v63 = vcombine.low %v9581_v47, %v9589_v50  ;;  %v15528_v0 = vcombine.low %v9582_v19, %v9590_v20  ;;  %v9670_v47 = vld [vmem:[#allocation8 + $0x958] sm:$0xff] }
 0x596   :  { %12834 = vmatpush1.bf16.msra.mxu0 %v15430_v54  ;;  %12980 = vmatpush1.bf16.msra.mxu1 %v15432_v55  ;;  %v15529_v54 = vcombine.high %v9582_v19, %v9590_v20  ;;  %v9597_v55 = vld [vmem:[#allocation8 + $0x710] sm:$0xff] }
 0x597   :  { %12835 = vmatprep.subr.bf16.mxu0 %v15447_v56  ;;  %12981 = vmatprep.subr.bf16.mxu1 %v15449_v57  ;;  %v9605_v56 = vld [vmem:[#allocation8 + $0x750] sm:$0xff]  ;;  %v9598_v57 = vld [vmem:[#allocation8 + $0x718] sm:$0xff] }
 0x598   :  { %v15543_v1 = vcombine.high %v9597_v55, %v9605_v56  ;;  %v15542_v7 = vcombine.low %v9597_v55, %v9605_v56  ;;  %v15544_v8 = vcombine.low %v9598_v57, %v9606_v60  ;;  %v9686_v55 = vld [vmem:[#allocation8 + $0x9d8] sm:$0xff] }
 0x59a   :  { %12836 = vmatpush1.bf16.msra.mxu0 %v15446_v2  ;;  %12982 = vmatpush1.bf16.msra.mxu1 %v15448_v3  ;;  %v15545_v2 = vcombine.high %v9598_v57, %v9606_v60  ;;  %v9613_v3 = vld [vmem:[#allocation8 + $0x790] sm:$0xff] }
 0x59b   :  { %12837 = vmatprep.subr.bf16.mxu0 %v15463_v4  ;;  %12983 = vmatprep.subr.bf16.mxu1 %v15465_v5  ;;  %v9621_v4 = vld [vmem:[#allocation8 + $0x7d0] sm:$0xff]  ;;  %v9614_v5 = vld [vmem:[#allocation8 + $0x798] sm:$0xff] }
 0x59c   :  { %v15559_v18 = vcombine.high %v9613_v3, %v9621_v4  ;;  %v15558_v28 = vcombine.low %v9613_v3, %v9621_v4  ;;  %v15560_v29 = vcombine.low %v9614_v5, %v9622_v6  ;;  %v9702_v3 = vld [vmem:[#allocation8 + $0xa58] sm:$0xff] }
 0x59e   :  { %12838 = vmatpush1.bf16.msra.mxu0 %v15462_v23  ;;  %12984 = vmatpush1.bf16.msra.mxu1 %v15464_v24  ;;  %v15561_v23 = vcombine.high %v9614_v5, %v9622_v6  ;;  %v9629_v24 = vld [vmem:[#allocation8 + $0x810] sm:$0xff] }
 0x59f   :  { %12839 = vmatprep.subr.bf16.mxu0 %v15479_v25  ;;  %12985 = vmatprep.subr.bf16.mxu1 %v15481_v26  ;;  %v9637_v25 = vld [vmem:[#allocation8 + $0x850] sm:$0xff]  ;;  %v9630_v26 = vld [vmem:[#allocation8 + $0x818] sm:$0xff] }
 0x5a0   :  { %v15575_v30 = vcombine.high %v9629_v24, %v9637_v25  ;;  %v15574_v36 = vcombine.low %v9629_v24, %v9637_v25  ;;  %v15576_v37 = vcombine.low %v9630_v26, %v9638_v27  ;;  %v9718_v24 = vld [vmem:[#allocation8 + $0xad8] sm:$0xff] }
 0x5a2   :  { %12840 = vmatpush1.bf16.msra.mxu0 %v15478_v31  ;;  %12986 = vmatpush1.bf16.msra.mxu1 %v15480_v32  ;;  %v15577_v31 = vcombine.high %v9630_v26, %v9638_v27  ;;  %v9645_v32 = vld [vmem:[#allocation8 + $0x890] sm:$0xff] }
 0x5a3   :  { %12841 = vmatprep.subr.bf16.mxu0 %v15495_v33  ;;  %12987 = vmatprep.subr.bf16.mxu1 %v15497_v34  ;;  %v9653_v33 = vld [vmem:[#allocation8 + $0x8d0] sm:$0xff]  ;;  %v9646_v34 = vld [vmem:[#allocation8 + $0x898] sm:$0xff] }
 0x5a4   :  { %v15591_v38 = vcombine.high %v9645_v32, %v9653_v33  ;;  %v15590_v50 = vcombine.low %v9645_v32, %v9653_v33  ;;  %v15592_v19 = vcombine.low %v9646_v34, %v9654_v35  ;;  %v9734_v32 = vld [vmem:[#allocation8 + $0xb58] sm:$0xff] }
 0x5a6   :  { %12842 = vmatpush1.bf16.msra.mxu0 %v15494_v43  ;;  %12988 = vmatpush1.bf16.msra.mxu1 %v15496_v15  ;;  %v15593_v43 = vcombine.high %v9646_v34, %v9654_v35  ;;  %v9661_v15 = vld [vmem:[#allocation8 + $0x910] sm:$0xff] }
 0x5a7   :  { %12843 = vmatprep.subr.bf16.mxu0 %v15511_v46  ;;  %12989 = vmatprep.subr.bf16.mxu1 %v15513_v16  ;;  %v9669_v46 = vld [vmem:[#allocation8 + $0x950] sm:$0xff]  ;;  %v9662_v16 = vld [vmem:[#allocation8 + $0x918] sm:$0xff] }
 0x5a8   :  { %v15607_v20 = vcombine.high %v9661_v15, %v9669_v46  ;;  %v15606_v56 = vcombine.low %v9661_v15, %v9669_v46  ;;  %v15608_v57 = vcombine.low %v9662_v16, %v9670_v47  ;;  %v9750_v15 = vld [vmem:[#allocation8 + $0xbd8] sm:$0xff] }
 0x5aa   :  { %12844 = vmatpush1.bf16.msra.mxu0 %v15510_v51  ;;  %12990 = vmatpush1.bf16.msra.mxu1 %v15512_v52  ;;  %v15609_v51 = vcombine.high %v9662_v16, %v9670_v47  ;;  %v9677_v52 = vld [vmem:[#allocation8 + $0x990] sm:$0xff] }
 0x5ab   :  { %12845 = vmatprep.subr.bf16.mxu0 %v15527_v53  ;;  %12991 = vmatprep.subr.bf16.mxu1 %v15529_v54  ;;  %v9685_v53 = vld [vmem:[#allocation8 + $0x9d0] sm:$0xff]  ;;  %v9678_v54 = vld [vmem:[#allocation8 + $0x998] sm:$0xff] }
 0x5ac   :  { %v15623_v60 = vcombine.high %v9677_v52, %v9685_v53  ;;  %v15622_v4 = vcombine.low %v9677_v52, %v9685_v53  ;;  %v15624_v5 = vcombine.low %v9678_v54, %v9686_v55  ;;  %v9766_v52 = vld [vmem:[#allocation8 + $0xc58] sm:$0xff] }
 0x5ae   :  { %12846 = vmatpush1.bf16.msra.mxu0 %v15526_v63  ;;  %12992 = vmatpush1.bf16.msra.mxu1 %v15528_v0  ;;  %v15625_v63 = vcombine.high %v9678_v54, %v9686_v55  ;;  %v9693_v0 = vld [vmem:[#allocation8 + $0xa10] sm:$0xff] }
 0x5af   :  { %12847 = vmatprep.subr.bf16.mxu0 %v15543_v1  ;;  %12993 = vmatprep.subr.bf16.mxu1 %v15545_v2  ;;  %v9701_v1 = vld [vmem:[#allocation8 + $0xa50] sm:$0xff]  ;;  %v9694_v2 = vld [vmem:[#allocation8 + $0xa18] sm:$0xff] }
 0x5b0   :  { %v15639_v6 = vcombine.high %v9693_v0, %v9701_v1  ;;  %v15638_v25 = vcombine.low %v9693_v0, %v9701_v1  ;;  %v15640_v26 = vcombine.low %v9694_v2, %v9702_v3  ;;  %v9782_v0 = vld [vmem:[#allocation8 + $0xcd8] sm:$0xff] }
 0x5b2   :  { %12848 = vmatpush1.bf16.msra.mxu0 %v15542_v7  ;;  %12994 = vmatpush1.bf16.msra.mxu1 %v15544_v8  ;;  %v15641_v7 = vcombine.high %v9694_v2, %v9702_v3  ;;  %v9709_v8 = vld [vmem:[#allocation8 + $0xa90] sm:$0xff] }
 0x5b3   :  { %12849 = vmatprep.subr.bf16.mxu0 %v15559_v18  ;;  %12995 = vmatprep.subr.bf16.mxu1 %v15561_v23  ;;  %v9717_v18 = vld [vmem:[#allocation8 + $0xad0] sm:$0xff]  ;;  %v9710_v23 = vld [vmem:[#allocation8 + $0xa98] sm:$0xff] }
 0x5b4   :  { %v15655_v27 = vcombine.high %v9709_v8, %v9717_v18  ;;  %v15654_v33 = vcombine.low %v9709_v8, %v9717_v18  ;;  %v15656_v34 = vcombine.low %v9710_v23, %v9718_v24  ;;  %v9798_v8 = vld [vmem:[#allocation8 + $0xd58] sm:$0xff] }
 0x5b6   :  { %12850 = vmatpush1.bf16.msra.mxu0 %v15558_v28  ;;  %12996 = vmatpush1.bf16.msra.mxu1 %v15560_v29  ;;  %v15657_v28 = vcombine.high %v9710_v23, %v9718_v24  ;;  %v9725_v29 = vld [vmem:[#allocation8 + $0xb10] sm:$0xff] }
 0x5b7   :  { %12892 = vmatprep.subr.bf16.mxu0 %v15575_v30  ;;  %13038 = vmatprep.subr.bf16.mxu1 %v15577_v31  ;;  %v9733_v30 = vld [vmem:[#allocation8 + $0xb50] sm:$0xff]  ;;  %v9726_v31 = vld [vmem:[#allocation8 + $0xb18] sm:$0xff] }
 0x5b8   :  { %v15671_v35 = vcombine.high %v9725_v29, %v9733_v30  ;;  %v15670_v46 = vcombine.low %v9725_v29, %v9733_v30  ;;  %v15672_v16 = vcombine.low %v9726_v31, %v9734_v32  ;;  %v9814_v29 = vld [vmem:[#allocation8 + $0xdd8] sm:$0xff] }
 0x5b9   :  { %12852 = vmatmul.mubr.bf16.vlgmr.msra.gmra.mrb[32].mxu0 %v18674_v39  ;;  %12998 = vmatmul.mubr.bf16.vlgmr.msra.gmra.mrb[32].mxu1 %v18674_v39 }
 0x5ba   :  { %12861 = vmatprep.mubr.bf16.mxu0 %v18702_v21  ;;  %12893 = vmatpush1.bf16.msra.mxu0 %v15574_v36  ;;  %v15673_v36 = vcombine.high %v9726_v31, %v9734_v32 }
 0x5bb   :  { %13007 = vmatprep.mubr.bf16.mxu1 %v18702_v21  ;;  %13039 = vmatpush1.bf16.msra.mxu1 %v15576_v37  ;;  %v9741_v37 = vld [vmem:[#allocation8 + $0xb90] sm:$0xff] }
 0x5bc   :  { %12894 = vmatprep.subr.bf16.mxu0 %v15591_v38  ;;  %13040 = vmatprep.subr.bf16.mxu1 %v15593_v43  ;;  %v9749_v38 = vld [vmem:[#allocation8 + $0xbd0] sm:$0xff]  ;;  %v9742_v43 = vld [vmem:[#allocation8 + $0xb98] sm:$0xff] }
 0x5bd   :  { %v15687_v47 = vcombine.high %v9741_v37, %v9749_v38  ;;  %v15686_v53 = vcombine.low %v9741_v37, %v9749_v38  ;;  %v15688_v54 = vcombine.low %v9742_v43, %v9750_v15  ;;  %v9830_v37 = vld [vmem:[#allocation8 + $0xe58] sm:$0xff] }
 0x5be   :  { %12895 = vmatpush1.bf16.msra.mxu0 %v15590_v50  ;;  %v15689_v50 = vcombine.high %v9742_v43, %v9750_v15 }
 0x5bf   :  { %13041 = vmatpush1.bf16.msra.mxu1 %v15592_v19  ;;  %12896 = vmatprep.subr.bf16.mxu0 %v15607_v20  ;;  %v9757_v19 = vld [vmem:[#allocation8 + $0xc10] sm:$0xff] }
 0x5c0   :  { %13042 = vmatprep.subr.bf16.mxu1 %v15609_v51  ;;  %v9765_v20 = vld [vmem:[#allocation8 + $0xc50] sm:$0xff]  ;;  %v9758_v51 = vld [vmem:[#allocation8 + $0xc18] sm:$0xff] }
 0x5c1   :  { %12862 = vmatmul.mubr.bf16.gmra.mrb[36].mxu0 %v18697_v12  ;;  %13008 = vmatmul.mubr.bf16.gmra.mrb[36].mxu1 %v18697_v12  ;;  %v15703_v55 = vcombine.high %v9757_v19, %v9765_v20  ;;  %v15702_v1 = vcombine.low %v9757_v19, %v9765_v20  ;;  %v15704_v2 = vcombine.low %v9758_v51, %v9766_v52  ;;  %v9846_v19 = vld [vmem:[#allocation8 + $0xed8] sm:$0xff] }
 0x5c2   :  { %12871 = vmatprep.mubr.bf16.mxu0 %v18726_v61  ;;  %12897 = vmatpush1.bf16.msra.mxu0 %v15606_v56  ;;  %v15705_v56 = vcombine.high %v9758_v51, %v9766_v52 }
 0x5c3   :  { %13017 = vmatprep.mubr.bf16.mxu1 %v18726_v61  ;;  %13043 = vmatpush1.bf16.msra.mxu1 %v15608_v57  ;;  %v9773_v57 = vld [vmem:[#allocation8 + $0xc90] sm:$0xff] }
 0x5c4   :  { %12898 = vmatprep.subr.bf16.mxu0 %v15623_v60  ;;  %13044 = vmatprep.subr.bf16.mxu1 %v15625_v63  ;;  %v9781_v60 = vld [vmem:[#allocation8 + $0xcd0] sm:$0xff]  ;;  %v9774_v63 = vld [vmem:[#allocation8 + $0xc98] sm:$0xff] }
 0x5c5   :  { %v15719_v3 = vcombine.high %v9773_v57, %v9781_v60  ;;  %v15718_v18 = vcombine.low %v9773_v57, %v9781_v60  ;;  %v15720_v23 = vcombine.low %v9774_v63, %v9782_v0  ;;  %v9862_v57 = vld [vmem:[#allocation8 + $0xf58] sm:$0xff] }
 0x5c6   :  { %12899 = vmatpush1.bf16.msra.mxu0 %v15622_v4  ;;  %v15721_v4 = vcombine.high %v9774_v63, %v9782_v0 }
 0x5c7   :  { %13045 = vmatpush1.bf16.msra.mxu1 %v15624_v5  ;;  %12900 = vmatprep.subr.bf16.mxu0 %v15639_v6  ;;  %v9789_v5 = vld [vmem:[#allocation8 + $0xd10] sm:$0xff] }
 0x5c8   :  { %13046 = vmatprep.subr.bf16.mxu1 %v15641_v7  ;;  %v9797_v6 = vld [vmem:[#allocation8 + $0xd50] sm:$0xff]  ;;  %v9790_v7 = vld [vmem:[#allocation8 + $0xd18] sm:$0xff] }
 0x5c9   :  { %12872 = vmatmul.mubr.bf16.gmra.mrb[40].mxu0 %v18721_v58  ;;  %13018 = vmatmul.mubr.bf16.gmra.mrb[40].mxu1 %v18721_v58  ;;  %v15735_v24 = vcombine.high %v9789_v5, %v9797_v6  ;;  %v15734_v30 = vcombine.low %v9789_v5, %v9797_v6  ;;  %v15736_v31 = vcombine.low %v9790_v7, %v9798_v8  ;;  %v9878_v5 = vld [vmem:[#allocation8 + $0xfd8] sm:$0xff] }
 0x5ca   :  { %12881 = vmatprep.mubr.bf16.mxu0 %v18746_v48  ;;  %12901 = vmatpush1.bf16.msra.mxu0 %v15638_v25  ;;  %v15737_v25 = vcombine.high %v9790_v7, %v9798_v8 }
 0x5cb   :  { %13027 = vmatprep.mubr.bf16.mxu1 %v18746_v48  ;;  %13047 = vmatpush1.bf16.msra.mxu1 %v15640_v26  ;;  %v9805_v26 = vld [vmem:[#allocation8 + $0xd90] sm:$0xff] }
 0x5cc   :  { %12902 = vmatprep.subr.bf16.mxu0 %v15655_v27  ;;  %13048 = vmatprep.subr.bf16.mxu1 %v15657_v28  ;;  %v9813_v27 = vld [vmem:[#allocation8 + $0xdd0] sm:$0xff]  ;;  %v9806_v28 = vld [vmem:[#allocation8 + $0xd98] sm:$0xff] }
 0x5cd   :  { %v15751_v32 = vcombine.high %v9805_v26, %v9813_v27  ;;  %v15750_v38 = vcombine.low %v9805_v26, %v9813_v27  ;;  %v15752_v43 = vcombine.low %v9806_v28, %v9814_v29  ;;  %v9384_v26 = vld [vmem:[#allocation8 + $0x68] sm:$0xff] }
 0x5ce   :  { %12903 = vmatpush1.bf16.msra.mxu0 %v15654_v33  ;;  %v15753_v33 = vcombine.high %v9806_v28, %v9814_v29 }
 0x5cf   :  { %13049 = vmatpush1.bf16.msra.mxu1 %v15656_v34  ;;  %12904 = vmatprep.subr.bf16.mxu0 %v15671_v35  ;;  %v9821_v34 = vld [vmem:[#allocation8 + $0xe10] sm:$0xff] }
 0x5d0   :  { %13050 = vmatprep.subr.bf16.mxu1 %v15673_v36  ;;  %v9829_v35 = vld [vmem:[#allocation8 + $0xe50] sm:$0xff]  ;;  %v9822_v36 = vld [vmem:[#allocation8 + $0xe18] sm:$0xff] }
 0x5d1   :  { %12882 = vmatmul.mubr.bf16.gmra.mrb[44].mxu0 %v18742_v44  ;;  %13028 = vmatmul.mubr.bf16.gmra.mrb[44].mxu1 %v18742_v44  ;;  %v15767_v15 = vcombine.high %v9821_v34, %v9829_v35  ;;  %v15766_v20 = vcombine.low %v9821_v34, %v9829_v35  ;;  %v15768_v51 = vcombine.low %v9822_v36, %v9830_v37  ;;  %v9400_v34 = vld [vmem:[#allocation8 + $0xe8] sm:$0xff] }
 0x5d2   :  { %12905 = vmatpush1.bf16.msra.mxu0 %v15670_v46  ;;  %12924 = vmatprep.mubr.bf16.mxu0 %v18680_v42  ;;  %v15769_v46 = vcombine.high %v9822_v36, %v9830_v37 }
 0x5d3   :  { %13051 = vmatpush1.bf16.msra.mxu1 %v15672_v16  ;;  %13070 = vmatprep.mubr.bf16.mxu1 %v18680_v42  ;;  %v9837_v16 = vld [vmem:[#allocation8 + $0xe90] sm:$0xff] }
 0x5d4   :  { %12906 = vmatprep.subr.bf16.mxu0 %v15687_v47  ;;  %13052 = vmatprep.subr.bf16.mxu1 %v15689_v50  ;;  %v9845_v47 = vld [vmem:[#allocation8 + $0xed0] sm:$0xff]  ;;  %v9838_v50 = vld [vmem:[#allocation8 + $0xe98] sm:$0xff] }
 0x5d5   :  { %v15783_v52 = vcombine.high %v9837_v16, %v9845_v47  ;;  %v15782_v60 = vcombine.low %v9837_v16, %v9845_v47  ;;  %v15784_v63 = vcombine.low %v9838_v50, %v9846_v19  ;;  %v9416_v16 = vld [vmem:[#allocation8 + $0x168] sm:$0xff] }
 0x5d6   :  { %12907 = vmatpush1.bf16.msra.mxu0 %v15686_v53  ;;  %v15785_v53 = vcombine.high %v9838_v50, %v9846_v19 }
 0x5d7   :  { %13053 = vmatpush1.bf16.msra.mxu1 %v15688_v54  ;;  %12908 = vmatprep.subr.bf16.mxu0 %v15703_v55  ;;  %v9853_v54 = vld [vmem:[#allocation8 + $0xf10] sm:$0xff] }
 0x5d8   :  { %13054 = vmatprep.subr.bf16.mxu1 %v15705_v56  ;;  %v9861_v55 = vld [vmem:[#allocation8 + $0xf50] sm:$0xff]  ;;  %v9854_v56 = vld [vmem:[#allocation8 + $0xf18] sm:$0xff] }
 0x5d9   :  { %v15799_v0 = vcombine.high %v9853_v54, %v9861_v55  ;;  %v15798_v6 = vcombine.low %v9853_v54, %v9861_v55  ;;  %v15800_v7 = vcombine.low %v9854_v56, %v9862_v57  ;;  %v9432_v54 = vld [vmem:[#allocation8 + $0x1e8] sm:$0xff] }
 0x5da   :  { %12909 = vmatpush1.bf16.msra.mxu0 %v15702_v1  ;;  %v15801_v1 = vcombine.high %v9854_v56, %v9862_v57 }
 0x5db   :  { %13055 = vmatpush1.bf16.msra.mxu1 %v15704_v2  ;;  %12910 = vmatprep.subr.bf16.mxu0 %v15719_v3  ;;  %v9869_v2 = vld [vmem:[#allocation8 + $0xf90] sm:$0xff] }
 0x5dc   :  { %13056 = vmatprep.subr.bf16.mxu1 %v15721_v4  ;;  %v9877_v3 = vld [vmem:[#allocation8 + $0xfd0] sm:$0xff]  ;;  %v9870_v4 = vld [vmem:[#allocation8 + $0xf98] sm:$0xff] }
 0x5dd   :  { %v15815_v8 = vcombine.high %v9869_v2, %v9877_v3  ;;  %v15814_v27 = vcombine.low %v9869_v2, %v9877_v3  ;;  %v15816_v28 = vcombine.low %v9870_v4, %v9878_v5  ;;  %v9448_v2 = vld [vmem:[#allocation8 + $0x268] sm:$0xff] }
 0x5de   :  { %12911 = vmatpush1.bf16.msra.mxu0 %v15718_v18  ;;  %v15817_v18 = vcombine.high %v9870_v4, %v9878_v5 }
 0x5df   :  { %13057 = vmatpush1.bf16.msra.mxu1 %v15720_v23  ;;  %12912 = vmatprep.subr.bf16.mxu0 %v15735_v24  ;;  %v9375_v23 = vld [vmem:[#allocation8 + $0x20] sm:$0xff] }
 0x5e0   :  { %13058 = vmatprep.subr.bf16.mxu1 %v15737_v25  ;;  %v9383_v24 = vld [vmem:[#allocation8 + $0x60] sm:$0xff]  ;;  %v9376_v25 = vld [vmem:[#allocation8 + $0x28] sm:$0xff] }
 0x5e1   :  { %v15323_v29 = vcombine.high %v9375_v23, %v9383_v24  ;;  %v15322_v35 = vcombine.low %v9375_v23, %v9383_v24  ;;  %v15324_v36 = vcombine.low %v9376_v25, %v9384_v26  ;;  %v9464_v23 = vld [vmem:[#allocation8 + $0x2e8] sm:$0xff] }
 0x5e2   :  { %12913 = vmatpush1.bf16.msra.mxu0 %v15734_v30  ;;  %v15325_v30 = vcombine.high %v9376_v25, %v9384_v26 }
 0x5e3   :  { %13059 = vmatpush1.bf16.msra.mxu1 %v15736_v31  ;;  %12914 = vmatprep.subr.bf16.mxu0 %v15751_v32  ;;  %v9391_v31 = vld [vmem:[#allocation8 + $0xa0] sm:$0xff] }
 0x5e4   :  { %13060 = vmatprep.subr.bf16.mxu1 %v15753_v33  ;;  %v9399_v32 = vld [vmem:[#allocation8 + $0xe0] sm:$0xff]  ;;  %v9392_v33 = vld [vmem:[#allocation8 + $0xa8] sm:$0xff] }
 0x5e5   :  { %v15339_v37 = vcombine.high %v9391_v31, %v9399_v32  ;;  %v15338_v47 = vcombine.low %v9391_v31, %v9399_v32  ;;  %v15340_v50 = vcombine.low %v9392_v33, %v9400_v34  ;;  %v9480_v31 = vld [vmem:[#allocation8 + $0x368] sm:$0xff] }
 0x5e6   :  { %12915 = vmatpush1.bf16.msra.mxu0 %v15750_v38  ;;  %v15341_v38 = vcombine.high %v9392_v33, %v9400_v34 }
 0x5e7   :  { %13061 = vmatpush1.bf16.msra.mxu1 %v15752_v43  ;;  %12916 = vmatprep.subr.bf16.mxu0 %v15767_v15  ;;  %v9407_v43 = vld [vmem:[#allocation8 + $0x120] sm:$0xff] }
 0x5e8   :  { %13062 = vmatprep.subr.bf16.mxu1 %v15769_v46  ;;  %v9415_v15 = vld [vmem:[#allocation8 + $0x160] sm:$0xff]  ;;  %v9408_v46 = vld [vmem:[#allocation8 + $0x128] sm:$0xff] }
 0x5e9   :  { %v15355_v19 = vcombine.high %v9407_v43, %v9415_v15  ;;  %v15354_v55 = vcombine.low %v9407_v43, %v9415_v15  ;;  %v15356_v56 = vcombine.low %v9408_v46, %v9416_v16  ;;  %v9496_v43 = vld [vmem:[#allocation8 + $0x3e8] sm:$0xff] }
 0x5ea   :  { %12917 = vmatpush1.bf16.msra.mxu0 %v15766_v20  ;;  %v15357_v20 = vcombine.high %v9408_v46, %v9416_v16 }
 0x5eb   :  { %13063 = vmatpush1.bf16.msra.mxu1 %v15768_v51  ;;  %12918 = vmatprep.subr.bf16.mxu0 %v15783_v52  ;;  %v9423_v51 = vld [vmem:[#allocation8 + $0x1a0] sm:$0xff] }
 0x5ec   :  { %13064 = vmatprep.subr.bf16.mxu1 %v15785_v53  ;;  %v9431_v52 = vld [vmem:[#allocation8 + $0x1e0] sm:$0xff]  ;;  %v9424_v53 = vld [vmem:[#allocation8 + $0x1a8] sm:$0xff] }
 0x5ed   :  { %v15371_v57 = vcombine.high %v9423_v51, %v9431_v52  ;;  %v15370_v3 = vcombine.low %v9423_v51, %v9431_v52  ;;  %v15372_v4 = vcombine.low %v9424_v53, %v9432_v54  ;;  %v9512_v51 = vld [vmem:[#allocation8 + $0x468] sm:$0xff] }
 0x5ee   :  { %12919 = vmatpush1.bf16.msra.mxu0 %v15782_v60  ;;  %v15373_v60 = vcombine.high %v9424_v53, %v9432_v54 }
 0x5ef   :  { %13065 = vmatpush1.bf16.msra.mxu1 %v15784_v63  ;;  %12920 = vmatprep.subr.bf16.mxu0 %v15799_v0  ;;  %v9439_v63 = vld [vmem:[#allocation8 + $0x220] sm:$0xff] }
 0x5f0   :  { %13066 = vmatprep.subr.bf16.mxu1 %v15801_v1  ;;  %v9447_v0 = vld [vmem:[#allocation8 + $0x260] sm:$0xff]  ;;  %v9440_v1 = vld [vmem:[#allocation8 + $0x228] sm:$0xff] }
 0x5f1   :  { %v15387_v5 = vcombine.high %v9439_v63, %v9447_v0  ;;  %v15386_v24 = vcombine.low %v9439_v63, %v9447_v0  ;;  %v15388_v25 = vcombine.low %v9440_v1, %v9448_v2  ;;  %v9528_v63 = vld [vmem:[#allocation8 + $0x4e8] sm:$0xff] }
 0x5f2   :  { %12921 = vmatpush1.bf16.msra.mxu0 %v15798_v6  ;;  %v15389_v6 = vcombine.high %v9440_v1, %v9448_v2 }
 0x5f3   :  { %13067 = vmatpush1.bf16.msra.mxu1 %v15800_v7  ;;  %12922 = vmatprep.subr.bf16.mxu0 %v15815_v8  ;;  %v9455_v7 = vld [vmem:[#allocation8 + $0x2a0] sm:$0xff] }
 0x5f4   :  { %13068 = vmatprep.subr.bf16.mxu1 %v15817_v18  ;;  %v9463_v8 = vld [vmem:[#allocation8 + $0x2e0] sm:$0xff]  ;;  %v9456_v18 = vld [vmem:[#allocation8 + $0x2a8] sm:$0xff] }
 0x5f5   :  { %v15403_v26 = vcombine.high %v9455_v7, %v9463_v8  ;;  %v15402_v32 = vcombine.low %v9455_v7, %v9463_v8  ;;  %v15404_v33 = vcombine.low %v9456_v18, %v9464_v23  ;;  %v9544_v7 = vld [vmem:[#allocation8 + $0x568] sm:$0xff] }
 0x5f6   :  { %12923 = vmatpush1.bf16.msra.mxu0 %v15814_v27  ;;  %v15405_v27 = vcombine.high %v9456_v18, %v9464_v23 }
 0x5f7   :  { %13069 = vmatpush1.bf16.msra.mxu1 %v15816_v28  ;;  %13111 = vmatprep.subr.bf16.mxu0 %v15323_v29  ;;  %v9471_v28 = vld [vmem:[#allocation8 + $0x320] sm:$0xff] }
 0x5f8   :  { %13257 = vmatprep.subr.bf16.mxu1 %v15325_v30  ;;  %v9479_v29 = vld [vmem:[#allocation8 + $0x360] sm:$0xff]  ;;  %v9472_v30 = vld [vmem:[#allocation8 + $0x328] sm:$0xff] }
 0x5f9   :  { %12925 = vmatmul.mubr.bf16.vlgmr.msra.gmra.mrb[32].mxu0 %v18676_v40  ;;  %v15419_v34 = vcombine.high %v9471_v28, %v9479_v29  ;;  %v15418_v15 = vcombine.low %v9471_v28, %v9479_v29  ;;  %v15420_v46 = vcombine.low %v9472_v30, %v9480_v31  ;;  %v9560_v28 = vld [vmem:[#allocation8 + $0x5e8] sm:$0xff] }
 0x5fa   :  { %13071 = vmatmul.mubr.bf16.vlgmr.msra.gmra.mrb[32].mxu1 %v18676_v40  ;;  %12934 = vmatprep.mubr.bf16.mxu0 %v18704_v22 }
 0x5fb   :  { %13080 = vmatprep.mubr.bf16.mxu1 %v18704_v22  ;;  %13112 = vmatpush1.bf16.msra.mxu0 %v15322_v35  ;;  %v15421_v35 = vcombine.high %v9472_v30, %v9480_v31 }
 0x5fc   :  { %13258 = vmatpush1.bf16.msra.mxu1 %v15324_v36  ;;  %13113 = vmatprep.subr.bf16.mxu0 %v15339_v37  ;;  %v9487_v36 = vld [vmem:[#allocation8 + $0x3a0] sm:$0xff] }
 0x5fd   :  { %13259 = vmatprep.subr.bf16.mxu1 %v15341_v38  ;;  %v9495_v37 = vld [vmem:[#allocation8 + $0x3e0] sm:$0xff]  ;;  %v9488_v38 = vld [vmem:[#allocation8 + $0x3a8] sm:$0xff] }
 0x5fe   :  { %v15435_v16 = vcombine.high %v9487_v36, %v9495_v37  ;;  %v15434_v52 = vcombine.low %v9487_v36, %v9495_v37  ;;  %v15436_v53 = vcombine.low %v9488_v38, %v9496_v43  ;;  %v9576_v36 = vld [vmem:[#allocation8 + $0x668] sm:$0xff] }
 0x5ff   :  { %13114 = vmatpush1.bf16.msra.mxu0 %v15338_v47  ;;  %v15437_v47 = vcombine.high %v9488_v38, %v9496_v43 }
 0x600   :  { %13260 = vmatpush1.bf16.msra.mxu1 %v15340_v50  ;;  %13115 = vmatprep.subr.bf16.mxu0 %v15355_v19  ;;  %v9503_v50 = vld [vmem:[#allocation8 + $0x420] sm:$0xff] }
 0x601   :  { %12935 = vmatmul.mubr.bf16.gmra.mrb[36].mxu0 %v18699_v17  ;;  %13261 = vmatprep.subr.bf16.mxu1 %v15357_v20  ;;  %v9511_v19 = vld [vmem:[#allocation8 + $0x460] sm:$0xff]  ;;  %v9504_v20 = vld [vmem:[#allocation8 + $0x428] sm:$0xff] }
 0x602   :  { %13081 = vmatmul.mubr.bf16.gmra.mrb[36].mxu1 %v18699_v17  ;;  %12944 = vmatprep.mubr.bf16.mxu0 %v18728_v62  ;;  %v15451_v54 = vcombine.high %v9503_v50, %v9511_v19  ;;  %v15450_v0 = vcombine.low %v9503_v50, %v9511_v19  ;;  %v15452_v1 = vcombine.low %v9504_v20, %v9512_v51  ;;  %v9592_v50 = vld [vmem:[#allocation8 + $0x6e8] sm:$0xff] }
 0x603   :  { %13090 = vmatprep.mubr.bf16.mxu1 %v18728_v62  ;;  %13116 = vmatpush1.bf16.msra.mxu0 %v15354_v55  ;;  %v15453_v55 = vcombine.high %v9504_v20, %v9512_v51 }
 0x604   :  { %13262 = vmatpush1.bf16.msra.mxu1 %v15356_v56  ;;  %13117 = vmatprep.subr.bf16.mxu0 %v15371_v57  ;;  %v9519_v56 = vld [vmem:[#allocation8 + $0x4a0] sm:$0xff] }
 0x605   :  { %13263 = vmatprep.subr.bf16.mxu1 %v15373_v60  ;;  %v9527_v57 = vld [vmem:[#allocation8 + $0x4e0] sm:$0xff]  ;;  %v9520_v60 = vld [vmem:[#allocation8 + $0x4a8] sm:$0xff] }
 0x606   :  { %v15467_v2 = vcombine.high %v9519_v56, %v9527_v57  ;;  %v15466_v8 = vcombine.low %v9519_v56, %v9527_v57  ;;  %v15468_v18 = vcombine.low %v9520_v60, %v9528_v63  ;;  %v9608_v56 = vld [vmem:[#allocation8 + $0x768] sm:$0xff] }
 0x607   :  { %13118 = vmatpush1.bf16.msra.mxu0 %v15370_v3  ;;  %v15469_v3 = vcombine.high %v9520_v60, %v9528_v63 }
 0x608   :  { %13264 = vmatpush1.bf16.msra.mxu1 %v15372_v4  ;;  %13119 = vmatprep.subr.bf16.mxu0 %v15387_v5  ;;  %v9535_v4 = vld [vmem:[#allocation8 + $0x520] sm:$0xff] }
 0x609   :  { %12945 = vmatmul.mubr.bf16.gmra.mrb[40].mxu0 %v18723_v59  ;;  %13265 = vmatprep.subr.bf16.mxu1 %v15389_v6  ;;  %v9543_v5 = vld [vmem:[#allocation8 + $0x560] sm:$0xff]  ;;  %v9536_v6 = vld [vmem:[#allocation8 + $0x528] sm:$0xff] }
 0x60a   :  { %13091 = vmatmul.mubr.bf16.gmra.mrb[40].mxu1 %v18723_v59  ;;  %12954 = vmatprep.mubr.bf16.mxu0 %v18748_v49  ;;  %v15483_v23 = vcombine.high %v9535_v4, %v9543_v5  ;;  %v15482_v29 = vcombine.low %v9535_v4, %v9543_v5  ;;  %v15484_v30 = vcombine.low %v9536_v6, %v9544_v7  ;;  %v9624_v4 = vld [vmem:[#allocation8 + $0x7e8] sm:$0xff] }
 0x60b   :  { %13100 = vmatprep.mubr.bf16.mxu1 %v18748_v49  ;;  %13120 = vmatpush1.bf16.msra.mxu0 %v15386_v24  ;;  %v15485_v24 = vcombine.high %v9536_v6, %v9544_v7 }
 0x60c   :  { %13266 = vmatpush1.bf16.msra.mxu1 %v15388_v25  ;;  %13121 = vmatprep.subr.bf16.mxu0 %v15403_v26  ;;  %v9551_v25 = vld [vmem:[#allocation8 + $0x5a0] sm:$0xff] }
 0x60d   :  { %13267 = vmatprep.subr.bf16.mxu1 %v15405_v27  ;;  %v9559_v26 = vld [vmem:[#allocation8 + $0x5e0] sm:$0xff]  ;;  %v9552_v27 = vld [vmem:[#allocation8 + $0x5a8] sm:$0xff] }
 0x60e   :  { %v15499_v31 = vcombine.high %v9551_v25, %v9559_v26  ;;  %v15498_v37 = vcombine.low %v9551_v25, %v9559_v26  ;;  %v15500_v38 = vcombine.low %v9552_v27, %v9560_v28  ;;  %v9640_v25 = vld [vmem:[#allocation8 + $0x868] sm:$0xff] }
 0x60f   :  { %13122 = vmatpush1.bf16.msra.mxu0 %v15402_v32  ;;  %v15501_v32 = vcombine.high %v9552_v27, %v9560_v28 }
 0x610   :  { %13268 = vmatpush1.bf16.msra.mxu1 %v15404_v33  ;;  %13123 = vmatprep.subr.bf16.mxu0 %v15419_v34  ;;  %v9567_v33 = vld [vmem:[#allocation8 + $0x620] sm:$0xff] }
 0x611   :  { %12955 = vmatmul.mubr.bf16.gmra.mrb[44].mxu0 %v18744_v45  ;;  %13269 = vmatprep.subr.bf16.mxu1 %v15421_v35  ;;  %v9575_v34 = vld [vmem:[#allocation8 + $0x660] sm:$0xff]  ;;  %v9568_v35 = vld [vmem:[#allocation8 + $0x628] sm:$0xff] }
 0x612   :  { %13101 = vmatmul.mubr.bf16.gmra.mrb[44].mxu1 %v18744_v45  ;;  %13143 = vmatprep.mubr.bf16.mxu0 %v18678_v41  ;;  %v15515_v43 = vcombine.high %v9567_v33, %v9575_v34  ;;  %v15514_v19 = vcombine.low %v9567_v33, %v9575_v34  ;;  %v15516_v20 = vcombine.low %v9568_v35, %v9576_v36  ;;  %v9656_v33 = vld [vmem:[#allocation8 + $0x8e8] sm:$0xff] }
 0x613   :  { %13124 = vmatpush1.bf16.msra.mxu0 %v15418_v15  ;;  %13289 = vmatprep.mubr.bf16.mxu1 %v18678_v41  ;;  %v15517_v15 = vcombine.high %v9568_v35, %v9576_v36 }
 0x614   :  { %13270 = vmatpush1.bf16.msra.mxu1 %v15420_v46  ;;  %13125 = vmatprep.subr.bf16.mxu0 %v15435_v16  ;;  %v9583_v46 = vld [vmem:[#allocation8 + $0x6a0] sm:$0xff] }
 0x615   :  { %13271 = vmatprep.subr.bf16.mxu1 %v15437_v47  ;;  %v9591_v16 = vld [vmem:[#allocation8 + $0x6e0] sm:$0xff]  ;;  %v9584_v47 = vld [vmem:[#allocation8 + $0x6a8] sm:$0xff] }
 0x616   :  { %v15531_v51 = vcombine.high %v9583_v46, %v9591_v16  ;;  %v15530_v57 = vcombine.low %v9583_v46, %v9591_v16  ;;  %v15532_v60 = vcombine.low %v9584_v47, %v9592_v50  ;;  %v9672_v46 = vld [vmem:[#allocation8 + $0x968] sm:$0xff] }
 0x617   :  { %13126 = vmatpush1.bf16.msra.mxu0 %v15434_v52  ;;  %v15533_v52 = vcombine.high %v9584_v47, %v9592_v50 }
 0x618   :  { %13272 = vmatpush1.bf16.msra.mxu1 %v15436_v53  ;;  %13127 = vmatprep.subr.bf16.mxu0 %v15451_v54  ;;  %v9599_v53 = vld [vmem:[#allocation8 + $0x720] sm:$0xff] }
 0x619   :  { %13273 = vmatprep.subr.bf16.mxu1 %v15453_v55  ;;  %v9607_v54 = vld [vmem:[#allocation8 + $0x760] sm:$0xff]  ;;  %v9600_v55 = vld [vmem:[#allocation8 + $0x728] sm:$0xff] }
 0x61a   :  { %v15547_v63 = vcombine.high %v9599_v53, %v9607_v54  ;;  %v15546_v5 = vcombine.low %v9599_v53, %v9607_v54  ;;  %v15548_v6 = vcombine.low %v9600_v55, %v9608_v56  ;;  %v9688_v53 = vld [vmem:[#allocation8 + $0x9e8] sm:$0xff] }
 0x61b   :  { %13128 = vmatpush1.bf16.msra.mxu0 %v15450_v0  ;;  %v15549_v0 = vcombine.high %v9600_v55, %v9608_v56 }
 0x61c   :  { %13274 = vmatpush1.bf16.msra.mxu1 %v15452_v1  ;;  %13129 = vmatprep.subr.bf16.mxu0 %v15467_v2  ;;  %v9615_v1 = vld [vmem:[#allocation8 + $0x7a0] sm:$0xff] }
 0x61d   :  { %13275 = vmatprep.subr.bf16.mxu1 %v15469_v3  ;;  %v9623_v2 = vld [vmem:[#allocation8 + $0x7e0] sm:$0xff]  ;;  %v9616_v3 = vld [vmem:[#allocation8 + $0x7a8] sm:$0xff] }
 0x61e   :  { %v15563_v7 = vcombine.high %v9615_v1, %v9623_v2  ;;  %v15562_v26 = vcombine.low %v9615_v1, %v9623_v2  ;;  %v15564_v27 = vcombine.low %v9616_v3, %v9624_v4  ;;  %v9704_v1 = vld [vmem:[#allocation8 + $0xa68] sm:$0xff] }
 0x61f   :  { %13130 = vmatpush1.bf16.msra.mxu0 %v15466_v8  ;;  %v15565_v8 = vcombine.high %v9616_v3, %v9624_v4 }
 0x620   :  { %13276 = vmatpush1.bf16.msra.mxu1 %v15468_v18  ;;  %13131 = vmatprep.subr.bf16.mxu0 %v15483_v23  ;;  %v9631_v18 = vld [vmem:[#allocation8 + $0x820] sm:$0xff] }
 0x621   :  { %13277 = vmatprep.subr.bf16.mxu1 %v15485_v24  ;;  %v9639_v23 = vld [vmem:[#allocation8 + $0x860] sm:$0xff]  ;;  %v9632_v24 = vld [vmem:[#allocation8 + $0x828] sm:$0xff] }
 0x622   :  { %v15579_v28 = vcombine.high %v9631_v18, %v9639_v23  ;;  %v15578_v34 = vcombine.low %v9631_v18, %v9639_v23  ;;  %v15580_v35 = vcombine.low %v9632_v24, %v9640_v25  ;;  %v9712_v18 = vld [vmem:[#allocation8 + $0xaa8] sm:$0xff] }
 0x623   :  { %13132 = vmatpush1.bf16.msra.mxu0 %v15482_v29  ;;  %v15581_v29 = vcombine.high %v9632_v24, %v9640_v25  ;;  %v9720_v23 = vld [vmem:[#allocation8 + $0xae8] sm:$0xff] }
 0x624   :  { %13278 = vmatpush1.bf16.msra.mxu1 %v15484_v30  ;;  %13133 = vmatprep.subr.bf16.mxu0 %v15499_v31  ;;  %v9647_v30 = vld [vmem:[#allocation8 + $0x8a0] sm:$0xff] }
 0x625   :  { %13279 = vmatprep.subr.bf16.mxu1 %v15501_v32  ;;  %v9655_v31 = vld [vmem:[#allocation8 + $0x8e0] sm:$0xff]  ;;  %v9648_v32 = vld [vmem:[#allocation8 + $0x8a8] sm:$0xff] }
 0x626   :  { %v15595_v36 = vcombine.high %v9647_v30, %v9655_v31  ;;  %v15594_v16 = vcombine.low %v9647_v30, %v9655_v31  ;;  %v15596_v47 = vcombine.low %v9648_v32, %v9656_v33  ;;  %v15661_v31 = vcombine.high %v9712_v18, %v9720_v23 }
 0x627   :  { %13134 = vmatpush1.bf16.msra.mxu0 %v15498_v37  ;;  %v15597_v37 = vcombine.high %v9648_v32, %v9656_v33  ;;  %v9727_v32 = vld [vmem:[#allocation8 + $0xb20] sm:$0xff] }
 0x628   :  { %13280 = vmatpush1.bf16.msra.mxu1 %v15500_v38  ;;  %13135 = vmatprep.subr.bf16.mxu0 %v15515_v43  ;;  %v9663_v38 = vld [vmem:[#allocation8 + $0x920] sm:$0xff] }
 0x629   :  { %13281 = vmatprep.subr.bf16.mxu1 %v15517_v15  ;;  %v9671_v43 = vld [vmem:[#allocation8 + $0x960] sm:$0xff]  ;;  %v9664_v15 = vld [vmem:[#allocation8 + $0x928] sm:$0xff] }
 0x62a   :  { %v15611_v50 = vcombine.high %v9663_v38, %v9671_v43  ;;  %v15610_v54 = vcombine.low %v9663_v38, %v9671_v43  ;;  %v15612_v55 = vcombine.low %v9664_v15, %v9672_v46  ;;  %v9735_v33 = vld [vmem:[#allocation8 + $0xb60] sm:$0xff]  ;;  %v9736_v38 = vld [vmem:[#allocation8 + $0xb68] sm:$0xff] }
 0x62b   :  { %13136 = vmatpush1.bf16.msra.mxu0 %v15514_v19  ;;  %v15613_v19 = vcombine.high %v9664_v15, %v9672_v46 }
 0x62c   :  { %13282 = vmatpush1.bf16.msra.mxu1 %v15516_v20  ;;  %13137 = vmatprep.subr.bf16.mxu0 %v15531_v51  ;;  %v9679_v20 = vld [vmem:[#allocation8 + $0x9a0] sm:$0xff] }
 0x62d   :  { %13283 = vmatprep.subr.bf16.mxu1 %v15533_v52  ;;  %v9687_v51 = vld [vmem:[#allocation8 + $0x9e0] sm:$0xff]  ;;  %v9680_v52 = vld [vmem:[#allocation8 + $0x9a8] sm:$0xff] }
 0x62e   :  { %v15627_v56 = vcombine.high %v9679_v20, %v9687_v51  ;;  %v15626_v2 = vcombine.low %v9679_v20, %v9687_v51  ;;  %v15628_v3 = vcombine.low %v9680_v52, %v9688_v53 }
 0x62f   :  { %13138 = vmatpush1.bf16.msra.mxu0 %v15530_v57  ;;  %v15629_v57 = vcombine.high %v9680_v52, %v9688_v53  ;;  %v15675_v52 = vcombine.high %v9727_v32, %v9735_v33 }
 0x630   :  { %13284 = vmatpush1.bf16.msra.mxu1 %v15532_v60  ;;  %13139 = vmatprep.subr.bf16.mxu0 %v15547_v63  ;;  %v9695_v60 = vld [vmem:[#allocation8 + $0xa20] sm:$0xff] }
 0x631   :  { %13285 = vmatprep.subr.bf16.mxu1 %v15549_v0  ;;  %v9703_v63 = vld [vmem:[#allocation8 + $0xa60] sm:$0xff]  ;;  %v9696_v0 = vld [vmem:[#allocation8 + $0xa28] sm:$0xff] }
 0x632   :  { %v15643_v4 = vcombine.high %v9695_v60, %v9703_v63  ;;  %v15642_v24 = vcombine.low %v9695_v60, %v9703_v63  ;;  %v15644_v25 = vcombine.low %v9696_v0, %v9704_v1  ;;  %v9743_v60 = vld [vmem:[#allocation8 + $0xba0] sm:$0xff] }
 0x633   :  { %13140 = vmatpush1.bf16.msra.mxu0 %v15546_v5  ;;  %v9883_v5 = vld [vmem:[#allocation10] sm:$0xff] }
 0x634   :  { %13286 = vmatpush1.bf16.msra.mxu1 %v15548_v6  ;;  %13141 = vmatprep.subr.bf16.mxu0 %v15563_v7  ;;  %v15645_v6 = vcombine.high %v9696_v0, %v9704_v1  ;;  %v9711_v7 = vld [vmem:[#allocation8 + $0xaa0] sm:$0xff] }
 0x635   :  { %13287 = vmatprep.subr.bf16.mxu1 %v15565_v8  ;;  %v9719_v8 = vld [vmem:[#allocation8 + $0xae0] sm:$0xff] }
 0x636   :  { %v15659_v30 = vcombine.high %v9711_v7, %v9719_v8  ;;  %v9751_v63 = vld [vmem:[#allocation8 + $0xbe0] sm:$0xff] }
 0x637   :  { %13142 = vmatpush1.bf16.msra.mxu0 %v15562_v26  ;;  %v18813_v26 = vrot.slane %v9883_v5, %v18643_v10 }
 0x638   :  { %13288 = vmatpush1.bf16.msra.mxu1 %v15564_v27  ;;  %13184 = vmatprep.subr.bf16.mxu0 %v15579_v28  ;;  %v18816_v27 = vrot.slane %v9883_v5, %v18646_v11  ;;  %v18819_v28 = vrot.slane %v9883_v5, %v18649_v13 }
 0x639   :  { %13330 = vmatprep.subr.bf16.mxu1 %v15581_v29  ;;  %v18822_v29 = vrot.slane %v9883_v5, %v18652_v14  ;;  %v9752_v5 = vld [vmem:[#allocation8 + $0xbe8] sm:$0xff] }
 0x63a   :  { %13144 = vmatmul.mubr.bf16.vlgmr.msra.gmra.mrb[48].mxu0 %v18674_v39 }
 0x63b   :  { %13290 = vmatmul.mubr.bf16.vlgmr.msra.gmra.mrb[48].mxu1 %v18674_v39  ;;  %13153 = vmatprep.mubr.bf16.mxu0 %v18702_v21 }
 0x63c   :  { %13185 = vmatpush1.bf16.msra.mxu0 %v15578_v34  ;;  %13299 = vmatprep.mubr.bf16.mxu1 %v18702_v21 }
 0x63d   :  { %13331 = vmatpush1.bf16.msra.mxu1 %v15580_v35  ;;  %13186 = vmatprep.subr.bf16.mxu0 %v15595_v36  ;;  %v15658_v36 = vcombine.low %v9711_v7, %v9719_v8 }
 0x63e   :  { %13332 = vmatprep.subr.bf16.mxu1 %v15597_v37  ;;  %v9728_v37 = vld [vmem:[#allocation8 + $0xb28] sm:$0xff] }
 0x63f   :  { %v15676_v7 = vcombine.low %v9728_v37, %v9736_v38 }
 0x640   :  { %13187 = vmatpush1.bf16.msra.mxu0 %v15594_v16 }
 0x641   :  { %13333 = vmatpush1.bf16.msra.mxu1 %v15596_v47  ;;  %13188 = vmatprep.subr.bf16.mxu0 %v15611_v50  ;;  %v15660_v47 = vcombine.low %v9712_v18, %v9720_v23  ;;  %v15691_v23 = vcombine.high %v9743_v60, %v9751_v63 }
 0x642   :  { %13154 = vmatmul.mubr.bf16.gmra.mrb[52].mxu0 %v18697_v12  ;;  %13334 = vmatprep.subr.bf16.mxu1 %v15613_v19 }
 0x643   :  { %13300 = vmatmul.mubr.bf16.gmra.mrb[52].mxu1 %v18697_v12  ;;  %13163 = vmatprep.mubr.bf16.mxu0 %v18726_v61 }
 0x644   :  { %13189 = vmatpush1.bf16.msra.mxu0 %v15610_v54  ;;  %13309 = vmatprep.mubr.bf16.mxu1 %v18726_v61 }
 0x645   :  { %13335 = vmatpush1.bf16.msra.mxu1 %v15612_v55  ;;  %13190 = vmatprep.subr.bf16.mxu0 %v15627_v56 }
 0x646   :  { %13336 = vmatprep.subr.bf16.mxu1 %v15629_v57  ;;  %v15677_v57 = vcombine.high %v9728_v37, %v9736_v38 }
 0x648   :  { %13191 = vmatpush1.bf16.msra.mxu0 %v15626_v2 }
 0x649   :  { %13337 = vmatpush1.bf16.msra.mxu1 %v15628_v3  ;;  %13192 = vmatprep.subr.bf16.mxu0 %v15643_v4  ;;  %v9744_v4 = vld [vmem:[#allocation8 + $0xba8] sm:$0xff] }
 0x64a   :  { %13164 = vmatmul.mubr.bf16.gmra.mrb[56].mxu0 %v18721_v58  ;;  %13338 = vmatprep.subr.bf16.mxu1 %v15645_v6  ;;  %v15674_v6 = vcombine.low %v9727_v32, %v9735_v33  ;;  %v15690_v33 = vcombine.low %v9743_v60, %v9751_v63 }
 0x64b   :  { %13310 = vmatmul.mubr.bf16.gmra.mrb[56].mxu1 %v18721_v58  ;;  %13173 = vmatprep.mubr.bf16.mxu0 %v18746_v48  ;;  %v12634_v34 = vpop.f32.mrb[16].mxu0  ;;  %v12780_v35 = vpop.f32.mrb[16].mxu1 }
 0x64c   :  { %13193 = vmatpush1.bf16.msra.mxu0 %v15642_v24  ;;  %13319 = vmatprep.mubr.bf16.mxu1 %v18746_v48  ;;  %v15986_v43 = vadd.f32 %v12634_v34, %v18813_v26  ;;  %v16002_v15 = vadd.f32 %v12780_v35, %v18816_v27  ;;  %v12636_v46 = vpop.f32.mrb[17].mxu0  ;;  %v12782_v16 = vpop.f32.mrb[17].mxu1  ;;  %v15693_v24 = vcombine.high %v9744_v4, %v9752_v5  ;;  %v9760_v34 = vld [vmem:[#allocation8 + $0xc28] sm:$0xff] }
 0x64d   :  { %13339 = vmatpush1.bf16.msra.mxu1 %v15644_v25  ;;  %v15987_v50 = vadd.f32 %v12636_v46, %v18819_v28  ;;  %v16003_v19 = vadd.f32 %v12782_v16, %v18822_v29  ;;  %13194 = vmatprep.subr.bf16.mxu0 %v15659_v30  ;;  %v12638_v20 = vpop.f32.mrb[18].mxu0  ;;  %v12784_v51 = vpop.f32.mrb[18].mxu1  ;;  %v9759_v25 = vld [vmem:[#allocation8 + $0xc20] sm:$0xff]  ;;  %v9768_v35 = vld [vmem:[#allocation8 + $0xc68] sm:$0xff] }
 0x64e   :  { %13340 = vmatprep.subr.bf16.mxu1 %v15661_v31  ;;  %v15988_v53 = vadd.f32 %v12638_v20, %v18813_v26  ;;  %v16004_v54 = vadd.f32 %v12784_v51, %v18816_v27  ;;  %v12640_v55 = vpop.f32.mrb[19].mxu0  ;;  %v12786_v56 = vpop.f32.mrb[19].mxu1  ;;  %v9767_v30 = vld [vmem:[#allocation8 + $0xc60] sm:$0xff] }
 0x64f   :  { %v15890_v0 = vpack.c.bf16 %v15987_v50, %v15986_v43  ;;  %v15891_v1 = vpack.c.bf16 %v16003_v19, %v16002_v15  ;;  %v15989_v2 = vadd.f32 %v12640_v55, %v18819_v28  ;;  %v16005_v3 = vadd.f32 %v12786_v56, %v18822_v29  ;;  %v9775_v55 = vld [vmem:[#allocation8 + $0xca0] sm:$0xff] }
 0x650   :  { %13195 = vmatpush1.bf16.msra.mxu0 %v15658_v36  ;;  %v15692_v15 = vcombine.low %v9744_v4, %v9752_v5  ;;  %v15707_v19 = vcombine.high %v9759_v25, %v9767_v30  ;;  %v9783_v56 = vld [vmem:[#allocation8 + $0xce0] sm:$0xff]  ;;  %v15708_v4 = vcombine.low %v9760_v34, %v9768_v35 }
 0x651   :  { %14079 = vst [vmem:[#allocation11] sm:$0xff] %v15890_v0  ;;  %14080 = vst [vmem:[#allocation11 + $0x8] sm:$0xff] %v15891_v1  ;;  %13341 = vmatpush1.bf16.msra.mxu1 %v15660_v47  ;;  %v15898_v8 = vpack.c.bf16 %v15989_v2, %v15988_v53  ;;  %v15899_v18 = vpack.c.bf16 %v16005_v3, %v16004_v54  ;;  %13196 = vmatprep.subr.bf16.mxu0 %v15675_v52  ;;  %v9776_v1 = vld [vmem:[#allocation8 + $0xca8] sm:$0xff] }
 0x652   :  { %13174 = vmatmul.mubr.bf16.gmra.mrb[60].mxu0 %v18742_v44  ;;  %13342 = vmatprep.subr.bf16.mxu1 %v15677_v57  ;;  %v15709_v54 = vcombine.high %v9760_v34, %v9768_v35  ;;  %v9784_v2 = vld [vmem:[#allocation8 + $0xce8] sm:$0xff]  ;;  %v15706_v3 = vcombine.low %v9759_v25, %v9767_v30  ;;  %v15722_v35 = vcombine.low %v9775_v55, %v9783_v56 }
 0x653   :  { %14087 = vst [vmem:[#allocation11 + $0x40] sm:$0xff] %v15898_v8  ;;  %14088 = vst [vmem:[#allocation11 + $0x48] sm:$0xff] %v15899_v18  ;;  %13320 = vmatmul.mubr.bf16.gmra.mrb[60].mxu1 %v18742_v44  ;;  %13216 = vmatprep.mubr.bf16.mxu0 %v18680_v42  ;;  %v12644_v31 = vpop.f32.mrb[20].mxu0  ;;  %v12790_v32 = vpop.f32.mrb[20].mxu1  ;;  %v15725_v8 = vcombine.high %v9776_v1, %v9784_v2  ;;  %v9791_v18 = vld [vmem:[#allocation8 + $0xd20] sm:$0xff] }
 0x654   :  { %13197 = vmatpush1.bf16.msra.mxu0 %v15674_v6  ;;  %13362 = vmatprep.mubr.bf16.mxu1 %v18680_v42  ;;  %v15990_v36 = vadd.f32 %v12644_v31, %v18813_v26  ;;  %v16006_v37 = vadd.f32 %v12790_v32, %v18816_v27  ;;  %v12646_v38 = vpop.f32.mrb[21].mxu0  ;;  %v12792_v43 = vpop.f32.mrb[21].mxu1  ;;  %v9792_v32 = vld [vmem:[#allocation8 + $0xd28] sm:$0xff] }
 0x655   :  { %13343 = vmatpush1.bf16.msra.mxu1 %v15676_v7  ;;  %v15991_v46 = vadd.f32 %v12646_v38, %v18819_v28  ;;  %v16007_v16 = vadd.f32 %v12792_v43, %v18822_v29  ;;  %13198 = vmatprep.subr.bf16.mxu0 %v15691_v23  ;;  %v12648_v47 = vpop.f32.mrb[22].mxu0  ;;  %v12794_v50 = vpop.f32.mrb[22].mxu1  ;;  %v15723_v7 = vcombine.high %v9775_v55, %v9783_v56  ;;  %v9799_v23 = vld [vmem:[#allocation8 + $0xd60] sm:$0xff] }
 0x656   :  { %13344 = vmatprep.subr.bf16.mxu1 %v15693_v24  ;;  %v15992_v20 = vadd.f32 %v12648_v47, %v18813_v26  ;;  %v16008_v51 = vadd.f32 %v12794_v50, %v18816_v27  ;;  %v12650_v52 = vpop.f32.mrb[23].mxu0  ;;  %v12796_v53 = vpop.f32.mrb[23].mxu1 }
 0x657   :  { %v15906_v57 = vpack.c.bf16 %v15991_v46, %v15990_v36  ;;  %v15907_v60 = vpack.c.bf16 %v16007_v16, %v16006_v37  ;;  %v15993_v63 = vadd.f32 %v12650_v52, %v18819_v28  ;;  %v16009_v0 = vadd.f32 %v12796_v53, %v18822_v29  ;;  %v9800_v36 = vld [vmem:[#allocation8 + $0xd68] sm:$0xff]  ;;  %v9807_v52 = vld [vmem:[#allocation8 + $0xda0] sm:$0xff] }
 0x658   :  { %13199 = vmatpush1.bf16.msra.mxu0 %v15690_v33  ;;  %v15724_v37 = vcombine.low %v9776_v1, %v9784_v2  ;;  %v15739_v16 = vcombine.high %v9791_v18, %v9799_v23  ;;  %v9815_v53 = vld [vmem:[#allocation8 + $0xde0] sm:$0xff]  ;;  %v15740_v1 = vcombine.low %v9792_v32, %v9800_v36 }
 0x659   :  { %14095 = vst [vmem:[#allocation11 + $0x80] sm:$0xff] %v15906_v57  ;;  %14096 = vst [vmem:[#allocation11 + $0x88] sm:$0xff] %v15907_v60  ;;  %13345 = vmatpush1.bf16.msra.mxu1 %v15692_v15  ;;  %v15914_v5 = vpack.c.bf16 %v15993_v63, %v15992_v20  ;;  %v15915_v6 = vpack.c.bf16 %v16009_v0, %v16008_v51  ;;  %13200 = vmatprep.subr.bf16.mxu0 %v15707_v19  ;;  %v9808_v60 = vld [vmem:[#allocation8 + $0xda8] sm:$0xff] }
 0x65a   :  { %13346 = vmatprep.subr.bf16.mxu1 %v15709_v54  ;;  %v15741_v51 = vcombine.high %v9792_v32, %v9800_v36  ;;  %v9816_v63 = vld [vmem:[#allocation8 + $0xde8] sm:$0xff]  ;;  %v15738_v0 = vcombine.low %v9791_v18, %v9799_v23 }
 0x65b   :  { %14103 = vst [vmem:[#allocation11 + $0xc0] sm:$0xff] %v15914_v5  ;;  %14104 = vst [vmem:[#allocation11 + $0xc8] sm:$0xff] %v15915_v6  ;;  %v12654_v24 = vpop.f32.mrb[24].mxu0  ;;  %v12800_v31 = vpop.f32.mrb[24].mxu1  ;;  %v15757_v5 = vcombine.high %v9808_v60, %v9816_v63  ;;  %v9823_v6 = vld [vmem:[#allocation8 + $0xe20] sm:$0xff] }
 0x65c   :  { %13201 = vmatpush1.bf16.msra.mxu0 %v15706_v3  ;;  %v15994_v25 = vadd.f32 %v12654_v24, %v18813_v26  ;;  %v16010_v30 = vadd.f32 %v12800_v31, %v18816_v27  ;;  %v12656_v33 = vpop.f32.mrb[25].mxu0  ;;  %v12802_v34 = vpop.f32.mrb[25].mxu1  ;;  %v9824_v31 = vld [vmem:[#allocation8 + $0xe28] sm:$0xff] }
 0x65d   :  { %13347 = vmatpush1.bf16.msra.mxu1 %v15708_v4  ;;  %v15995_v38 = vadd.f32 %v12656_v33, %v18819_v28  ;;  %v16011_v43 = vadd.f32 %v12802_v34, %v18822_v29  ;;  %13202 = vmatprep.subr.bf16.mxu0 %v15723_v7  ;;  %v12658_v15 = vpop.f32.mrb[26].mxu0  ;;  %v12804_v46 = vpop.f32.mrb[26].mxu1  ;;  %v15755_v4 = vcombine.high %v9807_v52, %v9815_v53  ;;  %v9831_v7 = vld [vmem:[#allocation8 + $0xe60] sm:$0xff] }
 0x65e   :  { %13348 = vmatprep.subr.bf16.mxu1 %v15725_v8  ;;  %v15996_v47 = vadd.f32 %v12658_v15, %v18813_v26  ;;  %v16012_v50 = vadd.f32 %v12804_v46, %v18816_v27  ;;  %v12660_v19 = vpop.f32.mrb[27].mxu0  ;;  %v12806_v20 = vpop.f32.mrb[27].mxu1  ;;  %v15756_v33 = vcombine.low %v9808_v60, %v9816_v63 }
 0x65f   :  { %v15922_v54 = vpack.c.bf16 %v15995_v38, %v15994_v25  ;;  %v15923_v55 = vpack.c.bf16 %v16011_v43, %v16010_v30  ;;  %v15997_v56 = vadd.f32 %v12660_v19, %v18819_v28  ;;  %v16013_v57 = vadd.f32 %v12806_v20, %v18822_v29  ;;  %v9832_v25 = vld [vmem:[#allocation8 + $0xe68] sm:$0xff]  ;;  %v9839_v19 = vld [vmem:[#allocation8 + $0xea0] sm:$0xff] }
 0x660   :  { %13203 = vmatpush1.bf16.msra.mxu0 %v15722_v35  ;;  %v15754_v30 = vcombine.low %v9807_v52, %v9815_v53  ;;  %v15771_v43 = vcombine.high %v9823_v6, %v9831_v7  ;;  %v9847_v20 = vld [vmem:[#allocation8 + $0xee0] sm:$0xff]  ;;  %v15772_v60 = vcombine.low %v9824_v31, %v9832_v25 }
 0x661   :  { %14111 = vst [vmem:[#allocation11 + $0x100] sm:$0xff] %v15922_v54  ;;  %14112 = vst [vmem:[#allocation11 + $0x108] sm:$0xff] %v15923_v55  ;;  %13349 = vmatpush1.bf16.msra.mxu1 %v15724_v37  ;;  %v15930_v2 = vpack.c.bf16 %v15997_v56, %v15996_v47  ;;  %v15931_v3 = vpack.c.bf16 %v16013_v57, %v16012_v50  ;;  %13204 = vmatprep.subr.bf16.mxu0 %v15739_v16  ;;  %v9840_v55 = vld [vmem:[#allocation8 + $0xea8] sm:$0xff] }
 0x662   :  { %13350 = vmatprep.subr.bf16.mxu1 %v15741_v51  ;;  %v15773_v50 = vcombine.high %v9824_v31, %v9832_v25  ;;  %v9848_v56 = vld [vmem:[#allocation8 + $0xee8] sm:$0xff]  ;;  %v15770_v57 = vcombine.low %v9823_v6, %v9831_v7  ;;  %v15787_v63 = vcombine.high %v9839_v19, %v9847_v20  ;;  %v9871_v7 = vld [vmem:[#allocation8 + $0xfa0] sm:$0xff] }
 0x663   :  { %14119 = vst [vmem:[#allocation11 + $0x140] sm:$0xff] %v15930_v2  ;;  %14120 = vst [vmem:[#allocation11 + $0x148] sm:$0xff] %v15931_v3  ;;  %v12664_v8 = vpop.f32.mrb[28].mxu0  ;;  %v12810_v24 = vpop.f32.mrb[28].mxu1  ;;  %v9863_v2 = vld [vmem:[#allocation8 + $0xf60] sm:$0xff]  ;;  %v15786_v3 = vcombine.low %v9839_v19, %v9847_v20  ;;  %v9880_v31 = vld [vmem:[#allocation8 + $0xfe8] sm:$0xff] }
 0x664   :  { %13205 = vmatpush1.bf16.msra.mxu0 %v15738_v0  ;;  %v15998_v18 = vadd.f32 %v12664_v8, %v18813_v26  ;;  %v16014_v23 = vadd.f32 %v12810_v24, %v18816_v27  ;;  %v12666_v32 = vpop.f32.mrb[29].mxu0  ;;  %v12812_v36 = vpop.f32.mrb[29].mxu1  ;;  %v15789_v0 = vcombine.high %v9840_v55, %v9848_v56  ;;  %v9879_v8 = vld [vmem:[#allocation8 + $0xfe0] sm:$0xff]  ;;  %v9872_v24 = vld [vmem:[#allocation8 + $0xfa8] sm:$0xff] }
 0x665   :  { %13351 = vmatpush1.bf16.msra.mxu1 %v15740_v1  ;;  %v15999_v34 = vadd.f32 %v12666_v32, %v18819_v28  ;;  %v16015_v35 = vadd.f32 %v12812_v36, %v18822_v29  ;;  %13206 = vmatprep.subr.bf16.mxu0 %v15755_v4  ;;  %v12668_v37 = vpop.f32.mrb[30].mxu0  ;;  %v12814_v38 = vpop.f32.mrb[30].mxu1  ;;  %v9855_v1 = vld [vmem:[#allocation8 + $0xf20] sm:$0xff]  ;;  %v15788_v4 = vcombine.low %v9840_v55, %v9848_v56  ;;  %v9377_v36 = vld [vmem:[#allocation8 + $0x30] sm:$0xff]  ;;  %v9418_v55 = vld [vmem:[#allocation8 + $0x178] sm:$0xff] }
 0x666   :  { %13352 = vmatprep.subr.bf16.mxu1 %v15757_v5  ;;  %v16000_v15 = vadd.f32 %v12668_v37, %v18813_v26  ;;  %v16016_v46 = vadd.f32 %v12814_v38, %v18816_v27  ;;  %v12670_v16 = vpop.f32.mrb[31].mxu0  ;;  %v12816_v47 = vpop.f32.mrb[31].mxu1  ;;  %v15803_v5 = vcombine.high %v9855_v1, %v9863_v2  ;;  %v15802_v25 = vcombine.low %v9855_v1, %v9863_v2  ;;  %v9434_v1 = vld [vmem:[#allocation8 + $0x1f8] sm:$0xff] }
 0x667   :  { %v15938_v51 = vpack.c.bf16 %v15999_v34, %v15998_v18  ;;  %v15939_v52 = vpack.c.bf16 %v16015_v35, %v16014_v23  ;;  %v16001_v53 = vadd.f32 %v12670_v16, %v18819_v28  ;;  %v16017_v54 = vadd.f32 %v12816_v47, %v18822_v29  ;;  %v9856_v28 = vld [vmem:[#allocation8 + $0xf28] sm:$0xff]  ;;  %v9386_v34 = vld [vmem:[#allocation8 + $0x78] sm:$0xff] }
 0x668   :  { %13207 = vmatpush1.bf16.msra.mxu0 %v15754_v30  ;;  %v9864_v29 = vld [vmem:[#allocation8 + $0xf68] sm:$0xff]  ;;  %v15819_v23 = vcombine.high %v9871_v7, %v9879_v8  ;;  %v15821_v32 = vcombine.high %v9872_v24, %v9880_v31  ;;  %v9385_v30 = vld [vmem:[#allocation8 + $0x70] sm:$0xff]  ;;  %v15818_v35 = vcombine.low %v9871_v7, %v9879_v8  ;;  %v15820_v37 = vcombine.low %v9872_v24, %v9880_v31  ;;  %v9394_v16 = vld [vmem:[#allocation8 + $0xb8] sm:$0xff] }
 0x669   :  { %14127 = vst [vmem:[#allocation11 + $0x180] sm:$0xff] %v15938_v51  ;;  %14128 = vst [vmem:[#allocation11 + $0x188] sm:$0xff] %v15939_v52  ;;  %13353 = vmatpush1.bf16.msra.mxu1 %v15756_v33  ;;  %v15946_v26 = vpack.c.bf16 %v16001_v53, %v16000_v15  ;;  %v15947_v27 = vpack.c.bf16 %v16017_v54, %v16016_v46  ;;  %13208 = vmatprep.subr.bf16.mxu0 %v15771_v43  ;;  %v9378_v33 = vld [vmem:[#allocation8 + $0x38] sm:$0xff]  ;;  %v9393_v15 = vld [vmem:[#allocation8 + $0xb0] sm:$0xff] }
 0x66a   :  { %13354 = vmatprep.subr.bf16.mxu1 %v15773_v50  ;;  %v15805_v6 = vcombine.high %v9856_v28, %v9864_v29  ;;  %v15804_v18 = vcombine.low %v9856_v28, %v9864_v29  ;;  %v15327_v38 = vcombine.high %v9377_v36, %v9385_v30  ;;  %v15329_v43 = vcombine.high %v9378_v33, %v9386_v34  ;;  %v9401_v46 = vld [vmem:[#allocation8 + $0xf0] sm:$0xff]  ;;  %v9402_v47 = vld [vmem:[#allocation8 + $0xf8] sm:$0xff] }
 0x66b   :  { %14135 = vst [vmem:[#allocation11 + $0x1c0] sm:$0xff] %v15946_v26  ;;  %14136 = vst [vmem:[#allocation11 + $0x1c8] sm:$0xff] %v15947_v27  ;;  %v15326_v50 = vcombine.low %v9377_v36, %v9385_v30  ;;  %v15328_v19 = vcombine.low %v9378_v33, %v9386_v34  ;;  %v15343_v20 = vcombine.high %v9393_v15, %v9401_v46  ;;  %v9409_v52 = vld [vmem:[#allocation8 + $0x130] sm:$0xff]  ;;  %v9410_v54 = vld [vmem:[#allocation8 + $0x138] sm:$0xff] }
 0x66c   :  { %13209 = vmatpush1.bf16.msra.mxu0 %v15770_v57  ;;  %v15345_v51 = vcombine.high %v9394_v16, %v9402_v47  ;;  %v9417_v53 = vld [vmem:[#allocation8 + $0x170] sm:$0xff]  ;;  %v15342_v56 = vcombine.low %v9393_v15, %v9401_v46  ;;  %v15344_v57 = vcombine.low %v9394_v16, %v9402_v47  ;;  %v15361_v26 = vcombine.high %v9410_v54, %v9418_v55  ;;  %v9450_v7 = vld [vmem:[#allocation8 + $0x278] sm:$0xff] }
 0x66d   :  { %13355 = vmatpush1.bf16.msra.mxu1 %v15772_v60  ;;  %13210 = vmatprep.subr.bf16.mxu0 %v15787_v63  ;;  %v15359_v60 = vcombine.high %v9409_v52, %v9417_v53  ;;  %v9425_v27 = vld [vmem:[#allocation8 + $0x1b0] sm:$0xff]  ;;  %v15358_v2 = vcombine.low %v9409_v52, %v9417_v53  ;;  %v15360_v28 = vcombine.low %v9410_v54, %v9418_v55  ;;  %v9466_v36 = vld [vmem:[#allocation8 + $0x2f8] sm:$0xff] }
 0x66e   :  { %13356 = vmatprep.subr.bf16.mxu1 %v15789_v0  ;;  %v9433_v63 = vld [vmem:[#allocation8 + $0x1f0] sm:$0xff]  ;;  %v9426_v0 = vld [vmem:[#allocation8 + $0x1b8] sm:$0xff] }
 0x66f   :  { %v15375_v29 = vcombine.high %v9425_v27, %v9433_v63  ;;  %v15374_v8 = vcombine.low %v9425_v27, %v9433_v63  ;;  %v15376_v24 = vcombine.low %v9426_v0, %v9434_v1  ;;  %v9482_v15 = vld [vmem:[#allocation8 + $0x378] sm:$0xff] }
 0x670   :  { %13211 = vmatpush1.bf16.msra.mxu0 %v15786_v3  ;;  %v15377_v3 = vcombine.high %v9426_v0, %v9434_v1  ;;  %v9498_v52 = vld [vmem:[#allocation8 + $0x3f8] sm:$0xff] }
 0x671   :  { %13357 = vmatpush1.bf16.msra.mxu1 %v15788_v4  ;;  %13212 = vmatprep.subr.bf16.mxu0 %v15803_v5  ;;  %v9441_v4 = vld [vmem:[#allocation8 + $0x230] sm:$0xff]  ;;  %v9514_v27 = vld [vmem:[#allocation8 + $0x478] sm:$0xff] }
 0x672   :  { %13358 = vmatprep.subr.bf16.mxu1 %v15805_v6  ;;  %v9449_v5 = vld [vmem:[#allocation8 + $0x270] sm:$0xff]  ;;  %v9442_v6 = vld [vmem:[#allocation8 + $0x238] sm:$0xff] }
 0x673   :  { %v15391_v31 = vcombine.high %v9441_v4, %v9449_v5  ;;  %v15390_v30 = vcombine.low %v9441_v4, %v9449_v5  ;;  %v15392_v33 = vcombine.low %v9442_v6, %v9450_v7  ;;  %v9530_v4 = vld [vmem:[#allocation8 + $0x4f8] sm:$0xff] }
 0x674   :  { %13213 = vmatpush1.bf16.msra.mxu0 %v15802_v25  ;;  %v15393_v25 = vcombine.high %v9442_v6, %v9450_v7 }
 0x675   :  { %13359 = vmatpush1.bf16.msra.mxu1 %v15804_v18  ;;  %13214 = vmatprep.subr.bf16.mxu0 %v15819_v23  ;;  %v9457_v18 = vld [vmem:[#allocation8 + $0x2b0] sm:$0xff] }
 0x676   :  { %13360 = vmatprep.subr.bf16.mxu1 %v15821_v32  ;;  %v9465_v23 = vld [vmem:[#allocation8 + $0x2f0] sm:$0xff]  ;;  %v9458_v32 = vld [vmem:[#allocation8 + $0x2b8] sm:$0xff] }
 0x677   :  { %v15407_v34 = vcombine.high %v9457_v18, %v9465_v23  ;;  %v15406_v46 = vcombine.low %v9457_v18, %v9465_v23  ;;  %v15408_v16 = vcombine.low %v9458_v32, %v9466_v36 }
 0x678   :  { %13215 = vmatpush1.bf16.msra.mxu0 %v15818_v35  ;;  %v15409_v35 = vcombine.high %v9458_v32, %v9466_v36 }
 0x679   :  { %13361 = vmatpush1.bf16.msra.mxu1 %v15820_v37  ;;  %13403 = vmatprep.subr.bf16.mxu0 %v15327_v38  ;;  %v9473_v37 = vld [vmem:[#allocation8 + $0x330] sm:$0xff] }
 0x67a   :  { %13549 = vmatprep.subr.bf16.mxu1 %v15329_v43  ;;  %v9481_v38 = vld [vmem:[#allocation8 + $0x370] sm:$0xff]  ;;  %v9474_v43 = vld [vmem:[#allocation8 + $0x338] sm:$0xff] }
 0x67b   :  { %13217 = vmatmul.mubr.bf16.vlgmr.msra.gmra.mrb[48].mxu0 %v18676_v40  ;;  %v15423_v47 = vcombine.high %v9473_v37, %v9481_v38  ;;  %v15422_v53 = vcombine.low %v9473_v37, %v9481_v38  ;;  %v15424_v54 = vcombine.low %v9474_v43, %v9482_v15 }
 0x67c   :  { %13363 = vmatmul.mubr.bf16.vlgmr.msra.gmra.mrb[48].mxu1 %v18676_v40  ;;  %13226 = vmatprep.mubr.bf16.mxu0 %v18704_v22 }
 0x67d   :  { %13372 = vmatprep.mubr.bf16.mxu1 %v18704_v22  ;;  %13404 = vmatpush1.bf16.msra.mxu0 %v15326_v50  ;;  %v15425_v50 = vcombine.high %v9474_v43, %v9482_v15 }
 0x67e   :  { %13550 = vmatpush1.bf16.msra.mxu1 %v15328_v19  ;;  %13405 = vmatprep.subr.bf16.mxu0 %v15343_v20  ;;  %v9489_v19 = vld [vmem:[#allocation8 + $0x3b0] sm:$0xff] }
 0x67f   :  { %13551 = vmatprep.subr.bf16.mxu1 %v15345_v51  ;;  %v9497_v20 = vld [vmem:[#allocation8 + $0x3f0] sm:$0xff]  ;;  %v9490_v51 = vld [vmem:[#allocation8 + $0x3b8] sm:$0xff] }
 0x680   :  { %v15439_v55 = vcombine.high %v9489_v19, %v9497_v20  ;;  %v15438_v63 = vcombine.low %v9489_v19, %v9497_v20  ;;  %v15440_v0 = vcombine.low %v9490_v51, %v9498_v52 }
 0x681   :  { %13406 = vmatpush1.bf16.msra.mxu0 %v15342_v56  ;;  %v15441_v56 = vcombine.high %v9490_v51, %v9498_v52 }
 0x682   :  { %13552 = vmatpush1.bf16.msra.mxu1 %v15344_v57  ;;  %13407 = vmatprep.subr.bf16.mxu0 %v15359_v60  ;;  %v9505_v57 = vld [vmem:[#allocation8 + $0x430] sm:$0xff] }
 0x683   :  { %13227 = vmatmul.mubr.bf16.gmra.mrb[52].mxu0 %v18699_v17  ;;  %13553 = vmatprep.subr.bf16.mxu1 %v15361_v26  ;;  %v9513_v60 = vld [vmem:[#allocation8 + $0x470] sm:$0xff]  ;;  %v9506_v26 = vld [vmem:[#allocation8 + $0x438] sm:$0xff] }
 0x684   :  { %13373 = vmatmul.mubr.bf16.gmra.mrb[52].mxu1 %v18699_v17  ;;  %13236 = vmatprep.mubr.bf16.mxu0 %v18728_v62  ;;  %v15455_v1 = vcombine.high %v9505_v57, %v9513_v60  ;;  %v15454_v5 = vcombine.low %v9505_v57, %v9513_v60  ;;  %v15456_v6 = vcombine.low %v9506_v26, %v9514_v27 }
 0x685   :  { %13382 = vmatprep.mubr.bf16.mxu1 %v18728_v62  ;;  %13408 = vmatpush1.bf16.msra.mxu0 %v15358_v2  ;;  %v15457_v2 = vcombine.high %v9506_v26, %v9514_v27 }
 0x686   :  { %13554 = vmatpush1.bf16.msra.mxu1 %v15360_v28  ;;  %13409 = vmatprep.subr.bf16.mxu0 %v15375_v29  ;;  %v9521_v28 = vld [vmem:[#allocation8 + $0x4b0] sm:$0xff] }
 0x687   :  { %13555 = vmatprep.subr.bf16.mxu1 %v15377_v3  ;;  %v9529_v29 = vld [vmem:[#allocation8 + $0x4f0] sm:$0xff]  ;;  %v9522_v3 = vld [vmem:[#allocation8 + $0x4b8] sm:$0xff] }
 0x688   :  { %v15471_v7 = vcombine.high %v9521_v28, %v9529_v29  ;;  %v15470_v18 = vcombine.low %v9521_v28, %v9529_v29  ;;  %v15472_v23 = vcombine.low %v9522_v3, %v9530_v4 }
 0x689   :  { %13410 = vmatpush1.bf16.msra.mxu0 %v15374_v8  ;;  %v15473_v8 = vcombine.high %v9522_v3, %v9530_v4 }
 0x68a   :  { %13556 = vmatpush1.bf16.msra.mxu1 %v15376_v24  ;;  %13411 = vmatprep.subr.bf16.mxu0 %v15391_v31  ;;  %v9545_v24 = vld [vmem:[#allocation8 + $0x570] sm:$0xff]  ;;  %v9538_v31 = vld [vmem:[#allocation8 + $0x538] sm:$0xff] }
 0x68b   :  { %13237 = vmatmul.mubr.bf16.gmra.mrb[56].mxu0 %v18723_v59  ;;  %13557 = vmatprep.subr.bf16.mxu1 %v15393_v25  ;;  %v9546_v25 = vld [vmem:[#allocation8 + $0x578] sm:$0xff] }
 0x68c   :  { %13383 = vmatmul.mubr.bf16.gmra.mrb[56].mxu1 %v18723_v59  ;;  %13246 = vmatprep.mubr.bf16.mxu0 %v18748_v49  ;;  %v15489_v36 = vcombine.high %v9538_v31, %v9546_v25  ;;  %v15488_v38 = vcombine.low %v9538_v31, %v9546_v25 }
 0x68d   :  { %13392 = vmatprep.mubr.bf16.mxu1 %v18748_v49  ;;  %13412 = vmatpush1.bf16.msra.mxu0 %v15390_v30  ;;  %v9553_v30 = vld [vmem:[#allocation8 + $0x5b0] sm:$0xff] }
 0x68e   :  { %13558 = vmatpush1.bf16.msra.mxu1 %v15392_v33  ;;  %13413 = vmatprep.subr.bf16.mxu0 %v15407_v34  ;;  %v9561_v33 = vld [vmem:[#allocation8 + $0x5f0] sm:$0xff]  ;;  %v9554_v34 = vld [vmem:[#allocation8 + $0x5b8] sm:$0xff] }
 0x68f   :  { %13559 = vmatprep.subr.bf16.mxu1 %v15409_v35  ;;  %v9562_v35 = vld [vmem:[#allocation8 + $0x5f8] sm:$0xff]  ;;  %v15503_v43 = vcombine.high %v9553_v30, %v9561_v33  ;;  %v15502_v19 = vcombine.low %v9553_v30, %v9561_v33 }
 0x690   :  { %v15505_v15 = vcombine.high %v9554_v34, %v9562_v35  ;;  %v15504_v20 = vcombine.low %v9554_v34, %v9562_v35 }
 0x691   :  { %13414 = vmatpush1.bf16.msra.mxu0 %v15406_v46  ;;  %v9569_v46 = vld [vmem:[#allocation8 + $0x630] sm:$0xff] }
 0x692   :  { %13560 = vmatpush1.bf16.msra.mxu1 %v15408_v16  ;;  %13415 = vmatprep.subr.bf16.mxu0 %v15423_v47  ;;  %v9577_v16 = vld [vmem:[#allocation8 + $0x670] sm:$0xff]  ;;  %v9570_v47 = vld [vmem:[#allocation8 + $0x638] sm:$0xff] }
 0x693   :  { %13247 = vmatmul.mubr.bf16.gmra.mrb[60].mxu0 %v18744_v45  ;;  %13561 = vmatprep.subr.bf16.mxu1 %v15425_v50  ;;  %v9578_v50 = vld [vmem:[#allocation8 + $0x678] sm:$0xff]  ;;  %v15519_v51 = vcombine.high %v9569_v46, %v9577_v16  ;;  %v15518_v57 = vcombine.low %v9569_v46, %v9577_v16 }
 0x694   :  { %13393 = vmatmul.mubr.bf16.gmra.mrb[60].mxu1 %v18744_v45  ;;  %13435 = vmatprep.mubr.bf16.mxu0 %v18678_v41  ;;  %v15521_v52 = vcombine.high %v9570_v47, %v9578_v50  ;;  %v15520_v60 = vcombine.low %v9570_v47, %v9578_v50 }
 0x695   :  { %13416 = vmatpush1.bf16.msra.mxu0 %v15422_v53  ;;  %13581 = vmatprep.mubr.bf16.mxu1 %v18678_v41  ;;  %v9537_v41 = vld [vmem:[#allocation8 + $0x530] sm:$0xff] }
 0x696   :  { %13562 = vmatpush1.bf16.msra.mxu1 %v15424_v54  ;;  %13417 = vmatprep.subr.bf16.mxu0 %v15439_v55  ;;  %v15487_v32 = vcombine.high %v9537_v41, %v9545_v24  ;;  %v15486_v37 = vcombine.low %v9537_v41, %v9545_v24  ;;  %v9585_v53 = vld [vmem:[#allocation8 + $0x6b0] sm:$0xff]  ;;  %v9586_v55 = vld [vmem:[#allocation8 + $0x6b8] sm:$0xff] }
 0x697   :  { %13563 = vmatprep.subr.bf16.mxu1 %v15441_v56  ;;  %v9593_v54 = vld [vmem:[#allocation8 + $0x6f0] sm:$0xff]  ;;  %v9594_v56 = vld [vmem:[#allocation8 + $0x6f8] sm:$0xff] }
 0x698   :  { %v15535_v26 = vcombine.high %v9585_v53, %v9593_v54  ;;  %v15537_v27 = vcombine.high %v9586_v55, %v9594_v56  ;;  %v15534_v28 = vcombine.low %v9585_v53, %v9593_v54  ;;  %v15536_v29 = vcombine.low %v9586_v55, %v9594_v56 }
 0x699   :  { %13418 = vmatpush1.bf16.msra.mxu0 %v15438_v63  ;;  %v9601_v63 = vld [vmem:[#allocation8 + $0x730] sm:$0xff] }
 0x69a   :  { %13564 = vmatpush1.bf16.msra.mxu1 %v15440_v0  ;;  %13419 = vmatprep.subr.bf16.mxu0 %v15455_v1  ;;  %v9609_v0 = vld [vmem:[#allocation8 + $0x770] sm:$0xff]  ;;  %v9602_v1 = vld [vmem:[#allocation8 + $0x738] sm:$0xff] }
 0x69b   :  { %13565 = vmatprep.subr.bf16.mxu1 %v15457_v2  ;;  %v9610_v2 = vld [vmem:[#allocation8 + $0x778] sm:$0xff]  ;;  %v15551_v3 = vcombine.high %v9601_v63, %v9609_v0  ;;  %v15550_v41 = vcombine.low %v9601_v63, %v9609_v0 }
 0x69c   :  { %v15553_v4 = vcombine.high %v9602_v1, %v9610_v2  ;;  %v15552_v24 = vcombine.low %v9602_v1, %v9610_v2  ;;  %v9697_v1 = vld [vmem:[#allocation8 + $0xa30] sm:$0xff] }
 0x69d   :  { %13420 = vmatpush1.bf16.msra.mxu0 %v15454_v5  ;;  %v9617_v5 = vld [vmem:[#allocation8 + $0x7b0] sm:$0xff] }
 0x69e   :  { %13566 = vmatpush1.bf16.msra.mxu1 %v15456_v6  ;;  %13421 = vmatprep.subr.bf16.mxu0 %v15471_v7  ;;  %v9625_v6 = vld [vmem:[#allocation8 + $0x7f0] sm:$0xff]  ;;  %v9618_v7 = vld [vmem:[#allocation8 + $0x7b8] sm:$0xff] }
 0x69f   :  { %13567 = vmatprep.subr.bf16.mxu1 %v15473_v8  ;;  %v9626_v8 = vld [vmem:[#allocation8 + $0x7f8] sm:$0xff]  ;;  %v15567_v31 = vcombine.high %v9617_v5, %v9625_v6  ;;  %v15566_v30 = vcombine.low %v9617_v5, %v9625_v6  ;;  %v9705_v2 = vld [vmem:[#allocation8 + $0xa70] sm:$0xff]  ;;  %v9913_v5 = vsub.s32 6, %v18640_v9  ;;  %v9909_v6 = vsub.s32 5, %v18640_v9 }
 0x6a0   :  { %v15569_v25 = vcombine.high %v9618_v7, %v9626_v8  ;;  %v15568_v33 = vcombine.low %v9618_v7, %v9626_v8  ;;  %v15647_v8 = vcombine.high %v9697_v1, %v9705_v2 }
 0x6a1   :  { %13422 = vmatpush1.bf16.msra.mxu0 %v15470_v18  ;;  %v9633_v18 = vld [vmem:[#allocation8 + $0x830] sm:$0xff] }
 0x6a2   :  { %13568 = vmatpush1.bf16.msra.mxu1 %v15472_v23  ;;  %13423 = vmatprep.subr.bf16.mxu0 %v15487_v32  ;;  %v9641_v23 = vld [vmem:[#allocation8 + $0x870] sm:$0xff]  ;;  %v9634_v32 = vld [vmem:[#allocation8 + $0x838] sm:$0xff] }
 0x6a3   :  { %13569 = vmatprep.subr.bf16.mxu1 %v15489_v36  ;;  %v9642_v36 = vld [vmem:[#allocation8 + $0x878] sm:$0xff]  ;;  %v15583_v34 = vcombine.high %v9633_v18, %v9641_v23  ;;  %v15582_v46 = vcombine.low %v9633_v18, %v9641_v23 }
 0x6a4   :  { %v15585_v35 = vcombine.high %v9634_v32, %v9642_v36  ;;  %v15584_v16 = vcombine.low %v9634_v32, %v9642_v36  ;;  %v9722_v23 = vld [vmem:[#allocation8 + $0xaf8] sm:$0xff]  ;;  %v15646_v32 = vcombine.low %v9697_v1, %v9705_v2  ;;  %v9753_v1 = vld [vmem:[#allocation8 + $0xbf0] sm:$0xff] }
 0x6a5   :  { %13424 = vmatpush1.bf16.msra.mxu0 %v15486_v37  ;;  %v9649_v37 = vld [vmem:[#allocation8 + $0x8b0] sm:$0xff] }
 0x6a6   :  { %13570 = vmatpush1.bf16.msra.mxu1 %v15488_v38  ;;  %13425 = vmatprep.subr.bf16.mxu0 %v15503_v43  ;;  %v9657_v38 = vld [vmem:[#allocation8 + $0x8f0] sm:$0xff]  ;;  %v9650_v43 = vld [vmem:[#allocation8 + $0x8b8] sm:$0xff] }
 0x6a7   :  { %13571 = vmatprep.subr.bf16.mxu1 %v15505_v15  ;;  %v9658_v15 = vld [vmem:[#allocation8 + $0x8f8] sm:$0xff]  ;;  %v15599_v47 = vcombine.high %v9649_v37, %v9657_v38  ;;  %v15598_v53 = vcombine.low %v9649_v37, %v9657_v38 }
 0x6a8   :  { %v15601_v50 = vcombine.high %v9650_v43, %v9658_v15  ;;  %v15600_v54 = vcombine.low %v9650_v43, %v9658_v15  ;;  %v9729_v43 = vld [vmem:[#allocation8 + $0xb30] sm:$0xff] }
 0x6a9   :  { %13426 = vmatpush1.bf16.msra.mxu0 %v15502_v19  ;;  %v9665_v19 = vld [vmem:[#allocation8 + $0x930] sm:$0xff] }
 0x6aa   :  { %13572 = vmatpush1.bf16.msra.mxu1 %v15504_v20  ;;  %13427 = vmatprep.subr.bf16.mxu0 %v15519_v51  ;;  %v9673_v20 = vld [vmem:[#allocation8 + $0x970] sm:$0xff]  ;;  %v9666_v51 = vld [vmem:[#allocation8 + $0x938] sm:$0xff] }
 0x6ab   :  { %13573 = vmatprep.subr.bf16.mxu1 %v15521_v52  ;;  %v9674_v52 = vld [vmem:[#allocation8 + $0x978] sm:$0xff]  ;;  %v15615_v55 = vcombine.high %v9665_v19, %v9673_v20  ;;  %v9737_v15 = vld [vmem:[#allocation8 + $0xb70] sm:$0xff] }
 0x6ac   :  { %v15617_v56 = vcombine.high %v9666_v51, %v9674_v52  ;;  %v15616_v63 = vcombine.low %v9666_v51, %v9674_v52 }
 0x6ad   :  { %13428 = vmatpush1.bf16.msra.mxu0 %v15518_v57  ;;  %v9681_v57 = vld [vmem:[#allocation8 + $0x9b0] sm:$0xff] }
 0x6ae   :  { %13574 = vmatpush1.bf16.msra.mxu1 %v15520_v60  ;;  %13429 = vmatprep.subr.bf16.mxu0 %v15535_v26  ;;  %v9689_v60 = vld [vmem:[#allocation8 + $0x9f0] sm:$0xff]  ;;  %v9682_v26 = vld [vmem:[#allocation8 + $0x9b8] sm:$0xff] }
 0x6af   :  { %13575 = vmatprep.subr.bf16.mxu1 %v15537_v27  ;;  %v9690_v27 = vld [vmem:[#allocation8 + $0x9f8] sm:$0xff]  ;;  %v15631_v0 = vcombine.high %v9681_v57, %v9689_v60 }
 0x6b0   :  { %v15632_v7 = vcombine.low %v9682_v26, %v9690_v27 }
 0x6b1   :  { %13430 = vmatpush1.bf16.msra.mxu0 %v15534_v28  ;;  %v9698_v28 = vld [vmem:[#allocation8 + $0xa38] sm:$0xff] }
 0x6b2   :  { %13576 = vmatpush1.bf16.msra.mxu1 %v15536_v29  ;;  %13431 = vmatprep.subr.bf16.mxu0 %v15551_v3  ;;  %v9706_v29 = vld [vmem:[#allocation8 + $0xa78] sm:$0xff]  ;;  %v9905_v3 = vsub.s32 4, %v18640_v9 }
 0x6b3   :  { %13577 = vmatprep.subr.bf16.mxu1 %v15553_v4  ;;  %v15630_v4 = vcombine.low %v9681_v57, %v9689_v60 }
 0x6b5   :  { %13432 = vmatpush1.bf16.msra.mxu0 %v15550_v41  ;;  %v15649_v41 = vcombine.high %v9698_v28, %v9706_v29 }
 0x6b6   :  { %13578 = vmatpush1.bf16.msra.mxu1 %v15552_v24  ;;  %13433 = vmatprep.subr.bf16.mxu0 %v15567_v31  ;;  %v9713_v24 = vld [vmem:[#allocation8 + $0xab0] sm:$0xff] }
 0x6b7   :  { %13579 = vmatprep.subr.bf16.mxu1 %v15569_v25  ;;  %v9721_v31 = vld [vmem:[#allocation8 + $0xaf0] sm:$0xff]  ;;  %v18270_v25 = vld [vmem:[#allocation10] sm:$0xff] }
 0x6b8   :  { %v18894_v18 = vrot.slane %v18270_v25, %v9905_v3  ;;  %v18898_v36 = vrot.slane %v18270_v25, %v9913_v5 }
 0x6b9   :  { %13434 = vmatpush1.bf16.msra.mxu0 %v15566_v30  ;;  %v18902_v30 = vrot.slane %v18270_v25, %v9909_v6 }
 0x6ba   :  { %13580 = vmatpush1.bf16.msra.mxu1 %v15568_v33  ;;  %13476 = vmatprep.subr.bf16.mxu0 %v15583_v34  ;;  %v15648_v33 = vcombine.low %v9698_v28, %v9706_v29  ;;  %v9746_v29 = vld [vmem:[#allocation8 + $0xbb8] sm:$0xff] }
 0x6bb   :  { %13622 = vmatprep.subr.bf16.mxu1 %v15585_v35  ;;  %v15663_v35 = vcombine.high %v9713_v24, %v9721_v31 }
 0x6bc   :  { %13436 = vmatmul.mubr.bf16.vlgmr.msra.gmra.mrb[64].mxu0 %v18674_v39 }
 0x6bd   :  { %13582 = vmatmul.mubr.bf16.vlgmr.msra.gmra.mrb[64].mxu1 %v18674_v39  ;;  %13445 = vmatprep.mubr.bf16.mxu0 %v18702_v21  ;;  %v15614_v39 = vcombine.low %v9665_v19, %v9673_v20  ;;  %v9730_v19 = vld [vmem:[#allocation8 + $0xb38] sm:$0xff] }
 0x6be   :  { %13477 = vmatpush1.bf16.msra.mxu0 %v15582_v46  ;;  %13591 = vmatprep.mubr.bf16.mxu1 %v18702_v21  ;;  %v15633_v21 = vcombine.high %v9682_v26, %v9690_v27  ;;  %v9738_v20 = vld [vmem:[#allocation8 + $0xb78] sm:$0xff]  ;;  %v15679_v26 = vcombine.high %v9729_v43, %v9737_v15 }
 0x6bf   :  { %13623 = vmatpush1.bf16.msra.mxu1 %v15584_v16  ;;  %13478 = vmatprep.subr.bf16.mxu0 %v15599_v47 }
 0x6c0   :  { %13624 = vmatprep.subr.bf16.mxu1 %v15601_v50  ;;  %v15662_v50 = vcombine.low %v9713_v24, %v9721_v31  ;;  %v15680_v24 = vcombine.low %v9730_v19, %v9738_v20 }
 0x6c2   :  { %13479 = vmatpush1.bf16.msra.mxu0 %v15598_v53 }
 0x6c3   :  { %13625 = vmatpush1.bf16.msra.mxu1 %v15600_v54  ;;  %13480 = vmatprep.subr.bf16.mxu0 %v15615_v55 }
 0x6c4   :  { %13446 = vmatmul.mubr.bf16.gmra.mrb[68].mxu0 %v18697_v12  ;;  %13626 = vmatprep.subr.bf16.mxu1 %v15617_v56 }
 0x6c5   :  { %13592 = vmatmul.mubr.bf16.gmra.mrb[68].mxu1 %v18697_v12  ;;  %13455 = vmatprep.mubr.bf16.mxu0 %v18726_v61  ;;  %v9917_v12 = vsub.s32 7, %v18640_v9 }
 0x6c6   :  { %13481 = vmatpush1.bf16.msra.mxu0 %v15614_v39  ;;  %13601 = vmatprep.mubr.bf16.mxu1 %v18726_v61  ;;  %v9714_v61 = vld [vmem:[#allocation8 + $0xab8] sm:$0xff] }
 0x6c7   :  { %13627 = vmatpush1.bf16.msra.mxu1 %v15616_v63  ;;  %13482 = vmatprep.subr.bf16.mxu0 %v15631_v0  ;;  %v18906_v34 = vrot.slane %v18270_v25, %v9917_v12  ;;  %v15665_v38 = vcombine.high %v9714_v61, %v9722_v23  ;;  %v15664_v54 = vcombine.low %v9714_v61, %v9722_v23  ;;  %v9761_v23 = vld [vmem:[#allocation8 + $0xc30] sm:$0xff] }
 0x6c8   :  { %13628 = vmatprep.subr.bf16.mxu1 %v15633_v21  ;;  %v15681_v0 = vcombine.high %v9730_v19, %v9738_v20  ;;  %v9745_v21 = vld [vmem:[#allocation8 + $0xbb0] sm:$0xff] }
 0x6c9   :  { %v15695_v31 = vcombine.high %v9745_v21, %v9753_v1 }
 0x6ca   :  { %13483 = vmatpush1.bf16.msra.mxu0 %v15630_v4  ;;  %v9754_v4 = vld [vmem:[#allocation8 + $0xbf8] sm:$0xff] }
 0x6cb   :  { %13629 = vmatpush1.bf16.msra.mxu1 %v15632_v7  ;;  %13484 = vmatprep.subr.bf16.mxu0 %v15647_v8  ;;  %v15678_v8 = vcombine.low %v9729_v43, %v9737_v15  ;;  %v15697_v61 = vcombine.high %v9746_v29, %v9754_v4  ;;  %v9762_v43 = vld [vmem:[#allocation8 + $0xc38] sm:$0xff] }
 0x6cc   :  { %13456 = vmatmul.mubr.bf16.gmra.mrb[72].mxu0 %v18721_v58  ;;  %13630 = vmatprep.subr.bf16.mxu1 %v15649_v41  ;;  %v12926_v37 = vpop.f32.mrb[32].mxu0  ;;  %v9770_v15 = vld [vmem:[#allocation8 + $0xc78] sm:$0xff] }
 0x6cd   :  { %13602 = vmatmul.mubr.bf16.gmra.mrb[72].mxu1 %v18721_v58  ;;  %13465 = vmatprep.mubr.bf16.mxu0 %v18746_v48  ;;  %v16018_v46 = vadd.f32 %v12926_v37, %v18894_v18  ;;  %v13072_v16 = vpop.f32.mrb[32].mxu1  ;;  %v12928_v47 = vpop.f32.mrb[33].mxu0 }
 0x6ce   :  { %13485 = vmatpush1.bf16.msra.mxu0 %v15646_v32  ;;  %13611 = vmatprep.mubr.bf16.mxu1 %v18746_v48  ;;  %v16034_v51 = vadd.f32 %v13072_v16, %v18898_v36  ;;  %v16019_v52 = vadd.f32 %v12928_v47, %v18902_v30  ;;  %v13074_v53 = vpop.f32.mrb[33].mxu1  ;;  %v12930_v55 = vpop.f32.mrb[34].mxu0  ;;  %v9769_v32 = vld [vmem:[#allocation8 + $0xc70] sm:$0xff] }
 0x6cf   :  { %13631 = vmatpush1.bf16.msra.mxu1 %v15648_v33  ;;  %v16035_v58 = vadd.f32 %v13074_v53, %v18906_v34  ;;  %13486 = vmatprep.subr.bf16.mxu0 %v15663_v35  ;;  %v16020_v56 = vadd.f32 %v12930_v55, %v18894_v18  ;;  %v13076_v57 = vpop.f32.mrb[34].mxu1  ;;  %v12932_v60 = vpop.f32.mrb[35].mxu0  ;;  %v15711_v53 = vcombine.high %v9761_v23, %v9769_v32 }
 0x6d0   :  { %v15892_v27 = vpack.c.bf16 %v16019_v52, %v16018_v46  ;;  %13632 = vmatprep.subr.bf16.mxu1 %v15665_v38  ;;  %v16036_v48 = vadd.f32 %v13076_v57, %v18898_v36  ;;  %v16021_v39 = vadd.f32 %v12932_v60, %v18902_v30  ;;  %v13078_v63 = vpop.f32.mrb[35].mxu1  ;;  %v15694_v38 = vcombine.low %v9745_v21, %v9753_v1  ;;  %v9777_v57 = vld [vmem:[#allocation8 + $0xcb0] sm:$0xff] }
 0x6d1   :  { %v15893_v2 = vpack.c.bf16 %v16035_v58, %v16034_v51  ;;  %v16037_v28 = vadd.f32 %v13078_v63, %v18906_v34  ;;  %v9785_v60 = vld [vmem:[#allocation8 + $0xcf0] sm:$0xff]  ;;  %v15712_v1 = vcombine.low %v9762_v43, %v9770_v15 }
 0x6d2   :  { %14081 = vst [vmem:[#allocation11 + $0x10] sm:$0xff] %v15892_v27  ;;  %13487 = vmatpush1.bf16.msra.mxu0 %v15662_v50  ;;  %v15900_v7 = vpack.c.bf16 %v16021_v39, %v16020_v56  ;;  %v15696_v50 = vcombine.low %v9746_v29, %v9754_v4  ;;  %v15713_v56 = vcombine.high %v9762_v43, %v9770_v15  ;;  %v9786_v39 = vld [vmem:[#allocation8 + $0xcf8] sm:$0xff]  ;;  %v9793_v4 = vld [vmem:[#allocation8 + $0xd30] sm:$0xff] }
 0x6d3   :  { %14082 = vst [vmem:[#allocation11 + $0x18] sm:$0xff] %v15893_v2  ;;  %13633 = vmatpush1.bf16.msra.mxu1 %v15664_v54  ;;  %v15901_v41 = vpack.c.bf16 %v16037_v28, %v16036_v48  ;;  %13488 = vmatprep.subr.bf16.mxu0 %v15679_v26  ;;  %v9778_v48 = vld [vmem:[#allocation8 + $0xcb8] sm:$0xff]  ;;  %v15727_v2 = vcombine.high %v9777_v57, %v9785_v60 }
 0x6d4   :  { %14089 = vst [vmem:[#allocation11 + $0x50] sm:$0xff] %v15900_v7  ;;  %13466 = vmatmul.mubr.bf16.gmra.mrb[76].mxu0 %v18742_v44  ;;  %13634 = vmatprep.subr.bf16.mxu1 %v15681_v0  ;;  %v12936_v25 = vpop.f32.mrb[36].mxu0  ;;  %v15710_v0 = vcombine.low %v9761_v23, %v9769_v32  ;;  %v15729_v29 = vcombine.high %v9778_v48, %v9786_v39  ;;  %v9801_v7 = vld [vmem:[#allocation8 + $0xd70] sm:$0xff] }
 0x6d5   :  { %14090 = vst [vmem:[#allocation11 + $0x58] sm:$0xff] %v15901_v41  ;;  %13612 = vmatmul.mubr.bf16.gmra.mrb[76].mxu1 %v18742_v44  ;;  %13508 = vmatprep.mubr.bf16.mxu0 %v18680_v42  ;;  %v16022_v33 = vadd.f32 %v12936_v25, %v18894_v18  ;;  %v13082_v35 = vpop.f32.mrb[36].mxu1  ;;  %v12938_v37 = vpop.f32.mrb[37].mxu0  ;;  %v9802_v25 = vld [vmem:[#allocation8 + $0xd78] sm:$0xff] }
 0x6d6   :  { %13489 = vmatpush1.bf16.msra.mxu0 %v15678_v8  ;;  %13654 = vmatprep.mubr.bf16.mxu1 %v18680_v42  ;;  %v16038_v46 = vadd.f32 %v13082_v35, %v18898_v36  ;;  %v16023_v16 = vadd.f32 %v12938_v37, %v18902_v30  ;;  %v13084_v47 = vpop.f32.mrb[37].mxu1  ;;  %v12940_v19 = vpop.f32.mrb[38].mxu0  ;;  %v15728_v35 = vcombine.low %v9778_v48, %v9786_v39  ;;  %v9825_v39 = vld [vmem:[#allocation8 + $0xe30] sm:$0xff] }
 0x6d7   :  { %13635 = vmatpush1.bf16.msra.mxu1 %v15680_v24  ;;  %v16039_v44 = vadd.f32 %v13084_v47, %v18906_v34  ;;  %13490 = vmatprep.subr.bf16.mxu0 %v15695_v31  ;;  %v16024_v20 = vadd.f32 %v12940_v19, %v18894_v18  ;;  %v13086_v51 = vpop.f32.mrb[38].mxu1  ;;  %v12942_v52 = vpop.f32.mrb[39].mxu0  ;;  %v9794_v31 = vld [vmem:[#allocation8 + $0xd38] sm:$0xff] }
 0x6d8   :  { %v15908_v54 = vpack.c.bf16 %v16023_v16, %v16022_v33  ;;  %13636 = vmatprep.subr.bf16.mxu1 %v15697_v61  ;;  %v16040_v42 = vadd.f32 %v13086_v51, %v18898_v36  ;;  %v16025_v55 = vadd.f32 %v12942_v52, %v18902_v30  ;;  %v13088_v58 = vpop.f32.mrb[39].mxu1  ;;  %v15726_v33 = vcombine.low %v9777_v57, %v9785_v60  ;;  %v9809_v51 = vld [vmem:[#allocation8 + $0xdb0] sm:$0xff] }
 0x6d9   :  { %v15909_v26 = vpack.c.bf16 %v16039_v44, %v16038_v46  ;;  %v16041_v27 = vadd.f32 %v13088_v58, %v18906_v34  ;;  %v15743_v16 = vcombine.high %v9793_v4, %v9801_v7  ;;  %v9817_v52 = vld [vmem:[#allocation8 + $0xdf0] sm:$0xff]  ;;  %v15744_v60 = vcombine.low %v9794_v31, %v9802_v25 }
 0x6da   :  { %14097 = vst [vmem:[#allocation11 + $0x90] sm:$0xff] %v15908_v54  ;;  %13491 = vmatpush1.bf16.msra.mxu0 %v15694_v38  ;;  %v15916_v63 = vpack.c.bf16 %v16025_v55, %v16024_v20  ;;  %v15745_v20 = vcombine.high %v9794_v31, %v9802_v25  ;;  %v9818_v55 = vld [vmem:[#allocation8 + $0xdf8] sm:$0xff] }
 0x6db   :  { %14098 = vst [vmem:[#allocation11 + $0x98] sm:$0xff] %v15909_v26  ;;  %13637 = vmatpush1.bf16.msra.mxu1 %v15696_v50  ;;  %v15917_v21 = vpack.c.bf16 %v16041_v27, %v16040_v42  ;;  %13492 = vmatprep.subr.bf16.mxu0 %v15711_v53  ;;  %v9810_v42 = vld [vmem:[#allocation8 + $0xdb8] sm:$0xff]  ;;  %v15759_v26 = vcombine.high %v9809_v51, %v9817_v52 }
 0x6dc   :  { %14105 = vst [vmem:[#allocation11 + $0xd0] sm:$0xff] %v15916_v63  ;;  %13638 = vmatprep.subr.bf16.mxu1 %v15713_v56  ;;  %v12946_v28 = vpop.f32.mrb[40].mxu0  ;;  %v15742_v56 = vcombine.low %v9793_v4, %v9801_v7  ;;  %v15761_v48 = vcombine.high %v9810_v42, %v9818_v55  ;;  %v9833_v63 = vld [vmem:[#allocation8 + $0xe70] sm:$0xff] }
 0x6dd   :  { %14106 = vst [vmem:[#allocation11 + $0xd8] sm:$0xff] %v15917_v21  ;;  %v16026_v8 = vadd.f32 %v12946_v28, %v18894_v18  ;;  %v13092_v41 = vpop.f32.mrb[40].mxu1  ;;  %v12948_v24 = vpop.f32.mrb[41].mxu0  ;;  %v9834_v28 = vld [vmem:[#allocation8 + $0xe78] sm:$0xff] }
 0x6de   :  { %13493 = vmatpush1.bf16.msra.mxu0 %v15710_v0  ;;  %v16042_v61 = vadd.f32 %v13092_v41, %v18898_v36  ;;  %v16027_v23 = vadd.f32 %v12948_v24, %v18902_v30  ;;  %v13094_v32 = vpop.f32.mrb[41].mxu1  ;;  %v12950_v37 = vpop.f32.mrb[42].mxu0  ;;  %v15760_v41 = vcombine.low %v9810_v42, %v9818_v55 }
 0x6df   :  { %13639 = vmatpush1.bf16.msra.mxu1 %v15712_v1  ;;  %v16043_v38 = vadd.f32 %v13094_v32, %v18906_v34  ;;  %13494 = vmatprep.subr.bf16.mxu0 %v15727_v2  ;;  %v16028_v43 = vadd.f32 %v12950_v37, %v18894_v18  ;;  %v13096_v15 = vpop.f32.mrb[42].mxu1  ;;  %v12952_v46 = vpop.f32.mrb[43].mxu0  ;;  %v9826_v2 = vld [vmem:[#allocation8 + $0xe38] sm:$0xff]  ;;  %v15775_v32 = vcombine.high %v9825_v39, %v9833_v63 }
 0x6e0   :  { %v15924_v47 = vpack.c.bf16 %v16027_v23, %v16026_v8  ;;  %13640 = vmatprep.subr.bf16.mxu1 %v15729_v29  ;;  %v16044_v50 = vadd.f32 %v13096_v15, %v18898_v36  ;;  %v16029_v19 = vadd.f32 %v12952_v46, %v18902_v30  ;;  %v13098_v44 = vpop.f32.mrb[43].mxu1  ;;  %v15758_v8 = vcombine.low %v9809_v51, %v9817_v52  ;;  %v9841_v15 = vld [vmem:[#allocation8 + $0xeb0] sm:$0xff] }
 0x6e1   :  { %v15925_v53 = vpack.c.bf16 %v16043_v38, %v16042_v61  ;;  %v16045_v54 = vadd.f32 %v13098_v44, %v18906_v34  ;;  %v9849_v46 = vld [vmem:[#allocation8 + $0xef0] sm:$0xff]  ;;  %v15774_v44 = vcombine.low %v9825_v39, %v9833_v63 }
 0x6e2   :  { %14113 = vst [vmem:[#allocation11 + $0x110] sm:$0xff] %v15924_v47  ;;  %13495 = vmatpush1.bf16.msra.mxu0 %v15726_v33  ;;  %v15932_v58 = vpack.c.bf16 %v16029_v19, %v16028_v43  ;;  %v15777_v43 = vcombine.high %v9826_v2, %v9834_v28  ;;  %v9850_v19 = vld [vmem:[#allocation8 + $0xef8] sm:$0xff]  ;;  %v15791_v51 = vcombine.high %v9841_v15, %v9849_v46  ;;  %v9857_v52 = vld [vmem:[#allocation8 + $0xf30] sm:$0xff] }
 0x6e3   :  { %14114 = vst [vmem:[#allocation11 + $0x118] sm:$0xff] %v15925_v53  ;;  %13641 = vmatpush1.bf16.msra.mxu1 %v15728_v35  ;;  %v15933_v57 = vpack.c.bf16 %v16045_v54, %v16044_v50  ;;  %13496 = vmatprep.subr.bf16.mxu0 %v15743_v16  ;;  %v9842_v50 = vld [vmem:[#allocation8 + $0xeb8] sm:$0xff]  ;;  %v9865_v53 = vld [vmem:[#allocation8 + $0xf70] sm:$0xff]  ;;  %v15790_v42 = vcombine.low %v9841_v15, %v9849_v46 }
 0x6e4   :  { %14121 = vst [vmem:[#allocation11 + $0x150] sm:$0xff] %v15932_v58  ;;  %13642 = vmatprep.subr.bf16.mxu1 %v15745_v20  ;;  %v12956_v27 = vpop.f32.mrb[44].mxu0  ;;  %v9858_v54 = vld [vmem:[#allocation8 + $0xf38] sm:$0xff]  ;;  %v15792_v55 = vcombine.low %v9842_v50, %v9850_v19  ;;  %v15807_v58 = vcombine.high %v9857_v52, %v9865_v53 }
 0x6e5   :  { %14122 = vst [vmem:[#allocation11 + $0x158] sm:$0xff] %v15933_v57  ;;  %v16030_v0 = vadd.f32 %v12956_v27, %v18894_v18  ;;  %v13102_v21 = vpop.f32.mrb[44].mxu1  ;;  %v12958_v1 = vpop.f32.mrb[45].mxu0  ;;  %v9873_v57 = vld [vmem:[#allocation8 + $0xfb0] sm:$0xff]  ;;  %v9882_v27 = vld [vmem:[#allocation8 + $0xff8] sm:$0xff] }
 0x6e6   :  { %13497 = vmatpush1.bf16.msra.mxu0 %v15742_v56  ;;  %v16046_v29 = vadd.f32 %v13102_v21, %v18898_v36  ;;  %v16031_v4 = vadd.f32 %v12958_v1, %v18902_v30  ;;  %v13104_v7 = vpop.f32.mrb[45].mxu1  ;;  %v12960_v24 = vpop.f32.mrb[46].mxu0 }
 0x6e7   :  { %13643 = vmatpush1.bf16.msra.mxu1 %v15744_v60  ;;  %v16047_v31 = vadd.f32 %v13104_v7, %v18906_v34  ;;  %13498 = vmatprep.subr.bf16.mxu0 %v15759_v26  ;;  %v16032_v25 = vadd.f32 %v12960_v24, %v18894_v18  ;;  %v13106_v61 = vpop.f32.mrb[46].mxu1  ;;  %v12962_v23 = vpop.f32.mrb[47].mxu0  ;;  %v9881_v60 = vld [vmem:[#allocation8 + $0xff0] sm:$0xff]  ;;  %v9874_v26 = vld [vmem:[#allocation8 + $0xfb8] sm:$0xff] }
 0x6e8   :  { %v15940_v33 = vpack.c.bf16 %v16031_v4, %v16030_v0  ;;  %13644 = vmatprep.subr.bf16.mxu1 %v15761_v48  ;;  %v16048_v35 = vadd.f32 %v13106_v61, %v18898_v36  ;;  %v16033_v37 = vadd.f32 %v12962_v23, %v18902_v30  ;;  %v13108_v38 = vpop.f32.mrb[47].mxu1  ;;  %v15776_v36 = vcombine.low %v9826_v2, %v9834_v28 }
 0x6e9   :  { %v15941_v16 = vpack.c.bf16 %v16047_v31, %v16046_v29  ;;  %v16049_v47 = vadd.f32 %v13108_v38, %v18906_v34  ;;  %v15793_v30 = vcombine.high %v9842_v50, %v9850_v19  ;;  %v9866_v34 = vld [vmem:[#allocation8 + $0xf78] sm:$0xff]  ;;  %v15806_v48 = vcombine.low %v9857_v52, %v9865_v53 }
 0x6ea   :  { %14129 = vst [vmem:[#allocation11 + $0x190] sm:$0xff] %v15940_v33  ;;  %13499 = vmatpush1.bf16.msra.mxu0 %v15758_v8  ;;  %v15948_v18 = vpack.c.bf16 %v16033_v37, %v16032_v25  ;;  %v15809_v56 = vcombine.high %v9858_v54, %v9866_v34  ;;  %v15808_v39 = vcombine.low %v9858_v54, %v9866_v34 }
 0x6eb   :  { %14130 = vst [vmem:[#allocation11 + $0x198] sm:$0xff] %v15941_v16  ;;  %13645 = vmatpush1.bf16.msra.mxu1 %v15760_v41  ;;  %v15949_v20 = vpack.c.bf16 %v16049_v47, %v16048_v35  ;;  %13500 = vmatprep.subr.bf16.mxu0 %v15775_v32  ;;  %v15823_v63 = vcombine.high %v9873_v57, %v9881_v60 }
 0x6ec   :  { %14137 = vst [vmem:[#allocation11 + $0x1d0] sm:$0xff] %v15948_v18  ;;  %13646 = vmatprep.subr.bf16.mxu1 %v15777_v43  ;;  %v15825_v0 = vcombine.high %v9874_v26, %v9882_v27  ;;  %v15822_v21 = vcombine.low %v9873_v57, %v9881_v60  ;;  %v15824_v1 = vcombine.low %v9874_v26, %v9882_v27 }
 0x6ed   :  { %14138 = vst [vmem:[#allocation11 + $0x1d8] sm:$0xff] %v15949_v20 }
 0x6ee   :  { %13501 = vmatpush1.bf16.msra.mxu0 %v15774_v44 }
 0x6ef   :  { %13647 = vmatpush1.bf16.msra.mxu1 %v15776_v36  ;;  %13502 = vmatprep.subr.bf16.mxu0 %v15791_v51 }
 0x6f0   :  { %13648 = vmatprep.subr.bf16.mxu1 %v15793_v30 }
 0x6f2   :  { %13503 = vmatpush1.bf16.msra.mxu0 %v15790_v42 }
 0x6f3   :  { %13649 = vmatpush1.bf16.msra.mxu1 %v15792_v55  ;;  %13504 = vmatprep.subr.bf16.mxu0 %v15807_v58 }
 0x6f4   :  { %13650 = vmatprep.subr.bf16.mxu1 %v15809_v56 }
 0x6f6   :  { %13505 = vmatpush1.bf16.msra.mxu0 %v15806_v48 }
 0x6f7   :  { %13651 = vmatpush1.bf16.msra.mxu1 %v15808_v39  ;;  %13506 = vmatprep.subr.bf16.mxu0 %v15823_v63 }
 0x6f8   :  { %13652 = vmatprep.subr.bf16.mxu1 %v15825_v0 }
 0x6fa   :  { %13507 = vmatpush1.bf16.msra.mxu0 %v15822_v21 }
 0x6fb   :  { %13653 = vmatpush1.bf16.msra.mxu1 %v15824_v1 }
 0x6fd   :  { %13509 = vmatmul.mubr.bf16.vlgmr.msra.gmra.mrb[64].mxu0 %v18676_v40 }
 0x6fe   :  { %13655 = vmatmul.mubr.bf16.vlgmr.msra.gmra.mrb[64].mxu1 %v18676_v40  ;;  %13518 = vmatprep.mubr.bf16.mxu0 %v18704_v22  ;;  %v18962_v40 = vld [vmem:[#allocation10 + $0x8] sm:$0xff] }
 0x6ff   :  { %13664 = vmatprep.mubr.bf16.mxu1 %v18704_v22  ;;  %v18970_v22 = vrot.slane %v18962_v40, %v18646_v11 }
 0x705   :  { %13519 = vmatmul.mubr.bf16.gmra.mrb[68].mxu0 %v18699_v17 }
 0x706   :  { %13665 = vmatmul.mubr.bf16.gmra.mrb[68].mxu1 %v18699_v17  ;;  %13528 = vmatprep.mubr.bf16.mxu0 %v18728_v62  ;;  %v18966_v17 = vrot.slane %v18962_v40, %v18643_v10 }
 0x707   :  { %13674 = vmatprep.mubr.bf16.mxu1 %v18728_v62  ;;  %v18978_v62 = vrot.slane %v18962_v40, %v18652_v14 }
 0x70d   :  { %13529 = vmatmul.mubr.bf16.gmra.mrb[72].mxu0 %v18723_v59 }
 0x70e   :  { %13675 = vmatmul.mubr.bf16.gmra.mrb[72].mxu1 %v18723_v59  ;;  %13538 = vmatprep.mubr.bf16.mxu0 %v18748_v49  ;;  %v18974_v59 = vrot.slane %v18962_v40, %v18649_v13 }
 0x70f   :  { %13684 = vmatprep.mubr.bf16.mxu1 %v18748_v49 }
 0x715   :  { %13539 = vmatmul.mubr.bf16.gmra.mrb[76].mxu0 %v18744_v45 }
 0x716   :  { %13685 = vmatmul.mubr.bf16.gmra.mrb[76].mxu1 %v18744_v45 }
 0x74e   :  { %v13218_v49 = vpop.f32.mrb[48].mxu0 }
 0x74f   :  { %v16050_v45 = vadd.f32 %v13218_v49, %v18966_v17  ;;  %v13364_v2 = vpop.f32.mrb[48].mxu1  ;;  %v13220_v28 = vpop.f32.mrb[49].mxu0 }
 0x750   :  { %v16066_v10 = vadd.f32 %v13364_v2, %v18970_v22  ;;  %v16051_v29 = vadd.f32 %v13220_v28, %v18974_v59  ;;  %v13366_v4 = vpop.f32.mrb[49].mxu1  ;;  %v13222_v11 = vpop.f32.mrb[50].mxu0 }
 0x751   :  { %v16067_v7 = vadd.f32 %v13366_v4, %v18978_v62  ;;  %v16052_v13 = vadd.f32 %v13222_v11, %v18966_v17  ;;  %v13368_v8 = vpop.f32.mrb[50].mxu1  ;;  %v13224_v41 = vpop.f32.mrb[51].mxu0 }
 0x752   :  { %v15894_v24 = vpack.c.bf16 %v16051_v29, %v16050_v45  ;;  %v16068_v14 = vadd.f32 %v13368_v8, %v18970_v22  ;;  %v16053_v31 = vadd.f32 %v13224_v41, %v18974_v59  ;;  %v13370_v25 = vpop.f32.mrb[51].mxu1 }
 0x753   :  { %v15895_v61 = vpack.c.bf16 %v16067_v7, %v16066_v10  ;;  %v16069_v23 = vadd.f32 %v13370_v25, %v18978_v62 }
 0x754   :  { %14083 = vst [vmem:[#allocation11 + $0x20] sm:$0xff] %v15894_v24  ;;  %v15902_v32 = vpack.c.bf16 %v16053_v31, %v16052_v13 }
 0x755   :  { %14084 = vst [vmem:[#allocation11 + $0x28] sm:$0xff] %v15895_v61  ;;  %v15903_v33 = vpack.c.bf16 %v16069_v23, %v16068_v14 }
 0x756   :  { %14091 = vst [vmem:[#allocation11 + $0x60] sm:$0xff] %v15902_v32  ;;  %v13228_v35 = vpop.f32.mrb[52].mxu0 }
 0x757   :  { %14092 = vst [vmem:[#allocation11 + $0x68] sm:$0xff] %v15903_v33  ;;  %v16054_v37 = vadd.f32 %v13228_v35, %v18966_v17  ;;  %v13374_v38 = vpop.f32.mrb[52].mxu1  ;;  %v13230_v43 = vpop.f32.mrb[53].mxu0 }
 0x758   :  { %v16070_v15 = vadd.f32 %v13374_v38, %v18970_v22  ;;  %v16055_v46 = vadd.f32 %v13230_v43, %v18974_v59  ;;  %v13376_v16 = vpop.f32.mrb[53].mxu1  ;;  %v13232_v47 = vpop.f32.mrb[54].mxu0 }
 0x759   :  { %v16071_v50 = vadd.f32 %v13376_v16, %v18978_v62  ;;  %v16056_v19 = vadd.f32 %v13232_v47, %v18966_v17  ;;  %v13378_v18 = vpop.f32.mrb[54].mxu1  ;;  %v13234_v44 = vpop.f32.mrb[55].mxu0 }
 0x75a   :  { %v15910_v20 = vpack.c.bf16 %v16055_v46, %v16054_v37  ;;  %v16072_v36 = vadd.f32 %v13378_v18, %v18970_v22  ;;  %v16057_v51 = vadd.f32 %v13234_v44, %v18974_v59  ;;  %v13380_v30 = vpop.f32.mrb[55].mxu1 }
 0x75b   :  { %v15911_v52 = vpack.c.bf16 %v16071_v50, %v16070_v15  ;;  %v16073_v53 = vadd.f32 %v13380_v30, %v18978_v62 }
 0x75c   :  { %14099 = vst [vmem:[#allocation11 + $0xa0] sm:$0xff] %v15910_v20  ;;  %v15918_v54 = vpack.c.bf16 %v16057_v51, %v16056_v19 }
 0x75d   :  { %14100 = vst [vmem:[#allocation11 + $0xa8] sm:$0xff] %v15911_v52  ;;  %v15919_v34 = vpack.c.bf16 %v16073_v53, %v16072_v36 }
 0x75e   :  { %14107 = vst [vmem:[#allocation11 + $0xe0] sm:$0xff] %v15918_v54  ;;  %v13238_v42 = vpop.f32.mrb[56].mxu0 }
 0x75f   :  { %14108 = vst [vmem:[#allocation11 + $0xe8] sm:$0xff] %v15919_v34  ;;  %v16058_v55 = vadd.f32 %v13238_v42, %v18966_v17  ;;  %v13384_v58 = vpop.f32.mrb[56].mxu1  ;;  %v13240_v56 = vpop.f32.mrb[57].mxu0 }
 0x760   :  { %v16074_v57 = vadd.f32 %v13384_v58, %v18970_v22  ;;  %v16059_v60 = vadd.f32 %v13240_v56, %v18974_v59  ;;  %v13386_v26 = vpop.f32.mrb[57].mxu1  ;;  %v13242_v27 = vpop.f32.mrb[58].mxu0 }
 0x761   :  { %v16075_v48 = vadd.f32 %v13386_v26, %v18978_v62  ;;  %v16060_v39 = vadd.f32 %v13242_v27, %v18966_v17  ;;  %v13388_v63 = vpop.f32.mrb[58].mxu1  ;;  %v13244_v0 = vpop.f32.mrb[59].mxu0 }
 0x762   :  { %v15926_v21 = vpack.c.bf16 %v16059_v60, %v16058_v55  ;;  %v16076_v1 = vadd.f32 %v13388_v63, %v18970_v22  ;;  %v16061_v49 = vadd.f32 %v13244_v0, %v18974_v59  ;;  %v13390_v45 = vpop.f32.mrb[59].mxu1 }
 0x763   :  { %v15927_v2 = vpack.c.bf16 %v16075_v48, %v16074_v57  ;;  %v16077_v28 = vadd.f32 %v13390_v45, %v18978_v62 }
 0x764   :  { %14115 = vst [vmem:[#allocation11 + $0x120] sm:$0xff] %v15926_v21  ;;  %v15934_v10 = vpack.c.bf16 %v16061_v49, %v16060_v39 }
 0x765   :  { %14116 = vst [vmem:[#allocation11 + $0x128] sm:$0xff] %v15927_v2  ;;  %v15935_v29 = vpack.c.bf16 %v16077_v28, %v16076_v1 }
 0x766   :  { %14123 = vst [vmem:[#allocation11 + $0x160] sm:$0xff] %v15934_v10  ;;  %v13248_v4 = vpop.f32.mrb[60].mxu0 }
 0x767   :  { %14124 = vst [vmem:[#allocation11 + $0x168] sm:$0xff] %v15935_v29  ;;  %v16062_v11 = vadd.f32 %v13248_v4, %v18966_v17  ;;  %v13394_v7 = vpop.f32.mrb[60].mxu1  ;;  %v13250_v13 = vpop.f32.mrb[61].mxu0 }
 0x768   :  { %v16078_v8 = vadd.f32 %v13394_v7, %v18970_v22  ;;  %v16063_v41 = vadd.f32 %v13250_v13, %v18974_v59  ;;  %v13396_v24 = vpop.f32.mrb[61].mxu1  ;;  %v13252_v14 = vpop.f32.mrb[62].mxu0 }
 0x769   :  { %v16079_v31 = vadd.f32 %v13396_v24, %v18978_v62  ;;  %v16064_v25 = vadd.f32 %v13252_v14, %v18966_v17  ;;  %v13398_v61 = vpop.f32.mrb[62].mxu1  ;;  %v13254_v23 = vpop.f32.mrb[63].mxu0  ;;  %v19015_v17 = vrot.slane %v18962_v40, %v9905_v3 }
 0x76a   :  { %v15942_v32 = vpack.c.bf16 %v16063_v41, %v16062_v11  ;;  %v16080_v33 = vadd.f32 %v13398_v61, %v18970_v22  ;;  %v16065_v35 = vadd.f32 %v13254_v23, %v18974_v59  ;;  %v13400_v37 = vpop.f32.mrb[63].mxu1  ;;  %v19020_v22 = vrot.slane %v18962_v40, %v9913_v5 }
 0x76b   :  { %v15943_v38 = vpack.c.bf16 %v16079_v31, %v16078_v8  ;;  %v16081_v43 = vadd.f32 %v13400_v37, %v18978_v62  ;;  %v19025_v59 = vrot.slane %v18962_v40, %v9909_v6  ;;  %v19030_v62 = vrot.slane %v18962_v40, %v9917_v12 }
 0x76c   :  { %14131 = vst [vmem:[#allocation11 + $0x1a0] sm:$0xff] %v15942_v32  ;;  %v15950_v15 = vpack.c.bf16 %v16065_v35, %v16064_v25 }
 0x76d   :  { %14132 = vst [vmem:[#allocation11 + $0x1a8] sm:$0xff] %v15943_v38  ;;  %v15951_v46 = vpack.c.bf16 %v16081_v43, %v16080_v33 }
 0x76e   :  { %14139 = vst [vmem:[#allocation11 + $0x1e0] sm:$0xff] %v15950_v15 }
 0x76f   :  { %14140 = vst [vmem:[#allocation11 + $0x1e8] sm:$0xff] %v15951_v46 }
 0x7d0   :  { %v13510_v16 = vpop.f32.mrb[64].mxu0 }
 0x7d1   :  { %v16082_v47 = vadd.f32 %v13510_v16, %v19015_v17  ;;  %v13656_v3 = vpop.f32.mrb[64].mxu1  ;;  %v13512_v50 = vpop.f32.mrb[65].mxu0 }
 0x7d2   :  { %v16098_v19 = vadd.f32 %v13656_v3, %v19020_v22  ;;  %v16083_v5 = vadd.f32 %v13512_v50, %v19025_v59  ;;  %v13658_v18 = vpop.f32.mrb[65].mxu1  ;;  %v13514_v44 = vpop.f32.mrb[66].mxu0 }
 0x7d3   :  { %v16099_v20 = vadd.f32 %v13658_v18, %v19030_v62  ;;  %v16084_v6 = vadd.f32 %v13514_v44, %v19015_v17  ;;  %v13660_v36 = vpop.f32.mrb[66].mxu1  ;;  %v13516_v9 = vpop.f32.mrb[67].mxu0 }
 0x7d4   :  { %v15896_v51 = vpack.c.bf16 %v16083_v5, %v16082_v47  ;;  %v16100_v12 = vadd.f32 %v13660_v36, %v19020_v22  ;;  %v16085_v40 = vadd.f32 %v13516_v9, %v19025_v59  ;;  %v13662_v30 = vpop.f32.mrb[67].mxu1 }
 0x7d5   :  { %v15897_v52 = vpack.c.bf16 %v16099_v20, %v16098_v19  ;;  %v16101_v53 = vadd.f32 %v13662_v30, %v19030_v62 }
 0x7d6   :  { %14085 = vst [vmem:[#allocation11 + $0x30] sm:$0xff] %v15896_v51  ;;  %v15904_v54 = vpack.c.bf16 %v16085_v40, %v16084_v6 }
 0x7d7   :  { %14086 = vst [vmem:[#allocation11 + $0x38] sm:$0xff] %v15897_v52  ;;  %v15905_v34 = vpack.c.bf16 %v16101_v53, %v16100_v12 }
 0x7d8   :  { %14093 = vst [vmem:[#allocation11 + $0x70] sm:$0xff] %v15904_v54  ;;  %v13520_v42 = vpop.f32.mrb[68].mxu0 }
 0x7d9   :  { %14094 = vst [vmem:[#allocation11 + $0x78] sm:$0xff] %v15905_v34  ;;  %v16086_v55 = vadd.f32 %v13520_v42, %v19015_v17  ;;  %v13666_v58 = vpop.f32.mrb[68].mxu1  ;;  %v13522_v56 = vpop.f32.mrb[69].mxu0 }
 0x7da   :  { %v16102_v57 = vadd.f32 %v13666_v58, %v19020_v22  ;;  %v16087_v60 = vadd.f32 %v13522_v56, %v19025_v59  ;;  %v13668_v26 = vpop.f32.mrb[69].mxu1  ;;  %v13524_v27 = vpop.f32.mrb[70].mxu0 }
 0x7db   :  { %v16103_v48 = vadd.f32 %v13668_v26, %v19030_v62  ;;  %v16088_v39 = vadd.f32 %v13524_v27, %v19015_v17  ;;  %v13670_v63 = vpop.f32.mrb[70].mxu1  ;;  %v13526_v0 = vpop.f32.mrb[71].mxu0 }
 0x7dc   :  { %v15912_v21 = vpack.c.bf16 %v16087_v60, %v16086_v55  ;;  %v16104_v1 = vadd.f32 %v13670_v63, %v19020_v22  ;;  %v16089_v49 = vadd.f32 %v13526_v0, %v19025_v59  ;;  %v13672_v45 = vpop.f32.mrb[71].mxu1 }
 0x7dd   :  { %v15913_v2 = vpack.c.bf16 %v16103_v48, %v16102_v57  ;;  %v16105_v28 = vadd.f32 %v13672_v45, %v19030_v62 }
 0x7de   :  { %14101 = vst [vmem:[#allocation11 + $0xb0] sm:$0xff] %v15912_v21  ;;  %v15920_v10 = vpack.c.bf16 %v16089_v49, %v16088_v39 }
 0x7df   :  { %14102 = vst [vmem:[#allocation11 + $0xb8] sm:$0xff] %v15913_v2  ;;  %v15921_v29 = vpack.c.bf16 %v16105_v28, %v16104_v1 }
 0x7e0   :  { %14109 = vst [vmem:[#allocation11 + $0xf0] sm:$0xff] %v15920_v10  ;;  %v13530_v4 = vpop.f32.mrb[72].mxu0 }
 0x7e1   :  { %14110 = vst [vmem:[#allocation11 + $0xf8] sm:$0xff] %v15921_v29  ;;  %v16090_v11 = vadd.f32 %v13530_v4, %v19015_v17  ;;  %v13676_v7 = vpop.f32.mrb[72].mxu1  ;;  %v13532_v13 = vpop.f32.mrb[73].mxu0 }
 0x7e2   :  { %v16106_v8 = vadd.f32 %v13676_v7, %v19020_v22  ;;  %v16091_v41 = vadd.f32 %v13532_v13, %v19025_v59  ;;  %v13678_v24 = vpop.f32.mrb[73].mxu1  ;;  %v13534_v14 = vpop.f32.mrb[74].mxu0 }
 0x7e3   :  { %v16107_v31 = vadd.f32 %v13678_v24, %v19030_v62  ;;  %v16092_v25 = vadd.f32 %v13534_v14, %v19015_v17  ;;  %v13680_v61 = vpop.f32.mrb[74].mxu1  ;;  %v13536_v23 = vpop.f32.mrb[75].mxu0 }
 0x7e4   :  { %v15928_v32 = vpack.c.bf16 %v16091_v41, %v16090_v11  ;;  %v16108_v33 = vadd.f32 %v13680_v61, %v19020_v22  ;;  %v16093_v35 = vadd.f32 %v13536_v23, %v19025_v59  ;;  %v13682_v37 = vpop.f32.mrb[75].mxu1 }
 0x7e5   :  { %v15929_v38 = vpack.c.bf16 %v16107_v31, %v16106_v8  ;;  %v16109_v43 = vadd.f32 %v13682_v37, %v19030_v62 }
 0x7e6   :  { %14117 = vst [vmem:[#allocation11 + $0x130] sm:$0xff] %v15928_v32  ;;  %v15936_v15 = vpack.c.bf16 %v16093_v35, %v16092_v25 }
 0x7e7   :  { %14118 = vst [vmem:[#allocation11 + $0x138] sm:$0xff] %v15929_v38  ;;  %v15937_v46 = vpack.c.bf16 %v16109_v43, %v16108_v33 }
 0x7e8   :  { %14125 = vst [vmem:[#allocation11 + $0x170] sm:$0xff] %v15936_v15  ;;  %v13540_v16 = vpop.f32.mrb[76].mxu0 }
 0x7e9   :  { %14126 = vst [vmem:[#allocation11 + $0x178] sm:$0xff] %v15937_v46  ;;  %v16094_v47 = vadd.f32 %v13540_v16, %v19015_v17  ;;  %v13686_v3 = vpop.f32.mrb[76].mxu1  ;;  %v13542_v50 = vpop.f32.mrb[77].mxu0 }
 0x7ea   :  { %v16110_v19 = vadd.f32 %v13686_v3, %v19020_v22  ;;  %v16095_v5 = vadd.f32 %v13542_v50, %v19025_v59  ;;  %v13688_v18 = vpop.f32.mrb[77].mxu1  ;;  %v13544_v44 = vpop.f32.mrb[78].mxu0 }
 0x7eb   :  { %v16111_v20 = vadd.f32 %v13688_v18, %v19030_v62  ;;  %v16096_v6 = vadd.f32 %v13544_v44, %v19015_v17  ;;  %v13690_v36 = vpop.f32.mrb[78].mxu1  ;;  %v13546_v9 = vpop.f32.mrb[79].mxu0 }
 0x7ec   :  { %v15944_v51 = vpack.c.bf16 %v16095_v5, %v16094_v47  ;;  %v16112_v12 = vadd.f32 %v13690_v36, %v19020_v22  ;;  %v16097_v40 = vadd.f32 %v13546_v9, %v19025_v59  ;;  %v13692_v30 = vpop.f32.mrb[79].mxu1 }
 0x7ed   :  { %v15945_v52 = vpack.c.bf16 %v16111_v20, %v16110_v19  ;;  %v16113_v53 = vadd.f32 %v13692_v30, %v19030_v62 }
 0x7ee   :  { %14133 = vst [vmem:[#allocation11 + $0x1b0] sm:$0xff] %v15944_v51  ;;  %v15952_v54 = vpack.c.bf16 %v16097_v40, %v16096_v6 }
 0x7ef   :  { %14134 = vst [vmem:[#allocation11 + $0x1b8] sm:$0xff] %v15945_v52  ;;  %v15953_v34 = vpack.c.bf16 %v16113_v53, %v16112_v12 }
 0x7f0   :  { %14141 = vst [vmem:[#allocation11 + $0x1f0] sm:$0xff] %v15952_v54 }
 0x7f1   :  { %14142 = vst [vmem:[#allocation11 + $0x1f8] sm:$0xff] %v15953_v34 }
 0x7f2   :  { %18392 = shalt.err (!%p18389_p2)
}
 0x7f3   :  { %s18393_s9 = scalar_lea.hbm %s19084_s5, 8192 }
 0x7f4   :  { %p18394_p3 = scmp.ne.s32.totalorder %s19084_s5, %s18393_s9  ;;  %p18397_p4 = scmp.lt.u32.totalorder %s18393_s9, %s19084_s5 }
 0x7f6   :  { %p18399_p5 = pnand %p18397_p4, %p18394_p3 }
 0x7f8   :  { %18402 = shalt.err (!%p18399_p5)
}
 0x7f9   :  { %14154 = dma.vmem_to_hbm [thread:$0]  %s14149_s30, 8192, %s19084_s5, [#allocation4], %s18415_s1, %s18415_s1, %s18416_s17  }
 0x7fa   :  { %18409 = dma.done.wait [#allocation4], 8192  }
 0x7fb   :  { %18410 = vsyncadd [#allocation4], 4294959104 }
 0x7fc   :  { %14158 = vsyncpa [#allocation3], 1 }
 0x7fd   :  { %14159 = vsyncpa [#allocation6], 1 }
 0x7fe   :  { %14160 = vsyncpa [#allocation9], 1 }
 0x7ff   :  { %14161 = vsyncpa [#allocation4], 1 }

</bundles_post_ra>
